<compile_context>
chip_gen: v5e
topology: v5e:2x2
jax: 0.10.0
libtpu: 0.0.40
codegen_flags: <defaults>
</compile_context>

<pallas_src>
import jax
import jax.numpy as jnp
from jax import lax
from jax.experimental import pallas as pl
from jax.experimental.pallas import tpu as pltpu

K = 5          # conv5x5
PAD = 2        # padding=2
_VPU_MAX_C = 32   # at/below this channel count the MXU is <13% utilized -> VPU path


def _vmem_limit_bytes():
    """~75% of the core's VMEM; never claim all of a v7x core's 64 MiB."""
    try:
        cap = int(pltpu.get_tpu_info().vmem_capacity_bytes)
    except Exception:
        cap = 64 * 1024 * 1024
    return max(32 * 1024 * 1024, min(3 * cap // 4, 110 * 1024 * 1024))


# ---------------------------------------------------------------------------
# Small-channel path (C <= _VPU_MAX_C): pure VPU, fully lane-dense.
#
# For output lane l = w*C + co and a slice starting at lane s of the padded
# row, the read lane is s + l = (w + kw + 1)*C + ci for exactly one (kw, ci)
# pair (unique since ci < C), so each (kh, s) pair carries one lane-weight
# vector T[kh*S + (s-1), w*C + co] = weight[co, ci, kh, kw] (0 if impossible).
# ---------------------------------------------------------------------------


def _vpu_weight_table(w_oihw, W):
    """(K*S, W*C) lane-weight table, S = (K+1)*C - 1.  Tiny for C<=32."""
    C = w_oihw.shape[0]
    S = (K + 1) * C - 1
    slabs = []
    for s in range(1, S + 1):
        cols = []
        for co in range(C):
            q = s + co
            kw, ci = q // C - 1, q % C
            if 0 <= kw < K:
                cols.append(w_oihw[co, ci, :, kw])            # (K,) over kh
            else:
                cols.append(jnp.zeros((K,), w_oihw.dtype))
        slabs.append(jnp.stack(cols, axis=-1))                # (K, C)
    tbl = jnp.stack(slabs, axis=1)                            # (K, S, C)
    tbl = jnp.tile(tbl[:, :, None, :], (1, 1, W, 1))          # (K, S, W, C)
    return tbl.reshape(K * S, W * C).astype(jnp.float32)


def _make_vpu_kernel(H, W, C):
    Hp = H + 2 * PAD
    WC = W * C
    Wtot = W + 2 * PAD + 2          # one extra zero "pixel" per side keeps every
                                    # (kw, channel-shift) slice start in range
    base = (PAD + 1) * C            # lane offset of image column 0 in the scratch
    S = (K + 1) * C - 1

    def zero_halo(pad_ref):
        # Only the halo bands; the interior is fully overwritten every step.
        pad_ref[0:PAD, :] = jnp.zeros((PAD, Wtot * C), jnp.float32)
        pad_ref[PAD + H:Hp, :] = jnp.zeros((Hp - PAD - H, Wtot * C), jnp.float32)
        pad_ref[:, 0:base] = jnp.zeros((Hp, base), jnp.float32)
        pad_ref[:, base + WC:Wtot * C] = jnp.zeros(
            (Hp, Wtot * C - base - WC), jnp.float32)

    def conv(pad_ref, wtbl_ref):
        acc = jnp.zeros((H, WC), jnp.float32)
        for kh in range(K):
            rows = pad_ref[kh:kh + H, :]                         # (H, Wtot*C)
            for si in range(S):                                  # slice start = si+1
                w_row = wtbl_ref[kh * S + si:kh * S + si + 1, :]  # (1, W*C)
                acc = acc + rows[:, si + 1:si + 1 + WC] * w_row
        return acc

    def kernel(x_ref, w1_ref, w2_ref, o_ref, xpad_ref, hpad_ref):
        x_ld = x_ref[0]                                          # (H, W*C) f32

        zero_halo(xpad_ref)
        xpad_ref[PAD:PAD + H, base:base + WC] = x_ld
        h_act = jnp.maximum(conv(xpad_ref, w1_ref), 0.0)         # relu(conv1(x))

        zero_halo(hpad_ref)
        hpad_ref[PAD:PAD + H, base:base + WC] = h_act
        out = conv(hpad_ref, w2_ref) + x_ld                      # conv2 + residual
        o_ref[0] = jnp.maximum(out, 0.0).astype(o_ref.dtype)

    return kernel, Hp, Wtot


def _forward_vpu(x_nchw, w1_oihw, w2_oihw):
    B, C, H, W = x_nchw.shape
    x_ld = jnp.transpose(x_nchw, (0, 2, 3, 1)).reshape(B, H, W * C)
    w1t = _vpu_weight_table(w1_oihw, W)
    w2t = _vpu_weight_table(w2_oihw, W)
    kernel, Hp, Wtot = _make_vpu_kernel(H, W, C)
    S = (K + 1) * C - 1

    out_ld = pl.pallas_call(
        kernel,
        out_shape=jax.ShapeDtypeStruct((B, H, W * C), x_nchw.dtype),
        grid_spec=pltpu.PrefetchScalarGridSpec(
            num_scalar_prefetch=0,
            grid=(B,),
            in_specs=[
                pl.BlockSpec((1, H, W * C), lambda b: (b, 0, 0)),
                pl.BlockSpec((K * S, W * C), lambda b: (0, 0)),
                pl.BlockSpec((K * S, W * C), lambda b: (0, 0)),
            ],
            out_specs=pl.BlockSpec((1, H, W * C), lambda b: (b, 0, 0)),
            scratch_shapes=[
                pltpu.VMEM((Hp, Wtot * C), jnp.float32),   # padded x (lane-dense)
                pltpu.VMEM((Hp, Wtot * C), jnp.float32),   # padded relu(conv1(x))
            ],
        ),
        compiler_params=pltpu.CompilerParams(
            dimension_semantics=("parallel",),
            vmem_limit_bytes=_vmem_limit_bytes(),
        ),
    )(x_ld, w1t, w2t)

    return jnp.transpose(out_ld.reshape(B, H, W, C), (0, 3, 1, 2))


# ---------------------------------------------------------------------------
# Wide-channel path (C > _VPU_MAX_C): per-tap accumulating MXU matmuls.
# ---------------------------------------------------------------------------


def _make_mxu_kernel(H, W, C):
    Hp, Wp = H + 2 * PAD, W + 2 * PAD

    def zero_halo(pad_ref):
        pad_ref[0:PAD, :, :] = jnp.zeros((PAD, Wp, C), jnp.float32)
        pad_ref[PAD + H:Hp, :, :] = jnp.zeros((Hp - PAD - H, Wp, C), jnp.float32)
        pad_ref[:, 0:PAD, :] = jnp.zeros((Hp, PAD, C), jnp.float32)
        pad_ref[:, PAD + W:Wp, :] = jnp.zeros((Hp, Wp - PAD - W, C), jnp.float32)

    def conv(pad_ref, w_ref):
        # 25 per-tap matmuls, contraction depth C, f32 accumulation; the chained
        # accumulator bounds the live set to one tap (no im2col buffer).
        # TODO(synk): keep padded activations resident in bf16 once the H-strip
        # axis lands so the per-tap operand cast disappears as well.
        acc = jnp.zeros((H * W, C), jnp.float32)
        for kh in range(K):
            for kw in range(K):
                t = kh * K + kw
                a = pad_ref[kh:kh + H, kw:kw + W, :].reshape(H * W, C)
                acc = acc + jnp.dot(a.astype(jnp.bfloat16),
                                    w_ref[t * C:(t + 1) * C, :],
                                    preferred_element_type=jnp.float32)
        return acc

    def kernel(x_ref, w1_ref, w2_ref, o_ref, xpad_ref, hpad_ref):
        x = x_ref[0]                                            # (H, W, C) f32

        zero_halo(xpad_ref)
        xpad_ref[PAD:PAD + H, PAD:PAD + W, :] = x
        h = jnp.maximum(conv(xpad_ref, w1_ref), 0.0)            # relu(conv1(x))

        zero_halo(hpad_ref)
        hpad_ref[PAD:PAD + H, PAD:PAD + W, :] = h.reshape(H, W, C)
        out = conv(hpad_ref, w2_ref) + x.reshape(H * W, C)      # conv2 + residual
        o_ref[0] = jnp.maximum(out, 0.0).reshape(H, W, C).astype(o_ref.dtype)

    return kernel, Hp, Wp


def _forward_mxu(x_nchw, w1_oihw, w2_oihw):
    B, C, H, W = x_nchw.shape
    x_nhwc = jnp.transpose(x_nchw, (0, 2, 3, 1))                # channel-minor
    # OIHW -> rows (kh, kw, ci) x cols co, bf16 for the MXU (f32 accumulate).
    w1 = jnp.transpose(w1_oihw, (2, 3, 1, 0)).reshape(K * K * C, C).astype(jnp.bfloat16)
    w2 = jnp.transpose(w2_oihw, (2, 3, 1, 0)).reshape(K * K * C, C).astype(jnp.bfloat16)
    kernel, Hp, Wp = _make_mxu_kernel(H, W, C)

    out = pl.pallas_call(
        kernel,
        out_shape=jax.ShapeDtypeStruct((B, H, W, C), x_nchw.dtype),
        grid_spec=pltpu.PrefetchScalarGridSpec(
            num_scalar_prefetch=0,
            grid=(B,),
            in_specs=[
                pl.BlockSpec((1, H, W, C), lambda b: (b, 0, 0, 0)),
                pl.BlockSpec((K * K * C, C), lambda b: (0, 0)),
                pl.BlockSpec((K * K * C, C), lambda b: (0, 0)),
            ],
            out_specs=pl.BlockSpec((1, H, W, C), lambda b: (b, 0, 0, 0)),
            scratch_shapes=[
                pltpu.VMEM((Hp, Wp, C), jnp.float32),   # padded x
                pltpu.VMEM((Hp, Wp, C), jnp.float32),   # padded relu(conv1(x))
            ],
        ),
        compiler_params=pltpu.CompilerParams(
            dimension_semantics=("parallel",),
            vmem_limit_bytes=_vmem_limit_bytes(),
        ),
    )(x_nhwc, w1, w2)

    return jnp.transpose(out, (0, 3, 1, 2))


def basic_block_forward(x_nchw, w1_oihw, w2_oihw):
    """BasicBlock.forward (stride=1, downsample=None, use_cbam=False)."""
    _, Cin, _, _ = x_nchw.shape
    Cmid, Cout = w1_oihw.shape[0], w2_oihw.shape[0]
    assert Cin == Cmid == Cout, "identity residual requires inplanes == planes"
    if Cout <= _VPU_MAX_C:
        return _forward_vpu(x_nchw, w1_oihw, w2_oihw)
    return _forward_mxu(x_nchw, w1_oihw, w2_oihw)


def _reference_forward(x, w1, w2, operand_dtype=jnp.float32):
    """Pure-JAX reference.  operand_dtype=bfloat16 mirrors the kernel's MXU
    quantization points (bf16 operands, f32 accumulation)."""
    dn = lax.conv_dimension_numbers(x.shape, w1.shape, ("NCHW", "OIHW", "NCHW"))

    def conv(a, w):
        return lax.conv_general_dilated(
            a.astype(operand_dtype), w.astype(operand_dtype), (1, 1),
            ((PAD, PAD), (PAD, PAD)), dimension_numbers=dn,
            preferred_element_type=jnp.float32)

    h = jnp.maximum(conv(x, w1), 0.0)
    out = conv(h, w2) + x.astype(jnp.float32)
    return jnp.maximum(out, 0.0)


if __name__ == "__main__":
    key = jax.random.PRNGKey(0)
    kx, k1, k2, kx2, k3, k4 = jax.random.split(key, 6)

    # --- small-channel config (lane-dense VPU path), module default shapes ---
    B, C, H, W = 2, 4, 16, 16            # inplanes = planes = 4, stride = 1
    x = jax.random.normal(kx, (B, C, H, W), jnp.float32)
    w1 = jax.random.normal(k1, (C, C, K, K), jnp.float32) * 0.1   # OIHW
    w2 = jax.random.normal(k2, (C, C, K, K), jnp.float32) * 0.1

    out = jax.block_until_ready(basic_block_forward(x, w1, w2))
    ref = _reference_forward(x, w1, w2)
    assert out.shape == (B, C, H, W)
    assert jnp.allclose(out, ref, atol=1e-3, rtol=1e-3), "VPU path mismatch"

    # --- wide-channel config (bf16 MXU path) ---------------------------------
    B2, C2, H2, W2 = 1, 64, 8, 8
    x2 = jax.random.normal(kx2, (B2, C2, H2, W2), jnp.float32)
    w1b = jax.random.normal(k3, (C2, C2, K, K), jnp.float32) * 0.05
    w2b = jax.random.normal(k4, (C2, C2, K, K), jnp.float32) * 0.05

    out2 = jax.block_until_ready(basic_block_forward(x2, w1b, w2b))
    ref2 = _reference_forward(x2, w1b, w2b, operand_dtype=jnp.bfloat16)
    assert out2.shape == (B2, C2, H2, W2)
    assert jnp.allclose(out2, ref2, atol=2e-2, rtol=2e-2), "MXU path mismatch"

    print("KERNEL_OK")
</pallas_src>

<mosaic_0001>
module attributes {stable_mosaic.version = 11 : i64} {
  func.func @kernel(%arg0: i32, %arg1: memref<1x16x64xf32, #tpu.memory_space<vmem>>, %arg2: memref<115x64xf32, #tpu.memory_space<vmem>>, %arg3: memref<115x64xf32, #tpu.memory_space<vmem>>, %arg4: memref<1x16x64xf32, #tpu.memory_space<vmem>>, %arg5: memref<20x88xf32, #tpu.memory_space<vmem>>, %arg6: memref<20x88xf32, #tpu.memory_space<vmem>>) attributes {dimension_semantics = [#tpu.dimension_semantics<parallel>], iteration_bounds = array<i64: 2>, scalar_prefetch = 0 : i64, scratch_operands = 2 : i64, tpu.core_type = #tpu.core_type<tc>, window_params = [{transform_indices = @transform_0, window_bounds = array<i64: 1, 16, 64>}, {pipeline_mode = #tpu.pipeline_mode<synchronous>, transform_indices = @transform_1, window_bounds = array<i64: 115, 64>}, {pipeline_mode = #tpu.pipeline_mode<synchronous>, transform_indices = @transform_2, window_bounds = array<i64: 115, 64>}, {transform_indices = @transform_3, window_bounds = array<i64: 1, 16, 64>}]} {
    %c0 = arith.constant 0 : index
    %c0_0 = arith.constant 0 : index
    %c0_1 = arith.constant 0 : index
    %0 = vector.load %arg1[%c0, %c0_0, %c0_1] : memref<1x16x64xf32, #tpu.memory_space<vmem>>, vector<1x16x64xf32>
    %1 = vector.shape_cast %0 : vector<1x16x64xf32> to vector<16x64xf32>
    %cst = arith.constant 0.000000e+00 : f32
    %2 = vector.broadcast %cst : f32 to vector<2x88xf32>
    %c0_2 = arith.constant 0 : index
    %c0_3 = arith.constant 0 : index
    %3 = vector.load %arg5[%c0_2, %c0_3] : memref<20x88xf32, #tpu.memory_space<vmem>>, vector<2x88xf32>
    tpu.vector_store %arg5[%c0_2, %c0_3], %2 {strides = array<i32>} : memref<20x88xf32, #tpu.memory_space<vmem>>, vector<2x88xf32>,
    %cst_4 = arith.constant 0.000000e+00 : f32
    %4 = vector.broadcast %cst_4 : f32 to vector<2x88xf32>
    %c18 = arith.constant 18 : index
    %c0_5 = arith.constant 0 : index
    %5 = vector.load %arg5[%c18, %c0_5] : memref<20x88xf32, #tpu.memory_space<vmem>>, vector<2x88xf32>
    tpu.vector_store %arg5[%c18, %c0_5], %4 {strides = array<i32>} : memref<20x88xf32, #tpu.memory_space<vmem>>, vector<2x88xf32>,
    %cst_6 = arith.constant 0.000000e+00 : f32
    %6 = vector.broadcast %cst_6 : f32 to vector<20x12xf32>
    %c0_7 = arith.constant 0 : index
    %c0_8 = arith.constant 0 : index
    %7 = vector.load %arg5[%c0_7, %c0_8] : memref<20x88xf32, #tpu.memory_space<vmem>>, vector<20x12xf32>
    tpu.vector_store %arg5[%c0_7, %c0_8], %6 {strides = array<i32>} : memref<20x88xf32, #tpu.memory_space<vmem>>, vector<20x12xf32>,
    %cst_9 = arith.constant 0.000000e+00 : f32
    %8 = vector.broadcast %cst_9 : f32 to vector<20x12xf32>
    %c0_10 = arith.constant 0 : index
    %c76 = arith.constant 76 : index
    %9 = vector.load %arg5[%c0_10, %c76] : memref<20x88xf32, #tpu.memory_space<vmem>>, vector<20x12xf32>
    tpu.vector_store %arg5[%c0_10, %c76], %8 {strides = array<i32>} : memref<20x88xf32, #tpu.memory_space<vmem>>, vector<20x12xf32>,
    %c2 = arith.constant 2 : index
    %c12 = arith.constant 12 : index
    %10 = vector.load %arg5[%c2, %c12] : memref<20x88xf32, #tpu.memory_space<vmem>>, vector<16x64xf32>
    tpu.vector_store %arg5[%c2, %c12], %1 {strides = array<i32>} : memref<20x88xf32, #tpu.memory_space<vmem>>, vector<16x64xf32>,
    %cst_11 = arith.constant 0.000000e+00 : f32
    %11 = vector.broadcast %cst_11 : f32 to vector<16x64xf32>
    %c0_12 = arith.constant 0 : index
    %c0_13 = arith.constant 0 : index
    %12 = vector.load %arg5[%c0_12, %c0_13] : memref<20x88xf32, #tpu.memory_space<vmem>>, vector<16x88xf32>
    %c0_14 = arith.constant 0 : index
    %c0_15 = arith.constant 0 : index
    %13 = vector.load %arg2[%c0_14, %c0_15] : memref<115x64xf32, #tpu.memory_space<vmem>>, vector<1x64xf32>
    %14 = vector.extract_strided_slice %12 {offsets = [0, 1], sizes = [16, 64], strides = [1, 1]} : vector<16x88xf32> to vector<16x64xf32>
    %15 = vector.broadcast %13 : vector<1x64xf32> to vector<16x64xf32>
    %16 = arith.mulf %14, %15 : vector<16x64xf32>
    %17 = arith.addf %11, %16 : vector<16x64xf32>
    %c1 = arith.constant 1 : index
    %c0_16 = arith.constant 0 : index
    %18 = vector.load %arg2[%c1, %c0_16] : memref<115x64xf32, #tpu.memory_space<vmem>>, vector<1x64xf32>
    %19 = vector.extract_strided_slice %12 {offsets = [0, 2], sizes = [16, 64], strides = [1, 1]} : vector<16x88xf32> to vector<16x64xf32>
    %20 = vector.broadcast %18 : vector<1x64xf32> to vector<16x64xf32>
    %21 = arith.mulf %19, %20 : vector<16x64xf32>
    %22 = arith.addf %17, %21 : vector<16x64xf32>
    %c2_17 = arith.constant 2 : index
    %c0_18 = arith.constant 0 : index
    %23 = vector.load %arg2[%c2_17, %c0_18] : memref<115x64xf32, #tpu.memory_space<vmem>>, vector<1x64xf32>
    %24 = vector.extract_strided_slice %12 {offsets = [0, 3], sizes = [16, 64], strides = [1, 1]} : vector<16x88xf32> to vector<16x64xf32>
    %25 = vector.broadcast %23 : vector<1x64xf32> to vector<16x64xf32>
    %26 = arith.mulf %24, %25 : vector<16x64xf32>
    %27 = arith.addf %22, %26 : vector<16x64xf32>
    %c3 = arith.constant 3 : index
    %c0_19 = arith.constant 0 : index
    %28 = vector.load %arg2[%c3, %c0_19] : memref<115x64xf32, #tpu.memory_space<vmem>>, vector<1x64xf32>
    %29 = vector.extract_strided_slice %12 {offsets = [0, 4], sizes = [16, 64], strides = [1, 1]} : vector<16x88xf32> to vector<16x64xf32>
    %30 = vector.broadcast %28 : vector<1x64xf32> to vector<16x64xf32>
    %31 = arith.mulf %29, %30 : vector<16x64xf32>
    %32 = arith.addf %27, %31 : vector<16x64xf32>
    %c4 = arith.constant 4 : index
    %c0_20 = arith.constant 0 : index
    %33 = vector.load %arg2[%c4, %c0_20] : memref<115x64xf32, #tpu.memory_space<vmem>>, vector<1x64xf32>
    %34 = vector.extract_strided_slice %12 {offsets = [0, 5], sizes = [16, 64], strides = [1, 1]} : vector<16x88xf32> to vector<16x64xf32>
    %35 = vector.broadcast %33 : vector<1x64xf32> to vector<16x64xf32>
    %36 = arith.mulf %34, %35 : vector<16x64xf32>
    %37 = arith.addf %32, %36 : vector<16x64xf32>
    %c5 = arith.constant 5 : index
    %c0_21 = arith.constant 0 : index
    %38 = vector.load %arg2[%c5, %c0_21] : memref<115x64xf32, #tpu.memory_space<vmem>>, vector<1x64xf32>
    %39 = vector.extract_strided_slice %12 {offsets = [0, 6], sizes = [16, 64], strides = [1, 1]} : vector<16x88xf32> to vector<16x64xf32>
    %40 = vector.broadcast %38 : vector<1x64xf32> to vector<16x64xf32>
    %41 = arith.mulf %39, %40 : vector<16x64xf32>
    %42 = arith.addf %37, %41 : vector<16x64xf32>
    %c6 = arith.constant 6 : index
    %c0_22 = arith.constant 0 : index
    %43 = vector.load %arg2[%c6, %c0_22] : memref<115x64xf32, #tpu.memory_space<vmem>>, vector<1x64xf32>
    %44 = vector.extract_strided_slice %12 {offsets = [0, 7], sizes = [16, 64], strides = [1, 1]} : vector<16x88xf32> to vector<16x64xf32>
    %45 = vector.broadcast %43 : vector<1x64xf32> to vector<16x64xf32>
    %46 = arith.mulf %44, %45 : vector<16x64xf32>
    %47 = arith.addf %42, %46 : vector<16x64xf32>
    %c7 = arith.constant 7 : index
    %c0_23 = arith.constant 0 : index
    %48 = vector.load %arg2[%c7, %c0_23] : memref<115x64xf32, #tpu.memory_space<vmem>>, vector<1x64xf32>
    %49 = vector.extract_strided_slice %12 {offsets = [0, 8], sizes = [16, 64], strides = [1, 1]} : vector<16x88xf32> to vector<16x64xf32>
    %50 = vector.broadcast %48 : vector<1x64xf32> to vector<16x64xf32>
    %51 = arith.mulf %49, %50 : vector<16x64xf32>
    %52 = arith.addf %47, %51 : vector<16x64xf32>
    %c8 = arith.constant 8 : index
    %c0_24 = arith.constant 0 : index
    %53 = vector.load %arg2[%c8, %c0_24] : memref<115x64xf32, #tpu.memory_space<vmem>>, vector<1x64xf32>
    %54 = vector.extract_strided_slice %12 {offsets = [0, 9], sizes = [16, 64], strides = [1, 1]} : vector<16x88xf32> to vector<16x64xf32>
    %55 = vector.broadcast %53 : vector<1x64xf32> to vector<16x64xf32>
    %56 = arith.mulf %54, %55 : vector<16x64xf32>
    %57 = arith.addf %52, %56 : vector<16x64xf32>
    %c9 = arith.constant 9 : index
    %c0_25 = arith.constant 0 : index
    %58 = vector.load %arg2[%c9, %c0_25] : memref<115x64xf32, #tpu.memory_space<vmem>>, vector<1x64xf32>
    %59 = vector.extract_strided_slice %12 {offsets = [0, 10], sizes = [16, 64], strides = [1, 1]} : vector<16x88xf32> to vector<16x64xf32>
    %60 = vector.broadcast %58 : vector<1x64xf32> to vector<16x64xf32>
    %61 = arith.mulf %59, %60 : vector<16x64xf32>
    %62 = arith.addf %57, %61 : vector<16x64xf32>
    %c10 = arith.constant 10 : index
    %c0_26 = arith.constant 0 : index
    %63 = vector.load %arg2[%c10, %c0_26] : memref<115x64xf32, #tpu.memory_space<vmem>>, vector<1x64xf32>
    %64 = vector.extract_strided_slice %12 {offsets = [0, 11], sizes = [16, 64], strides = [1, 1]} : vector<16x88xf32> to vector<16x64xf32>
    %65 = vector.broadcast %63 : vector<1x64xf32> to vector<16x64xf32>
    %66 = arith.mulf %64, %65 : vector<16x64xf32>
    %67 = arith.addf %62, %66 : vector<16x64xf32>
    %c11 = arith.constant 11 : index
    %c0_27 = arith.constant 0 : index
    %68 = vector.load %arg2[%c11, %c0_27] : memref<115x64xf32, #tpu.memory_space<vmem>>, vector<1x64xf32>
    %69 = vector.extract_strided_slice %12 {offsets = [0, 12], sizes = [16, 64], strides = [1, 1]} : vector<16x88xf32> to vector<16x64xf32>
    %70 = vector.broadcast %68 : vector<1x64xf32> to vector<16x64xf32>
    %71 = arith.mulf %69, %70 : vector<16x64xf32>
    %72 = arith.addf %67, %71 : vector<16x64xf32>
    %c12_28 = arith.constant 12 : index
    %c0_29 = arith.constant 0 : index
    %73 = vector.load %arg2[%c12_28, %c0_29] : memref<115x64xf32, #tpu.memory_space<vmem>>, vector<1x64xf32>
    %74 = vector.extract_strided_slice %12 {offsets = [0, 13], sizes = [16, 64], strides = [1, 1]} : vector<16x88xf32> to vector<16x64xf32>
    %75 = vector.broadcast %73 : vector<1x64xf32> to vector<16x64xf32>
    %76 = arith.mulf %74, %75 : vector<16x64xf32>
    %77 = arith.addf %72, %76 : vector<16x64xf32>
    %c13 = arith.constant 13 : index
    %c0_30 = arith.constant 0 : index
    %78 = vector.load %arg2[%c13, %c0_30] : memref<115x64xf32, #tpu.memory_space<vmem>>, vector<1x64xf32>
    %79 = vector.extract_strided_slice %12 {offsets = [0, 14], sizes = [16, 64], strides = [1, 1]} : vector<16x88xf32> to vector<16x64xf32>
    %80 = vector.broadcast %78 : vector<1x64xf32> to vector<16x64xf32>
    %81 = arith.mulf %79, %80 : vector<16x64xf32>
    %82 = arith.addf %77, %81 : vector<16x64xf32>
    %c14 = arith.constant 14 : index
    %c0_31 = arith.constant 0 : index
    %83 = vector.load %arg2[%c14, %c0_31] : memref<115x64xf32, #tpu.memory_space<vmem>>, vector<1x64xf32>
    %84 = vector.extract_strided_slice %12 {offsets = [0, 15], sizes = [16, 64], strides = [1, 1]} : vector<16x88xf32> to vector<16x64xf32>
    %85 = vector.broadcast %83 : vector<1x64xf32> to vector<16x64xf32>
    %86 = arith.mulf %84, %85 : vector<16x64xf32>
    %87 = arith.addf %82, %86 : vector<16x64xf32>
    %c15 = arith.constant 15 : index
    %c0_32 = arith.constant 0 : index
    %88 = vector.load %arg2[%c15, %c0_32] : memref<115x64xf32, #tpu.memory_space<vmem>>, vector<1x64xf32>
    %89 = vector.extract_strided_slice %12 {offsets = [0, 16], sizes = [16, 64], strides = [1, 1]} : vector<16x88xf32> to vector<16x64xf32>
    %90 = vector.broadcast %88 : vector<1x64xf32> to vector<16x64xf32>
    %91 = arith.mulf %89, %90 : vector<16x64xf32>
    %92 = arith.addf %87, %91 : vector<16x64xf32>
    %c16 = arith.constant 16 : index
    %c0_33 = arith.constant 0 : index
    %93 = vector.load %arg2[%c16, %c0_33] : memref<115x64xf32, #tpu.memory_space<vmem>>, vector<1x64xf32>
    %94 = vector.extract_strided_slice %12 {offsets = [0, 17], sizes = [16, 64], strides = [1, 1]} : vector<16x88xf32> to vector<16x64xf32>
    %95 = vector.broadcast %93 : vector<1x64xf32> to vector<16x64xf32>
    %96 = arith.mulf %94, %95 : vector<16x64xf32>
    %97 = arith.addf %92, %96 : vector<16x64xf32>
    %c17 = arith.constant 17 : index
    %c0_34 = arith.constant 0 : index
    %98 = vector.load %arg2[%c17, %c0_34] : memref<115x64xf32, #tpu.memory_space<vmem>>, vector<1x64xf32>
    %99 = vector.extract_strided_slice %12 {offsets = [0, 18], sizes = [16, 64], strides = [1, 1]} : vector<16x88xf32> to vector<16x64xf32>
    %100 = vector.broadcast %98 : vector<1x64xf32> to vector<16x64xf32>
    %101 = arith.mulf %99, %100 : vector<16x64xf32>
    %102 = arith.addf %97, %101 : vector<16x64xf32>
    %c18_35 = arith.constant 18 : index
    %c0_36 = arith.constant 0 : index
    %103 = vector.load %arg2[%c18_35, %c0_36] : memref<115x64xf32, #tpu.memory_space<vmem>>, vector<1x64xf32>
    %104 = vector.extract_strided_slice %12 {offsets = [0, 19], sizes = [16, 64], strides = [1, 1]} : vector<16x88xf32> to vector<16x64xf32>
    %105 = vector.broadcast %103 : vector<1x64xf32> to vector<16x64xf32>
    %106 = arith.mulf %104, %105 : vector<16x64xf32>
    %107 = arith.addf %102, %106 : vector<16x64xf32>
    %c19 = arith.constant 19 : index
    %c0_37 = arith.constant 0 : index
    %108 = vector.load %arg2[%c19, %c0_37] : memref<115x64xf32, #tpu.memory_space<vmem>>, vector<1x64xf32>
    %109 = vector.extract_strided_slice %12 {offsets = [0, 20], sizes = [16, 64], strides = [1, 1]} : vector<16x88xf32> to vector<16x64xf32>
    %110 = vector.broadcast %108 : vector<1x64xf32> to vector<16x64xf32>
    %111 = arith.mulf %109, %110 : vector<16x64xf32>
    %112 = arith.addf %107, %111 : vector<16x64xf32>
    %c20 = arith.constant 20 : index
    %c0_38 = arith.constant 0 : index
    %113 = vector.load %arg2[%c20, %c0_38] : memref<115x64xf32, #tpu.memory_space<vmem>>, vector<1x64xf32>
    %114 = vector.extract_strided_slice %12 {offsets = [0, 21], sizes = [16, 64], strides = [1, 1]} : vector<16x88xf32> to vector<16x64xf32>
    %115 = vector.broadcast %113 : vector<1x64xf32> to vector<16x64xf32>
    %116 = arith.mulf %114, %115 : vector<16x64xf32>
    %117 = arith.addf %112, %116 : vector<16x64xf32>
    %c21 = arith.constant 21 : index
    %c0_39 = arith.constant 0 : index
    %118 = vector.load %arg2[%c21, %c0_39] : memref<115x64xf32, #tpu.memory_space<vmem>>, vector<1x64xf32>
    %119 = vector.extract_strided_slice %12 {offsets = [0, 22], sizes = [16, 64], strides = [1, 1]} : vector<16x88xf32> to vector<16x64xf32>
    %120 = vector.broadcast %118 : vector<1x64xf32> to vector<16x64xf32>
    %121 = arith.mulf %119, %120 : vector<16x64xf32>
    %122 = arith.addf %117, %121 : vector<16x64xf32>
    %c22 = arith.constant 22 : index
    %c0_40 = arith.constant 0 : index
    %123 = vector.load %arg2[%c22, %c0_40] : memref<115x64xf32, #tpu.memory_space<vmem>>, vector<1x64xf32>
    %124 = vector.extract_strided_slice %12 {offsets = [0, 23], sizes = [16, 64], strides = [1, 1]} : vector<16x88xf32> to vector<16x64xf32>
    %125 = vector.broadcast %123 : vector<1x64xf32> to vector<16x64xf32>
    %126 = arith.mulf %124, %125 : vector<16x64xf32>
    %127 = arith.addf %122, %126 : vector<16x64xf32>
    %c1_41 = arith.constant 1 : index
    %c0_42 = arith.constant 0 : index
    %128 = vector.load %arg5[%c1_41, %c0_42] : memref<20x88xf32, #tpu.memory_space<vmem>>, vector<16x88xf32>
    %c23 = arith.constant 23 : index
    %c0_43 = arith.constant 0 : index
    %129 = vector.load %arg2[%c23, %c0_43] : memref<115x64xf32, #tpu.memory_space<vmem>>, vector<1x64xf32>
    %130 = vector.extract_strided_slice %128 {offsets = [0, 1], sizes = [16, 64], strides = [1, 1]} : vector<16x88xf32> to vector<16x64xf32>
    %131 = vector.broadcast %129 : vector<1x64xf32> to vector<16x64xf32>
    %132 = arith.mulf %130, %131 : vector<16x64xf32>
    %133 = arith.addf %127, %132 : vector<16x64xf32>
    %c24 = arith.constant 24 : index
    %c0_44 = arith.constant 0 : index
    %134 = vector.load %arg2[%c24, %c0_44] : memref<115x64xf32, #tpu.memory_space<vmem>>, vector<1x64xf32>
    %135 = vector.extract_strided_slice %128 {offsets = [0, 2], sizes = [16, 64], strides = [1, 1]} : vector<16x88xf32> to vector<16x64xf32>
    %136 = vector.broadcast %134 : vector<1x64xf32> to vector<16x64xf32>
    %137 = arith.mulf %135, %136 : vector<16x64xf32>
    %138 = arith.addf %133, %137 : vector<16x64xf32>
    %c25 = arith.constant 25 : index
    %c0_45 = arith.constant 0 : index
    %139 = vector.load %arg2[%c25, %c0_45] : memref<115x64xf32, #tpu.memory_space<vmem>>, vector<1x64xf32>
    %140 = vector.extract_strided_slice %128 {offsets = [0, 3], sizes = [16, 64], strides = [1, 1]} : vector<16x88xf32> to vector<16x64xf32>
    %141 = vector.broadcast %139 : vector<1x64xf32> to vector<16x64xf32>
    %142 = arith.mulf %140, %141 : vector<16x64xf32>
    %143 = arith.addf %138, %142 : vector<16x64xf32>
    %c26 = arith.constant 26 : index
    %c0_46 = arith.constant 0 : index
    %144 = vector.load %arg2[%c26, %c0_46] : memref<115x64xf32, #tpu.memory_space<vmem>>, vector<1x64xf32>
    %145 = vector.extract_strided_slice %128 {offsets = [0, 4], sizes = [16, 64], strides = [1, 1]} : vector<16x88xf32> to vector<16x64xf32>
    %146 = vector.broadcast %144 : vector<1x64xf32> to vector<16x64xf32>
    %147 = arith.mulf %145, %146 : vector<16x64xf32>
    %148 = arith.addf %143, %147 : vector<16x64xf32>
    %c27 = arith.constant 27 : index
    %c0_47 = arith.constant 0 : index
    %149 = vector.load %arg2[%c27, %c0_47] : memref<115x64xf32, #tpu.memory_space<vmem>>, vector<1x64xf32>
    %150 = vector.extract_strided_slice %128 {offsets = [0, 5], sizes = [16, 64], strides = [1, 1]} : vector<16x88xf32> to vector<16x64xf32>
    %151 = vector.broadcast %149 : vector<1x64xf32> to vector<16x64xf32>
    %152 = arith.mulf %150, %151 : vector<16x64xf32>
    %153 = arith.addf %148, %152 : vector<16x64xf32>
    %c28 = arith.constant 28 : index
    %c0_48 = arith.constant 0 : index
    %154 = vector.load %arg2[%c28, %c0_48] : memref<115x64xf32, #tpu.memory_space<vmem>>, vector<1x64xf32>
    %155 = vector.extract_strided_slice %128 {offsets = [0, 6], sizes = [16, 64], strides = [1, 1]} : vector<16x88xf32> to vector<16x64xf32>
    %156 = vector.broadcast %154 : vector<1x64xf32> to vector<16x64xf32>
    %157 = arith.mulf %155, %156 : vector<16x64xf32>
    %158 = arith.addf %153, %157 : vector<16x64xf32>
    %c29 = arith.constant 29 : index
    %c0_49 = arith.constant 0 : index
    %159 = vector.load %arg2[%c29, %c0_49] : memref<115x64xf32, #tpu.memory_space<vmem>>, vector<1x64xf32>
    %160 = vector.extract_strided_slice %128 {offsets = [0, 7], sizes = [16, 64], strides = [1, 1]} : vector<16x88xf32> to vector<16x64xf32>
    %161 = vector.broadcast %159 : vector<1x64xf32> to vector<16x64xf32>
    %162 = arith.mulf %160, %161 : vector<16x64xf32>
    %163 = arith.addf %158, %162 : vector<16x64xf32>
    %c30 = arith.constant 30 : index
    %c0_50 = arith.constant 0 : index
    %164 = vector.load %arg2[%c30, %c0_50] : memref<115x64xf32, #tpu.memory_space<vmem>>, vector<1x64xf32>
    %165 = vector.extract_strided_slice %128 {offsets = [0, 8], sizes = [16, 64], strides = [1, 1]} : vector<16x88xf32> to vector<16x64xf32>
    %166 = vector.broadcast %164 : vector<1x64xf32> to vector<16x64xf32>
    %167 = arith.mulf %165, %166 : vector<16x64xf32>
    %168 = arith.addf %163, %167 : vector<16x64xf32>
    %c31 = arith.constant 31 : index
    %c0_51 = arith.constant 0 : index
    %169 = vector.load %arg2[%c31, %c0_51] : memref<115x64xf32, #tpu.memory_space<vmem>>, vector<1x64xf32>
    %170 = vector.extract_strided_slice %128 {offsets = [0, 9], sizes = [16, 64], strides = [1, 1]} : vector<16x88xf32> to vector<16x64xf32>
    %171 = vector.broadcast %169 : vector<1x64xf32> to vector<16x64xf32>
    %172 = arith.mulf %170, %171 : vector<16x64xf32>
    %173 = arith.addf %168, %172 : vector<16x64xf32>
    %c32 = arith.constant 32 : index
    %c0_52 = arith.constant 0 : index
    %174 = vector.load %arg2[%c32, %c0_52] : memref<115x64xf32, #tpu.memory_space<vmem>>, vector<1x64xf32>
    %175 = vector.extract_strided_slice %128 {offsets = [0, 10], sizes = [16, 64], strides = [1, 1]} : vector<16x88xf32> to vector<16x64xf32>
    %176 = vector.broadcast %174 : vector<1x64xf32> to vector<16x64xf32>
    %177 = arith.mulf %175, %176 : vector<16x64xf32>
    %178 = arith.addf %173, %177 : vector<16x64xf32>
    %c33 = arith.constant 33 : index
    %c0_53 = arith.constant 0 : index
    %179 = vector.load %arg2[%c33, %c0_53] : memref<115x64xf32, #tpu.memory_space<vmem>>, vector<1x64xf32>
    %180 = vector.extract_strided_slice %128 {offsets = [0, 11], sizes = [16, 64], strides = [1, 1]} : vector<16x88xf32> to vector<16x64xf32>
    %181 = vector.broadcast %179 : vector<1x64xf32> to vector<16x64xf32>
    %182 = arith.mulf %180, %181 : vector<16x64xf32>
    %183 = arith.addf %178, %182 : vector<16x64xf32>
    %c34 = arith.constant 34 : index
    %c0_54 = arith.constant 0 : index
    %184 = vector.load %arg2[%c34, %c0_54] : memref<115x64xf32, #tpu.memory_space<vmem>>, vector<1x64xf32>
    %185 = vector.extract_strided_slice %128 {offsets = [0, 12], sizes = [16, 64], strides = [1, 1]} : vector<16x88xf32> to vector<16x64xf32>
    %186 = vector.broadcast %184 : vector<1x64xf32> to vector<16x64xf32>
    %187 = arith.mulf %185, %186 : vector<16x64xf32>
    %188 = arith.addf %183, %187 : vector<16x64xf32>
    %c35 = arith.constant 35 : index
    %c0_55 = arith.constant 0 : index
    %189 = vector.load %arg2[%c35, %c0_55] : memref<115x64xf32, #tpu.memory_space<vmem>>, vector<1x64xf32>
    %190 = vector.extract_strided_slice %128 {offsets = [0, 13], sizes = [16, 64], strides = [1, 1]} : vector<16x88xf32> to vector<16x64xf32>
    %191 = vector.broadcast %189 : vector<1x64xf32> to vector<16x64xf32>
    %192 = arith.mulf %190, %191 : vector<16x64xf32>
    %193 = arith.addf %188, %192 : vector<16x64xf32>
    %c36 = arith.constant 36 : index
    %c0_56 = arith.constant 0 : index
    %194 = vector.load %arg2[%c36, %c0_56] : memref<115x64xf32, #tpu.memory_space<vmem>>, vector<1x64xf32>
    %195 = vector.extract_strided_slice %128 {offsets = [0, 14], sizes = [16, 64], strides = [1, 1]} : vector<16x88xf32> to vector<16x64xf32>
    %196 = vector.broadcast %194 : vector<1x64xf32> to vector<16x64xf32>
    %197 = arith.mulf %195, %196 : vector<16x64xf32>
    %198 = arith.addf %193, %197 : vector<16x64xf32>
    %c37 = arith.constant 37 : index
    %c0_57 = arith.constant 0 : index
    %199 = vector.load %arg2[%c37, %c0_57] : memref<115x64xf32, #tpu.memory_space<vmem>>, vector<1x64xf32>
    %200 = vector.extract_strided_slice %128 {offsets = [0, 15], sizes = [16, 64], strides = [1, 1]} : vector<16x88xf32> to vector<16x64xf32>
    %201 = vector.broadcast %199 : vector<1x64xf32> to vector<16x64xf32>
    %202 = arith.mulf %200, %201 : vector<16x64xf32>
    %203 = arith.addf %198, %202 : vector<16x64xf32>
    %c38 = arith.constant 38 : index
    %c0_58 = arith.constant 0 : index
    %204 = vector.load %arg2[%c38, %c0_58] : memref<115x64xf32, #tpu.memory_space<vmem>>, vector<1x64xf32>
    %205 = vector.extract_strided_slice %128 {offsets = [0, 16], sizes = [16, 64], strides = [1, 1]} : vector<16x88xf32> to vector<16x64xf32>
    %206 = vector.broadcast %204 : vector<1x64xf32> to vector<16x64xf32>
    %207 = arith.mulf %205, %206 : vector<16x64xf32>
    %208 = arith.addf %203, %207 : vector<16x64xf32>
    %c39 = arith.constant 39 : index
    %c0_59 = arith.constant 0 : index
    %209 = vector.load %arg2[%c39, %c0_59] : memref<115x64xf32, #tpu.memory_space<vmem>>, vector<1x64xf32>
    %210 = vector.extract_strided_slice %128 {offsets = [0, 17], sizes = [16, 64], strides = [1, 1]} : vector<16x88xf32> to vector<16x64xf32>
    %211 = vector.broadcast %209 : vector<1x64xf32> to vector<16x64xf32>
    %212 = arith.mulf %210, %211 : vector<16x64xf32>
    %213 = arith.addf %208, %212 : vector<16x64xf32>
    %c40 = arith.constant 40 : index
    %c0_60 = arith.constant 0 : index
    %214 = vector.load %arg2[%c40, %c0_60] : memref<115x64xf32, #tpu.memory_space<vmem>>, vector<1x64xf32>
    %215 = vector.extract_strided_slice %128 {offsets = [0, 18], sizes = [16, 64], strides = [1, 1]} : vector<16x88xf32> to vector<16x64xf32>
    %216 = vector.broadcast %214 : vector<1x64xf32> to vector<16x64xf32>
    %217 = arith.mulf %215, %216 : vector<16x64xf32>
    %218 = arith.addf %213, %217 : vector<16x64xf32>
    %c41 = arith.constant 41 : index
    %c0_61 = arith.constant 0 : index
    %219 = vector.load %arg2[%c41, %c0_61] : memref<115x64xf32, #tpu.memory_space<vmem>>, vector<1x64xf32>
    %220 = vector.extract_strided_slice %128 {offsets = [0, 19], sizes = [16, 64], strides = [1, 1]} : vector<16x88xf32> to vector<16x64xf32>
    %221 = vector.broadcast %219 : vector<1x64xf32> to vector<16x64xf32>
    %222 = arith.mulf %220, %221 : vector<16x64xf32>
    %223 = arith.addf %218, %222 : vector<16x64xf32>
    %c42 = arith.constant 42 : index
    %c0_62 = arith.constant 0 : index
    %224 = vector.load %arg2[%c42, %c0_62] : memref<115x64xf32, #tpu.memory_space<vmem>>, vector<1x64xf32>
    %225 = vector.extract_strided_slice %128 {offsets = [0, 20], sizes = [16, 64], strides = [1, 1]} : vector<16x88xf32> to vector<16x64xf32>
    %226 = vector.broadcast %224 : vector<1x64xf32> to vector<16x64xf32>
    %227 = arith.mulf %225, %226 : vector<16x64xf32>
    %228 = arith.addf %223, %227 : vector<16x64xf32>
    %c43 = arith.constant 43 : index
    %c0_63 = arith.constant 0 : index
    %229 = vector.load %arg2[%c43, %c0_63] : memref<115x64xf32, #tpu.memory_space<vmem>>, vector<1x64xf32>
    %230 = vector.extract_strided_slice %128 {offsets = [0, 21], sizes = [16, 64], strides = [1, 1]} : vector<16x88xf32> to vector<16x64xf32>
    %231 = vector.broadcast %229 : vector<1x64xf32> to vector<16x64xf32>
    %232 = arith.mulf %230, %231 : vector<16x64xf32>
    %233 = arith.addf %228, %232 : vector<16x64xf32>
    %c44 = arith.constant 44 : index
    %c0_64 = arith.constant 0 : index
    %234 = vector.load %arg2[%c44, %c0_64] : memref<115x64xf32, #tpu.memory_space<vmem>>, vector<1x64xf32>
    %235 = vector.extract_strided_slice %128 {offsets = [0, 22], sizes = [16, 64], strides = [1, 1]} : vector<16x88xf32> to vector<16x64xf32>
    %236 = vector.broadcast %234 : vector<1x64xf32> to vector<16x64xf32>
    %237 = arith.mulf %235, %236 : vector<16x64xf32>
    %238 = arith.addf %233, %237 : vector<16x64xf32>
    %c45 = arith.constant 45 : index
    %c0_65 = arith.constant 0 : index
    %239 = vector.load %arg2[%c45, %c0_65] : memref<115x64xf32, #tpu.memory_space<vmem>>, vector<1x64xf32>
    %240 = vector.extract_strided_slice %128 {offsets = [0, 23], sizes = [16, 64], strides = [1, 1]} : vector<16x88xf32> to vector<16x64xf32>
    %241 = vector.broadcast %239 : vector<1x64xf32> to vector<16x64xf32>
    %242 = arith.mulf %240, %241 : vector<16x64xf32>
    %243 = arith.addf %238, %242 : vector<16x64xf32>
    %c2_66 = arith.constant 2 : index
    %c0_67 = arith.constant 0 : index
    %244 = vector.load %arg5[%c2_66, %c0_67] : memref<20x88xf32, #tpu.memory_space<vmem>>, vector<16x88xf32>
    %c46 = arith.constant 46 : index
    %c0_68 = arith.constant 0 : index
    %245 = vector.load %arg2[%c46, %c0_68] : memref<115x64xf32, #tpu.memory_space<vmem>>, vector<1x64xf32>
    %246 = vector.extract_strided_slice %244 {offsets = [0, 1], sizes = [16, 64], strides = [1, 1]} : vector<16x88xf32> to vector<16x64xf32>
    %247 = vector.broadcast %245 : vector<1x64xf32> to vector<16x64xf32>
    %248 = arith.mulf %246, %247 : vector<16x64xf32>
    %249 = arith.addf %243, %248 : vector<16x64xf32>
    %c47 = arith.constant 47 : index
    %c0_69 = arith.constant 0 : index
    %250 = vector.load %arg2[%c47, %c0_69] : memref<115x64xf32, #tpu.memory_space<vmem>>, vector<1x64xf32>
    %251 = vector.extract_strided_slice %244 {offsets = [0, 2], sizes = [16, 64], strides = [1, 1]} : vector<16x88xf32> to vector<16x64xf32>
    %252 = vector.broadcast %250 : vector<1x64xf32> to vector<16x64xf32>
    %253 = arith.mulf %251, %252 : vector<16x64xf32>
    %254 = arith.addf %249, %253 : vector<16x64xf32>
    %c48 = arith.constant 48 : index
    %c0_70 = arith.constant 0 : index
    %255 = vector.load %arg2[%c48, %c0_70] : memref<115x64xf32, #tpu.memory_space<vmem>>, vector<1x64xf32>
    %256 = vector.extract_strided_slice %244 {offsets = [0, 3], sizes = [16, 64], strides = [1, 1]} : vector<16x88xf32> to vector<16x64xf32>
    %257 = vector.broadcast %255 : vector<1x64xf32> to vector<16x64xf32>
    %258 = arith.mulf %256, %257 : vector<16x64xf32>
    %259 = arith.addf %254, %258 : vector<16x64xf32>
    %c49 = arith.constant 49 : index
    %c0_71 = arith.constant 0 : index
    %260 = vector.load %arg2[%c49, %c0_71] : memref<115x64xf32, #tpu.memory_space<vmem>>, vector<1x64xf32>
    %261 = vector.extract_strided_slice %244 {offsets = [0, 4], sizes = [16, 64], strides = [1, 1]} : vector<16x88xf32> to vector<16x64xf32>
    %262 = vector.broadcast %260 : vector<1x64xf32> to vector<16x64xf32>
    %263 = arith.mulf %261, %262 : vector<16x64xf32>
    %264 = arith.addf %259, %263 : vector<16x64xf32>
    %c50 = arith.constant 50 : index
    %c0_72 = arith.constant 0 : index
    %265 = vector.load %arg2[%c50, %c0_72] : memref<115x64xf32, #tpu.memory_space<vmem>>, vector<1x64xf32>
    %266 = vector.extract_strided_slice %244 {offsets = [0, 5], sizes = [16, 64], strides = [1, 1]} : vector<16x88xf32> to vector<16x64xf32>
    %267 = vector.broadcast %265 : vector<1x64xf32> to vector<16x64xf32>
    %268 = arith.mulf %266, %267 : vector<16x64xf32>
    %269 = arith.addf %264, %268 : vector<16x64xf32>
    %c51 = arith.constant 51 : index
    %c0_73 = arith.constant 0 : index
    %270 = vector.load %arg2[%c51, %c0_73] : memref<115x64xf32, #tpu.memory_space<vmem>>, vector<1x64xf32>
    %271 = vector.extract_strided_slice %244 {offsets = [0, 6], sizes = [16, 64], strides = [1, 1]} : vector<16x88xf32> to vector<16x64xf32>
    %272 = vector.broadcast %270 : vector<1x64xf32> to vector<16x64xf32>
    %273 = arith.mulf %271, %272 : vector<16x64xf32>
    %274 = arith.addf %269, %273 : vector<16x64xf32>
    %c52 = arith.constant 52 : index
    %c0_74 = arith.constant 0 : index
    %275 = vector.load %arg2[%c52, %c0_74] : memref<115x64xf32, #tpu.memory_space<vmem>>, vector<1x64xf32>
    %276 = vector.extract_strided_slice %244 {offsets = [0, 7], sizes = [16, 64], strides = [1, 1]} : vector<16x88xf32> to vector<16x64xf32>
    %277 = vector.broadcast %275 : vector<1x64xf32> to vector<16x64xf32>
    %278 = arith.mulf %276, %277 : vector<16x64xf32>
    %279 = arith.addf %274, %278 : vector<16x64xf32>
    %c53 = arith.constant 53 : index
    %c0_75 = arith.constant 0 : index
    %280 = vector.load %arg2[%c53, %c0_75] : memref<115x64xf32, #tpu.memory_space<vmem>>, vector<1x64xf32>
    %281 = vector.extract_strided_slice %244 {offsets = [0, 8], sizes = [16, 64], strides = [1, 1]} : vector<16x88xf32> to vector<16x64xf32>
    %282 = vector.broadcast %280 : vector<1x64xf32> to vector<16x64xf32>
    %283 = arith.mulf %281, %282 : vector<16x64xf32>
    %284 = arith.addf %279, %283 : vector<16x64xf32>
    %c54 = arith.constant 54 : index
    %c0_76 = arith.constant 0 : index
    %285 = vector.load %arg2[%c54, %c0_76] : memref<115x64xf32, #tpu.memory_space<vmem>>, vector<1x64xf32>
    %286 = vector.extract_strided_slice %244 {offsets = [0, 9], sizes = [16, 64], strides = [1, 1]} : vector<16x88xf32> to vector<16x64xf32>
    %287 = vector.broadcast %285 : vector<1x64xf32> to vector<16x64xf32>
    %288 = arith.mulf %286, %287 : vector<16x64xf32>
    %289 = arith.addf %284, %288 : vector<16x64xf32>
    %c55 = arith.constant 55 : index
    %c0_77 = arith.constant 0 : index
    %290 = vector.load %arg2[%c55, %c0_77] : memref<115x64xf32, #tpu.memory_space<vmem>>, vector<1x64xf32>
    %291 = vector.extract_strided_slice %244 {offsets = [0, 10], sizes = [16, 64], strides = [1, 1]} : vector<16x88xf32> to vector<16x64xf32>
    %292 = vector.broadcast %290 : vector<1x64xf32> to vector<16x64xf32>
    %293 = arith.mulf %291, %292 : vector<16x64xf32>
    %294 = arith.addf %289, %293 : vector<16x64xf32>
    %c56 = arith.constant 56 : index
    %c0_78 = arith.constant 0 : index
    %295 = vector.load %arg2[%c56, %c0_78] : memref<115x64xf32, #tpu.memory_space<vmem>>, vector<1x64xf32>
    %296 = vector.extract_strided_slice %244 {offsets = [0, 11], sizes = [16, 64], strides = [1, 1]} : vector<16x88xf32> to vector<16x64xf32>
    %297 = vector.broadcast %295 : vector<1x64xf32> to vector<16x64xf32>
    %298 = arith.mulf %296, %297 : vector<16x64xf32>
    %299 = arith.addf %294, %298 : vector<16x64xf32>
    %c57 = arith.constant 57 : index
    %c0_79 = arith.constant 0 : index
    %300 = vector.load %arg2[%c57, %c0_79] : memref<115x64xf32, #tpu.memory_space<vmem>>, vector<1x64xf32>
    %301 = vector.extract_strided_slice %244 {offsets = [0, 12], sizes = [16, 64], strides = [1, 1]} : vector<16x88xf32> to vector<16x64xf32>
    %302 = vector.broadcast %300 : vector<1x64xf32> to vector<16x64xf32>
    %303 = arith.mulf %301, %302 : vector<16x64xf32>
    %304 = arith.addf %299, %303 : vector<16x64xf32>
    %c58 = arith.constant 58 : index
    %c0_80 = arith.constant 0 : index
    %305 = vector.load %arg2[%c58, %c0_80] : memref<115x64xf32, #tpu.memory_space<vmem>>, vector<1x64xf32>
    %306 = vector.extract_strided_slice %244 {offsets = [0, 13], sizes = [16, 64], strides = [1, 1]} : vector<16x88xf32> to vector<16x64xf32>
    %307 = vector.broadcast %305 : vector<1x64xf32> to vector<16x64xf32>
    %308 = arith.mulf %306, %307 : vector<16x64xf32>
    %309 = arith.addf %304, %308 : vector<16x64xf32>
    %c59 = arith.constant 59 : index
    %c0_81 = arith.constant 0 : index
    %310 = vector.load %arg2[%c59, %c0_81] : memref<115x64xf32, #tpu.memory_space<vmem>>, vector<1x64xf32>
    %311 = vector.extract_strided_slice %244 {offsets = [0, 14], sizes = [16, 64], strides = [1, 1]} : vector<16x88xf32> to vector<16x64xf32>
    %312 = vector.broadcast %310 : vector<1x64xf32> to vector<16x64xf32>
    %313 = arith.mulf %311, %312 : vector<16x64xf32>
    %314 = arith.addf %309, %313 : vector<16x64xf32>
    %c60 = arith.constant 60 : index
    %c0_82 = arith.constant 0 : index
    %315 = vector.load %arg2[%c60, %c0_82] : memref<115x64xf32, #tpu.memory_space<vmem>>, vector<1x64xf32>
    %316 = vector.extract_strided_slice %244 {offsets = [0, 15], sizes = [16, 64], strides = [1, 1]} : vector<16x88xf32> to vector<16x64xf32>
    %317 = vector.broadcast %315 : vector<1x64xf32> to vector<16x64xf32>
    %318 = arith.mulf %316, %317 : vector<16x64xf32>
    %319 = arith.addf %314, %318 : vector<16x64xf32>
    %c61 = arith.constant 61 : index
    %c0_83 = arith.constant 0 : index
    %320 = vector.load %arg2[%c61, %c0_83] : memref<115x64xf32, #tpu.memory_space<vmem>>, vector<1x64xf32>
    %321 = vector.extract_strided_slice %244 {offsets = [0, 16], sizes = [16, 64], strides = [1, 1]} : vector<16x88xf32> to vector<16x64xf32>
    %322 = vector.broadcast %320 : vector<1x64xf32> to vector<16x64xf32>
    %323 = arith.mulf %321, %322 : vector<16x64xf32>
    %324 = arith.addf %319, %323 : vector<16x64xf32>
    %c62 = arith.constant 62 : index
    %c0_84 = arith.constant 0 : index
    %325 = vector.load %arg2[%c62, %c0_84] : memref<115x64xf32, #tpu.memory_space<vmem>>, vector<1x64xf32>
    %326 = vector.extract_strided_slice %244 {offsets = [0, 17], sizes = [16, 64], strides = [1, 1]} : vector<16x88xf32> to vector<16x64xf32>
    %327 = vector.broadcast %325 : vector<1x64xf32> to vector<16x64xf32>
    %328 = arith.mulf %326, %327 : vector<16x64xf32>
    %329 = arith.addf %324, %328 : vector<16x64xf32>
    %c63 = arith.constant 63 : index
    %c0_85 = arith.constant 0 : index
    %330 = vector.load %arg2[%c63, %c0_85] : memref<115x64xf32, #tpu.memory_space<vmem>>, vector<1x64xf32>
    %331 = vector.extract_strided_slice %244 {offsets = [0, 18], sizes = [16, 64], strides = [1, 1]} : vector<16x88xf32> to vector<16x64xf32>
    %332 = vector.broadcast %330 : vector<1x64xf32> to vector<16x64xf32>
    %333 = arith.mulf %331, %332 : vector<16x64xf32>
    %334 = arith.addf %329, %333 : vector<16x64xf32>
    %c64 = arith.constant 64 : index
    %c0_86 = arith.constant 0 : index
    %335 = vector.load %arg2[%c64, %c0_86] : memref<115x64xf32, #tpu.memory_space<vmem>>, vector<1x64xf32>
    %336 = vector.extract_strided_slice %244 {offsets = [0, 19], sizes = [16, 64], strides = [1, 1]} : vector<16x88xf32> to vector<16x64xf32>
    %337 = vector.broadcast %335 : vector<1x64xf32> to vector<16x64xf32>
    %338 = arith.mulf %336, %337 : vector<16x64xf32>
    %339 = arith.addf %334, %338 : vector<16x64xf32>
    %c65 = arith.constant 65 : index
    %c0_87 = arith.constant 0 : index
    %340 = vector.load %arg2[%c65, %c0_87] : memref<115x64xf32, #tpu.memory_space<vmem>>, vector<1x64xf32>
    %341 = vector.extract_strided_slice %244 {offsets = [0, 20], sizes = [16, 64], strides = [1, 1]} : vector<16x88xf32> to vector<16x64xf32>
    %342 = vector.broadcast %340 : vector<1x64xf32> to vector<16x64xf32>
    %343 = arith.mulf %341, %342 : vector<16x64xf32>
    %344 = arith.addf %339, %343 : vector<16x64xf32>
    %c66 = arith.constant 66 : index
    %c0_88 = arith.constant 0 : index
    %345 = vector.load %arg2[%c66, %c0_88] : memref<115x64xf32, #tpu.memory_space<vmem>>, vector<1x64xf32>
    %346 = vector.extract_strided_slice %244 {offsets = [0, 21], sizes = [16, 64], strides = [1, 1]} : vector<16x88xf32> to vector<16x64xf32>
    %347 = vector.broadcast %345 : vector<1x64xf32> to vector<16x64xf32>
    %348 = arith.mulf %346, %347 : vector<16x64xf32>
    %349 = arith.addf %344, %348 : vector<16x64xf32>
    %c67 = arith.constant 67 : index
    %c0_89 = arith.constant 0 : index
    %350 = vector.load %arg2[%c67, %c0_89] : memref<115x64xf32, #tpu.memory_space<vmem>>, vector<1x64xf32>
    %351 = vector.extract_strided_slice %244 {offsets = [0, 22], sizes = [16, 64], strides = [1, 1]} : vector<16x88xf32> to vector<16x64xf32>
    %352 = vector.broadcast %350 : vector<1x64xf32> to vector<16x64xf32>
    %353 = arith.mulf %351, %352 : vector<16x64xf32>
    %354 = arith.addf %349, %353 : vector<16x64xf32>
    %c68 = arith.constant 68 : index
    %c0_90 = arith.constant 0 : index
    %355 = vector.load %arg2[%c68, %c0_90] : memref<115x64xf32, #tpu.memory_space<vmem>>, vector<1x64xf32>
    %356 = vector.extract_strided_slice %244 {offsets = [0, 23], sizes = [16, 64], strides = [1, 1]} : vector<16x88xf32> to vector<16x64xf32>
    %357 = vector.broadcast %355 : vector<1x64xf32> to vector<16x64xf32>
    %358 = arith.mulf %356, %357 : vector<16x64xf32>
    %359 = arith.addf %354, %358 : vector<16x64xf32>
    %c3_91 = arith.constant 3 : index
    %c0_92 = arith.constant 0 : index
    %360 = vector.load %arg5[%c3_91, %c0_92] : memref<20x88xf32, #tpu.memory_space<vmem>>, vector<16x88xf32>
    %c69 = arith.constant 69 : index
    %c0_93 = arith.constant 0 : index
    %361 = vector.load %arg2[%c69, %c0_93] : memref<115x64xf32, #tpu.memory_space<vmem>>, vector<1x64xf32>
    %362 = vector.extract_strided_slice %360 {offsets = [0, 1], sizes = [16, 64], strides = [1, 1]} : vector<16x88xf32> to vector<16x64xf32>
    %363 = vector.broadcast %361 : vector<1x64xf32> to vector<16x64xf32>
    %364 = arith.mulf %362, %363 : vector<16x64xf32>
    %365 = arith.addf %359, %364 : vector<16x64xf32>
    %c70 = arith.constant 70 : index
    %c0_94 = arith.constant 0 : index
    %366 = vector.load %arg2[%c70, %c0_94] : memref<115x64xf32, #tpu.memory_space<vmem>>, vector<1x64xf32>
    %367 = vector.extract_strided_slice %360 {offsets = [0, 2], sizes = [16, 64], strides = [1, 1]} : vector<16x88xf32> to vector<16x64xf32>
    %368 = vector.broadcast %366 : vector<1x64xf32> to vector<16x64xf32>
    %369 = arith.mulf %367, %368 : vector<16x64xf32>
    %370 = arith.addf %365, %369 : vector<16x64xf32>
    %c71 = arith.constant 71 : index
    %c0_95 = arith.constant 0 : index
    %371 = vector.load %arg2[%c71, %c0_95] : memref<115x64xf32, #tpu.memory_space<vmem>>, vector<1x64xf32>
    %372 = vector.extract_strided_slice %360 {offsets = [0, 3], sizes = [16, 64], strides = [1, 1]} : vector<16x88xf32> to vector<16x64xf32>
    %373 = vector.broadcast %371 : vector<1x64xf32> to vector<16x64xf32>
    %374 = arith.mulf %372, %373 : vector<16x64xf32>
    %375 = arith.addf %370, %374 : vector<16x64xf32>
    %c72 = arith.constant 72 : index
    %c0_96 = arith.constant 0 : index
    %376 = vector.load %arg2[%c72, %c0_96] : memref<115x64xf32, #tpu.memory_space<vmem>>, vector<1x64xf32>
    %377 = vector.extract_strided_slice %360 {offsets = [0, 4], sizes = [16, 64], strides = [1, 1]} : vector<16x88xf32> to vector<16x64xf32>
    %378 = vector.broadcast %376 : vector<1x64xf32> to vector<16x64xf32>
    %379 = arith.mulf %377, %378 : vector<16x64xf32>
    %380 = arith.addf %375, %379 : vector<16x64xf32>
    %c73 = arith.constant 73 : index
    %c0_97 = arith.constant 0 : index
    %381 = vector.load %arg2[%c73, %c0_97] : memref<115x64xf32, #tpu.memory_space<vmem>>, vector<1x64xf32>
    %382 = vector.extract_strided_slice %360 {offsets = [0, 5], sizes = [16, 64], strides = [1, 1]} : vector<16x88xf32> to vector<16x64xf32>
    %383 = vector.broadcast %381 : vector<1x64xf32> to vector<16x64xf32>
    %384 = arith.mulf %382, %383 : vector<16x64xf32>
    %385 = arith.addf %380, %384 : vector<16x64xf32>
    %c74 = arith.constant 74 : index
    %c0_98 = arith.constant 0 : index
    %386 = vector.load %arg2[%c74, %c0_98] : memref<115x64xf32, #tpu.memory_space<vmem>>, vector<1x64xf32>
    %387 = vector.extract_strided_slice %360 {offsets = [0, 6], sizes = [16, 64], strides = [1, 1]} : vector<16x88xf32> to vector<16x64xf32>
    %388 = vector.broadcast %386 : vector<1x64xf32> to vector<16x64xf32>
    %389 = arith.mulf %387, %388 : vector<16x64xf32>
    %390 = arith.addf %385, %389 : vector<16x64xf32>
    %c75 = arith.constant 75 : index
    %c0_99 = arith.constant 0 : index
    %391 = vector.load %arg2[%c75, %c0_99] : memref<115x64xf32, #tpu.memory_space<vmem>>, vector<1x64xf32>
    %392 = vector.extract_strided_slice %360 {offsets = [0, 7], sizes = [16, 64], strides = [1, 1]} : vector<16x88xf32> to vector<16x64xf32>
    %393 = vector.broadcast %391 : vector<1x64xf32> to vector<16x64xf32>
    %394 = arith.mulf %392, %393 : vector<16x64xf32>
    %395 = arith.addf %390, %394 : vector<16x64xf32>
    %c76_100 = arith.constant 76 : index
    %c0_101 = arith.constant 0 : index
    %396 = vector.load %arg2[%c76_100, %c0_101] : memref<115x64xf32, #tpu.memory_space<vmem>>, vector<1x64xf32>
    %397 = vector.extract_strided_slice %360 {offsets = [0, 8], sizes = [16, 64], strides = [1, 1]} : vector<16x88xf32> to vector<16x64xf32>
    %398 = vector.broadcast %396 : vector<1x64xf32> to vector<16x64xf32>
    %399 = arith.mulf %397, %398 : vector<16x64xf32>
    %400 = arith.addf %395, %399 : vector<16x64xf32>
    %c77 = arith.constant 77 : index
    %c0_102 = arith.constant 0 : index
    %401 = vector.load %arg2[%c77, %c0_102] : memref<115x64xf32, #tpu.memory_space<vmem>>, vector<1x64xf32>
    %402 = vector.extract_strided_slice %360 {offsets = [0, 9], sizes = [16, 64], strides = [1, 1]} : vector<16x88xf32> to vector<16x64xf32>
    %403 = vector.broadcast %401 : vector<1x64xf32> to vector<16x64xf32>
    %404 = arith.mulf %402, %403 : vector<16x64xf32>
    %405 = arith.addf %400, %404 : vector<16x64xf32>
    %c78 = arith.constant 78 : index
    %c0_103 = arith.constant 0 : index
    %406 = vector.load %arg2[%c78, %c0_103] : memref<115x64xf32, #tpu.memory_space<vmem>>, vector<1x64xf32>
    %407 = vector.extract_strided_slice %360 {offsets = [0, 10], sizes = [16, 64], strides = [1, 1]} : vector<16x88xf32> to vector<16x64xf32>
    %408 = vector.broadcast %406 : vector<1x64xf32> to vector<16x64xf32>
    %409 = arith.mulf %407, %408 : vector<16x64xf32>
    %410 = arith.addf %405, %409 : vector<16x64xf32>
    %c79 = arith.constant 79 : index
    %c0_104 = arith.constant 0 : index
    %411 = vector.load %arg2[%c79, %c0_104] : memref<115x64xf32, #tpu.memory_space<vmem>>, vector<1x64xf32>
    %412 = vector.extract_strided_slice %360 {offsets = [0, 11], sizes = [16, 64], strides = [1, 1]} : vector<16x88xf32> to vector<16x64xf32>
    %413 = vector.broadcast %411 : vector<1x64xf32> to vector<16x64xf32>
    %414 = arith.mulf %412, %413 : vector<16x64xf32>
    %415 = arith.addf %410, %414 : vector<16x64xf32>
    %c80 = arith.constant 80 : index
    %c0_105 = arith.constant 0 : index
    %416 = vector.load %arg2[%c80, %c0_105] : memref<115x64xf32, #tpu.memory_space<vmem>>, vector<1x64xf32>
    %417 = vector.extract_strided_slice %360 {offsets = [0, 12], sizes = [16, 64], strides = [1, 1]} : vector<16x88xf32> to vector<16x64xf32>
    %418 = vector.broadcast %416 : vector<1x64xf32> to vector<16x64xf32>
    %419 = arith.mulf %417, %418 : vector<16x64xf32>
    %420 = arith.addf %415, %419 : vector<16x64xf32>
    %c81 = arith.constant 81 : index
    %c0_106 = arith.constant 0 : index
    %421 = vector.load %arg2[%c81, %c0_106] : memref<115x64xf32, #tpu.memory_space<vmem>>, vector<1x64xf32>
    %422 = vector.extract_strided_slice %360 {offsets = [0, 13], sizes = [16, 64], strides = [1, 1]} : vector<16x88xf32> to vector<16x64xf32>
    %423 = vector.broadcast %421 : vector<1x64xf32> to vector<16x64xf32>
    %424 = arith.mulf %422, %423 : vector<16x64xf32>
    %425 = arith.addf %420, %424 : vector<16x64xf32>
    %c82 = arith.constant 82 : index
    %c0_107 = arith.constant 0 : index
    %426 = vector.load %arg2[%c82, %c0_107] : memref<115x64xf32, #tpu.memory_space<vmem>>, vector<1x64xf32>
    %427 = vector.extract_strided_slice %360 {offsets = [0, 14], sizes = [16, 64], strides = [1, 1]} : vector<16x88xf32> to vector<16x64xf32>
    %428 = vector.broadcast %426 : vector<1x64xf32> to vector<16x64xf32>
    %429 = arith.mulf %427, %428 : vector<16x64xf32>
    %430 = arith.addf %425, %429 : vector<16x64xf32>
    %c83 = arith.constant 83 : index
    %c0_108 = arith.constant 0 : index
    %431 = vector.load %arg2[%c83, %c0_108] : memref<115x64xf32, #tpu.memory_space<vmem>>, vector<1x64xf32>
    %432 = vector.extract_strided_slice %360 {offsets = [0, 15], sizes = [16, 64], strides = [1, 1]} : vector<16x88xf32> to vector<16x64xf32>
    %433 = vector.broadcast %431 : vector<1x64xf32> to vector<16x64xf32>
    %434 = arith.mulf %432, %433 : vector<16x64xf32>
    %435 = arith.addf %430, %434 : vector<16x64xf32>
    %c84 = arith.constant 84 : index
    %c0_109 = arith.constant 0 : index
    %436 = vector.load %arg2[%c84, %c0_109] : memref<115x64xf32, #tpu.memory_space<vmem>>, vector<1x64xf32>
    %437 = vector.extract_strided_slice %360 {offsets = [0, 16], sizes = [16, 64], strides = [1, 1]} : vector<16x88xf32> to vector<16x64xf32>
    %438 = vector.broadcast %436 : vector<1x64xf32> to vector<16x64xf32>
    %439 = arith.mulf %437, %438 : vector<16x64xf32>
    %440 = arith.addf %435, %439 : vector<16x64xf32>
    %c85 = arith.constant 85 : index
    %c0_110 = arith.constant 0 : index
    %441 = vector.load %arg2[%c85, %c0_110] : memref<115x64xf32, #tpu.memory_space<vmem>>, vector<1x64xf32>
    %442 = vector.extract_strided_slice %360 {offsets = [0, 17], sizes = [16, 64], strides = [1, 1]} : vector<16x88xf32> to vector<16x64xf32>
    %443 = vector.broadcast %441 : vector<1x64xf32> to vector<16x64xf32>
    %444 = arith.mulf %442, %443 : vector<16x64xf32>
    %445 = arith.addf %440, %444 : vector<16x64xf32>
    %c86 = arith.constant 86 : index
    %c0_111 = arith.constant 0 : index
    %446 = vector.load %arg2[%c86, %c0_111] : memref<115x64xf32, #tpu.memory_space<vmem>>, vector<1x64xf32>
    %447 = vector.extract_strided_slice %360 {offsets = [0, 18], sizes = [16, 64], strides = [1, 1]} : vector<16x88xf32> to vector<16x64xf32>
    %448 = vector.broadcast %446 : vector<1x64xf32> to vector<16x64xf32>
    %449 = arith.mulf %447, %448 : vector<16x64xf32>
    %450 = arith.addf %445, %449 : vector<16x64xf32>
    %c87 = arith.constant 87 : index
    %c0_112 = arith.constant 0 : index
    %451 = vector.load %arg2[%c87, %c0_112] : memref<115x64xf32, #tpu.memory_space<vmem>>, vector<1x64xf32>
    %452 = vector.extract_strided_slice %360 {offsets = [0, 19], sizes = [16, 64], strides = [1, 1]} : vector<16x88xf32> to vector<16x64xf32>
    %453 = vector.broadcast %451 : vector<1x64xf32> to vector<16x64xf32>
    %454 = arith.mulf %452, %453 : vector<16x64xf32>
    %455 = arith.addf %450, %454 : vector<16x64xf32>
    %c88 = arith.constant 88 : index
    %c0_113 = arith.constant 0 : index
    %456 = vector.load %arg2[%c88, %c0_113] : memref<115x64xf32, #tpu.memory_space<vmem>>, vector<1x64xf32>
    %457 = vector.extract_strided_slice %360 {offsets = [0, 20], sizes = [16, 64], strides = [1, 1]} : vector<16x88xf32> to vector<16x64xf32>
    %458 = vector.broadcast %456 : vector<1x64xf32> to vector<16x64xf32>
    %459 = arith.mulf %457, %458 : vector<16x64xf32>
    %460 = arith.addf %455, %459 : vector<16x64xf32>
    %c89 = arith.constant 89 : index
    %c0_114 = arith.constant 0 : index
    %461 = vector.load %arg2[%c89, %c0_114] : memref<115x64xf32, #tpu.memory_space<vmem>>, vector<1x64xf32>
    %462 = vector.extract_strided_slice %360 {offsets = [0, 21], sizes = [16, 64], strides = [1, 1]} : vector<16x88xf32> to vector<16x64xf32>
    %463 = vector.broadcast %461 : vector<1x64xf32> to vector<16x64xf32>
    %464 = arith.mulf %462, %463 : vector<16x64xf32>
    %465 = arith.addf %460, %464 : vector<16x64xf32>
    %c90 = arith.constant 90 : index
    %c0_115 = arith.constant 0 : index
    %466 = vector.load %arg2[%c90, %c0_115] : memref<115x64xf32, #tpu.memory_space<vmem>>, vector<1x64xf32>
    %467 = vector.extract_strided_slice %360 {offsets = [0, 22], sizes = [16, 64], strides = [1, 1]} : vector<16x88xf32> to vector<16x64xf32>
    %468 = vector.broadcast %466 : vector<1x64xf32> to vector<16x64xf32>
    %469 = arith.mulf %467, %468 : vector<16x64xf32>
    %470 = arith.addf %465, %469 : vector<16x64xf32>
    %c91 = arith.constant 91 : index
    %c0_116 = arith.constant 0 : index
    %471 = vector.load %arg2[%c91, %c0_116] : memref<115x64xf32, #tpu.memory_space<vmem>>, vector<1x64xf32>
    %472 = vector.extract_strided_slice %360 {offsets = [0, 23], sizes = [16, 64], strides = [1, 1]} : vector<16x88xf32> to vector<16x64xf32>
    %473 = vector.broadcast %471 : vector<1x64xf32> to vector<16x64xf32>
    %474 = arith.mulf %472, %473 : vector<16x64xf32>
    %475 = arith.addf %470, %474 : vector<16x64xf32>
    %c4_117 = arith.constant 4 : index
    %c0_118 = arith.constant 0 : index
    %476 = vector.load %arg5[%c4_117, %c0_118] : memref<20x88xf32, #tpu.memory_space<vmem>>, vector<16x88xf32>
    %c92 = arith.constant 92 : index
    %c0_119 = arith.constant 0 : index
    %477 = vector.load %arg2[%c92, %c0_119] : memref<115x64xf32, #tpu.memory_space<vmem>>, vector<1x64xf32>
    %478 = vector.extract_strided_slice %476 {offsets = [0, 1], sizes = [16, 64], strides = [1, 1]} : vector<16x88xf32> to vector<16x64xf32>
    %479 = vector.broadcast %477 : vector<1x64xf32> to vector<16x64xf32>
    %480 = arith.mulf %478, %479 : vector<16x64xf32>
    %481 = arith.addf %475, %480 : vector<16x64xf32>
    %c93 = arith.constant 93 : index
    %c0_120 = arith.constant 0 : index
    %482 = vector.load %arg2[%c93, %c0_120] : memref<115x64xf32, #tpu.memory_space<vmem>>, vector<1x64xf32>
    %483 = vector.extract_strided_slice %476 {offsets = [0, 2], sizes = [16, 64], strides = [1, 1]} : vector<16x88xf32> to vector<16x64xf32>
    %484 = vector.broadcast %482 : vector<1x64xf32> to vector<16x64xf32>
    %485 = arith.mulf %483, %484 : vector<16x64xf32>
    %486 = arith.addf %481, %485 : vector<16x64xf32>
    %c94 = arith.constant 94 : index
    %c0_121 = arith.constant 0 : index
    %487 = vector.load %arg2[%c94, %c0_121] : memref<115x64xf32, #tpu.memory_space<vmem>>, vector<1x64xf32>
    %488 = vector.extract_strided_slice %476 {offsets = [0, 3], sizes = [16, 64], strides = [1, 1]} : vector<16x88xf32> to vector<16x64xf32>
    %489 = vector.broadcast %487 : vector<1x64xf32> to vector<16x64xf32>
    %490 = arith.mulf %488, %489 : vector<16x64xf32>
    %491 = arith.addf %486, %490 : vector<16x64xf32>
    %c95 = arith.constant 95 : index
    %c0_122 = arith.constant 0 : index
    %492 = vector.load %arg2[%c95, %c0_122] : memref<115x64xf32, #tpu.memory_space<vmem>>, vector<1x64xf32>
    %493 = vector.extract_strided_slice %476 {offsets = [0, 4], sizes = [16, 64], strides = [1, 1]} : vector<16x88xf32> to vector<16x64xf32>
    %494 = vector.broadcast %492 : vector<1x64xf32> to vector<16x64xf32>
    %495 = arith.mulf %493, %494 : vector<16x64xf32>
    %496 = arith.addf %491, %495 : vector<16x64xf32>
    %c96 = arith.constant 96 : index
    %c0_123 = arith.constant 0 : index
    %497 = vector.load %arg2[%c96, %c0_123] : memref<115x64xf32, #tpu.memory_space<vmem>>, vector<1x64xf32>
    %498 = vector.extract_strided_slice %476 {offsets = [0, 5], sizes = [16, 64], strides = [1, 1]} : vector<16x88xf32> to vector<16x64xf32>
    %499 = vector.broadcast %497 : vector<1x64xf32> to vector<16x64xf32>
    %500 = arith.mulf %498, %499 : vector<16x64xf32>
    %501 = arith.addf %496, %500 : vector<16x64xf32>
    %c97 = arith.constant 97 : index
    %c0_124 = arith.constant 0 : index
    %502 = vector.load %arg2[%c97, %c0_124] : memref<115x64xf32, #tpu.memory_space<vmem>>, vector<1x64xf32>
    %503 = vector.extract_strided_slice %476 {offsets = [0, 6], sizes = [16, 64], strides = [1, 1]} : vector<16x88xf32> to vector<16x64xf32>
    %504 = vector.broadcast %502 : vector<1x64xf32> to vector<16x64xf32>
    %505 = arith.mulf %503, %504 : vector<16x64xf32>
    %506 = arith.addf %501, %505 : vector<16x64xf32>
    %c98 = arith.constant 98 : index
    %c0_125 = arith.constant 0 : index
    %507 = vector.load %arg2[%c98, %c0_125] : memref<115x64xf32, #tpu.memory_space<vmem>>, vector<1x64xf32>
    %508 = vector.extract_strided_slice %476 {offsets = [0, 7], sizes = [16, 64], strides = [1, 1]} : vector<16x88xf32> to vector<16x64xf32>
    %509 = vector.broadcast %507 : vector<1x64xf32> to vector<16x64xf32>
    %510 = arith.mulf %508, %509 : vector<16x64xf32>
    %511 = arith.addf %506, %510 : vector<16x64xf32>
    %c99 = arith.constant 99 : index
    %c0_126 = arith.constant 0 : index
    %512 = vector.load %arg2[%c99, %c0_126] : memref<115x64xf32, #tpu.memory_space<vmem>>, vector<1x64xf32>
    %513 = vector.extract_strided_slice %476 {offsets = [0, 8], sizes = [16, 64], strides = [1, 1]} : vector<16x88xf32> to vector<16x64xf32>
    %514 = vector.broadcast %512 : vector<1x64xf32> to vector<16x64xf32>
    %515 = arith.mulf %513, %514 : vector<16x64xf32>
    %516 = arith.addf %511, %515 : vector<16x64xf32>
    %c100 = arith.constant 100 : index
    %c0_127 = arith.constant 0 : index
    %517 = vector.load %arg2[%c100, %c0_127] : memref<115x64xf32, #tpu.memory_space<vmem>>, vector<1x64xf32>
    %518 = vector.extract_strided_slice %476 {offsets = [0, 9], sizes = [16, 64], strides = [1, 1]} : vector<16x88xf32> to vector<16x64xf32>
    %519 = vector.broadcast %517 : vector<1x64xf32> to vector<16x64xf32>
    %520 = arith.mulf %518, %519 : vector<16x64xf32>
    %521 = arith.addf %516, %520 : vector<16x64xf32>
    %c101 = arith.constant 101 : index
    %c0_128 = arith.constant 0 : index
    %522 = vector.load %arg2[%c101, %c0_128] : memref<115x64xf32, #tpu.memory_space<vmem>>, vector<1x64xf32>
    %523 = vector.extract_strided_slice %476 {offsets = [0, 10], sizes = [16, 64], strides = [1, 1]} : vector<16x88xf32> to vector<16x64xf32>
    %524 = vector.broadcast %522 : vector<1x64xf32> to vector<16x64xf32>
    %525 = arith.mulf %523, %524 : vector<16x64xf32>
    %526 = arith.addf %521, %525 : vector<16x64xf32>
    %c102 = arith.constant 102 : index
    %c0_129 = arith.constant 0 : index
    %527 = vector.load %arg2[%c102, %c0_129] : memref<115x64xf32, #tpu.memory_space<vmem>>, vector<1x64xf32>
    %528 = vector.extract_strided_slice %476 {offsets = [0, 11], sizes = [16, 64], strides = [1, 1]} : vector<16x88xf32> to vector<16x64xf32>
    %529 = vector.broadcast %527 : vector<1x64xf32> to vector<16x64xf32>
    %530 = arith.mulf %528, %529 : vector<16x64xf32>
    %531 = arith.addf %526, %530 : vector<16x64xf32>
    %c103 = arith.constant 103 : index
    %c0_130 = arith.constant 0 : index
    %532 = vector.load %arg2[%c103, %c0_130] : memref<115x64xf32, #tpu.memory_space<vmem>>, vector<1x64xf32>
    %533 = vector.extract_strided_slice %476 {offsets = [0, 12], sizes = [16, 64], strides = [1, 1]} : vector<16x88xf32> to vector<16x64xf32>
    %534 = vector.broadcast %532 : vector<1x64xf32> to vector<16x64xf32>
    %535 = arith.mulf %533, %534 : vector<16x64xf32>
    %536 = arith.addf %531, %535 : vector<16x64xf32>
    %c104 = arith.constant 104 : index
    %c0_131 = arith.constant 0 : index
    %537 = vector.load %arg2[%c104, %c0_131] : memref<115x64xf32, #tpu.memory_space<vmem>>, vector<1x64xf32>
    %538 = vector.extract_strided_slice %476 {offsets = [0, 13], sizes = [16, 64], strides = [1, 1]} : vector<16x88xf32> to vector<16x64xf32>
    %539 = vector.broadcast %537 : vector<1x64xf32> to vector<16x64xf32>
    %540 = arith.mulf %538, %539 : vector<16x64xf32>
    %541 = arith.addf %536, %540 : vector<16x64xf32>
    %c105 = arith.constant 105 : index
    %c0_132 = arith.constant 0 : index
    %542 = vector.load %arg2[%c105, %c0_132] : memref<115x64xf32, #tpu.memory_space<vmem>>, vector<1x64xf32>
    %543 = vector.extract_strided_slice %476 {offsets = [0, 14], sizes = [16, 64], strides = [1, 1]} : vector<16x88xf32> to vector<16x64xf32>
    %544 = vector.broadcast %542 : vector<1x64xf32> to vector<16x64xf32>
    %545 = arith.mulf %543, %544 : vector<16x64xf32>
    %546 = arith.addf %541, %545 : vector<16x64xf32>
    %c106 = arith.constant 106 : index
    %c0_133 = arith.constant 0 : index
    %547 = vector.load %arg2[%c106, %c0_133] : memref<115x64xf32, #tpu.memory_space<vmem>>, vector<1x64xf32>
    %548 = vector.extract_strided_slice %476 {offsets = [0, 15], sizes = [16, 64], strides = [1, 1]} : vector<16x88xf32> to vector<16x64xf32>
    %549 = vector.broadcast %547 : vector<1x64xf32> to vector<16x64xf32>
    %550 = arith.mulf %548, %549 : vector<16x64xf32>
    %551 = arith.addf %546, %550 : vector<16x64xf32>
    %c107 = arith.constant 107 : index
    %c0_134 = arith.constant 0 : index
    %552 = vector.load %arg2[%c107, %c0_134] : memref<115x64xf32, #tpu.memory_space<vmem>>, vector<1x64xf32>
    %553 = vector.extract_strided_slice %476 {offsets = [0, 16], sizes = [16, 64], strides = [1, 1]} : vector<16x88xf32> to vector<16x64xf32>
    %554 = vector.broadcast %552 : vector<1x64xf32> to vector<16x64xf32>
    %555 = arith.mulf %553, %554 : vector<16x64xf32>
    %556 = arith.addf %551, %555 : vector<16x64xf32>
    %c108 = arith.constant 108 : index
    %c0_135 = arith.constant 0 : index
    %557 = vector.load %arg2[%c108, %c0_135] : memref<115x64xf32, #tpu.memory_space<vmem>>, vector<1x64xf32>
    %558 = vector.extract_strided_slice %476 {offsets = [0, 17], sizes = [16, 64], strides = [1, 1]} : vector<16x88xf32> to vector<16x64xf32>
    %559 = vector.broadcast %557 : vector<1x64xf32> to vector<16x64xf32>
    %560 = arith.mulf %558, %559 : vector<16x64xf32>
    %561 = arith.addf %556, %560 : vector<16x64xf32>
    %c109 = arith.constant 109 : index
    %c0_136 = arith.constant 0 : index
    %562 = vector.load %arg2[%c109, %c0_136] : memref<115x64xf32, #tpu.memory_space<vmem>>, vector<1x64xf32>
    %563 = vector.extract_strided_slice %476 {offsets = [0, 18], sizes = [16, 64], strides = [1, 1]} : vector<16x88xf32> to vector<16x64xf32>
    %564 = vector.broadcast %562 : vector<1x64xf32> to vector<16x64xf32>
    %565 = arith.mulf %563, %564 : vector<16x64xf32>
    %566 = arith.addf %561, %565 : vector<16x64xf32>
    %c110 = arith.constant 110 : index
    %c0_137 = arith.constant 0 : index
    %567 = vector.load %arg2[%c110, %c0_137] : memref<115x64xf32, #tpu.memory_space<vmem>>, vector<1x64xf32>
    %568 = vector.extract_strided_slice %476 {offsets = [0, 19], sizes = [16, 64], strides = [1, 1]} : vector<16x88xf32> to vector<16x64xf32>
    %569 = vector.broadcast %567 : vector<1x64xf32> to vector<16x64xf32>
    %570 = arith.mulf %568, %569 : vector<16x64xf32>
    %571 = arith.addf %566, %570 : vector<16x64xf32>
    %c111 = arith.constant 111 : index
    %c0_138 = arith.constant 0 : index
    %572 = vector.load %arg2[%c111, %c0_138] : memref<115x64xf32, #tpu.memory_space<vmem>>, vector<1x64xf32>
    %573 = vector.extract_strided_slice %476 {offsets = [0, 20], sizes = [16, 64], strides = [1, 1]} : vector<16x88xf32> to vector<16x64xf32>
    %574 = vector.broadcast %572 : vector<1x64xf32> to vector<16x64xf32>
    %575 = arith.mulf %573, %574 : vector<16x64xf32>
    %576 = arith.addf %571, %575 : vector<16x64xf32>
    %c112 = arith.constant 112 : index
    %c0_139 = arith.constant 0 : index
    %577 = vector.load %arg2[%c112, %c0_139] : memref<115x64xf32, #tpu.memory_space<vmem>>, vector<1x64xf32>
    %578 = vector.extract_strided_slice %476 {offsets = [0, 21], sizes = [16, 64], strides = [1, 1]} : vector<16x88xf32> to vector<16x64xf32>
    %579 = vector.broadcast %577 : vector<1x64xf32> to vector<16x64xf32>
    %580 = arith.mulf %578, %579 : vector<16x64xf32>
    %581 = arith.addf %576, %580 : vector<16x64xf32>
    %c113 = arith.constant 113 : index
    %c0_140 = arith.constant 0 : index
    %582 = vector.load %arg2[%c113, %c0_140] : memref<115x64xf32, #tpu.memory_space<vmem>>, vector<1x64xf32>
    %583 = vector.extract_strided_slice %476 {offsets = [0, 22], sizes = [16, 64], strides = [1, 1]} : vector<16x88xf32> to vector<16x64xf32>
    %584 = vector.broadcast %582 : vector<1x64xf32> to vector<16x64xf32>
    %585 = arith.mulf %583, %584 : vector<16x64xf32>
    %586 = arith.addf %581, %585 : vector<16x64xf32>
    %c114 = arith.constant 114 : index
    %c0_141 = arith.constant 0 : index
    %587 = vector.load %arg2[%c114, %c0_141] : memref<115x64xf32, #tpu.memory_space<vmem>>, vector<1x64xf32>
    %588 = vector.extract_strided_slice %476 {offsets = [0, 23], sizes = [16, 64], strides = [1, 1]} : vector<16x88xf32> to vector<16x64xf32>
    %589 = vector.broadcast %587 : vector<1x64xf32> to vector<16x64xf32>
    %590 = arith.mulf %588, %589 : vector<16x64xf32>
    %591 = arith.addf %586, %590 : vector<16x64xf32>
    %cst_142 = arith.constant 0.000000e+00 : f32
    %592 = vector.broadcast %cst_142 : f32 to vector<16x64xf32>
    %593 = arith.maximumf %591, %592 : vector<16x64xf32>
    %cst_143 = arith.constant 0.000000e+00 : f32
    %594 = vector.broadcast %cst_143 : f32 to vector<2x88xf32>
    %c0_144 = arith.constant 0 : index
    %c0_145 = arith.constant 0 : index
    %595 = vector.load %arg6[%c0_144, %c0_145] : memref<20x88xf32, #tpu.memory_space<vmem>>, vector<2x88xf32>
    tpu.vector_store %arg6[%c0_144, %c0_145], %594 {strides = array<i32>} : memref<20x88xf32, #tpu.memory_space<vmem>>, vector<2x88xf32>,
    %cst_146 = arith.constant 0.000000e+00 : f32
    %596 = vector.broadcast %cst_146 : f32 to vector<2x88xf32>
    %c18_147 = arith.constant 18 : index
    %c0_148 = arith.constant 0 : index
    %597 = vector.load %arg6[%c18_147, %c0_148] : memref<20x88xf32, #tpu.memory_space<vmem>>, vector<2x88xf32>
    tpu.vector_store %arg6[%c18_147, %c0_148], %596 {strides = array<i32>} : memref<20x88xf32, #tpu.memory_space<vmem>>, vector<2x88xf32>,
    %cst_149 = arith.constant 0.000000e+00 : f32
    %598 = vector.broadcast %cst_149 : f32 to vector<20x12xf32>
    %c0_150 = arith.constant 0 : index
    %c0_151 = arith.constant 0 : index
    %599 = vector.load %arg6[%c0_150, %c0_151] : memref<20x88xf32, #tpu.memory_space<vmem>>, vector<20x12xf32>
    tpu.vector_store %arg6[%c0_150, %c0_151], %598 {strides = array<i32>} : memref<20x88xf32, #tpu.memory_space<vmem>>, vector<20x12xf32>,
    %cst_152 = arith.constant 0.000000e+00 : f32
    %600 = vector.broadcast %cst_152 : f32 to vector<20x12xf32>
    %c0_153 = arith.constant 0 : index
    %c76_154 = arith.constant 76 : index
    %601 = vector.load %arg6[%c0_153, %c76_154] : memref<20x88xf32, #tpu.memory_space<vmem>>, vector<20x12xf32>
    tpu.vector_store %arg6[%c0_153, %c76_154], %600 {strides = array<i32>} : memref<20x88xf32, #tpu.memory_space<vmem>>, vector<20x12xf32>,
    %c2_155 = arith.constant 2 : index
    %c12_156 = arith.constant 12 : index
    %602 = vector.load %arg6[%c2_155, %c12_156] : memref<20x88xf32, #tpu.memory_space<vmem>>, vector<16x64xf32>
    tpu.vector_store %arg6[%c2_155, %c12_156], %593 {strides = array<i32>} : memref<20x88xf32, #tpu.memory_space<vmem>>, vector<16x64xf32>,
    %cst_157 = arith.constant 0.000000e+00 : f32
    %603 = vector.broadcast %cst_157 : f32 to vector<16x64xf32>
    %c0_158 = arith.constant 0 : index
    %c0_159 = arith.constant 0 : index
    %604 = vector.load %arg6[%c0_158, %c0_159] : memref<20x88xf32, #tpu.memory_space<vmem>>, vector<16x88xf32>
    %c0_160 = arith.constant 0 : index
    %c0_161 = arith.constant 0 : index
    %605 = vector.load %arg3[%c0_160, %c0_161] : memref<115x64xf32, #tpu.memory_space<vmem>>, vector<1x64xf32>
    %606 = vector.extract_strided_slice %604 {offsets = [0, 1], sizes = [16, 64], strides = [1, 1]} : vector<16x88xf32> to vector<16x64xf32>
    %607 = vector.broadcast %605 : vector<1x64xf32> to vector<16x64xf32>
    %608 = arith.mulf %606, %607 : vector<16x64xf32>
    %609 = arith.addf %603, %608 : vector<16x64xf32>
    %c1_162 = arith.constant 1 : index
    %c0_163 = arith.constant 0 : index
    %610 = vector.load %arg3[%c1_162, %c0_163] : memref<115x64xf32, #tpu.memory_space<vmem>>, vector<1x64xf32>
    %611 = vector.extract_strided_slice %604 {offsets = [0, 2], sizes = [16, 64], strides = [1, 1]} : vector<16x88xf32> to vector<16x64xf32>
    %612 = vector.broadcast %610 : vector<1x64xf32> to vector<16x64xf32>
    %613 = arith.mulf %611, %612 : vector<16x64xf32>
    %614 = arith.addf %609, %613 : vector<16x64xf32>
    %c2_164 = arith.constant 2 : index
    %c0_165 = arith.constant 0 : index
    %615 = vector.load %arg3[%c2_164, %c0_165] : memref<115x64xf32, #tpu.memory_space<vmem>>, vector<1x64xf32>
    %616 = vector.extract_strided_slice %604 {offsets = [0, 3], sizes = [16, 64], strides = [1, 1]} : vector<16x88xf32> to vector<16x64xf32>
    %617 = vector.broadcast %615 : vector<1x64xf32> to vector<16x64xf32>
    %618 = arith.mulf %616, %617 : vector<16x64xf32>
    %619 = arith.addf %614, %618 : vector<16x64xf32>
    %c3_166 = arith.constant 3 : index
    %c0_167 = arith.constant 0 : index
    %620 = vector.load %arg3[%c3_166, %c0_167] : memref<115x64xf32, #tpu.memory_space<vmem>>, vector<1x64xf32>
    %621 = vector.extract_strided_slice %604 {offsets = [0, 4], sizes = [16, 64], strides = [1, 1]} : vector<16x88xf32> to vector<16x64xf32>
    %622 = vector.broadcast %620 : vector<1x64xf32> to vector<16x64xf32>
    %623 = arith.mulf %621, %622 : vector<16x64xf32>
    %624 = arith.addf %619, %623 : vector<16x64xf32>
    %c4_168 = arith.constant 4 : index
    %c0_169 = arith.constant 0 : index
    %625 = vector.load %arg3[%c4_168, %c0_169] : memref<115x64xf32, #tpu.memory_space<vmem>>, vector<1x64xf32>
    %626 = vector.extract_strided_slice %604 {offsets = [0, 5], sizes = [16, 64], strides = [1, 1]} : vector<16x88xf32> to vector<16x64xf32>
    %627 = vector.broadcast %625 : vector<1x64xf32> to vector<16x64xf32>
    %628 = arith.mulf %626, %627 : vector<16x64xf32>
    %629 = arith.addf %624, %628 : vector<16x64xf32>
    %c5_170 = arith.constant 5 : index
    %c0_171 = arith.constant 0 : index
    %630 = vector.load %arg3[%c5_170, %c0_171] : memref<115x64xf32, #tpu.memory_space<vmem>>, vector<1x64xf32>
    %631 = vector.extract_strided_slice %604 {offsets = [0, 6], sizes = [16, 64], strides = [1, 1]} : vector<16x88xf32> to vector<16x64xf32>
    %632 = vector.broadcast %630 : vector<1x64xf32> to vector<16x64xf32>
    %633 = arith.mulf %631, %632 : vector<16x64xf32>
    %634 = arith.addf %629, %633 : vector<16x64xf32>
    %c6_172 = arith.constant 6 : index
    %c0_173 = arith.constant 0 : index
    %635 = vector.load %arg3[%c6_172, %c0_173] : memref<115x64xf32, #tpu.memory_space<vmem>>, vector<1x64xf32>
    %636 = vector.extract_strided_slice %604 {offsets = [0, 7], sizes = [16, 64], strides = [1, 1]} : vector<16x88xf32> to vector<16x64xf32>
    %637 = vector.broadcast %635 : vector<1x64xf32> to vector<16x64xf32>
    %638 = arith.mulf %636, %637 : vector<16x64xf32>
    %639 = arith.addf %634, %638 : vector<16x64xf32>
    %c7_174 = arith.constant 7 : index
    %c0_175 = arith.constant 0 : index
    %640 = vector.load %arg3[%c7_174, %c0_175] : memref<115x64xf32, #tpu.memory_space<vmem>>, vector<1x64xf32>
    %641 = vector.extract_strided_slice %604 {offsets = [0, 8], sizes = [16, 64], strides = [1, 1]} : vector<16x88xf32> to vector<16x64xf32>
    %642 = vector.broadcast %640 : vector<1x64xf32> to vector<16x64xf32>
    %643 = arith.mulf %641, %642 : vector<16x64xf32>
    %644 = arith.addf %639, %643 : vector<16x64xf32>
    %c8_176 = arith.constant 8 : index
    %c0_177 = arith.constant 0 : index
    %645 = vector.load %arg3[%c8_176, %c0_177] : memref<115x64xf32, #tpu.memory_space<vmem>>, vector<1x64xf32>
    %646 = vector.extract_strided_slice %604 {offsets = [0, 9], sizes = [16, 64], strides = [1, 1]} : vector<16x88xf32> to vector<16x64xf32>
    %647 = vector.broadcast %645 : vector<1x64xf32> to vector<16x64xf32>
    %648 = arith.mulf %646, %647 : vector<16x64xf32>
    %649 = arith.addf %644, %648 : vector<16x64xf32>
    %c9_178 = arith.constant 9 : index
    %c0_179 = arith.constant 0 : index
    %650 = vector.load %arg3[%c9_178, %c0_179] : memref<115x64xf32, #tpu.memory_space<vmem>>, vector<1x64xf32>
    %651 = vector.extract_strided_slice %604 {offsets = [0, 10], sizes = [16, 64], strides = [1, 1]} : vector<16x88xf32> to vector<16x64xf32>
    %652 = vector.broadcast %650 : vector<1x64xf32> to vector<16x64xf32>
    %653 = arith.mulf %651, %652 : vector<16x64xf32>
    %654 = arith.addf %649, %653 : vector<16x64xf32>
    %c10_180 = arith.constant 10 : index
    %c0_181 = arith.constant 0 : index
    %655 = vector.load %arg3[%c10_180, %c0_181] : memref<115x64xf32, #tpu.memory_space<vmem>>, vector<1x64xf32>
    %656 = vector.extract_strided_slice %604 {offsets = [0, 11], sizes = [16, 64], strides = [1, 1]} : vector<16x88xf32> to vector<16x64xf32>
    %657 = vector.broadcast %655 : vector<1x64xf32> to vector<16x64xf32>
    %658 = arith.mulf %656, %657 : vector<16x64xf32>
    %659 = arith.addf %654, %658 : vector<16x64xf32>
    %c11_182 = arith.constant 11 : index
    %c0_183 = arith.constant 0 : index
    %660 = vector.load %arg3[%c11_182, %c0_183] : memref<115x64xf32, #tpu.memory_space<vmem>>, vector<1x64xf32>
    %661 = vector.extract_strided_slice %604 {offsets = [0, 12], sizes = [16, 64], strides = [1, 1]} : vector<16x88xf32> to vector<16x64xf32>
    %662 = vector.broadcast %660 : vector<1x64xf32> to vector<16x64xf32>
    %663 = arith.mulf %661, %662 : vector<16x64xf32>
    %664 = arith.addf %659, %663 : vector<16x64xf32>
    %c12_184 = arith.constant 12 : index
    %c0_185 = arith.constant 0 : index
    %665 = vector.load %arg3[%c12_184, %c0_185] : memref<115x64xf32, #tpu.memory_space<vmem>>, vector<1x64xf32>
    %666 = vector.extract_strided_slice %604 {offsets = [0, 13], sizes = [16, 64], strides = [1, 1]} : vector<16x88xf32> to vector<16x64xf32>
    %667 = vector.broadcast %665 : vector<1x64xf32> to vector<16x64xf32>
    %668 = arith.mulf %666, %667 : vector<16x64xf32>
    %669 = arith.addf %664, %668 : vector<16x64xf32>
    %c13_186 = arith.constant 13 : index
    %c0_187 = arith.constant 0 : index
    %670 = vector.load %arg3[%c13_186, %c0_187] : memref<115x64xf32, #tpu.memory_space<vmem>>, vector<1x64xf32>
    %671 = vector.extract_strided_slice %604 {offsets = [0, 14], sizes = [16, 64], strides = [1, 1]} : vector<16x88xf32> to vector<16x64xf32>
    %672 = vector.broadcast %670 : vector<1x64xf32> to vector<16x64xf32>
    %673 = arith.mulf %671, %672 : vector<16x64xf32>
    %674 = arith.addf %669, %673 : vector<16x64xf32>
    %c14_188 = arith.constant 14 : index
    %c0_189 = arith.constant 0 : index
    %675 = vector.load %arg3[%c14_188, %c0_189] : memref<115x64xf32, #tpu.memory_space<vmem>>, vector<1x64xf32>
    %676 = vector.extract_strided_slice %604 {offsets = [0, 15], sizes = [16, 64], strides = [1, 1]} : vector<16x88xf32> to vector<16x64xf32>
    %677 = vector.broadcast %675 : vector<1x64xf32> to vector<16x64xf32>
    %678 = arith.mulf %676, %677 : vector<16x64xf32>
    %679 = arith.addf %674, %678 : vector<16x64xf32>
    %c15_190 = arith.constant 15 : index
    %c0_191 = arith.constant 0 : index
    %680 = vector.load %arg3[%c15_190, %c0_191] : memref<115x64xf32, #tpu.memory_space<vmem>>, vector<1x64xf32>
    %681 = vector.extract_strided_slice %604 {offsets = [0, 16], sizes = [16, 64], strides = [1, 1]} : vector<16x88xf32> to vector<16x64xf32>
    %682 = vector.broadcast %680 : vector<1x64xf32> to vector<16x64xf32>
    %683 = arith.mulf %681, %682 : vector<16x64xf32>
    %684 = arith.addf %679, %683 : vector<16x64xf32>
    %c16_192 = arith.constant 16 : index
    %c0_193 = arith.constant 0 : index
    %685 = vector.load %arg3[%c16_192, %c0_193] : memref<115x64xf32, #tpu.memory_space<vmem>>, vector<1x64xf32>
    %686 = vector.extract_strided_slice %604 {offsets = [0, 17], sizes = [16, 64], strides = [1, 1]} : vector<16x88xf32> to vector<16x64xf32>
    %687 = vector.broadcast %685 : vector<1x64xf32> to vector<16x64xf32>
    %688 = arith.mulf %686, %687 : vector<16x64xf32>
    %689 = arith.addf %684, %688 : vector<16x64xf32>
    %c17_194 = arith.constant 17 : index
    %c0_195 = arith.constant 0 : index
    %690 = vector.load %arg3[%c17_194, %c0_195] : memref<115x64xf32, #tpu.memory_space<vmem>>, vector<1x64xf32>
    %691 = vector.extract_strided_slice %604 {offsets = [0, 18], sizes = [16, 64], strides = [1, 1]} : vector<16x88xf32> to vector<16x64xf32>
    %692 = vector.broadcast %690 : vector<1x64xf32> to vector<16x64xf32>
    %693 = arith.mulf %691, %692 : vector<16x64xf32>
    %694 = arith.addf %689, %693 : vector<16x64xf32>
    %c18_196 = arith.constant 18 : index
    %c0_197 = arith.constant 0 : index
    %695 = vector.load %arg3[%c18_196, %c0_197] : memref<115x64xf32, #tpu.memory_space<vmem>>, vector<1x64xf32>
    %696 = vector.extract_strided_slice %604 {offsets = [0, 19], sizes = [16, 64], strides = [1, 1]} : vector<16x88xf32> to vector<16x64xf32>
    %697 = vector.broadcast %695 : vector<1x64xf32> to vector<16x64xf32>
    %698 = arith.mulf %696, %697 : vector<16x64xf32>
    %699 = arith.addf %694, %698 : vector<16x64xf32>
    %c19_198 = arith.constant 19 : index
    %c0_199 = arith.constant 0 : index
    %700 = vector.load %arg3[%c19_198, %c0_199] : memref<115x64xf32, #tpu.memory_space<vmem>>, vector<1x64xf32>
    %701 = vector.extract_strided_slice %604 {offsets = [0, 20], sizes = [16, 64], strides = [1, 1]} : vector<16x88xf32> to vector<16x64xf32>
    %702 = vector.broadcast %700 : vector<1x64xf32> to vector<16x64xf32>
    %703 = arith.mulf %701, %702 : vector<16x64xf32>
    %704 = arith.addf %699, %703 : vector<16x64xf32>
    %c20_200 = arith.constant 20 : index
    %c0_201 = arith.constant 0 : index
    %705 = vector.load %arg3[%c20_200, %c0_201] : memref<115x64xf32, #tpu.memory_space<vmem>>, vector<1x64xf32>
    %706 = vector.extract_strided_slice %604 {offsets = [0, 21], sizes = [16, 64], strides = [1, 1]} : vector<16x88xf32> to vector<16x64xf32>
    %707 = vector.broadcast %705 : vector<1x64xf32> to vector<16x64xf32>
    %708 = arith.mulf %706, %707 : vector<16x64xf32>
    %709 = arith.addf %704, %708 : vector<16x64xf32>
    %c21_202 = arith.constant 21 : index
    %c0_203 = arith.constant 0 : index
    %710 = vector.load %arg3[%c21_202, %c0_203] : memref<115x64xf32, #tpu.memory_space<vmem>>, vector<1x64xf32>
    %711 = vector.extract_strided_slice %604 {offsets = [0, 22], sizes = [16, 64], strides = [1, 1]} : vector<16x88xf32> to vector<16x64xf32>
    %712 = vector.broadcast %710 : vector<1x64xf32> to vector<16x64xf32>
    %713 = arith.mulf %711, %712 : vector<16x64xf32>
    %714 = arith.addf %709, %713 : vector<16x64xf32>
    %c22_204 = arith.constant 22 : index
    %c0_205 = arith.constant 0 : index
    %715 = vector.load %arg3[%c22_204, %c0_205] : memref<115x64xf32, #tpu.memory_space<vmem>>, vector<1x64xf32>
    %716 = vector.extract_strided_slice %604 {offsets = [0, 23], sizes = [16, 64], strides = [1, 1]} : vector<16x88xf32> to vector<16x64xf32>
    %717 = vector.broadcast %715 : vector<1x64xf32> to vector<16x64xf32>
    %718 = arith.mulf %716, %717 : vector<16x64xf32>
    %719 = arith.addf %714, %718 : vector<16x64xf32>
    %c1_206 = arith.constant 1 : index
    %c0_207 = arith.constant 0 : index
    %720 = vector.load %arg6[%c1_206, %c0_207] : memref<20x88xf32, #tpu.memory_space<vmem>>, vector<16x88xf32>
    %c23_208 = arith.constant 23 : index
    %c0_209 = arith.constant 0 : index
    %721 = vector.load %arg3[%c23_208, %c0_209] : memref<115x64xf32, #tpu.memory_space<vmem>>, vector<1x64xf32>
    %722 = vector.extract_strided_slice %720 {offsets = [0, 1], sizes = [16, 64], strides = [1, 1]} : vector<16x88xf32> to vector<16x64xf32>
    %723 = vector.broadcast %721 : vector<1x64xf32> to vector<16x64xf32>
    %724 = arith.mulf %722, %723 : vector<16x64xf32>
    %725 = arith.addf %719, %724 : vector<16x64xf32>
    %c24_210 = arith.constant 24 : index
    %c0_211 = arith.constant 0 : index
    %726 = vector.load %arg3[%c24_210, %c0_211] : memref<115x64xf32, #tpu.memory_space<vmem>>, vector<1x64xf32>
    %727 = vector.extract_strided_slice %720 {offsets = [0, 2], sizes = [16, 64], strides = [1, 1]} : vector<16x88xf32> to vector<16x64xf32>
    %728 = vector.broadcast %726 : vector<1x64xf32> to vector<16x64xf32>
    %729 = arith.mulf %727, %728 : vector<16x64xf32>
    %730 = arith.addf %725, %729 : vector<16x64xf32>
    %c25_212 = arith.constant 25 : index
    %c0_213 = arith.constant 0 : index
    %731 = vector.load %arg3[%c25_212, %c0_213] : memref<115x64xf32, #tpu.memory_space<vmem>>, vector<1x64xf32>
    %732 = vector.extract_strided_slice %720 {offsets = [0, 3], sizes = [16, 64], strides = [1, 1]} : vector<16x88xf32> to vector<16x64xf32>
    %733 = vector.broadcast %731 : vector<1x64xf32> to vector<16x64xf32>
    %734 = arith.mulf %732, %733 : vector<16x64xf32>
    %735 = arith.addf %730, %734 : vector<16x64xf32>
    %c26_214 = arith.constant 26 : index
    %c0_215 = arith.constant 0 : index
    %736 = vector.load %arg3[%c26_214, %c0_215] : memref<115x64xf32, #tpu.memory_space<vmem>>, vector<1x64xf32>
    %737 = vector.extract_strided_slice %720 {offsets = [0, 4], sizes = [16, 64], strides = [1, 1]} : vector<16x88xf32> to vector<16x64xf32>
    %738 = vector.broadcast %736 : vector<1x64xf32> to vector<16x64xf32>
    %739 = arith.mulf %737, %738 : vector<16x64xf32>
    %740 = arith.addf %735, %739 : vector<16x64xf32>
    %c27_216 = arith.constant 27 : index
    %c0_217 = arith.constant 0 : index
    %741 = vector.load %arg3[%c27_216, %c0_217] : memref<115x64xf32, #tpu.memory_space<vmem>>, vector<1x64xf32>
    %742 = vector.extract_strided_slice %720 {offsets = [0, 5], sizes = [16, 64], strides = [1, 1]} : vector<16x88xf32> to vector<16x64xf32>
    %743 = vector.broadcast %741 : vector<1x64xf32> to vector<16x64xf32>
    %744 = arith.mulf %742, %743 : vector<16x64xf32>
    %745 = arith.addf %740, %744 : vector<16x64xf32>
    %c28_218 = arith.constant 28 : index
    %c0_219 = arith.constant 0 : index
    %746 = vector.load %arg3[%c28_218, %c0_219] : memref<115x64xf32, #tpu.memory_space<vmem>>, vector<1x64xf32>
    %747 = vector.extract_strided_slice %720 {offsets = [0, 6], sizes = [16, 64], strides = [1, 1]} : vector<16x88xf32> to vector<16x64xf32>
    %748 = vector.broadcast %746 : vector<1x64xf32> to vector<16x64xf32>
    %749 = arith.mulf %747, %748 : vector<16x64xf32>
    %750 = arith.addf %745, %749 : vector<16x64xf32>
    %c29_220 = arith.constant 29 : index
    %c0_221 = arith.constant 0 : index
    %751 = vector.load %arg3[%c29_220, %c0_221] : memref<115x64xf32, #tpu.memory_space<vmem>>, vector<1x64xf32>
    %752 = vector.extract_strided_slice %720 {offsets = [0, 7], sizes = [16, 64], strides = [1, 1]} : vector<16x88xf32> to vector<16x64xf32>
    %753 = vector.broadcast %751 : vector<1x64xf32> to vector<16x64xf32>
    %754 = arith.mulf %752, %753 : vector<16x64xf32>
    %755 = arith.addf %750, %754 : vector<16x64xf32>
    %c30_222 = arith.constant 30 : index
    %c0_223 = arith.constant 0 : index
    %756 = vector.load %arg3[%c30_222, %c0_223] : memref<115x64xf32, #tpu.memory_space<vmem>>, vector<1x64xf32>
    %757 = vector.extract_strided_slice %720 {offsets = [0, 8], sizes = [16, 64], strides = [1, 1]} : vector<16x88xf32> to vector<16x64xf32>
    %758 = vector.broadcast %756 : vector<1x64xf32> to vector<16x64xf32>
    %759 = arith.mulf %757, %758 : vector<16x64xf32>
    %760 = arith.addf %755, %759 : vector<16x64xf32>
    %c31_224 = arith.constant 31 : index
    %c0_225 = arith.constant 0 : index
    %761 = vector.load %arg3[%c31_224, %c0_225] : memref<115x64xf32, #tpu.memory_space<vmem>>, vector<1x64xf32>
    %762 = vector.extract_strided_slice %720 {offsets = [0, 9], sizes = [16, 64], strides = [1, 1]} : vector<16x88xf32> to vector<16x64xf32>
    %763 = vector.broadcast %761 : vector<1x64xf32> to vector<16x64xf32>
    %764 = arith.mulf %762, %763 : vector<16x64xf32>
    %765 = arith.addf %760, %764 : vector<16x64xf32>
    %c32_226 = arith.constant 32 : index
    %c0_227 = arith.constant 0 : index
    %766 = vector.load %arg3[%c32_226, %c0_227] : memref<115x64xf32, #tpu.memory_space<vmem>>, vector<1x64xf32>
    %767 = vector.extract_strided_slice %720 {offsets = [0, 10], sizes = [16, 64], strides = [1, 1]} : vector<16x88xf32> to vector<16x64xf32>
    %768 = vector.broadcast %766 : vector<1x64xf32> to vector<16x64xf32>
    %769 = arith.mulf %767, %768 : vector<16x64xf32>
    %770 = arith.addf %765, %769 : vector<16x64xf32>
    %c33_228 = arith.constant 33 : index
    %c0_229 = arith.constant 0 : index
    %771 = vector.load %arg3[%c33_228, %c0_229] : memref<115x64xf32, #tpu.memory_space<vmem>>, vector<1x64xf32>
    %772 = vector.extract_strided_slice %720 {offsets = [0, 11], sizes = [16, 64], strides = [1, 1]} : vector<16x88xf32> to vector<16x64xf32>
    %773 = vector.broadcast %771 : vector<1x64xf32> to vector<16x64xf32>
    %774 = arith.mulf %772, %773 : vector<16x64xf32>
    %775 = arith.addf %770, %774 : vector<16x64xf32>
    %c34_230 = arith.constant 34 : index
    %c0_231 = arith.constant 0 : index
    %776 = vector.load %arg3[%c34_230, %c0_231] : memref<115x64xf32, #tpu.memory_space<vmem>>, vector<1x64xf32>
    %777 = vector.extract_strided_slice %720 {offsets = [0, 12], sizes = [16, 64], strides = [1, 1]} : vector<16x88xf32> to vector<16x64xf32>
    %778 = vector.broadcast %776 : vector<1x64xf32> to vector<16x64xf32>
    %779 = arith.mulf %777, %778 : vector<16x64xf32>
    %780 = arith.addf %775, %779 : vector<16x64xf32>
    %c35_232 = arith.constant 35 : index
    %c0_233 = arith.constant 0 : index
    %781 = vector.load %arg3[%c35_232, %c0_233] : memref<115x64xf32, #tpu.memory_space<vmem>>, vector<1x64xf32>
    %782 = vector.extract_strided_slice %720 {offsets = [0, 13], sizes = [16, 64], strides = [1, 1]} : vector<16x88xf32> to vector<16x64xf32>
    %783 = vector.broadcast %781 : vector<1x64xf32> to vector<16x64xf32>
    %784 = arith.mulf %782, %783 : vector<16x64xf32>
    %785 = arith.addf %780, %784 : vector<16x64xf32>
    %c36_234 = arith.constant 36 : index
    %c0_235 = arith.constant 0 : index
    %786 = vector.load %arg3[%c36_234, %c0_235] : memref<115x64xf32, #tpu.memory_space<vmem>>, vector<1x64xf32>
    %787 = vector.extract_strided_slice %720 {offsets = [0, 14], sizes = [16, 64], strides = [1, 1]} : vector<16x88xf32> to vector<16x64xf32>
    %788 = vector.broadcast %786 : vector<1x64xf32> to vector<16x64xf32>
    %789 = arith.mulf %787, %788 : vector<16x64xf32>
    %790 = arith.addf %785, %789 : vector<16x64xf32>
    %c37_236 = arith.constant 37 : index
    %c0_237 = arith.constant 0 : index
    %791 = vector.load %arg3[%c37_236, %c0_237] : memref<115x64xf32, #tpu.memory_space<vmem>>, vector<1x64xf32>
    %792 = vector.extract_strided_slice %720 {offsets = [0, 15], sizes = [16, 64], strides = [1, 1]} : vector<16x88xf32> to vector<16x64xf32>
    %793 = vector.broadcast %791 : vector<1x64xf32> to vector<16x64xf32>
    %794 = arith.mulf %792, %793 : vector<16x64xf32>
    %795 = arith.addf %790, %794 : vector<16x64xf32>
    %c38_238 = arith.constant 38 : index
    %c0_239 = arith.constant 0 : index
    %796 = vector.load %arg3[%c38_238, %c0_239] : memref<115x64xf32, #tpu.memory_space<vmem>>, vector<1x64xf32>
    %797 = vector.extract_strided_slice %720 {offsets = [0, 16], sizes = [16, 64], strides = [1, 1]} : vector<16x88xf32> to vector<16x64xf32>
    %798 = vector.broadcast %796 : vector<1x64xf32> to vector<16x64xf32>
    %799 = arith.mulf %797, %798 : vector<16x64xf32>
    %800 = arith.addf %795, %799 : vector<16x64xf32>
    %c39_240 = arith.constant 39 : index
    %c0_241 = arith.constant 0 : index
    %801 = vector.load %arg3[%c39_240, %c0_241] : memref<115x64xf32, #tpu.memory_space<vmem>>, vector<1x64xf32>
    %802 = vector.extract_strided_slice %720 {offsets = [0, 17], sizes = [16, 64], strides = [1, 1]} : vector<16x88xf32> to vector<16x64xf32>
    %803 = vector.broadcast %801 : vector<1x64xf32> to vector<16x64xf32>
    %804 = arith.mulf %802, %803 : vector<16x64xf32>
    %805 = arith.addf %800, %804 : vector<16x64xf32>
    %c40_242 = arith.constant 40 : index
    %c0_243 = arith.constant 0 : index
    %806 = vector.load %arg3[%c40_242, %c0_243] : memref<115x64xf32, #tpu.memory_space<vmem>>, vector<1x64xf32>
    %807 = vector.extract_strided_slice %720 {offsets = [0, 18], sizes = [16, 64], strides = [1, 1]} : vector<16x88xf32> to vector<16x64xf32>
    %808 = vector.broadcast %806 : vector<1x64xf32> to vector<16x64xf32>
    %809 = arith.mulf %807, %808 : vector<16x64xf32>
    %810 = arith.addf %805, %809 : vector<16x64xf32>
    %c41_244 = arith.constant 41 : index
    %c0_245 = arith.constant 0 : index
    %811 = vector.load %arg3[%c41_244, %c0_245] : memref<115x64xf32, #tpu.memory_space<vmem>>, vector<1x64xf32>
    %812 = vector.extract_strided_slice %720 {offsets = [0, 19], sizes = [16, 64], strides = [1, 1]} : vector<16x88xf32> to vector<16x64xf32>
    %813 = vector.broadcast %811 : vector<1x64xf32> to vector<16x64xf32>
    %814 = arith.mulf %812, %813 : vector<16x64xf32>
    %815 = arith.addf %810, %814 : vector<16x64xf32>
    %c42_246 = arith.constant 42 : index
    %c0_247 = arith.constant 0 : index
    %816 = vector.load %arg3[%c42_246, %c0_247] : memref<115x64xf32, #tpu.memory_space<vmem>>, vector<1x64xf32>
    %817 = vector.extract_strided_slice %720 {offsets = [0, 20], sizes = [16, 64], strides = [1, 1]} : vector<16x88xf32> to vector<16x64xf32>
    %818 = vector.broadcast %816 : vector<1x64xf32> to vector<16x64xf32>
    %819 = arith.mulf %817, %818 : vector<16x64xf32>
    %820 = arith.addf %815, %819 : vector<16x64xf32>
    %c43_248 = arith.constant 43 : index
    %c0_249 = arith.constant 0 : index
    %821 = vector.load %arg3[%c43_248, %c0_249] : memref<115x64xf32, #tpu.memory_space<vmem>>, vector<1x64xf32>
    %822 = vector.extract_strided_slice %720 {offsets = [0, 21], sizes = [16, 64], strides = [1, 1]} : vector<16x88xf32> to vector<16x64xf32>
    %823 = vector.broadcast %821 : vector<1x64xf32> to vector<16x64xf32>
    %824 = arith.mulf %822, %823 : vector<16x64xf32>
    %825 = arith.addf %820, %824 : vector<16x64xf32>
    %c44_250 = arith.constant 44 : index
    %c0_251 = arith.constant 0 : index
    %826 = vector.load %arg3[%c44_250, %c0_251] : memref<115x64xf32, #tpu.memory_space<vmem>>, vector<1x64xf32>
    %827 = vector.extract_strided_slice %720 {offsets = [0, 22], sizes = [16, 64], strides = [1, 1]} : vector<16x88xf32> to vector<16x64xf32>
    %828 = vector.broadcast %826 : vector<1x64xf32> to vector<16x64xf32>
    %829 = arith.mulf %827, %828 : vector<16x64xf32>
    %830 = arith.addf %825, %829 : vector<16x64xf32>
    %c45_252 = arith.constant 45 : index
    %c0_253 = arith.constant 0 : index
    %831 = vector.load %arg3[%c45_252, %c0_253] : memref<115x64xf32, #tpu.memory_space<vmem>>, vector<1x64xf32>
    %832 = vector.extract_strided_slice %720 {offsets = [0, 23], sizes = [16, 64], strides = [1, 1]} : vector<16x88xf32> to vector<16x64xf32>
    %833 = vector.broadcast %831 : vector<1x64xf32> to vector<16x64xf32>
    %834 = arith.mulf %832, %833 : vector<16x64xf32>
    %835 = arith.addf %830, %834 : vector<16x64xf32>
    %c2_254 = arith.constant 2 : index
    %c0_255 = arith.constant 0 : index
    %836 = vector.load %arg6[%c2_254, %c0_255] : memref<20x88xf32, #tpu.memory_space<vmem>>, vector<16x88xf32>
    %c46_256 = arith.constant 46 : index
    %c0_257 = arith.constant 0 : index
    %837 = vector.load %arg3[%c46_256, %c0_257] : memref<115x64xf32, #tpu.memory_space<vmem>>, vector<1x64xf32>
    %838 = vector.extract_strided_slice %836 {offsets = [0, 1], sizes = [16, 64], strides = [1, 1]} : vector<16x88xf32> to vector<16x64xf32>
    %839 = vector.broadcast %837 : vector<1x64xf32> to vector<16x64xf32>
    %840 = arith.mulf %838, %839 : vector<16x64xf32>
    %841 = arith.addf %835, %840 : vector<16x64xf32>
    %c47_258 = arith.constant 47 : index
    %c0_259 = arith.constant 0 : index
    %842 = vector.load %arg3[%c47_258, %c0_259] : memref<115x64xf32, #tpu.memory_space<vmem>>, vector<1x64xf32>
    %843 = vector.extract_strided_slice %836 {offsets = [0, 2], sizes = [16, 64], strides = [1, 1]} : vector<16x88xf32> to vector<16x64xf32>
    %844 = vector.broadcast %842 : vector<1x64xf32> to vector<16x64xf32>
    %845 = arith.mulf %843, %844 : vector<16x64xf32>
    %846 = arith.addf %841, %845 : vector<16x64xf32>
    %c48_260 = arith.constant 48 : index
    %c0_261 = arith.constant 0 : index
    %847 = vector.load %arg3[%c48_260, %c0_261] : memref<115x64xf32, #tpu.memory_space<vmem>>, vector<1x64xf32>
    %848 = vector.extract_strided_slice %836 {offsets = [0, 3], sizes = [16, 64], strides = [1, 1]} : vector<16x88xf32> to vector<16x64xf32>
    %849 = vector.broadcast %847 : vector<1x64xf32> to vector<16x64xf32>
    %850 = arith.mulf %848, %849 : vector<16x64xf32>
    %851 = arith.addf %846, %850 : vector<16x64xf32>
    %c49_262 = arith.constant 49 : index
    %c0_263 = arith.constant 0 : index
    %852 = vector.load %arg3[%c49_262, %c0_263] : memref<115x64xf32, #tpu.memory_space<vmem>>, vector<1x64xf32>
    %853 = vector.extract_strided_slice %836 {offsets = [0, 4], sizes = [16, 64], strides = [1, 1]} : vector<16x88xf32> to vector<16x64xf32>
    %854 = vector.broadcast %852 : vector<1x64xf32> to vector<16x64xf32>
    %855 = arith.mulf %853, %854 : vector<16x64xf32>
    %856 = arith.addf %851, %855 : vector<16x64xf32>
    %c50_264 = arith.constant 50 : index
    %c0_265 = arith.constant 0 : index
    %857 = vector.load %arg3[%c50_264, %c0_265] : memref<115x64xf32, #tpu.memory_space<vmem>>, vector<1x64xf32>
    %858 = vector.extract_strided_slice %836 {offsets = [0, 5], sizes = [16, 64], strides = [1, 1]} : vector<16x88xf32> to vector<16x64xf32>
    %859 = vector.broadcast %857 : vector<1x64xf32> to vector<16x64xf32>
    %860 = arith.mulf %858, %859 : vector<16x64xf32>
    %861 = arith.addf %856, %860 : vector<16x64xf32>
    %c51_266 = arith.constant 51 : index
    %c0_267 = arith.constant 0 : index
    %862 = vector.load %arg3[%c51_266, %c0_267] : memref<115x64xf32, #tpu.memory_space<vmem>>, vector<1x64xf32>
    %863 = vector.extract_strided_slice %836 {offsets = [0, 6], sizes = [16, 64], strides = [1, 1]} : vector<16x88xf32> to vector<16x64xf32>
    %864 = vector.broadcast %862 : vector<1x64xf32> to vector<16x64xf32>
    %865 = arith.mulf %863, %864 : vector<16x64xf32>
    %866 = arith.addf %861, %865 : vector<16x64xf32>
    %c52_268 = arith.constant 52 : index
    %c0_269 = arith.constant 0 : index
    %867 = vector.load %arg3[%c52_268, %c0_269] : memref<115x64xf32, #tpu.memory_space<vmem>>, vector<1x64xf32>
    %868 = vector.extract_strided_slice %836 {offsets = [0, 7], sizes = [16, 64], strides = [1, 1]} : vector<16x88xf32> to vector<16x64xf32>
    %869 = vector.broadcast %867 : vector<1x64xf32> to vector<16x64xf32>
    %870 = arith.mulf %868, %869 : vector<16x64xf32>
    %871 = arith.addf %866, %870 : vector<16x64xf32>
    %c53_270 = arith.constant 53 : index
    %c0_271 = arith.constant 0 : index
    %872 = vector.load %arg3[%c53_270, %c0_271] : memref<115x64xf32, #tpu.memory_space<vmem>>, vector<1x64xf32>
    %873 = vector.extract_strided_slice %836 {offsets = [0, 8], sizes = [16, 64], strides = [1, 1]} : vector<16x88xf32> to vector<16x64xf32>
    %874 = vector.broadcast %872 : vector<1x64xf32> to vector<16x64xf32>
    %875 = arith.mulf %873, %874 : vector<16x64xf32>
    %876 = arith.addf %871, %875 : vector<16x64xf32>
    %c54_272 = arith.constant 54 : index
    %c0_273 = arith.constant 0 : index
    %877 = vector.load %arg3[%c54_272, %c0_273] : memref<115x64xf32, #tpu.memory_space<vmem>>, vector<1x64xf32>
    %878 = vector.extract_strided_slice %836 {offsets = [0, 9], sizes = [16, 64], strides = [1, 1]} : vector<16x88xf32> to vector<16x64xf32>
    %879 = vector.broadcast %877 : vector<1x64xf32> to vector<16x64xf32>
    %880 = arith.mulf %878, %879 : vector<16x64xf32>
    %881 = arith.addf %876, %880 : vector<16x64xf32>
    %c55_274 = arith.constant 55 : index
    %c0_275 = arith.constant 0 : index
    %882 = vector.load %arg3[%c55_274, %c0_275] : memref<115x64xf32, #tpu.memory_space<vmem>>, vector<1x64xf32>
    %883 = vector.extract_strided_slice %836 {offsets = [0, 10], sizes = [16, 64], strides = [1, 1]} : vector<16x88xf32> to vector<16x64xf32>
    %884 = vector.broadcast %882 : vector<1x64xf32> to vector<16x64xf32>
    %885 = arith.mulf %883, %884 : vector<16x64xf32>
    %886 = arith.addf %881, %885 : vector<16x64xf32>
    %c56_276 = arith.constant 56 : index
    %c0_277 = arith.constant 0 : index
    %887 = vector.load %arg3[%c56_276, %c0_277] : memref<115x64xf32, #tpu.memory_space<vmem>>, vector<1x64xf32>
    %888 = vector.extract_strided_slice %836 {offsets = [0, 11], sizes = [16, 64], strides = [1, 1]} : vector<16x88xf32> to vector<16x64xf32>
    %889 = vector.broadcast %887 : vector<1x64xf32> to vector<16x64xf32>
    %890 = arith.mulf %888, %889 : vector<16x64xf32>
    %891 = arith.addf %886, %890 : vector<16x64xf32>
    %c57_278 = arith.constant 57 : index
    %c0_279 = arith.constant 0 : index
    %892 = vector.load %arg3[%c57_278, %c0_279] : memref<115x64xf32, #tpu.memory_space<vmem>>, vector<1x64xf32>
    %893 = vector.extract_strided_slice %836 {offsets = [0, 12], sizes = [16, 64], strides = [1, 1]} : vector<16x88xf32> to vector<16x64xf32>
    %894 = vector.broadcast %892 : vector<1x64xf32> to vector<16x64xf32>
    %895 = arith.mulf %893, %894 : vector<16x64xf32>
    %896 = arith.addf %891, %895 : vector<16x64xf32>
    %c58_280 = arith.constant 58 : index
    %c0_281 = arith.constant 0 : index
    %897 = vector.load %arg3[%c58_280, %c0_281] : memref<115x64xf32, #tpu.memory_space<vmem>>, vector<1x64xf32>
    %898 = vector.extract_strided_slice %836 {offsets = [0, 13], sizes = [16, 64], strides = [1, 1]} : vector<16x88xf32> to vector<16x64xf32>
    %899 = vector.broadcast %897 : vector<1x64xf32> to vector<16x64xf32>
    %900 = arith.mulf %898, %899 : vector<16x64xf32>
    %901 = arith.addf %896, %900 : vector<16x64xf32>
    %c59_282 = arith.constant 59 : index
    %c0_283 = arith.constant 0 : index
    %902 = vector.load %arg3[%c59_282, %c0_283] : memref<115x64xf32, #tpu.memory_space<vmem>>, vector<1x64xf32>
    %903 = vector.extract_strided_slice %836 {offsets = [0, 14], sizes = [16, 64], strides = [1, 1]} : vector<16x88xf32> to vector<16x64xf32>
    %904 = vector.broadcast %902 : vector<1x64xf32> to vector<16x64xf32>
    %905 = arith.mulf %903, %904 : vector<16x64xf32>
    %906 = arith.addf %901, %905 : vector<16x64xf32>
    %c60_284 = arith.constant 60 : index
    %c0_285 = arith.constant 0 : index
    %907 = vector.load %arg3[%c60_284, %c0_285] : memref<115x64xf32, #tpu.memory_space<vmem>>, vector<1x64xf32>
    %908 = vector.extract_strided_slice %836 {offsets = [0, 15], sizes = [16, 64], strides = [1, 1]} : vector<16x88xf32> to vector<16x64xf32>
    %909 = vector.broadcast %907 : vector<1x64xf32> to vector<16x64xf32>
    %910 = arith.mulf %908, %909 : vector<16x64xf32>
    %911 = arith.addf %906, %910 : vector<16x64xf32>
    %c61_286 = arith.constant 61 : index
    %c0_287 = arith.constant 0 : index
    %912 = vector.load %arg3[%c61_286, %c0_287] : memref<115x64xf32, #tpu.memory_space<vmem>>, vector<1x64xf32>
    %913 = vector.extract_strided_slice %836 {offsets = [0, 16], sizes = [16, 64], strides = [1, 1]} : vector<16x88xf32> to vector<16x64xf32>
    %914 = vector.broadcast %912 : vector<1x64xf32> to vector<16x64xf32>
    %915 = arith.mulf %913, %914 : vector<16x64xf32>
    %916 = arith.addf %911, %915 : vector<16x64xf32>
    %c62_288 = arith.constant 62 : index
    %c0_289 = arith.constant 0 : index
    %917 = vector.load %arg3[%c62_288, %c0_289] : memref<115x64xf32, #tpu.memory_space<vmem>>, vector<1x64xf32>
    %918 = vector.extract_strided_slice %836 {offsets = [0, 17], sizes = [16, 64], strides = [1, 1]} : vector<16x88xf32> to vector<16x64xf32>
    %919 = vector.broadcast %917 : vector<1x64xf32> to vector<16x64xf32>
    %920 = arith.mulf %918, %919 : vector<16x64xf32>
    %921 = arith.addf %916, %920 : vector<16x64xf32>
    %c63_290 = arith.constant 63 : index
    %c0_291 = arith.constant 0 : index
    %922 = vector.load %arg3[%c63_290, %c0_291] : memref<115x64xf32, #tpu.memory_space<vmem>>, vector<1x64xf32>
    %923 = vector.extract_strided_slice %836 {offsets = [0, 18], sizes = [16, 64], strides = [1, 1]} : vector<16x88xf32> to vector<16x64xf32>
    %924 = vector.broadcast %922 : vector<1x64xf32> to vector<16x64xf32>
    %925 = arith.mulf %923, %924 : vector<16x64xf32>
    %926 = arith.addf %921, %925 : vector<16x64xf32>
    %c64_292 = arith.constant 64 : index
    %c0_293 = arith.constant 0 : index
    %927 = vector.load %arg3[%c64_292, %c0_293] : memref<115x64xf32, #tpu.memory_space<vmem>>, vector<1x64xf32>
    %928 = vector.extract_strided_slice %836 {offsets = [0, 19], sizes = [16, 64], strides = [1, 1]} : vector<16x88xf32> to vector<16x64xf32>
    %929 = vector.broadcast %927 : vector<1x64xf32> to vector<16x64xf32>
    %930 = arith.mulf %928, %929 : vector<16x64xf32>
    %931 = arith.addf %926, %930 : vector<16x64xf32>
    %c65_294 = arith.constant 65 : index
    %c0_295 = arith.constant 0 : index
    %932 = vector.load %arg3[%c65_294, %c0_295] : memref<115x64xf32, #tpu.memory_space<vmem>>, vector<1x64xf32>
    %933 = vector.extract_strided_slice %836 {offsets = [0, 20], sizes = [16, 64], strides = [1, 1]} : vector<16x88xf32> to vector<16x64xf32>
    %934 = vector.broadcast %932 : vector<1x64xf32> to vector<16x64xf32>
    %935 = arith.mulf %933, %934 : vector<16x64xf32>
    %936 = arith.addf %931, %935 : vector<16x64xf32>
    %c66_296 = arith.constant 66 : index
    %c0_297 = arith.constant 0 : index
    %937 = vector.load %arg3[%c66_296, %c0_297] : memref<115x64xf32, #tpu.memory_space<vmem>>, vector<1x64xf32>
    %938 = vector.extract_strided_slice %836 {offsets = [0, 21], sizes = [16, 64], strides = [1, 1]} : vector<16x88xf32> to vector<16x64xf32>
    %939 = vector.broadcast %937 : vector<1x64xf32> to vector<16x64xf32>
    %940 = arith.mulf %938, %939 : vector<16x64xf32>
    %941 = arith.addf %936, %940 : vector<16x64xf32>
    %c67_298 = arith.constant 67 : index
    %c0_299 = arith.constant 0 : index
    %942 = vector.load %arg3[%c67_298, %c0_299] : memref<115x64xf32, #tpu.memory_space<vmem>>, vector<1x64xf32>
    %943 = vector.extract_strided_slice %836 {offsets = [0, 22], sizes = [16, 64], strides = [1, 1]} : vector<16x88xf32> to vector<16x64xf32>
    %944 = vector.broadcast %942 : vector<1x64xf32> to vector<16x64xf32>
    %945 = arith.mulf %943, %944 : vector<16x64xf32>
    %946 = arith.addf %941, %945 : vector<16x64xf32>
    %c68_300 = arith.constant 68 : index
    %c0_301 = arith.constant 0 : index
    %947 = vector.load %arg3[%c68_300, %c0_301] : memref<115x64xf32, #tpu.memory_space<vmem>>, vector<1x64xf32>
    %948 = vector.extract_strided_slice %836 {offsets = [0, 23], sizes = [16, 64], strides = [1, 1]} : vector<16x88xf32> to vector<16x64xf32>
    %949 = vector.broadcast %947 : vector<1x64xf32> to vector<16x64xf32>
    %950 = arith.mulf %948, %949 : vector<16x64xf32>
    %951 = arith.addf %946, %950 : vector<16x64xf32>
    %c3_302 = arith.constant 3 : index
    %c0_303 = arith.constant 0 : index
    %952 = vector.load %arg6[%c3_302, %c0_303] : memref<20x88xf32, #tpu.memory_space<vmem>>, vector<16x88xf32>
    %c69_304 = arith.constant 69 : index
    %c0_305 = arith.constant 0 : index
    %953 = vector.load %arg3[%c69_304, %c0_305] : memref<115x64xf32, #tpu.memory_space<vmem>>, vector<1x64xf32>
    %954 = vector.extract_strided_slice %952 {offsets = [0, 1], sizes = [16, 64], strides = [1, 1]} : vector<16x88xf32> to vector<16x64xf32>
    %955 = vector.broadcast %953 : vector<1x64xf32> to vector<16x64xf32>
    %956 = arith.mulf %954, %955 : vector<16x64xf32>
    %957 = arith.addf %951, %956 : vector<16x64xf32>
    %c70_306 = arith.constant 70 : index
    %c0_307 = arith.constant 0 : index
    %958 = vector.load %arg3[%c70_306, %c0_307] : memref<115x64xf32, #tpu.memory_space<vmem>>, vector<1x64xf32>
    %959 = vector.extract_strided_slice %952 {offsets = [0, 2], sizes = [16, 64], strides = [1, 1]} : vector<16x88xf32> to vector<16x64xf32>
    %960 = vector.broadcast %958 : vector<1x64xf32> to vector<16x64xf32>
    %961 = arith.mulf %959, %960 : vector<16x64xf32>
    %962 = arith.addf %957, %961 : vector<16x64xf32>
    %c71_308 = arith.constant 71 : index
    %c0_309 = arith.constant 0 : index
    %963 = vector.load %arg3[%c71_308, %c0_309] : memref<115x64xf32, #tpu.memory_space<vmem>>, vector<1x64xf32>
    %964 = vector.extract_strided_slice %952 {offsets = [0, 3], sizes = [16, 64], strides = [1, 1]} : vector<16x88xf32> to vector<16x64xf32>
    %965 = vector.broadcast %963 : vector<1x64xf32> to vector<16x64xf32>
    %966 = arith.mulf %964, %965 : vector<16x64xf32>
    %967 = arith.addf %962, %966 : vector<16x64xf32>
    %c72_310 = arith.constant 72 : index
    %c0_311 = arith.constant 0 : index
    %968 = vector.load %arg3[%c72_310, %c0_311] : memref<115x64xf32, #tpu.memory_space<vmem>>, vector<1x64xf32>
    %969 = vector.extract_strided_slice %952 {offsets = [0, 4], sizes = [16, 64], strides = [1, 1]} : vector<16x88xf32> to vector<16x64xf32>
    %970 = vector.broadcast %968 : vector<1x64xf32> to vector<16x64xf32>
    %971 = arith.mulf %969, %970 : vector<16x64xf32>
    %972 = arith.addf %967, %971 : vector<16x64xf32>
    %c73_312 = arith.constant 73 : index
    %c0_313 = arith.constant 0 : index
    %973 = vector.load %arg3[%c73_312, %c0_313] : memref<115x64xf32, #tpu.memory_space<vmem>>, vector<1x64xf32>
    %974 = vector.extract_strided_slice %952 {offsets = [0, 5], sizes = [16, 64], strides = [1, 1]} : vector<16x88xf32> to vector<16x64xf32>
    %975 = vector.broadcast %973 : vector<1x64xf32> to vector<16x64xf32>
    %976 = arith.mulf %974, %975 : vector<16x64xf32>
    %977 = arith.addf %972, %976 : vector<16x64xf32>
    %c74_314 = arith.constant 74 : index
    %c0_315 = arith.constant 0 : index
    %978 = vector.load %arg3[%c74_314, %c0_315] : memref<115x64xf32, #tpu.memory_space<vmem>>, vector<1x64xf32>
    %979 = vector.extract_strided_slice %952 {offsets = [0, 6], sizes = [16, 64], strides = [1, 1]} : vector<16x88xf32> to vector<16x64xf32>
    %980 = vector.broadcast %978 : vector<1x64xf32> to vector<16x64xf32>
    %981 = arith.mulf %979, %980 : vector<16x64xf32>
    %982 = arith.addf %977, %981 : vector<16x64xf32>
    %c75_316 = arith.constant 75 : index
    %c0_317 = arith.constant 0 : index
    %983 = vector.load %arg3[%c75_316, %c0_317] : memref<115x64xf32, #tpu.memory_space<vmem>>, vector<1x64xf32>
    %984 = vector.extract_strided_slice %952 {offsets = [0, 7], sizes = [16, 64], strides = [1, 1]} : vector<16x88xf32> to vector<16x64xf32>
    %985 = vector.broadcast %983 : vector<1x64xf32> to vector<16x64xf32>
    %986 = arith.mulf %984, %985 : vector<16x64xf32>
    %987 = arith.addf %982, %986 : vector<16x64xf32>
    %c76_318 = arith.constant 76 : index
    %c0_319 = arith.constant 0 : index
    %988 = vector.load %arg3[%c76_318, %c0_319] : memref<115x64xf32, #tpu.memory_space<vmem>>, vector<1x64xf32>
    %989 = vector.extract_strided_slice %952 {offsets = [0, 8], sizes = [16, 64], strides = [1, 1]} : vector<16x88xf32> to vector<16x64xf32>
    %990 = vector.broadcast %988 : vector<1x64xf32> to vector<16x64xf32>
    %991 = arith.mulf %989, %990 : vector<16x64xf32>
    %992 = arith.addf %987, %991 : vector<16x64xf32>
    %c77_320 = arith.constant 77 : index
    %c0_321 = arith.constant 0 : index
    %993 = vector.load %arg3[%c77_320, %c0_321] : memref<115x64xf32, #tpu.memory_space<vmem>>, vector<1x64xf32>
    %994 = vector.extract_strided_slice %952 {offsets = [0, 9], sizes = [16, 64], strides = [1, 1]} : vector<16x88xf32> to vector<16x64xf32>
    %995 = vector.broadcast %993 : vector<1x64xf32> to vector<16x64xf32>
    %996 = arith.mulf %994, %995 : vector<16x64xf32>
    %997 = arith.addf %992, %996 : vector<16x64xf32>
    %c78_322 = arith.constant 78 : index
    %c0_323 = arith.constant 0 : index
    %998 = vector.load %arg3[%c78_322, %c0_323] : memref<115x64xf32, #tpu.memory_space<vmem>>, vector<1x64xf32>
    %999 = vector.extract_strided_slice %952 {offsets = [0, 10], sizes = [16, 64], strides = [1, 1]} : vector<16x88xf32> to vector<16x64xf32>
    %1000 = vector.broadcast %998 : vector<1x64xf32> to vector<16x64xf32>
    %1001 = arith.mulf %999, %1000 : vector<16x64xf32>
    %1002 = arith.addf %997, %1001 : vector<16x64xf32>
    %c79_324 = arith.constant 79 : index
    %c0_325 = arith.constant 0 : index
    %1003 = vector.load %arg3[%c79_324, %c0_325] : memref<115x64xf32, #tpu.memory_space<vmem>>, vector<1x64xf32>
    %1004 = vector.extract_strided_slice %952 {offsets = [0, 11], sizes = [16, 64], strides = [1, 1]} : vector<16x88xf32> to vector<16x64xf32>
    %1005 = vector.broadcast %1003 : vector<1x64xf32> to vector<16x64xf32>
    %1006 = arith.mulf %1004, %1005 : vector<16x64xf32>
    %1007 = arith.addf %1002, %1006 : vector<16x64xf32>
    %c80_326 = arith.constant 80 : index
    %c0_327 = arith.constant 0 : index
    %1008 = vector.load %arg3[%c80_326, %c0_327] : memref<115x64xf32, #tpu.memory_space<vmem>>, vector<1x64xf32>
    %1009 = vector.extract_strided_slice %952 {offsets = [0, 12], sizes = [16, 64], strides = [1, 1]} : vector<16x88xf32> to vector<16x64xf32>
    %1010 = vector.broadcast %1008 : vector<1x64xf32> to vector<16x64xf32>
    %1011 = arith.mulf %1009, %1010 : vector<16x64xf32>
    %1012 = arith.addf %1007, %1011 : vector<16x64xf32>
    %c81_328 = arith.constant 81 : index
    %c0_329 = arith.constant 0 : index
    %1013 = vector.load %arg3[%c81_328, %c0_329] : memref<115x64xf32, #tpu.memory_space<vmem>>, vector<1x64xf32>
    %1014 = vector.extract_strided_slice %952 {offsets = [0, 13], sizes = [16, 64], strides = [1, 1]} : vector<16x88xf32> to vector<16x64xf32>
    %1015 = vector.broadcast %1013 : vector<1x64xf32> to vector<16x64xf32>
    %1016 = arith.mulf %1014, %1015 : vector<16x64xf32>
    %1017 = arith.addf %1012, %1016 : vector<16x64xf32>
    %c82_330 = arith.constant 82 : index
    %c0_331 = arith.constant 0 : index
    %1018 = vector.load %arg3[%c82_330, %c0_331] : memref<115x64xf32, #tpu.memory_space<vmem>>, vector<1x64xf32>
    %1019 = vector.extract_strided_slice %952 {offsets = [0, 14], sizes = [16, 64], strides = [1, 1]} : vector<16x88xf32> to vector<16x64xf32>
    %1020 = vector.broadcast %1018 : vector<1x64xf32> to vector<16x64xf32>
    %1021 = arith.mulf %1019, %1020 : vector<16x64xf32>
    %1022 = arith.addf %1017, %1021 : vector<16x64xf32>
    %c83_332 = arith.constant 83 : index
    %c0_333 = arith.constant 0 : index
    %1023 = vector.load %arg3[%c83_332, %c0_333] : memref<115x64xf32, #tpu.memory_space<vmem>>, vector<1x64xf32>
    %1024 = vector.extract_strided_slice %952 {offsets = [0, 15], sizes = [16, 64], strides = [1, 1]} : vector<16x88xf32> to vector<16x64xf32>
    %1025 = vector.broadcast %1023 : vector<1x64xf32> to vector<16x64xf32>
    %1026 = arith.mulf %1024, %1025 : vector<16x64xf32>
    %1027 = arith.addf %1022, %1026 : vector<16x64xf32>
    %c84_334 = arith.constant 84 : index
    %c0_335 = arith.constant 0 : index
    %1028 = vector.load %arg3[%c84_334, %c0_335] : memref<115x64xf32, #tpu.memory_space<vmem>>, vector<1x64xf32>
    %1029 = vector.extract_strided_slice %952 {offsets = [0, 16], sizes = [16, 64], strides = [1, 1]} : vector<16x88xf32> to vector<16x64xf32>
    %1030 = vector.broadcast %1028 : vector<1x64xf32> to vector<16x64xf32>
    %1031 = arith.mulf %1029, %1030 : vector<16x64xf32>
    %1032 = arith.addf %1027, %1031 : vector<16x64xf32>
    %c85_336 = arith.constant 85 : index
    %c0_337 = arith.constant 0 : index
    %1033 = vector.load %arg3[%c85_336, %c0_337] : memref<115x64xf32, #tpu.memory_space<vmem>>, vector<1x64xf32>
    %1034 = vector.extract_strided_slice %952 {offsets = [0, 17], sizes = [16, 64], strides = [1, 1]} : vector<16x88xf32> to vector<16x64xf32>
    %1035 = vector.broadcast %1033 : vector<1x64xf32> to vector<16x64xf32>
    %1036 = arith.mulf %1034, %1035 : vector<16x64xf32>
    %1037 = arith.addf %1032, %1036 : vector<16x64xf32>
    %c86_338 = arith.constant 86 : index
    %c0_339 = arith.constant 0 : index
    %1038 = vector.load %arg3[%c86_338, %c0_339] : memref<115x64xf32, #tpu.memory_space<vmem>>, vector<1x64xf32>
    %1039 = vector.extract_strided_slice %952 {offsets = [0, 18], sizes = [16, 64], strides = [1, 1]} : vector<16x88xf32> to vector<16x64xf32>
    %1040 = vector.broadcast %1038 : vector<1x64xf32> to vector<16x64xf32>
    %1041 = arith.mulf %1039, %1040 : vector<16x64xf32>
    %1042 = arith.addf %1037, %1041 : vector<16x64xf32>
    %c87_340 = arith.constant 87 : index
    %c0_341 = arith.constant 0 : index
    %1043 = vector.load %arg3[%c87_340, %c0_341] : memref<115x64xf32, #tpu.memory_space<vmem>>, vector<1x64xf32>
    %1044 = vector.extract_strided_slice %952 {offsets = [0, 19], sizes = [16, 64], strides = [1, 1]} : vector<16x88xf32> to vector<16x64xf32>
    %1045 = vector.broadcast %1043 : vector<1x64xf32> to vector<16x64xf32>
    %1046 = arith.mulf %1044, %1045 : vector<16x64xf32>
    %1047 = arith.addf %1042, %1046 : vector<16x64xf32>
    %c88_342 = arith.constant 88 : index
    %c0_343 = arith.constant 0 : index
    %1048 = vector.load %arg3[%c88_342, %c0_343] : memref<115x64xf32, #tpu.memory_space<vmem>>, vector<1x64xf32>
    %1049 = vector.extract_strided_slice %952 {offsets = [0, 20], sizes = [16, 64], strides = [1, 1]} : vector<16x88xf32> to vector<16x64xf32>
    %1050 = vector.broadcast %1048 : vector<1x64xf32> to vector<16x64xf32>
    %1051 = arith.mulf %1049, %1050 : vector<16x64xf32>
    %1052 = arith.addf %1047, %1051 : vector<16x64xf32>
    %c89_344 = arith.constant 89 : index
    %c0_345 = arith.constant 0 : index
    %1053 = vector.load %arg3[%c89_344, %c0_345] : memref<115x64xf32, #tpu.memory_space<vmem>>, vector<1x64xf32>
    %1054 = vector.extract_strided_slice %952 {offsets = [0, 21], sizes = [16, 64], strides = [1, 1]} : vector<16x88xf32> to vector<16x64xf32>
    %1055 = vector.broadcast %1053 : vector<1x64xf32> to vector<16x64xf32>
    %1056 = arith.mulf %1054, %1055 : vector<16x64xf32>
    %1057 = arith.addf %1052, %1056 : vector<16x64xf32>
    %c90_346 = arith.constant 90 : index
    %c0_347 = arith.constant 0 : index
    %1058 = vector.load %arg3[%c90_346, %c0_347] : memref<115x64xf32, #tpu.memory_space<vmem>>, vector<1x64xf32>
    %1059 = vector.extract_strided_slice %952 {offsets = [0, 22], sizes = [16, 64], strides = [1, 1]} : vector<16x88xf32> to vector<16x64xf32>
    %1060 = vector.broadcast %1058 : vector<1x64xf32> to vector<16x64xf32>
    %1061 = arith.mulf %1059, %1060 : vector<16x64xf32>
    %1062 = arith.addf %1057, %1061 : vector<16x64xf32>
    %c91_348 = arith.constant 91 : index
    %c0_349 = arith.constant 0 : index
    %1063 = vector.load %arg3[%c91_348, %c0_349] : memref<115x64xf32, #tpu.memory_space<vmem>>, vector<1x64xf32>
    %1064 = vector.extract_strided_slice %952 {offsets = [0, 23], sizes = [16, 64], strides = [1, 1]} : vector<16x88xf32> to vector<16x64xf32>
    %1065 = vector.broadcast %1063 : vector<1x64xf32> to vector<16x64xf32>
    %1066 = arith.mulf %1064, %1065 : vector<16x64xf32>
    %1067 = arith.addf %1062, %1066 : vector<16x64xf32>
    %c4_350 = arith.constant 4 : index
    %c0_351 = arith.constant 0 : index
    %1068 = vector.load %arg6[%c4_350, %c0_351] : memref<20x88xf32, #tpu.memory_space<vmem>>, vector<16x88xf32>
    %c92_352 = arith.constant 92 : index
    %c0_353 = arith.constant 0 : index
    %1069 = vector.load %arg3[%c92_352, %c0_353] : memref<115x64xf32, #tpu.memory_space<vmem>>, vector<1x64xf32>
    %1070 = vector.extract_strided_slice %1068 {offsets = [0, 1], sizes = [16, 64], strides = [1, 1]} : vector<16x88xf32> to vector<16x64xf32>
    %1071 = vector.broadcast %1069 : vector<1x64xf32> to vector<16x64xf32>
    %1072 = arith.mulf %1070, %1071 : vector<16x64xf32>
    %1073 = arith.addf %1067, %1072 : vector<16x64xf32>
    %c93_354 = arith.constant 93 : index
    %c0_355 = arith.constant 0 : index
    %1074 = vector.load %arg3[%c93_354, %c0_355] : memref<115x64xf32, #tpu.memory_space<vmem>>, vector<1x64xf32>
    %1075 = vector.extract_strided_slice %1068 {offsets = [0, 2], sizes = [16, 64], strides = [1, 1]} : vector<16x88xf32> to vector<16x64xf32>
    %1076 = vector.broadcast %1074 : vector<1x64xf32> to vector<16x64xf32>
    %1077 = arith.mulf %1075, %1076 : vector<16x64xf32>
    %1078 = arith.addf %1073, %1077 : vector<16x64xf32>
    %c94_356 = arith.constant 94 : index
    %c0_357 = arith.constant 0 : index
    %1079 = vector.load %arg3[%c94_356, %c0_357] : memref<115x64xf32, #tpu.memory_space<vmem>>, vector<1x64xf32>
    %1080 = vector.extract_strided_slice %1068 {offsets = [0, 3], sizes = [16, 64], strides = [1, 1]} : vector<16x88xf32> to vector<16x64xf32>
    %1081 = vector.broadcast %1079 : vector<1x64xf32> to vector<16x64xf32>
    %1082 = arith.mulf %1080, %1081 : vector<16x64xf32>
    %1083 = arith.addf %1078, %1082 : vector<16x64xf32>
    %c95_358 = arith.constant 95 : index
    %c0_359 = arith.constant 0 : index
    %1084 = vector.load %arg3[%c95_358, %c0_359] : memref<115x64xf32, #tpu.memory_space<vmem>>, vector<1x64xf32>
    %1085 = vector.extract_strided_slice %1068 {offsets = [0, 4], sizes = [16, 64], strides = [1, 1]} : vector<16x88xf32> to vector<16x64xf32>
    %1086 = vector.broadcast %1084 : vector<1x64xf32> to vector<16x64xf32>
    %1087 = arith.mulf %1085, %1086 : vector<16x64xf32>
    %1088 = arith.addf %1083, %1087 : vector<16x64xf32>
    %c96_360 = arith.constant 96 : index
    %c0_361 = arith.constant 0 : index
    %1089 = vector.load %arg3[%c96_360, %c0_361] : memref<115x64xf32, #tpu.memory_space<vmem>>, vector<1x64xf32>
    %1090 = vector.extract_strided_slice %1068 {offsets = [0, 5], sizes = [16, 64], strides = [1, 1]} : vector<16x88xf32> to vector<16x64xf32>
    %1091 = vector.broadcast %1089 : vector<1x64xf32> to vector<16x64xf32>
    %1092 = arith.mulf %1090, %1091 : vector<16x64xf32>
    %1093 = arith.addf %1088, %1092 : vector<16x64xf32>
    %c97_362 = arith.constant 97 : index
    %c0_363 = arith.constant 0 : index
    %1094 = vector.load %arg3[%c97_362, %c0_363] : memref<115x64xf32, #tpu.memory_space<vmem>>, vector<1x64xf32>
    %1095 = vector.extract_strided_slice %1068 {offsets = [0, 6], sizes = [16, 64], strides = [1, 1]} : vector<16x88xf32> to vector<16x64xf32>
    %1096 = vector.broadcast %1094 : vector<1x64xf32> to vector<16x64xf32>
    %1097 = arith.mulf %1095, %1096 : vector<16x64xf32>
    %1098 = arith.addf %1093, %1097 : vector<16x64xf32>
    %c98_364 = arith.constant 98 : index
    %c0_365 = arith.constant 0 : index
    %1099 = vector.load %arg3[%c98_364, %c0_365] : memref<115x64xf32, #tpu.memory_space<vmem>>, vector<1x64xf32>
    %1100 = vector.extract_strided_slice %1068 {offsets = [0, 7], sizes = [16, 64], strides = [1, 1]} : vector<16x88xf32> to vector<16x64xf32>
    %1101 = vector.broadcast %1099 : vector<1x64xf32> to vector<16x64xf32>
    %1102 = arith.mulf %1100, %1101 : vector<16x64xf32>
    %1103 = arith.addf %1098, %1102 : vector<16x64xf32>
    %c99_366 = arith.constant 99 : index
    %c0_367 = arith.constant 0 : index
    %1104 = vector.load %arg3[%c99_366, %c0_367] : memref<115x64xf32, #tpu.memory_space<vmem>>, vector<1x64xf32>
    %1105 = vector.extract_strided_slice %1068 {offsets = [0, 8], sizes = [16, 64], strides = [1, 1]} : vector<16x88xf32> to vector<16x64xf32>
    %1106 = vector.broadcast %1104 : vector<1x64xf32> to vector<16x64xf32>
    %1107 = arith.mulf %1105, %1106 : vector<16x64xf32>
    %1108 = arith.addf %1103, %1107 : vector<16x64xf32>
    %c100_368 = arith.constant 100 : index
    %c0_369 = arith.constant 0 : index
    %1109 = vector.load %arg3[%c100_368, %c0_369] : memref<115x64xf32, #tpu.memory_space<vmem>>, vector<1x64xf32>
    %1110 = vector.extract_strided_slice %1068 {offsets = [0, 9], sizes = [16, 64], strides = [1, 1]} : vector<16x88xf32> to vector<16x64xf32>
    %1111 = vector.broadcast %1109 : vector<1x64xf32> to vector<16x64xf32>
    %1112 = arith.mulf %1110, %1111 : vector<16x64xf32>
    %1113 = arith.addf %1108, %1112 : vector<16x64xf32>
    %c101_370 = arith.constant 101 : index
    %c0_371 = arith.constant 0 : index
    %1114 = vector.load %arg3[%c101_370, %c0_371] : memref<115x64xf32, #tpu.memory_space<vmem>>, vector<1x64xf32>
    %1115 = vector.extract_strided_slice %1068 {offsets = [0, 10], sizes = [16, 64], strides = [1, 1]} : vector<16x88xf32> to vector<16x64xf32>
    %1116 = vector.broadcast %1114 : vector<1x64xf32> to vector<16x64xf32>
    %1117 = arith.mulf %1115, %1116 : vector<16x64xf32>
    %1118 = arith.addf %1113, %1117 : vector<16x64xf32>
    %c102_372 = arith.constant 102 : index
    %c0_373 = arith.constant 0 : index
    %1119 = vector.load %arg3[%c102_372, %c0_373] : memref<115x64xf32, #tpu.memory_space<vmem>>, vector<1x64xf32>
    %1120 = vector.extract_strided_slice %1068 {offsets = [0, 11], sizes = [16, 64], strides = [1, 1]} : vector<16x88xf32> to vector<16x64xf32>
    %1121 = vector.broadcast %1119 : vector<1x64xf32> to vector<16x64xf32>
    %1122 = arith.mulf %1120, %1121 : vector<16x64xf32>
    %1123 = arith.addf %1118, %1122 : vector<16x64xf32>
    %c103_374 = arith.constant 103 : index
    %c0_375 = arith.constant 0 : index
    %1124 = vector.load %arg3[%c103_374, %c0_375] : memref<115x64xf32, #tpu.memory_space<vmem>>, vector<1x64xf32>
    %1125 = vector.extract_strided_slice %1068 {offsets = [0, 12], sizes = [16, 64], strides = [1, 1]} : vector<16x88xf32> to vector<16x64xf32>
    %1126 = vector.broadcast %1124 : vector<1x64xf32> to vector<16x64xf32>
    %1127 = arith.mulf %1125, %1126 : vector<16x64xf32>
    %1128 = arith.addf %1123, %1127 : vector<16x64xf32>
    %c104_376 = arith.constant 104 : index
    %c0_377 = arith.constant 0 : index
    %1129 = vector.load %arg3[%c104_376, %c0_377] : memref<115x64xf32, #tpu.memory_space<vmem>>, vector<1x64xf32>
    %1130 = vector.extract_strided_slice %1068 {offsets = [0, 13], sizes = [16, 64], strides = [1, 1]} : vector<16x88xf32> to vector<16x64xf32>
    %1131 = vector.broadcast %1129 : vector<1x64xf32> to vector<16x64xf32>
    %1132 = arith.mulf %1130, %1131 : vector<16x64xf32>
    %1133 = arith.addf %1128, %1132 : vector<16x64xf32>
    %c105_378 = arith.constant 105 : index
    %c0_379 = arith.constant 0 : index
    %1134 = vector.load %arg3[%c105_378, %c0_379] : memref<115x64xf32, #tpu.memory_space<vmem>>, vector<1x64xf32>
    %1135 = vector.extract_strided_slice %1068 {offsets = [0, 14], sizes = [16, 64], strides = [1, 1]} : vector<16x88xf32> to vector<16x64xf32>
    %1136 = vector.broadcast %1134 : vector<1x64xf32> to vector<16x64xf32>
    %1137 = arith.mulf %1135, %1136 : vector<16x64xf32>
    %1138 = arith.addf %1133, %1137 : vector<16x64xf32>
    %c106_380 = arith.constant 106 : index
    %c0_381 = arith.constant 0 : index
    %1139 = vector.load %arg3[%c106_380, %c0_381] : memref<115x64xf32, #tpu.memory_space<vmem>>, vector<1x64xf32>
    %1140 = vector.extract_strided_slice %1068 {offsets = [0, 15], sizes = [16, 64], strides = [1, 1]} : vector<16x88xf32> to vector<16x64xf32>
    %1141 = vector.broadcast %1139 : vector<1x64xf32> to vector<16x64xf32>
    %1142 = arith.mulf %1140, %1141 : vector<16x64xf32>
    %1143 = arith.addf %1138, %1142 : vector<16x64xf32>
    %c107_382 = arith.constant 107 : index
    %c0_383 = arith.constant 0 : index
    %1144 = vector.load %arg3[%c107_382, %c0_383] : memref<115x64xf32, #tpu.memory_space<vmem>>, vector<1x64xf32>
    %1145 = vector.extract_strided_slice %1068 {offsets = [0, 16], sizes = [16, 64], strides = [1, 1]} : vector<16x88xf32> to vector<16x64xf32>
    %1146 = vector.broadcast %1144 : vector<1x64xf32> to vector<16x64xf32>
    %1147 = arith.mulf %1145, %1146 : vector<16x64xf32>
    %1148 = arith.addf %1143, %1147 : vector<16x64xf32>
    %c108_384 = arith.constant 108 : index
    %c0_385 = arith.constant 0 : index
    %1149 = vector.load %arg3[%c108_384, %c0_385] : memref<115x64xf32, #tpu.memory_space<vmem>>, vector<1x64xf32>
    %1150 = vector.extract_strided_slice %1068 {offsets = [0, 17], sizes = [16, 64], strides = [1, 1]} : vector<16x88xf32> to vector<16x64xf32>
    %1151 = vector.broadcast %1149 : vector<1x64xf32> to vector<16x64xf32>
    %1152 = arith.mulf %1150, %1151 : vector<16x64xf32>
    %1153 = arith.addf %1148, %1152 : vector<16x64xf32>
    %c109_386 = arith.constant 109 : index
    %c0_387 = arith.constant 0 : index
    %1154 = vector.load %arg3[%c109_386, %c0_387] : memref<115x64xf32, #tpu.memory_space<vmem>>, vector<1x64xf32>
    %1155 = vector.extract_strided_slice %1068 {offsets = [0, 18], sizes = [16, 64], strides = [1, 1]} : vector<16x88xf32> to vector<16x64xf32>
    %1156 = vector.broadcast %1154 : vector<1x64xf32> to vector<16x64xf32>
    %1157 = arith.mulf %1155, %1156 : vector<16x64xf32>
    %1158 = arith.addf %1153, %1157 : vector<16x64xf32>
    %c110_388 = arith.constant 110 : index
    %c0_389 = arith.constant 0 : index
    %1159 = vector.load %arg3[%c110_388, %c0_389] : memref<115x64xf32, #tpu.memory_space<vmem>>, vector<1x64xf32>
    %1160 = vector.extract_strided_slice %1068 {offsets = [0, 19], sizes = [16, 64], strides = [1, 1]} : vector<16x88xf32> to vector<16x64xf32>
    %1161 = vector.broadcast %1159 : vector<1x64xf32> to vector<16x64xf32>
    %1162 = arith.mulf %1160, %1161 : vector<16x64xf32>
    %1163 = arith.addf %1158, %1162 : vector<16x64xf32>
    %c111_390 = arith.constant 111 : index
    %c0_391 = arith.constant 0 : index
    %1164 = vector.load %arg3[%c111_390, %c0_391] : memref<115x64xf32, #tpu.memory_space<vmem>>, vector<1x64xf32>
    %1165 = vector.extract_strided_slice %1068 {offsets = [0, 20], sizes = [16, 64], strides = [1, 1]} : vector<16x88xf32> to vector<16x64xf32>
    %1166 = vector.broadcast %1164 : vector<1x64xf32> to vector<16x64xf32>
    %1167 = arith.mulf %1165, %1166 : vector<16x64xf32>
    %1168 = arith.addf %1163, %1167 : vector<16x64xf32>
    %c112_392 = arith.constant 112 : index
    %c0_393 = arith.constant 0 : index
    %1169 = vector.load %arg3[%c112_392, %c0_393] : memref<115x64xf32, #tpu.memory_space<vmem>>, vector<1x64xf32>
    %1170 = vector.extract_strided_slice %1068 {offsets = [0, 21], sizes = [16, 64], strides = [1, 1]} : vector<16x88xf32> to vector<16x64xf32>
    %1171 = vector.broadcast %1169 : vector<1x64xf32> to vector<16x64xf32>
    %1172 = arith.mulf %1170, %1171 : vector<16x64xf32>
    %1173 = arith.addf %1168, %1172 : vector<16x64xf32>
    %c113_394 = arith.constant 113 : index
    %c0_395 = arith.constant 0 : index
    %1174 = vector.load %arg3[%c113_394, %c0_395] : memref<115x64xf32, #tpu.memory_space<vmem>>, vector<1x64xf32>
    %1175 = vector.extract_strided_slice %1068 {offsets = [0, 22], sizes = [16, 64], strides = [1, 1]} : vector<16x88xf32> to vector<16x64xf32>
    %1176 = vector.broadcast %1174 : vector<1x64xf32> to vector<16x64xf32>
    %1177 = arith.mulf %1175, %1176 : vector<16x64xf32>
    %1178 = arith.addf %1173, %1177 : vector<16x64xf32>
    %c114_396 = arith.constant 114 : index
    %c0_397 = arith.constant 0 : index
    %1179 = vector.load %arg3[%c114_396, %c0_397] : memref<115x64xf32, #tpu.memory_space<vmem>>, vector<1x64xf32>
    %1180 = vector.extract_strided_slice %1068 {offsets = [0, 23], sizes = [16, 64], strides = [1, 1]} : vector<16x88xf32> to vector<16x64xf32>
    %1181 = vector.broadcast %1179 : vector<1x64xf32> to vector<16x64xf32>
    %1182 = arith.mulf %1180, %1181 : vector<16x64xf32>
    %1183 = arith.addf %1178, %1182 : vector<16x64xf32>
    %1184 = arith.addf %1183, %1 : vector<16x64xf32>
    %cst_398 = arith.constant 0.000000e+00 : f32
    %1185 = vector.broadcast %cst_398 : f32 to vector<16x64xf32>
    %1186 = arith.maximumf %1184, %1185 : vector<16x64xf32>
    %c0_399 = arith.constant 0 : index
    %c0_400 = arith.constant 0 : index
    %c0_401 = arith.constant 0 : index
    %1187 = vector.load %arg4[%c0_399, %c0_400, %c0_401] : memref<1x16x64xf32, #tpu.memory_space<vmem>>, vector<1x16x64xf32>
    %1188 = vector.shape_cast %1187 : vector<1x16x64xf32> to vector<16x64xf32>
    %1189 = vector.shape_cast %1186 : vector<16x64xf32> to vector<1x16x64xf32>
    tpu.vector_store %arg4[%c0_399, %c0_400, %c0_401], %1189 {strides = array<i32>} : memref<1x16x64xf32, #tpu.memory_space<vmem>>, vector<1x16x64xf32>,
    return
  }
  func.func @transform_0(%arg0: i32) -> (i32, i32, i32) {
    %c0_i32 = arith.constant 0 : i32
    %c0_i32_0 = arith.constant 0 : i32
    %c0_i32_1 = arith.constant 0 : i32
    return %arg0, %c0_i32, %c0_i32_0 : i32, i32, i32
  }
  func.func @transform_1(%arg0: i32) -> (i32, i32) {
    %c0_i32 = arith.constant 0 : i32
    %c0_i32_0 = arith.constant 0 : i32
    %c0_i32_1 = arith.constant 0 : i32
    return %c0_i32, %c0_i32_0 : i32, i32
  }
  func.func @transform_2(%arg0: i32) -> (i32, i32) {
    %c0_i32 = arith.constant 0 : i32
    %c0_i32_0 = arith.constant 0 : i32
    %c0_i32_1 = arith.constant 0 : i32
    return %c0_i32, %c0_i32_0 : i32, i32
  }
  func.func @transform_3(%arg0: i32) -> (i32, i32, i32) {
    %c0_i32 = arith.constant 0 : i32
    %c0_i32_0 = arith.constant 0 : i32
    %c0_i32_1 = arith.constant 0 : i32
    return %arg0, %c0_i32, %c0_i32_0 : i32, i32, i32
  }
}

</mosaic_0001>

<bundles_post_ra>
// kernel: tpu_custom_call.1
= control target key start
LH: loop header
LB: loop body
LE: loop exit
PB: predicated region body
PF: predicated region fallthrough
CT: control target
= control target key end

     0   :  { %s7822_s0 = inlined_call_operand.vmem [shape: f32[2,16,64], index: 0, kind: input, shape index: {}]   ;;  %s7823_s1 = inlined_call_operand.vmem [shape: f32[115,64], index: 1, kind: input, shape index: {}]   ;;  %s7824_s2 = inlined_call_operand.vmem [shape: f32[115,64], index: 2, kind: input, shape index: {}]   ;;  %s7825_s3 = inlined_call_operand.hbm [shape: f32[2,16,64], index: 3, kind: output, shape index: {}]  }
   0x1   :  { %8068 = sst [smem:[#allocation141_spill]] %s7822_s0 }
   0x2   :  { %8069 = sst [smem:[#allocation142_spill]] %s7823_s1 }
   0x3   :  { %8070 = sst [smem:[#allocation143_spill]] %s7824_s2 }
   0x4   :  { %8071 = sst [smem:[#allocation144_spill]] %s7825_s3 }
   0x5   :  { %8 = vsyncpa [#allocation5], 0 }
   0x6   :  { %10 = vsyncpa [#allocation5 + $0x1], 0  ;;  %s4865_s12 = smov 0   ;;  %s4867_s13 = smov 0  }
   0x7   :  { %s4869_s14 = smov 0   ;;  %s4871_s15 = smov 0  }
   0x8 LB: > { %8072 = sst [smem:[#allocation7_spill]] %s4784_s12  ;;  %s4886_s16 = sadd.s32 4294967295, %s4796_s15   ;;  %s4796_s15 = sphi %s4871_s15, %s8646_s15   ;;  %s4792_s14 = sphi %s4869_s14, %s8649_s14   ;;  %s4788_s13 = sphi %s4867_s13, %s8648_s13   ;;  %s4784_s12 = sphi %s4865_s12, %s8647_s12  }
   0x9   : > { %8073 = sst [smem:[#allocation8_spill]] %s4788_s13  ;;  %s4394_s17 = sadd.s32 4294967294, %s4796_s15  }
   0xa   : > { %8074 = sst [smem:[#allocation9_spill]] %s4792_s14  ;;  %s4890_s18 = sadd.s32 1, %s4796_s15  }
   0xb   : > { %8075 = sst [smem:[#allocation10_spill]] %s4796_s15  ;;  %s91_s19 = sadd.s32 1, %s4792_s14 }
   0xc   : > { %8076 = sst [smem:[#allocation11_spill]] %s4886_s16  ;;  %s88_s20 = ssub.s32 %s4796_s15, %s4890_s18 }
   0xd   : > { %8077 = sst [smem:[#allocation12_spill]] %s4890_s18  ;;  %p101_p0 = scmp.ne.s32.totalorder %s4792_s14, %s4788_s13 }
   0xe   : > { %p89_p1 = scmp.eq.s32.totalorder %s88_s20, 0  ;;  %p102_p2 = scmp.eq.s32.totalorder %s4886_s16, 1 }
   0xf   : > { %p107_p3 = scmp.ne.s32.totalorder %s4788_s13, %s4784_s12  ;;  %p108_p4 = scmp.eq.s32.totalorder %s4394_s17, 1 }
  0x10   : > { %s4901_s21 = scalar_select %p89_p1, %s4792_s14, %s91_s19  }
  0x11   : > { %p4903_p5 = por %p102_p2, %p101_p0  ;;  %p4907_p6 = por %p108_p4, %p107_p3 }
  0x12   : > { %8078 = sst [smem:[#allocation13_spill]] %s4901_s21  ;;  %p4397_p7 = scmp.ge.s32.totalorder %s4796_s15, 1 }
  0x13   : > { %s8079_s22 = scalar_select %p4903_p5, 1, 0 }
  0x14   : > { %s8081_s23 = scalar_select %p4907_p6, 1, 0 }
  0x15   : > { %8080 = sst [smem:[#allocation14_spill]] %s8079_s22  ;;  %p140_p8 = scmp.lt.s32.totalorder %s4796_s15, 3 }
  0x16   : > { %8082 = sst [smem:[#allocation15_spill]] %s8081_s23 }
  0x17   : > { %p141_p9 = pnand %p4397_p7, %p140_p8 }
  0x19   : > { %144 = sbr.rel (%p141_p9) target bundleno = 3301 (0xce5), region = 32 }
  0x1e   : > { %s8083_s1 = sld [smem:[#allocation142_spill]]  ;;  %p164_p10 = scmp.lt.s32.totalorder %s4886_s16, 1  ;;  %vm171_vm0 = vcmask 713728   ;;  %v4810_v13 = vmov 0.0   ;;  %vm174_vm1 = vcmask 97280   ;;  %vm179_vm2 = vcmask 720480  }
  0x1f   : > { %s7884_s26 = smov 1   ;;  %s8084_s0 = sld [smem:[#allocation141_spill]]  ;;  %172 = vst.msk [vmem:[#allocation2] sm:$0x3] %vm171_vm0, %v4810_v13  ;;  %vm177_vm3 = vcmask 93184   ;;  %vm182_vm4 = vcmask 716384  }
  0x20   : > { %s165_s27 = scalar_select %p164_p10, %s4886_s16, 1  ;;  %175 = vst.msk [vmem:[#allocation2] sm:$0xff] %vm174_vm1, %v4810_v13  ;;  %vm192_vm5 = vcmask 621664   ;;  %vm4313_vm6 = vcmask 523264  }
  0x21   : > { %s7828_s7 = smov 12   ;;  %s7890_s8 = smov 2   ;;  %176 = vst.msk [vmem:[#allocation2 + $0x8] sm:$0xff] %vm174_vm1, %v4810_v13 }
  0x22   : > { %s4406_s28 = sshll.u32 %s165_s27, 4  ;;  %s7908_s11 = smov 3   ;;  %180 = vst.msk [vmem:[#allocation2] sm:$0xff] %vm179_vm2, %v4810_v13 }
  0x23   : > { %s7906_s20 = smov 4   ;;  %s7894_s27 = smov 5   ;;  %181 = vst.msk [vmem:[#allocation2 + $0x8] sm:$0xff] %vm179_vm2, %v4810_v13 }
  0x24   : > { %v4494_v0 = vld [vmem:[%s8083_s1] ss:$0 sm:$0xff]  ;;  %v4495_v2 = vld [vmem:[%s8083_s1 + $0x1] ss:$0 sm:$0xff]  ;;  %v4496_v4 = vld [vmem:[%s8083_s1 + $0x2] ss:$0 sm:$0xff] }
  0x25   : > { %200 = vrot.lane.b32.xlu1 %v4494_v0, %s7884_s26  ;;  %s4922_s4 = scalar_lea.vmem %s8084_s0, %s4406_s28  ;;  %v4497_v5 = vld [vmem:[%s8083_s1 + $0x3] ss:$0 sm:$0xff]  ;;  %v4498_v6 = vld [vmem:[%s8083_s1 + $0x4] ss:$0 sm:$0xff]  ;;  %v4499_v7 = vld [vmem:[%s8083_s1 + $0x5] ss:$0 sm:$0xff] }
  0x26   : > { %8085 = sst [smem:[#allocation16_spill]] %s4922_s4  ;;  %v169_v1 = vld [vmem:[%s4922_s4] sm:$0xff]  ;;  %v170_v3 = vld [vmem:[%s4922_s4 + $0x8] sm:$0xff]  ;;  %s7902_s30 = smov 6   ;;  %173 = vst.msk [vmem:[#allocation2 + $0x12] sm:$0x3] %vm171_vm0, %v4810_v13 }
  0x27   : > { %186 = vrot.lane.b32.xlu0 %v169_v1, %s7828_s7  ;;  %v4500_v8 = vld [vmem:[%s8083_s1 + $0x6] ss:$0 sm:$0xff]  ;;  %s7826_s9 = smov 7   ;;  %v4501_v9 = vld [vmem:[%s8083_s1 + $0x7] ss:$0 sm:$0xff]  ;;  %s7900_s19 = smov 8  }
  0x28   : > { %v4502_v10 = vld [vmem:[%s8083_s1 + $0x8] ss:$0 sm:$0xff]  ;;  %s7896_s28 = smov 9   ;;  %v4503_v11 = vld [vmem:[%s8083_s1 + $0x9] ss:$0 sm:$0xff]  ;;  %s7898_s6 = smov 10  }
  0x29   : > { %v4504_v12 = vld [vmem:[%s8083_s1 + $0xa] ss:$0 sm:$0xff]  ;;  %s7830_s17 = smov 11   ;;  %v4505_v14 = vld [vmem:[%s8083_s1 + $0xb] ss:$0 sm:$0xff]  ;;  %2240 = vst.msk [vmem:[#allocation3 + $0x8] sm:$0xff] %vm174_vm1, %v4810_v13 }
  0x2a   : > { %2237 = vst.msk [vmem:[#allocation3] sm:$0x3] %vm171_vm0, %v4810_v13  ;;  %v4506_v15 = vld [vmem:[%s8083_s1 + $0xc] ss:$0 sm:$0xff]  ;;  %s7832_s5 = smov 13   ;;  %s7904_s25 = smov 14  }
  0x2b   : > { %2238 = vst.msk [vmem:[#allocation3 + $0x12] sm:$0x3] %vm171_vm0, %v4810_v13  ;;  %v4507_v16 = vld [vmem:[%s8083_s1 + $0xd] ss:$0 sm:$0xff]  ;;  %v4508_v17 = vld [vmem:[%s8083_s1 + $0xe] ss:$0 sm:$0xff] }
  0x2c   : > { %2239 = vst.msk [vmem:[#allocation3] sm:$0xff] %vm174_vm1, %v4810_v13  ;;  %v4509_v20 = vld [vmem:[%s8083_s1 + $0xf] ss:$0 sm:$0xff]  ;;  %s7834_s10 = smov 16   ;;  %v4510_v25 = vld [vmem:[%s8083_s1 + $0x10] ss:$0 sm:$0xff] }
  0x2d   : > { %210 = vrot.lane.b32.xlu1 %v4495_v2, %s7890_s8  ;;  %2243 = vst.msk [vmem:[#allocation3 + $0x8] sm:$0xff] %vm179_vm2, %v4810_v13  ;;  %s7842_s24 = smov 127   ;;  %v4511_v30 = vld [vmem:[%s8083_s1 + $0x11] ss:$0 sm:$0xff]  ;;  %v4512_v34 = vld [vmem:[%s8083_s1 + $0x12] ss:$0 sm:$0xff] }
  0x2e   : > { %2242 = vst.msk [vmem:[#allocation3] sm:$0xff] %vm179_vm2, %v4810_v13  ;;  %s7844_s29 = smov 19   ;;  %v4513_v38 = vld [vmem:[%s8083_s1 + $0x13] ss:$0 sm:$0xff]  ;;  %v4514_v42 = vld [vmem:[%s8083_s1 + $0x14] ss:$0 sm:$0xff] }
  0x2f   : > { %188 = vrot.lane.b32.xlu0 %v170_v3, %s7828_s7  ;;  %178 = vst.msk [vmem:[#allocation2 + $0x10] sm:$0xf] %vm177_vm3, %v4810_v13  ;;  %v4515_v46 = vld [vmem:[%s8083_s1 + $0x15] ss:$0 sm:$0xff]  ;;  %v4516_v50 = vld [vmem:[%s8083_s1 + $0x16] ss:$0 sm:$0xff] }
  0x30   : > { %183 = vst.msk [vmem:[#allocation2 + $0x10] sm:$0xf] %vm182_vm4, %v4810_v13  ;;  %v4517_v54 = vld [vmem:[%s8083_s1 + $0x17] ss:$0 sm:$0xff]  ;;  %s8100_s21 = smov 123   ;;  %s8102_s18 = smov 122  }
  0x31   : > { %2241 = vst.msk [vmem:[#allocation3 + $0x10] sm:$0xf] %vm177_vm3, %v4810_v13  ;;  %s8103_s0 = smov 22   ;;  %s8104_s12 = smov 121  }
  0x32   : > { %2244 = vst.msk [vmem:[#allocation3 + $0x10] sm:$0xf] %vm182_vm4, %v4810_v13  ;;  %s8105_s14 = smov 23   ;;  %s8106_s3 = smov 120  }
  0x33   : > { %s8107_s23 = smov 1   ;;  %s8110_s15 = smov 118  }
  0x34   : > { %s8113_s22 = smov 116   ;;  %s8114_s16 = smov 115  }
  0x35   : > { %s8115_s13 = smov 114   ;;  %s8116_s4 = smov 113  }
  0x36   : > { %s8117_s2 = smov 112  }
  0x37   : > { %228 = vrot.lane.b32.xlu0 %v4496_v4, %s7908_s11 }
  0x3f   : > { %246 = vrot.lane.b32.xlu0 %v4497_v5, %s7906_s20 }
  0x47   : > { %264 = vrot.lane.b32.xlu0 %v4498_v6, %s7894_s27 }
  0x4f   : > { %282 = vrot.lane.b32.xlu0 %v4499_v7, %s7902_s30 }
  0x57   : > { %300 = vrot.lane.b32.xlu0 %v4500_v8, %s7826_s9  ;;  %s7838_s9 = smov 15  }
  0x5f   : > { %318 = vrot.lane.b32.xlu0 %v4501_v9, %s7900_s19 }
  0x67   : > { %336 = vrot.lane.b32.xlu0 %v4502_v10, %s7896_s28 }
  0x6f   : > { %354 = vrot.lane.b32.xlu0 %v4503_v11, %s7898_s6 }
  0x77   : > { %372 = vrot.lane.b32.xlu0 %v4504_v12, %s7830_s17  ;;  %s7840_s17 = smov 18  }
  0x7f   : > { %390 = vrot.lane.b32.xlu0 %v4505_v14, %s7828_s7  ;;  %s7846_s7 = smov 126  }
  0x87   : > { %408 = vrot.lane.b32.xlu0 %v4506_v15, %s7832_s5  ;;  %s7836_s5 = smov 17  }
  0x8f   : > { %426 = vrot.lane.b32.xlu0 %v4507_v16, %s7904_s25 }
  0x97   : > { %v4983_v18 = vpop.permute.xlu1 %200  ;;  %444 = vrot.lane.b32.xlu0 %v4508_v17, %s7838_s9  ;;  %s7854_s9 = smov 124  }
  0x99   : > { %v187_v19 = vpop.permute.xlu0 %186 }
  0x9a   : > { %193 = vst.msk [vmem:[#allocation2 + $0x2] sm:$0xff] %vm192_vm5, %v187_v19 }
  0x9f   : > { %462 = vrot.lane.b32.xlu0 %v4509_v20, %s7834_s10  ;;  %v211_v21 = vpop.permute.xlu1 %210  ;;  %s7850_s10 = smov 125  }
  0xa1   : > { %v4991_v22 = vld [vmem:[#allocation2] sm:$0xff]  ;;  %v189_v23 = vpop.permute.xlu0 %188 }
  0xa2   : > { %194 = vst.msk [vmem:[#allocation2 + $0xa] sm:$0xff] %vm192_vm5, %v189_v23  ;;  %v213_v24 = vmul.f32 %v211_v21, %v4991_v22 }
  0xa4   : > { %217 = vrot.lane.b32.xlu2 %v213_v24, %s7842_s24 }
  0xa7   : > { %480 = vrot.lane.b32.xlu0 %v4510_v25, %s7836_s5  ;;  %s7848_s5 = smov 20  }
  0xa9   : > { %v5000_v26 = vld [vmem:[#allocation2 + $0x8] sm:$0xff]  ;;  %v229_v27 = vpop.permute.xlu0 %228 }
  0xaa   : > { %v231_v28 = vmul.f32 %v229_v27, %v4991_v22  ;;  %v214_v29 = vmul.f32 %v211_v21, %v5000_v26  ;;  %v232_v32 = vmul.f32 %v229_v27, %v5000_v26 }
  0xac   : > { %219 = vrot.lane.b32.xlu2 %v214_v29, %s7842_s24  ;;  %235 = vrot.lane.b32.xlu1 %v231_v28, %s7846_s7  ;;  %s7858_s24 = smov 123  }
  0xaf   : > { %498 = vrot.lane.b32.xlu0 %v4511_v30, %s7840_s17  ;;  %s7852_s17 = smov 21  }
  0xb1   : > { %v247_v31 = vpop.permute.xlu0 %246 }
  0xb2   : > { %v249_v33 = vmul.f32 %v247_v31, %v4991_v22  ;;  %v250_v36 = vmul.f32 %v247_v31, %v5000_v26 }
  0xb4   : > { %237 = vrot.lane.b32.xlu2 %v232_v32, %s7846_s7  ;;  %253 = vrot.lane.b32.xlu1 %v249_v33, %s7850_s10  ;;  %s7914_s7 = smov 122  }
  0xb7   : > { %516 = vrot.lane.b32.xlu0 %v4512_v34, %s7844_s29  ;;  %s7856_s29 = smov 22  }
  0xb9   : > { %v265_v35 = vpop.permute.xlu0 %264 }
  0xba   : > { %v267_v37 = vmul.f32 %v265_v35, %v4991_v22  ;;  %v268_v40 = vmul.f32 %v265_v35, %v5000_v26 }
  0xbc   : > { %255 = vrot.lane.b32.xlu2 %v250_v36, %s7850_s10  ;;  %271 = vrot.lane.b32.xlu1 %v267_v37, %s7854_s9  ;;  %s7912_s10 = smov 121  }
  0xbf   : > { %534 = vrot.lane.b32.xlu0 %v4513_v38, %s7848_s5  ;;  %s7910_s5 = smov 23  }
  0xc1   : > { %v283_v39 = vpop.permute.xlu0 %282 }
  0xc2   : > { %v285_v41 = vmul.f32 %v283_v39, %v4991_v22  ;;  %v286_v44 = vmul.f32 %v283_v39, %v5000_v26 }
  0xc4   : > { %273 = vrot.lane.b32.xlu2 %v268_v40, %s7854_s9  ;;  %289 = vrot.lane.b32.xlu1 %v285_v41, %s7858_s24  ;;  %s7888_s9 = smov 120  }
  0xc7   : > { %552 = vrot.lane.b32.xlu0 %v4514_v42, %s7852_s17  ;;  %s7860_s17 = smov 119  }
  0xc9   : > { %v301_v43 = vpop.permute.xlu0 %300 }
  0xca   : > { %v303_v45 = vmul.f32 %v301_v43, %v4991_v22  ;;  %v304_v48 = vmul.f32 %v301_v43, %v5000_v26 }
  0xcc   : > { %291 = vrot.lane.b32.xlu2 %v286_v44, %s7858_s24  ;;  %307 = vrot.lane.b32.xlu1 %v303_v45, %s7914_s7  ;;  %s7862_s24 = smov 118   ;;  %v4518_v45 = vld [vmem:[%s8083_s1 + $0x18] ss:$0 sm:$0xff] }
  0xcf   : > { %570 = vrot.lane.b32.xlu0 %v4515_v46, %s7856_s29  ;;  %s7864_s29 = smov 117  }
  0xd1   : > { %v319_v47 = vpop.permute.xlu0 %318 }
  0xd2   : > { %v321_v49 = vmul.f32 %v319_v47, %v4991_v22  ;;  %v322_v52 = vmul.f32 %v319_v47, %v5000_v26 }
  0xd4   : > { %309 = vrot.lane.b32.xlu2 %v304_v48, %s7914_s7  ;;  %325 = vrot.lane.b32.xlu1 %v321_v49, %s7912_s10  ;;  %v4519_v48 = vld [vmem:[%s8083_s1 + $0x19] ss:$0 sm:$0xff]  ;;  %s8098_s7 = smov 124  }
  0xd7   : > { %588 = vrot.lane.b32.xlu0 %v4516_v50, %s7910_s5  ;;  %s8096_s5 = smov 125  }
  0xd9   : > { %v337_v51 = vpop.permute.xlu0 %336 }
  0xda   : > { %v339_v53 = vmul.f32 %v337_v51, %v4991_v22  ;;  %v340_v56 = vmul.f32 %v337_v51, %v5000_v26 }
  0xdc   : > { %327 = vrot.lane.b32.xlu2 %v322_v52, %s7912_s10  ;;  %343 = vrot.lane.b32.xlu1 %v339_v53, %s7888_s9  ;;  %v4521_v53 = vld [vmem:[%s8083_s1 + $0x1b] ss:$0 sm:$0xff]  ;;  %s8101_s10 = smov 21  }
  0xdf   : > { %608 = vrot.lane.b32.xlu0 %v4517_v54, %s7884_s26  ;;  %s8088_s26 = smov 12  }
  0xe1   : > { %v355_v55 = vpop.permute.xlu0 %354 }
  0xe2   : > { %v357_v57 = vmul.f32 %v355_v55, %v4991_v22  ;;  %v358_v59 = vmul.f32 %v355_v55, %v5000_v26  ;;  %v4522_v55 = vld [vmem:[%s8083_s1 + $0x1c] ss:$0 sm:$0xff] }
  0xe4   : > { %345 = vrot.lane.b32.xlu2 %v340_v56, %s7888_s9  ;;  %361 = vrot.lane.b32.xlu1 %v357_v57, %s7860_s17  ;;  %s8087_s9 = smov 11  }
  0xe9   : > { %v373_v58 = vpop.permute.xlu0 %372 }
  0xea   : > { %v375_v60 = vmul.f32 %v373_v58, %v4991_v22  ;;  %v376_v62 = vmul.f32 %v373_v58, %v5000_v26  ;;  %v4523_v58 = vld [vmem:[%s8083_s1 + $0x1d] ss:$0 sm:$0xff] }
  0xec   : > { %363 = vrot.lane.b32.xlu2 %v358_v59, %s7860_s17  ;;  %379 = vrot.lane.b32.xlu1 %v375_v60, %s7862_s24  ;;  %s7866_s17 = smov 116  }
  0xf1   : > { %v391_v61 = vpop.permute.xlu0 %390 }
  0xf2   : > { %v393_v63 = vmul.f32 %v391_v61, %v4991_v22  ;;  %v394_v1 = vmul.f32 %v391_v61, %v5000_v26  ;;  %v4524_v61 = vld [vmem:[%s8083_s1 + $0x1e] ss:$0 sm:$0xff] }
  0xf4   : > { %381 = vrot.lane.b32.xlu2 %v376_v62, %s7862_s24  ;;  %397 = vrot.lane.b32.xlu1 %v393_v63, %s7864_s29  ;;  %s7868_s24 = smov 115  }
  0xf9   : > { %v409_v0 = vpop.permute.xlu0 %408 }
  0xfa   : > { %v411_v2 = vmul.f32 %v409_v0, %v4991_v22  ;;  %v412_v4 = vmul.f32 %v409_v0, %v5000_v26  ;;  %v4525_v0 = vld [vmem:[%s8083_s1 + $0x1f] ss:$0 sm:$0xff] }
  0xfc   : > { %399 = vrot.lane.b32.xlu2 %v394_v1, %s7864_s29  ;;  %415 = vrot.lane.b32.xlu1 %v411_v2, %s7866_s17  ;;  %s7870_s29 = smov 114  }
  0xfe   : > { %v5116_v35 = vpop.permute.xlu2 %217 }
 0x101   : > { %v427_v3 = vpop.permute.xlu0 %426 }
 0x102   : > { %v429_v5 = vmul.f32 %v427_v3, %v4991_v22  ;;  %v430_v7 = vmul.f32 %v427_v3, %v5000_v26  ;;  %v4526_v3 = vld [vmem:[%s8083_s1 + $0x20] ss:$0 sm:$0xff] }
 0x104   : > { %417 = vrot.lane.b32.xlu2 %v412_v4, %s7866_s17  ;;  %433 = vrot.lane.b32.xlu1 %v429_v5, %s7868_s24  ;;  %s7872_s17 = smov 113   ;;  %v4527_v5 = vld [vmem:[%s8083_s1 + $0x21] ss:$0 sm:$0xff] }
 0x106   : > { %v5124_v40 = vpop.permute.xlu2 %219 }
 0x109   : > { %v445_v6 = vpop.permute.xlu0 %444 }
 0x10a   : > { %v447_v8 = vmul.f32 %v445_v6, %v4991_v22  ;;  %v448_v10 = vmul.f32 %v445_v6, %v5000_v26 }
 0x10c   : > { %435 = vrot.lane.b32.xlu2 %v430_v7, %s7868_s24  ;;  %451 = vrot.lane.b32.xlu1 %v447_v8, %s7870_s29  ;;  %s7874_s24 = smov 112   ;;  %v4528_v8 = vld [vmem:[%s8083_s1 + $0x22] ss:$0 sm:$0xff] }
 0x10e   : > { %v5136_v47 = vpop.permute.xlu2 %237 }
 0x111   : > { %v463_v9 = vpop.permute.xlu0 %462 }
 0x112   : > { %v465_v11 = vmul.f32 %v463_v9, %v4991_v22  ;;  %v466_v13 = vmul.f32 %v463_v9, %v5000_v26 }
 0x114   : > { %453 = vrot.lane.b32.xlu2 %v448_v10, %s7870_s29  ;;  %469 = vrot.lane.b32.xlu1 %v465_v11, %s7872_s17  ;;  %s7876_s29 = smov 111   ;;  %v4529_v11 = vld [vmem:[%s8083_s1 + $0x23] ss:$0 sm:$0xff] }
 0x116   : > { %v5146_v49 = vpop.permute.xlu2 %255 }
 0x119   : > { %v481_v12 = vpop.permute.xlu0 %480 }
 0x11a   : > { %v483_v14 = vmul.f32 %v481_v12, %v4991_v22  ;;  %v484_v17 = vmul.f32 %v481_v12, %v5000_v26 }
 0x11c   : > { %471 = vrot.lane.b32.xlu2 %v466_v13, %s7872_s17  ;;  %487 = vrot.lane.b32.xlu1 %v483_v14, %s7874_s24  ;;  %s7878_s17 = smov 110   ;;  %v4530_v14 = vld [vmem:[%s8083_s1 + $0x24] ss:$0 sm:$0xff] }
 0x11e   : > { %v5090_v15 = vpop.permute.xlu1 %235  ;;  %v5156_v52 = vpop.permute.xlu2 %273 }
 0x121   : > { %v499_v16 = vpop.permute.xlu0 %498 }
 0x122   : > { %v501_v19 = vmul.f32 %v499_v16, %v4991_v22  ;;  %v502_v23 = vmul.f32 %v499_v16, %v5000_v26 }
 0x124   : > { %489 = vrot.lane.b32.xlu2 %v484_v17, %s7874_s24  ;;  %505 = vrot.lane.b32.xlu1 %v501_v19, %s7876_s29  ;;  %s7880_s24 = smov 109   ;;  %v4531_v19 = vld [vmem:[%s8083_s1 + $0x25] ss:$0 sm:$0xff] }
 0x126   : > { %v5096_v20 = vpop.permute.xlu1 %253  ;;  %v5167_v56 = vpop.permute.xlu2 %291 }
 0x129   : > { %v517_v21 = vpop.permute.xlu0 %516 }
 0x12a   : > { %v519_v24 = vmul.f32 %v517_v21, %v4991_v22  ;;  %v520_v28 = vmul.f32 %v517_v21, %v5000_v26 }
 0x12c   : > { %507 = vrot.lane.b32.xlu2 %v502_v23, %s7876_s29  ;;  %523 = vrot.lane.b32.xlu1 %v519_v24, %s7878_s17  ;;  %s7882_s29 = smov 108   ;;  %v4532_v23 = vld [vmem:[%s8083_s1 + $0x26] ss:$0 sm:$0xff] }
 0x12e   : > { %v5102_v25 = vpop.permute.xlu1 %271  ;;  %v5175_v59 = vpop.permute.xlu2 %309 }
 0x131   : > { %v535_v27 = vpop.permute.xlu0 %534 }
 0x132   : > { %v537_v29 = vmul.f32 %v535_v27, %v4991_v22  ;;  %v538_v32 = vmul.f32 %v535_v27, %v5000_v26  ;;  %v5246_v27 = vld [vmem:[#allocation2 + $0x1] sm:$0xff] }
 0x134   : > { %525 = vrot.lane.b32.xlu2 %v520_v28, %s7878_s17  ;;  %541 = vrot.lane.b32.xlu1 %v537_v29, %s7880_s24  ;;  %s7886_s17 = smov 107   ;;  %v5248_v28 = vld [vmem:[#allocation2 + $0x9] sm:$0xff] }
 0x136   : > { %v5108_v30 = vpop.permute.xlu1 %289  ;;  %v5184_v62 = vpop.permute.xlu2 %327 }
 0x139   : > { %v553_v31 = vpop.permute.xlu0 %552 }
 0x13a   : > { %v555_v33 = vmul.f32 %v553_v31, %v4991_v22  ;;  %v556_v37 = vmul.f32 %v553_v31, %v5000_v26 }
 0x13c   : > { %543 = vrot.lane.b32.xlu2 %v538_v32, %s7880_s24  ;;  %559 = vrot.lane.b32.xlu1 %v555_v33, %s7882_s29  ;;  %s7892_s24 = smov 106   ;;  %v4533_v33 = vld [vmem:[%s8083_s1 + $0x27] ss:$0 sm:$0xff] }
 0x13e   : > { %v5114_v34 = vpop.permute.xlu1 %307  ;;  %v5194_v2 = vpop.permute.xlu2 %345 }
 0x141   : > { %v571_v36 = vpop.permute.xlu0 %570 }
 0x142   : > { %v573_v38 = vmul.f32 %v571_v36, %v4991_v22  ;;  %v574_v42 = vmul.f32 %v571_v36, %v5000_v26 }
 0x144   : > { %561 = vrot.lane.b32.xlu2 %v556_v37, %s7882_s29  ;;  %577 = vrot.lane.b32.xlu1 %v573_v38, %s7886_s17  ;;  %s8111_s29 = smov 117  }
 0x146   : > { %v5122_v39 = vpop.permute.xlu1 %325  ;;  %v5205_v6 = vpop.permute.xlu2 %363 }
 0x149   : > { %v589_v41 = vpop.permute.xlu0 %588 }
 0x14a   : > { %v591_v43 = vmul.f32 %v589_v41, %v4991_v22  ;;  %v592_v46 = vmul.f32 %v589_v41, %v5000_v26  ;;  %v4520_v26 = vld [vmem:[%s8083_s1 + $0x1a] ss:$0 sm:$0xff] }
 0x14c   : > { %579 = vrot.lane.b32.xlu2 %v574_v42, %s7886_s17  ;;  %595 = vrot.lane.b32.xlu1 %v591_v43, %s7892_s24  ;;  %s8092_s17 = smov 127   ;;  %v4534_v42 = vld [vmem:[%s8083_s1 + $0x28] ss:$0 sm:$0xff] }
 0x14e   : > { %v5130_v44 = vpop.permute.xlu1 %343  ;;  %v5213_v9 = vpop.permute.xlu2 %381 }
 0x154   : > { %597 = vrot.lane.b32.xlu2 %v592_v46, %s7892_s24  ;;  %618 = vrot.lane.b32.xlu1 %v4518_v45, %s7890_s8  ;;  %s8086_s8 = smov 7   ;;  %s8095_s24 = smov 18  }
 0x156   : > { %v5140_v22 = vpop.permute.xlu1 %361  ;;  %v5222_v12 = vpop.permute.xlu2 %399 }
 0x15c   : > { %636 = vrot.lane.b32.xlu1 %v4519_v48, %s7908_s11  ;;  %s8099_s11 = smov 20  }
 0x15e   : > { %v5148_v50 = vpop.permute.xlu1 %379  ;;  %v5232_v17 = vpop.permute.xlu2 %417 }
 0x164   : > { %654 = vrot.lane.b32.xlu1 %v4520_v26, %s7906_s20  ;;  %s8094_s20 = smov 126   ;;  %v4535_v26 = vld [vmem:[%s8083_s1 + $0x29] ss:$0 sm:$0xff] }
 0x166   : > { %v5154_v51 = vpop.permute.xlu1 %397  ;;  %v5243_v24 = vpop.permute.xlu2 %435 }
 0x16c   : > { %672 = vrot.lane.b32.xlu1 %v4521_v53, %s7894_s27  ;;  %s8089_s27 = smov 13  }
 0x16e   : > { %v5162_v54 = vpop.permute.xlu1 %415  ;;  %v5257_v36 = vpop.permute.xlu2 %453 }
 0x174   : > { %690 = vrot.lane.b32.xlu1 %v4522_v55, %s7902_s30  ;;  %s8093_s30 = smov 17  }
 0x176   : > { %v5170_v57 = vpop.permute.xlu1 %433  ;;  %v5268_v43 = vpop.permute.xlu2 %471 }
 0x17c   : > { %708 = vrot.lane.b32.xlu1 %v4523_v58, %s8086_s8 }
 0x17e   : > { %v5178_v60 = vpop.permute.xlu1 %451  ;;  %v5278_v55 = vpop.permute.xlu2 %489 }
 0x184   : > { %726 = vrot.lane.b32.xlu1 %v4524_v61, %s7900_s19  ;;  %s8091_s19 = smov 16  }
 0x186   : > { %v5186_v63 = vpop.permute.xlu1 %469 }
 0x18c   : > { %744 = vrot.lane.b32.xlu1 %v4525_v0, %s7896_s28  ;;  %v4536_v0 = vld [vmem:[%s8083_s1 + $0x2a] ss:$0 sm:$0xff]  ;;  %s8108_s28 = smov 119  }
 0x18e   : > { %v5192_v1 = vpop.permute.xlu1 %487 }
 0x194   : > { %762 = vrot.lane.b32.xlu1 %v4526_v3, %s7898_s6  ;;  %s8090_s6 = smov 15  }
 0x196   : > { %v5200_v4 = vpop.permute.xlu1 %505 }
 0x19c   : > { %780 = vrot.lane.b32.xlu1 %v4527_v5, %s8087_s9 }
 0x19e   : > { %v5208_v7 = vpop.permute.xlu1 %523 }
 0x1a4   : > { %798 = vrot.lane.b32.xlu1 %v4528_v8, %s8088_s26 }
 0x1a6   : > { %v5216_v10 = vpop.permute.xlu1 %541 }
 0x1ac   : > { %816 = vrot.lane.b32.xlu1 %v4529_v11, %s8089_s27  ;;  %v4537_v11 = vld [vmem:[%s8083_s1 + $0x2b] ss:$0 sm:$0xff] }
 0x1ae   : > { %v5224_v13 = vpop.permute.xlu1 %559 }
 0x1b4   : > { %834 = vrot.lane.b32.xlu1 %v4530_v14, %s7904_s25  ;;  %s8097_s25 = smov 19   ;;  %v5293_v14 = vpop.permute.xlu2 %507 }
 0x1b6   : > { %v5230_v16 = vpop.permute.xlu1 %577 }
 0x1bc   : > { %852 = vrot.lane.b32.xlu1 %v4531_v19, %s8090_s6 }
 0x1be   : > { %v5238_v21 = vpop.permute.xlu1 %595 }
 0x1c4   : > { %870 = vrot.lane.b32.xlu1 %v4532_v23, %s8091_s19 }
 0x1c6   : > { %v619_v29 = vpop.permute.xlu1 %618 }
 0x1c7   : > { %v621_v31 = vmul.f32 %v619_v29, %v5246_v27  ;;  %v622_v32 = vmul.f32 %v619_v29, %v5248_v28 }
 0x1c9   : > { %627 = vrot.lane.b32.xlu0 %v622_v32, %s8092_s17  ;;  %625 = vrot.lane.b32.xlu2 %v621_v31, %s8092_s17  ;;  %v4538_v31 = vld [vmem:[%s8083_s1 + $0x2c] ss:$0 sm:$0xff]  ;;  %v5305_v32 = vpop.permute.xlu2 %525 }
 0x1cc   : > { %888 = vrot.lane.b32.xlu1 %v4533_v33, %s8093_s30 }
 0x1ce   : > { %v637_v37 = vpop.permute.xlu1 %636 }
 0x1cf   : > { %v639_v38 = vmul.f32 %v637_v37, %v5246_v27  ;;  %v640_v41 = vmul.f32 %v637_v37, %v5248_v28 }
 0x1d1   : > { %645 = vrot.lane.b32.xlu0 %v640_v41, %s8094_s20  ;;  %643 = vrot.lane.b32.xlu2 %v639_v38, %s8094_s20  ;;  %v4539_v41 = vld [vmem:[%s8083_s1 + $0x2d] ss:$0 sm:$0xff] }
 0x1d4   : > { %906 = vrot.lane.b32.xlu1 %v4534_v42, %s8095_s24  ;;  %v5316_v42 = vpop.permute.xlu2 %543 }
 0x1d6   : > { %v655_v45 = vpop.permute.xlu1 %654 }
 0x1d7   : > { %v657_v46 = vmul.f32 %v655_v45, %v5246_v27  ;;  %v658_v48 = vmul.f32 %v655_v45, %v5248_v28 }
 0x1d9   : > { %663 = vrot.lane.b32.xlu0 %v658_v48, %s8096_s5  ;;  %661 = vrot.lane.b32.xlu2 %v657_v46, %s8096_s5 }
 0x1dc   : > { %924 = vrot.lane.b32.xlu1 %v4535_v26, %s8097_s25  ;;  %v4540_v26 = vld [vmem:[%s8083_s1 + $0x2e] ss:$0 sm:$0xff] }
 0x1de   : > { %v673_v53 = vpop.permute.xlu1 %672 }
 0x1df   : > { %v675_v58 = vmul.f32 %v673_v53, %v5246_v27  ;;  %v676_v61 = vmul.f32 %v673_v53, %v5248_v28 }
 0x1e1   : > { %681 = vrot.lane.b32.xlu0 %v676_v61, %s8098_s7  ;;  %679 = vrot.lane.b32.xlu2 %v675_v58, %s8098_s7  ;;  %v5326_v58 = vpop.permute.xlu2 %561 }
 0x1e4   : > { %942 = vrot.lane.b32.xlu1 %v4536_v0, %s8099_s11 }
 0x1e6   : > { %v691_v3 = vpop.permute.xlu1 %690 }
 0x1e7   : > { %v693_v5 = vmul.f32 %v691_v3, %v5246_v27  ;;  %v694_v8 = vmul.f32 %v691_v3, %v5248_v28 }
 0x1e9   : > { %699 = vrot.lane.b32.xlu0 %v694_v8, %s8100_s21  ;;  %697 = vrot.lane.b32.xlu2 %v693_v5, %s8100_s21 }
 0x1ec   : > { %960 = vrot.lane.b32.xlu1 %v4537_v11, %s8101_s10  ;;  %v5334_v11 = vpop.permute.xlu2 %579 }
 0x1ed   : > { %8109 = vst [vmem:[#allocation17_spill] sm:$0xff] %v5334_v11 }
 0x1ee   : > { %v709_v19 = vpop.permute.xlu1 %708 }
 0x1ef   : > { %v711_v23 = vmul.f32 %v709_v19, %v5246_v27  ;;  %v712_v29 = vmul.f32 %v709_v19, %v5248_v28 }
 0x1f1   : > { %717 = vrot.lane.b32.xlu0 %v712_v29, %s8102_s18  ;;  %715 = vrot.lane.b32.xlu2 %v711_v23, %s8102_s18 }
 0x1f4   : > { %978 = vrot.lane.b32.xlu1 %v4538_v31, %s8103_s0  ;;  %v5342_v31 = vpop.permute.xlu2 %597 }
 0x1f5   : > { %8112 = vst [vmem:[#allocation18_spill] sm:$0xff] %v5342_v31 }
 0x1f6   : > { %v727_v33 = vpop.permute.xlu1 %726 }
 0x1f7   : > { %v729_v37 = vmul.f32 %v727_v33, %v5246_v27  ;;  %v730_v38 = vmul.f32 %v727_v33, %v5248_v28 }
 0x1f9   : > { %735 = vrot.lane.b32.xlu0 %v730_v38, %s8104_s12  ;;  %733 = vrot.lane.b32.xlu2 %v729_v37, %s8104_s12 }
 0x1fc   : > { %996 = vrot.lane.b32.xlu1 %v4539_v41, %s8105_s14  ;;  %s8171_s14 = smov 116  }
 0x1fe   : > { %v745_v45 = vpop.permute.xlu1 %744 }
 0x1ff   : > { %v747_v46 = vmul.f32 %v745_v45, %v5246_v27  ;;  %v748_v48 = vmul.f32 %v745_v45, %v5248_v28 }
 0x201   : > { %753 = vrot.lane.b32.xlu0 %v748_v48, %s8106_s3  ;;  %751 = vrot.lane.b32.xlu2 %v747_v46, %s8106_s3 }
 0x204   : > { %1016 = vrot.lane.b32.xlu1 %v4540_v26, %s8107_s23  ;;  %s8174_s23 = smov 114  }
 0x206   : > { %v763_v53 = vpop.permute.xlu1 %762 }
 0x207   : > { %v765_v61 = vmul.f32 %v763_v53, %v5246_v27  ;;  %v766_v0 = vmul.f32 %v763_v53, %v5248_v28 }
 0x209   : > { %771 = vrot.lane.b32.xlu0 %v766_v0, %s8108_s28  ;;  %769 = vrot.lane.b32.xlu2 %v765_v61, %s8108_s28 }
 0x20e   : > { %v781_v3 = vpop.permute.xlu1 %780 }
 0x20f   : > { %v783_v5 = vmul.f32 %v781_v3, %v5246_v27  ;;  %v784_v8 = vmul.f32 %v781_v3, %v5248_v28 }
 0x211   : > { %789 = vrot.lane.b32.xlu0 %v784_v8, %s8110_s15  ;;  %787 = vrot.lane.b32.xlu2 %v783_v5, %s8110_s15 }
 0x216   : > { %v799_v19 = vpop.permute.xlu1 %798 }
 0x217   : > { %v801_v23 = vmul.f32 %v799_v19, %v5246_v27  ;;  %v802_v29 = vmul.f32 %v799_v19, %v5248_v28 }
 0x219   : > { %807 = vrot.lane.b32.xlu0 %v802_v29, %s8111_s29  ;;  %805 = vrot.lane.b32.xlu2 %v801_v23, %s8111_s29  ;;  %s8132_s29 = smov 3  }
 0x21e   : > { %v817_v33 = vpop.permute.xlu1 %816 }
 0x21f   : > { %v819_v37 = vmul.f32 %v817_v33, %v5246_v27  ;;  %v820_v38 = vmul.f32 %v817_v33, %v5248_v28 }
 0x221   : > { %825 = vrot.lane.b32.xlu0 %v820_v38, %s8113_s22  ;;  %823 = vrot.lane.b32.xlu2 %v819_v37, %s8113_s22  ;;  %s8138_s22 = smov 5  }
 0x223   : > { %v5348_v41 = vpop.permute.xlu2 %625 }
 0x226   : > { %v835_v45 = vpop.permute.xlu1 %834 }
 0x227   : > { %v837_v46 = vmul.f32 %v835_v45, %v5246_v27  ;;  %v838_v48 = vmul.f32 %v835_v45, %v5248_v28 }
 0x229   : > { %843 = vrot.lane.b32.xlu0 %v838_v48, %s8114_s16  ;;  %841 = vrot.lane.b32.xlu2 %v837_v46, %s8114_s16  ;;  %s8135_s16 = smov 4  }
 0x22b   : > { %v5354_v26 = vpop.permute.xlu2 %643 }
 0x22e   : > { %v853_v53 = vpop.permute.xlu1 %852 }
 0x22f   : > { %v855_v61 = vmul.f32 %v853_v53, %v5246_v27  ;;  %v856_v0 = vmul.f32 %v853_v53, %v5248_v28 }
 0x231   : > { %861 = vrot.lane.b32.xlu0 %v856_v0, %s8115_s13  ;;  %859 = vrot.lane.b32.xlu2 %v855_v61, %s8115_s13  ;;  %s8118_s13 = smov 111  }
 0x233   : > { %v5360_v3 = vpop.permute.xlu2 %661 }
 0x236   : > { %v871_v5 = vpop.permute.xlu1 %870 }
 0x237   : > { %v873_v8 = vmul.f32 %v871_v5, %v5246_v27  ;;  %v874_v19 = vmul.f32 %v871_v5, %v5248_v28 }
 0x239   : > { %879 = vrot.lane.b32.xlu0 %v874_v19, %s8116_s4  ;;  %877 = vrot.lane.b32.xlu2 %v873_v8, %s8116_s4  ;;  %s8119_s4 = smov 110  }
 0x23b   : > { %v5366_v23 = vpop.permute.xlu2 %679 }
 0x23e   : > { %v889_v29 = vpop.permute.xlu1 %888 }
 0x23f   : > { %v891_v33 = vmul.f32 %v889_v29, %v5246_v27  ;;  %v892_v37 = vmul.f32 %v889_v29, %v5248_v28 }
 0x241   : > { %897 = vrot.lane.b32.xlu0 %v892_v37, %s8117_s2  ;;  %895 = vrot.lane.b32.xlu2 %v891_v33, %s8117_s2  ;;  %s8120_s2 = smov 109  }
 0x243   : > { %v5372_v38 = vpop.permute.xlu2 %697 }
 0x246   : > { %v907_v45 = vpop.permute.xlu1 %906 }
 0x247   : > { %v909_v46 = vmul.f32 %v907_v45, %v5246_v27  ;;  %v910_v48 = vmul.f32 %v907_v45, %v5248_v28 }
 0x249   : > { %915 = vrot.lane.b32.xlu0 %v910_v48, %s8118_s13  ;;  %913 = vrot.lane.b32.xlu2 %v909_v46, %s8118_s13  ;;  %s8122_s13 = smov 108  }
 0x24b   : > { %v5378_v53 = vpop.permute.xlu2 %715 }
 0x24e   : > { %v925_v61 = vpop.permute.xlu1 %924 }
 0x24f   : > { %v927_v0 = vmul.f32 %v925_v61, %v5246_v27  ;;  %v928_v5 = vmul.f32 %v925_v61, %v5248_v28 }
 0x251   : > { %933 = vrot.lane.b32.xlu0 %v928_v5, %s8119_s4  ;;  %931 = vrot.lane.b32.xlu2 %v927_v0, %s8119_s4  ;;  %v5398_v0 = vpop.permute.xlu0 %608  ;;  %s8173_s4 = smov 115  }
 0x253   : > { %v5384_v8 = vpop.permute.xlu2 %733 }
 0x256   : > { %v943_v19 = vpop.permute.xlu1 %942 }
 0x257   : > { %v945_v29 = vmul.f32 %v943_v19, %v5246_v27  ;;  %v946_v33 = vmul.f32 %v943_v19, %v5248_v28 }
 0x259   : > { %951 = vrot.lane.b32.xlu0 %v946_v33, %s8120_s2  ;;  %949 = vrot.lane.b32.xlu2 %v945_v29, %s8120_s2  ;;  %s8124_s2 = smov 107  }
 0x25b   : > { %v5390_v37 = vpop.permute.xlu2 %751 }
 0x25c   : > { %8121 = vst [vmem:[#allocation19_spill] sm:$0xff] %v5390_v37 }
 0x25e   : > { %v961_v45 = vpop.permute.xlu1 %960 }
 0x25f   : > { %v963_v46 = vmul.f32 %v961_v45, %v5246_v27  ;;  %v964_v48 = vmul.f32 %v961_v45, %v5248_v28  ;;  %v5406_v45 = vpop.permute.xlu0 %627 }
 0x260   : > { %8126 = vst [vmem:[#allocation22_spill] sm:$0xff] %v5406_v45 }
 0x261   : > { %969 = vrot.lane.b32.xlu0 %v964_v48, %s8122_s13  ;;  %967 = vrot.lane.b32.xlu2 %v963_v46, %s8122_s13  ;;  %s8127_s13 = smov 106  }
 0x263   : > { %v5396_v61 = vpop.permute.xlu2 %769 }
 0x264   : > { %8123 = vst [vmem:[#allocation20_spill] sm:$0xff] %v5396_v61 }
 0x266   : > { %v979_v5 = vpop.permute.xlu1 %978 }
 0x267   : > { %v981_v19 = vmul.f32 %v979_v5, %v5246_v27  ;;  %v982_v29 = vmul.f32 %v979_v5, %v5248_v28  ;;  %v4541_v5 = vld [vmem:[%s8083_s1 + $0x2f] ss:$0 sm:$0xff] }
 0x269   : > { %987 = vrot.lane.b32.xlu0 %v982_v29, %s8124_s2  ;;  %985 = vrot.lane.b32.xlu2 %v981_v19, %s8124_s2  ;;  %v5417_v19 = vpop.permute.xlu0 %645  ;;  %s8130_s2 = smov 2  }
 0x26a   : > { %8129 = vst [vmem:[#allocation24_spill] sm:$0xff] %v5417_v19  ;;  %v4544_v19 = vld [vmem:[%s8083_s1 + $0x32] ss:$0 sm:$0xff] }
 0x26b   : > { %v5404_v33 = vpop.permute.xlu2 %787 }
 0x26c   : > { %8125 = vst [vmem:[#allocation21_spill] sm:$0xff] %v5404_v33 }
 0x26e   : > { %v997_v48 = vpop.permute.xlu1 %996 }
 0x26f   : > { %v999_v46 = vmul.f32 %v997_v48, %v5246_v27  ;;  %v1000_v31 = vmul.f32 %v997_v48, %v5248_v28  ;;  %v4542_v27 = vld [vmem:[%s8083_s1 + $0x30] ss:$0 sm:$0xff]  ;;  %v4543_v48 = vld [vmem:[%s8083_s1 + $0x31] ss:$0 sm:$0xff] }
 0x271   : > { %1005 = vrot.lane.b32.xlu0 %v1000_v31, %s8127_s13  ;;  %1003 = vrot.lane.b32.xlu2 %v999_v46, %s8127_s13  ;;  %v5426_v28 = vpop.permute.xlu0 %663  ;;  %s8141_s13 = smov 6  }
 0x272   : > { %8133 = vst [vmem:[#allocation26_spill] sm:$0xff] %v5426_v28  ;;  %v4545_v28 = vld [vmem:[%s8083_s1 + $0x33] ss:$0 sm:$0xff] }
 0x273   : > { %v5412_v61 = vpop.permute.xlu2 %805 }
 0x274   : > { %8128 = vst [vmem:[#allocation23_spill] sm:$0xff] %v5412_v61 }
 0x279   : > { %1026 = vrot.lane.b32.xlu2 %v4541_v5, %s8130_s2  ;;  %v5436_v5 = vpop.permute.xlu0 %681  ;;  %s8151_s2 = smov 10  }
 0x27a   : > { %8137 = vst [vmem:[#allocation29_spill] sm:$0xff] %v5436_v5  ;;  %v4546_v5 = vld [vmem:[%s8083_s1 + $0x34] ss:$0 sm:$0xff] }
 0x27b   : > { %v5420_v29 = vpop.permute.xlu2 %823 }
 0x27c   : > { %8131 = vst [vmem:[#allocation25_spill] sm:$0xff] %v5420_v29 }
 0x281   : > { %1044 = vrot.lane.b32.xlu2 %v4542_v27, %s8132_s29  ;;  %s8145_s29 = smov 8  }
 0x283   : > { %v5428_v31 = vpop.permute.xlu2 %841 }
 0x284   : > { %8134 = vst [vmem:[#allocation27_spill] sm:$0xff] %v5428_v31  ;;  %v5447_v31 = vpop.permute.xlu0 %699 }
 0x285   : > { %8140 = vst [vmem:[#allocation31_spill] sm:$0xff] %v5447_v31 }
 0x289   : > { %1062 = vrot.lane.b32.xlu2 %v4543_v48, %s8135_s16  ;;  %s8148_s16 = smov 9  }
 0x28b   : > { %v5434_v46 = vpop.permute.xlu2 %859 }
 0x28c   : > { %8136 = vst [vmem:[#allocation28_spill] sm:$0xff] %v5434_v46  ;;  %v5455_v46 = vpop.permute.xlu0 %717 }
 0x28d   : > { %8143 = vst [vmem:[#allocation33_spill] sm:$0xff] %v5455_v46 }
 0x291   : > { %1080 = vrot.lane.b32.xlu2 %v4544_v19, %s8138_s22 }
 0x293   : > { %v5442_v27 = vpop.permute.xlu2 %877 }
 0x294   : > { %8139 = vst [vmem:[#allocation30_spill] sm:$0xff] %v5442_v27  ;;  %v4547_v27 = vld [vmem:[%s8083_s1 + $0x35] ss:$0 sm:$0xff]  ;;  %v5464_v31 = vpop.permute.xlu0 %735 }
 0x295   : > { %8146 = vst [vmem:[#allocation35_spill] sm:$0xff] %v5464_v31  ;;  %v4550_v31 = vld [vmem:[%s8083_s1 + $0x38] ss:$0 sm:$0xff] }
 0x299   : > { %1098 = vrot.lane.b32.xlu2 %v4545_v28, %s8141_s13  ;;  %s8158_s13 = smov 14  }
 0x29b   : > { %v5450_v48 = vpop.permute.xlu2 %895 }
 0x29c   : > { %8142 = vst [vmem:[#allocation32_spill] sm:$0xff] %v5450_v48  ;;  %v4548_v48 = vld [vmem:[%s8083_s1 + $0x36] ss:$0 sm:$0xff] }
 0x2a1   : > { %1116 = vrot.lane.b32.xlu2 %v4546_v5, %s8086_s8  ;;  %v5474_v5 = vpop.permute.xlu0 %753  ;;  %s8169_s8 = smov 1  }
 0x2a2   : > { %8150 = vst [vmem:[#allocation38_spill] sm:$0xff] %v5474_v5  ;;  %v4551_v5 = vld [vmem:[%s8083_s1 + $0x39] ss:$0 sm:$0xff] }
 0x2a3   : > { %v5458_v19 = vpop.permute.xlu2 %913 }
 0x2a4   : > { %8144 = vst [vmem:[#allocation34_spill] sm:$0xff] %v5458_v19  ;;  %v4549_v19 = vld [vmem:[%s8083_s1 + $0x37] ss:$0 sm:$0xff] }
 0x2a9   : > { %1134 = vrot.lane.b32.xlu2 %v4547_v27, %s8145_s29  ;;  %s8166_s29 = smov 23  }
 0x2ab   : > { %v5466_v28 = vpop.permute.xlu2 %931 }
 0x2ac   : > { %8147 = vst [vmem:[#allocation36_spill] sm:$0xff] %v5466_v28  ;;  %v5485_v28 = vpop.permute.xlu0 %771 }
 0x2ad   : > { %8153 = vst [vmem:[#allocation40_spill] sm:$0xff] %v5485_v28 }
 0x2b1   : > { %1152 = vrot.lane.b32.xlu2 %v4548_v48, %s8148_s16 }
 0x2b3   : > { %v5472_v46 = vpop.permute.xlu2 %949 }
 0x2b4   : > { %8149 = vst [vmem:[#allocation37_spill] sm:$0xff] %v5472_v46  ;;  %v5493_v46 = vpop.permute.xlu0 %789 }
 0x2b5   : > { %8155 = vst [vmem:[#allocation42_spill] sm:$0xff] %v5493_v46 }
 0x2b9   : > { %1170 = vrot.lane.b32.xlu2 %v4549_v19, %s8151_s2 }
 0x2bb   : > { %v5480_v27 = vpop.permute.xlu2 %967 }
 0x2bc   : > { %8152 = vst [vmem:[#allocation39_spill] sm:$0xff] %v5480_v27  ;;  %v4552_v27 = vld [vmem:[%s8083_s1 + $0x3a] ss:$0 sm:$0xff]  ;;  %v5502_v28 = vpop.permute.xlu0 %807 }
 0x2bd   : > { %8157 = vst [vmem:[#allocation44_spill] sm:$0xff] %v5502_v28 }
 0x2c1   : > { %1188 = vrot.lane.b32.xlu2 %v4550_v31, %s8087_s9  ;;  %v5504_v31 = vld [vmem:[#allocation2 + $0x2] sm:$0xff] }
 0x2c3   : > { %v5488_v48 = vpop.permute.xlu2 %985 }
 0x2c4   : > { %8154 = vst [vmem:[#allocation41_spill] sm:$0xff] %v5488_v48  ;;  %v5506_v48 = vld [vmem:[#allocation2 + $0xa] sm:$0xff]  ;;  %v5516_v28 = vpop.permute.xlu0 %825 }
 0x2c5   : > { %8159 = vst [vmem:[#allocation45_spill] sm:$0xff] %v5516_v28  ;;  %v4555_v28 = vld [vmem:[%s8083_s1 + $0x3d] ss:$0 sm:$0xff] }
 0x2c9   : > { %1206 = vrot.lane.b32.xlu2 %v4551_v5, %s8088_s26  ;;  %v4553_v5 = vld [vmem:[%s8083_s1 + $0x3b] ss:$0 sm:$0xff] }
 0x2cb   : > { %v5496_v19 = vpop.permute.xlu2 %1003 }
 0x2cc   : > { %8156 = vst [vmem:[#allocation43_spill] sm:$0xff] %v5496_v19 }
 0x2d1   : > { %1224 = vrot.lane.b32.xlu2 %v4552_v27, %s8089_s27 }
 0x2d3   : > { %v1027_v45 = vpop.permute.xlu2 %1026 }
 0x2d4   : > { %v1029_v29 = vmul.f32 %v1027_v45, %v5504_v31  ;;  %v1030_v46 = vmul.f32 %v1027_v45, %v5506_v48  ;;  %v4554_v45 = vld [vmem:[%s8083_s1 + $0x3c] ss:$0 sm:$0xff] }
 0x2d6   : > { %1035 = vrot.lane.b32.xlu1 %v1030_v46, %s8092_s17  ;;  %1033 = vrot.lane.b32.xlu0 %v1029_v29, %s8092_s17 }
 0x2d9   : > { %1242 = vrot.lane.b32.xlu2 %v4553_v5, %s8158_s13 }
 0x2db   : > { %v1045_v27 = vpop.permute.xlu2 %1044 }
 0x2dc   : > { %v1047_v19 = vmul.f32 %v1045_v27, %v5504_v31  ;;  %v1048_v61 = vmul.f32 %v1045_v27, %v5506_v48  ;;  %v5531_v27 = vpop.permute.xlu0 %843 }
 0x2dd   : > { %8160 = vst [vmem:[#allocation46_spill] sm:$0xff] %v5531_v27 }
 0x2de   : > { %1053 = vrot.lane.b32.xlu1 %v1048_v61, %s8094_s20  ;;  %1051 = vrot.lane.b32.xlu0 %v1047_v19, %s8094_s20 }
 0x2e1   : > { %1260 = vrot.lane.b32.xlu2 %v4554_v45, %s8090_s6 }
 0x2e3   : > { %v1063_v29 = vpop.permute.xlu2 %1062 }
 0x2e4   : > { %v1065_v46 = vmul.f32 %v1063_v29, %v5504_v31  ;;  %v1066_v5 = vmul.f32 %v1063_v29, %v5506_v48  ;;  %v4556_v29 = vld [vmem:[%s8083_s1 + $0x3e] ss:$0 sm:$0xff]  ;;  %v5543_v27 = vpop.permute.xlu0 %861 }
 0x2e5   : > { %8161 = vst [vmem:[#allocation47_spill] sm:$0xff] %v5543_v27 }
 0x2e6   : > { %1071 = vrot.lane.b32.xlu1 %v1066_v5, %s8096_s5  ;;  %1069 = vrot.lane.b32.xlu0 %v1065_v46, %s8096_s5 }
 0x2e9   : > { %1278 = vrot.lane.b32.xlu2 %v4555_v28, %s8091_s19 }
 0x2eb   : > { %v1081_v61 = vpop.permute.xlu2 %1080 }
 0x2ec   : > { %v1083_v19 = vmul.f32 %v1081_v61, %v5504_v31  ;;  %v1084_v45 = vmul.f32 %v1081_v61, %v5506_v48  ;;  %v4557_v61 = vld [vmem:[%s8083_s1 + $0x3f] ss:$0 sm:$0xff] }
 0x2ee   : > { %1089 = vrot.lane.b32.xlu1 %v1084_v45, %s8098_s7  ;;  %1087 = vrot.lane.b32.xlu0 %v1083_v19, %s8098_s7  ;;  %v5554_v19 = vpop.permute.xlu0 %879 }
 0x2ef   : > { %8162 = vst [vmem:[#allocation48_spill] sm:$0xff] %v5554_v19 }
 0x2f1   : > { %1296 = vrot.lane.b32.xlu2 %v4556_v29, %s8093_s30 }
 0x2f3   : > { %v1099_v46 = vpop.permute.xlu2 %1098 }
 0x2f4   : > { %v1101_v28 = vmul.f32 %v1099_v46, %v5504_v31  ;;  %v1102_v5 = vmul.f32 %v1099_v46, %v5506_v48  ;;  %v4558_v46 = vld [vmem:[%s8083_s1 + $0x40] ss:$0 sm:$0xff] }
 0x2f6   : > { %1107 = vrot.lane.b32.xlu1 %v1102_v5, %s8100_s21  ;;  %1105 = vrot.lane.b32.xlu0 %v1101_v28, %s8100_s21  ;;  %v5564_v5 = vpop.permute.xlu0 %897 }
 0x2f7   : > { %8163 = vst [vmem:[#allocation49_spill] sm:$0xff] %v5564_v5  ;;  %v4560_v5 = vld [vmem:[%s8083_s1 + $0x42] ss:$0 sm:$0xff] }
 0x2f9   : > { %1314 = vrot.lane.b32.xlu2 %v4557_v61, %s8095_s24 }
 0x2fb   : > { %v1117_v45 = vpop.permute.xlu2 %1116 }
 0x2fc   : > { %v1119_v29 = vmul.f32 %v1117_v45, %v5504_v31  ;;  %v1120_v27 = vmul.f32 %v1117_v45, %v5506_v48  ;;  %v4559_v45 = vld [vmem:[%s8083_s1 + $0x41] ss:$0 sm:$0xff] }
 0x2fe   : > { %1125 = vrot.lane.b32.xlu1 %v1120_v27, %s8102_s18  ;;  %1123 = vrot.lane.b32.xlu0 %v1119_v29, %s8102_s18 }
 0x301   : > { %1332 = vrot.lane.b32.xlu2 %v4558_v46, %s8097_s25 }
 0x303   : > { %v1135_v28 = vpop.permute.xlu2 %1134 }
 0x304   : > { %v1137_v61 = vmul.f32 %v1135_v28, %v5504_v31  ;;  %v1138_v19 = vmul.f32 %v1135_v28, %v5506_v48  ;;  %v5579_v28 = vpop.permute.xlu0 %915 }
 0x305   : > { %8164 = vst [vmem:[#allocation50_spill] sm:$0xff] %v5579_v28 }
 0x306   : > { %1143 = vrot.lane.b32.xlu1 %v1138_v19, %s8104_s12  ;;  %1141 = vrot.lane.b32.xlu0 %v1137_v61, %s8104_s12 }
 0x309   : > { %1350 = vrot.lane.b32.xlu2 %v4559_v45, %s8099_s11 }
 0x30b   : > { %v1153_v27 = vpop.permute.xlu2 %1152 }
 0x30c   : > { %v1155_v29 = vmul.f32 %v1153_v27, %v5504_v31  ;;  %v1156_v46 = vmul.f32 %v1153_v27, %v5506_v48  ;;  %v4561_v27 = vld [vmem:[%s8083_s1 + $0x43] ss:$0 sm:$0xff]  ;;  %v5591_v28 = vpop.permute.xlu0 %933 }
 0x30d   : > { %8165 = vst [vmem:[#allocation51_spill] sm:$0xff] %v5591_v28 }
 0x30e   : > { %1161 = vrot.lane.b32.xlu1 %v1156_v46, %s8106_s3  ;;  %1159 = vrot.lane.b32.xlu0 %v1155_v29, %s8106_s3  ;;  %s8195_s3 = smov 3  }
 0x311   : > { %1368 = vrot.lane.b32.xlu2 %v4560_v5, %s8101_s10 }
 0x313   : > { %v1171_v19 = vpop.permute.xlu2 %1170 }
 0x314   : > { %v1173_v61 = vmul.f32 %v1171_v19, %v5504_v31  ;;  %v1174_v45 = vmul.f32 %v1171_v19, %v5506_v48  ;;  %v4562_v19 = vld [vmem:[%s8083_s1 + $0x44] ss:$0 sm:$0xff] }
 0x316   : > { %1179 = vrot.lane.b32.xlu1 %v1174_v45, %s8108_s28  ;;  %1177 = vrot.lane.b32.xlu0 %v1173_v61, %s8108_s28  ;;  %v5602_v61 = vpop.permute.xlu0 %951  ;;  %s8168_s28 = smov 117  }
 0x317   : > { %8167 = vst [vmem:[#allocation52_spill] sm:$0xff] %v5602_v61 }
 0x319   : > { %1386 = vrot.lane.b32.xlu2 %v4561_v27, %s8103_s0 }
 0x31b   : > { %v1189_v29 = vpop.permute.xlu2 %1188 }
 0x31c   : > { %v1191_v5 = vmul.f32 %v1189_v29, %v5504_v31  ;;  %v1192_v46 = vmul.f32 %v1189_v29, %v5506_v48  ;;  %v4563_v29 = vld [vmem:[%s8083_s1 + $0x45] ss:$0 sm:$0xff] }
 0x31e   : > { %1197 = vrot.lane.b32.xlu1 %v1192_v46, %s8110_s15  ;;  %1195 = vrot.lane.b32.xlu0 %v1191_v5, %s8110_s15  ;;  %v5612_v46 = vpop.permute.xlu0 %969  ;;  %s8192_s15 = smov 2  }
 0x31f   : > { %8170 = vst [vmem:[#allocation53_spill] sm:$0xff] %v5612_v46 }
 0x321   : > { %1404 = vrot.lane.b32.xlu2 %v4562_v19, %s8166_s29  ;;  %s8202_s29 = smov 6  }
 0x323   : > { %v1207_v45 = vpop.permute.xlu2 %1206 }
 0x324   : > { %v1209_v27 = vmul.f32 %v1207_v45, %v5504_v31  ;;  %v1210_v28 = vmul.f32 %v1207_v45, %v5506_v48 }
 0x326   : > { %1215 = vrot.lane.b32.xlu1 %v1210_v28, %s8168_s28  ;;  %1213 = vrot.lane.b32.xlu0 %v1209_v27, %s8168_s28  ;;  %v5620_v11 = vpop.permute.xlu0 %987  ;;  %s8198_s28 = smov 4  }
 0x327   : > { %8172 = vst [vmem:[#allocation54_spill] sm:$0xff] %v5620_v11 }
 0x329   : > { %1424 = vrot.lane.b32.xlu2 %v4563_v29, %s8169_s8  ;;  %s8208_s8 = smov 8  }
 0x32b   : > { %v1225_v5 = vpop.permute.xlu2 %1224 }
 0x32c   : > { %v1227_v19 = vmul.f32 %v1225_v5, %v5504_v31  ;;  %v1228_v61 = vmul.f32 %v1225_v5, %v5506_v48 }
 0x32e   : > { %1233 = vrot.lane.b32.xlu1 %v1228_v61, %s8171_s14  ;;  %1231 = vrot.lane.b32.xlu0 %v1227_v19, %s8171_s14  ;;  %v5628_v61 = vpop.permute.xlu0 %1005  ;;  %s8176_s14 = smov 113  }
 0x32f   : > { %8175 = vst [vmem:[#allocation55_spill] sm:$0xff] %v5628_v61 }
 0x333   : > { %v1243_v45 = vpop.permute.xlu2 %1242 }
 0x334   : > { %v1245_v33 = vmul.f32 %v1243_v45, %v5504_v31  ;;  %v1246_v28 = vmul.f32 %v1243_v45, %v5506_v48 }
 0x336   : > { %1251 = vrot.lane.b32.xlu1 %v1246_v28, %s8173_s4  ;;  %1249 = vrot.lane.b32.xlu0 %v1245_v33, %s8173_s4  ;;  %s8178_s4 = smov 112  }
 0x33b   : > { %v1261_v27 = vpop.permute.xlu2 %1260 }
 0x33c   : > { %v1263_v29 = vmul.f32 %v1261_v27, %v5504_v31  ;;  %v1264_v5 = vmul.f32 %v1261_v27, %v5506_v48 }
 0x33e   : > { %1269 = vrot.lane.b32.xlu1 %v1264_v5, %s8174_s23  ;;  %1267 = vrot.lane.b32.xlu0 %v1263_v29, %s8174_s23  ;;  %s8180_s23 = smov 111  }
 0x343   : > { %v1279_v19 = vpop.permute.xlu2 %1278 }
 0x344   : > { %v1281_v45 = vmul.f32 %v1279_v19, %v5504_v31  ;;  %v1282_v11 = vmul.f32 %v1279_v19, %v5506_v48 }
 0x346   : > { %1287 = vrot.lane.b32.xlu1 %v1282_v11, %s8176_s14  ;;  %1285 = vrot.lane.b32.xlu0 %v1281_v45, %s8176_s14  ;;  %s8182_s14 = smov 110  }
 0x348   : > { %v5634_v33 = vpop.permute.xlu0 %1033 }
 0x349   : > { %8177 = vst [vmem:[#allocation56_spill] sm:$0xff] %v5634_v33 }
 0x34b   : > { %v1297_v28 = vpop.permute.xlu2 %1296 }
 0x34c   : > { %v1299_v27 = vmul.f32 %v1297_v28, %v5504_v31  ;;  %v1300_v5 = vmul.f32 %v1297_v28, %v5506_v48 }
 0x34e   : > { %1305 = vrot.lane.b32.xlu1 %v1300_v5, %s8178_s4  ;;  %1303 = vrot.lane.b32.xlu0 %v1299_v27, %s8178_s4  ;;  %s8184_s4 = smov 109  }
 0x350   : > { %v5640_v29 = vpop.permute.xlu0 %1051 }
 0x351   : > { %8179 = vst [vmem:[#allocation57_spill] sm:$0xff] %v5640_v29 }
 0x353   : > { %v1315_v61 = vpop.permute.xlu2 %1314 }
 0x354   : > { %v1317_v19 = vmul.f32 %v1315_v61, %v5504_v31  ;;  %v1318_v11 = vmul.f32 %v1315_v61, %v5506_v48 }
 0x356   : > { %1323 = vrot.lane.b32.xlu1 %v1318_v11, %s8180_s23  ;;  %1321 = vrot.lane.b32.xlu0 %v1317_v19, %s8180_s23  ;;  %s8186_s23 = smov 108  }
 0x358   : > { %v5646_v45 = vpop.permute.xlu0 %1069 }
 0x359   : > { %8181 = vst [vmem:[#allocation58_spill] sm:$0xff] %v5646_v45 }
 0x35b   : > { %v1333_v46 = vpop.permute.xlu2 %1332 }
 0x35c   : > { %v1335_v28 = vmul.f32 %v1333_v46, %v5504_v31  ;;  %v1336_v5 = vmul.f32 %v1333_v46, %v5506_v48 }
 0x35e   : > { %1341 = vrot.lane.b32.xlu1 %v1336_v5, %s8182_s14  ;;  %1339 = vrot.lane.b32.xlu0 %v1335_v28, %s8182_s14  ;;  %s8188_s14 = smov 107  }
 0x360   : > { %v5652_v27 = vpop.permute.xlu0 %1087 }
 0x361   : > { %8183 = vst [vmem:[#allocation59_spill] sm:$0xff] %v5652_v27 }
 0x363   : > { %v1351_v29 = vpop.permute.xlu2 %1350 }
 0x364   : > { %v1353_v61 = vmul.f32 %v1351_v29, %v5504_v31  ;;  %v1354_v11 = vmul.f32 %v1351_v29, %v5506_v48 }
 0x366   : > { %1359 = vrot.lane.b32.xlu1 %v1354_v11, %s8184_s4  ;;  %1357 = vrot.lane.b32.xlu0 %v1353_v61, %s8184_s4  ;;  %s8190_s4 = smov 106  }
 0x368   : > { %v5658_v19 = vpop.permute.xlu0 %1105 }
 0x369   : > { %8185 = vst [vmem:[#allocation60_spill] sm:$0xff] %v5658_v19 }
 0x36b   : > { %v1369_v45 = vpop.permute.xlu2 %1368 }
 0x36c   : > { %v1371_v46 = vmul.f32 %v1369_v45, %v5504_v31  ;;  %v1372_v5 = vmul.f32 %v1369_v45, %v5506_v48 }
 0x36e   : > { %1377 = vrot.lane.b32.xlu1 %v1372_v5, %s8186_s23  ;;  %1375 = vrot.lane.b32.xlu0 %v1371_v46, %s8186_s23  ;;  %s8234_s23 = smov 119  }
 0x370   : > { %v5664_v28 = vpop.permute.xlu0 %1123 }
 0x371   : > { %8187 = vst [vmem:[#allocation61_spill] sm:$0xff] %v5664_v28 }
 0x373   : > { %v1387_v27 = vpop.permute.xlu2 %1386 }
 0x374   : > { %v1389_v29 = vmul.f32 %v1387_v27, %v5504_v31  ;;  %v1390_v11 = vmul.f32 %v1387_v27, %v5506_v48  ;;  %v4564_v27 = vld [vmem:[%s8083_s1 + $0x46] ss:$0 sm:$0xff] }
 0x376   : > { %1395 = vrot.lane.b32.xlu1 %v1390_v11, %s8188_s14  ;;  %1393 = vrot.lane.b32.xlu0 %v1389_v29, %s8188_s14  ;;  %v5687_v11 = vpop.permute.xlu1 %1016  ;;  %s8236_s14 = smov 118  }
 0x377   : > { %8194 = vst [vmem:[#allocation65_spill] sm:$0xff] %v5687_v11 }
 0x378   : > { %v5670_v61 = vpop.permute.xlu0 %1141 }
 0x379   : > { %8189 = vst [vmem:[#allocation62_spill] sm:$0xff] %v5670_v61 }
 0x37b   : > { %v1405_v19 = vpop.permute.xlu2 %1404 }
 0x37c   : > { %v1407_v45 = vmul.f32 %v1405_v19, %v5504_v31  ;;  %v1408_v5 = vmul.f32 %v1405_v19, %v5506_v48  ;;  %v4565_v31 = vld [vmem:[%s8083_s1 + $0x47] ss:$0 sm:$0xff]  ;;  %v4566_v19 = vld [vmem:[%s8083_s1 + $0x48] ss:$0 sm:$0xff] }
 0x37e   : > { %1413 = vrot.lane.b32.xlu1 %v1408_v5, %s8190_s4  ;;  %1411 = vrot.lane.b32.xlu0 %v1407_v45, %s8190_s4  ;;  %v5695_v45 = vpop.permute.xlu1 %1035  ;;  %s8232_s4 = smov 120  }
 0x37f   : > { %8197 = vst [vmem:[#allocation67_spill] sm:$0xff] %v5695_v45 }
 0x380   : > { %v5676_v46 = vpop.permute.xlu0 %1159 }
 0x381   : > { %8191 = vst [vmem:[#allocation63_spill] sm:$0xff] %v5676_v46 }
 0x386   : > { %1434 = vrot.lane.b32.xlu0 %v4564_v27, %s8192_s15  ;;  %v4567_v27 = vld [vmem:[%s8083_s1 + $0x49] ss:$0 sm:$0xff]  ;;  %s8205_s15 = smov 7  }
 0x388   : > { %v5682_v29 = vpop.permute.xlu0 %1177 }
 0x389   : > { %8193 = vst [vmem:[#allocation64_spill] sm:$0xff] %v5682_v29  ;;  %v5703_v29 = vpop.permute.xlu1 %1053 }
 0x38a   : > { %8200 = vst [vmem:[#allocation69_spill] sm:$0xff] %v5703_v29 }
 0x38e   : > { %1452 = vrot.lane.b32.xlu0 %v4565_v31, %s8195_s3 }
 0x390   : > { %v5690_v48 = vpop.permute.xlu0 %1195 }
 0x391   : > { %8196 = vst [vmem:[#allocation66_spill] sm:$0xff] %v5690_v48  ;;  %v4568_v48 = vld [vmem:[%s8083_s1 + $0x4a] ss:$0 sm:$0xff]  ;;  %v5712_v45 = vpop.permute.xlu1 %1071 }
 0x392   : > { %8203 = vst [vmem:[#allocation71_spill] sm:$0xff] %v5712_v45  ;;  %v4571_v45 = vld [vmem:[%s8083_s1 + $0x4d] ss:$0 sm:$0xff] }
 0x396   : > { %1470 = vrot.lane.b32.xlu0 %v4566_v19, %s8198_s28  ;;  %s8238_s28 = smov 117  }
 0x398   : > { %v5698_v5 = vpop.permute.xlu0 %1213 }
 0x399   : > { %8199 = vst [vmem:[#allocation68_spill] sm:$0xff] %v5698_v5  ;;  %v4569_v5 = vld [vmem:[%s8083_s1 + $0x4b] ss:$0 sm:$0xff] }
 0x39e   : > { %1488 = vrot.lane.b32.xlu0 %v4567_v27, %s8138_s22  ;;  %v5722_v27 = vpop.permute.xlu1 %1089  ;;  %s8233_s22 = smov 1  }
 0x39f   : > { %8207 = vst [vmem:[#allocation74_spill] sm:$0xff] %v5722_v27  ;;  %v4572_v27 = vld [vmem:[%s8083_s1 + $0x4e] ss:$0 sm:$0xff] }
 0x3a0   : > { %v5706_v31 = vpop.permute.xlu0 %1231 }
 0x3a1   : > { %8201 = vst [vmem:[#allocation70_spill] sm:$0xff] %v5706_v31  ;;  %v4570_v31 = vld [vmem:[%s8083_s1 + $0x4c] ss:$0 sm:$0xff] }
 0x3a6   : > { %1506 = vrot.lane.b32.xlu0 %v4568_v48, %s8202_s29  ;;  %s8230_s29 = smov 23  }
 0x3a8   : > { %v5714_v19 = vpop.permute.xlu0 %1249 }
 0x3a9   : > { %8204 = vst [vmem:[#allocation72_spill] sm:$0xff] %v5714_v19  ;;  %v5733_v19 = vpop.permute.xlu1 %1107 }
 0x3aa   : > { %8210 = vst [vmem:[#allocation76_spill] sm:$0xff] %v5733_v19 }
 0x3ae   : > { %1524 = vrot.lane.b32.xlu0 %v4569_v5, %s8205_s15 }
 0x3b0   : > { %v5720_v29 = vpop.permute.xlu0 %1267 }
 0x3b1   : > { %8206 = vst [vmem:[#allocation73_spill] sm:$0xff] %v5720_v29  ;;  %v5741_v29 = vpop.permute.xlu1 %1125 }
 0x3b2   : > { %8212 = vst [vmem:[#allocation78_spill] sm:$0xff] %v5741_v29 }
 0x3b6   : > { %1542 = vrot.lane.b32.xlu0 %v4570_v31, %s8208_s8 }
 0x3b8   : > { %v5728_v48 = vpop.permute.xlu0 %1285 }
 0x3b9   : > { %8209 = vst [vmem:[#allocation75_spill] sm:$0xff] %v5728_v48  ;;  %v4573_v48 = vld [vmem:[%s8083_s1 + $0x4f] ss:$0 sm:$0xff]  ;;  %v5750_v19 = vpop.permute.xlu1 %1143 }
 0x3ba   : > { %8214 = vst [vmem:[#allocation80_spill] sm:$0xff] %v5750_v19  ;;  %v4576_v19 = vld [vmem:[%s8083_s1 + $0x52] ss:$0 sm:$0xff] }
 0x3be   : > { %1560 = vrot.lane.b32.xlu0 %v4571_v45, %s8148_s16 }
 0x3c0   : > { %v5736_v5 = vpop.permute.xlu0 %1303 }
 0x3c1   : > { %8211 = vst [vmem:[#allocation77_spill] sm:$0xff] %v5736_v5  ;;  %v4574_v5 = vld [vmem:[%s8083_s1 + $0x50] ss:$0 sm:$0xff] }
 0x3c6   : > { %1578 = vrot.lane.b32.xlu0 %v4572_v27, %s8151_s2  ;;  %v5760_v27 = vpop.permute.xlu1 %1161 }
 0x3c7   : > { %8217 = vst [vmem:[#allocation83_spill] sm:$0xff] %v5760_v27  ;;  %v4577_v27 = vld [vmem:[%s8083_s1 + $0x53] ss:$0 sm:$0xff] }
 0x3c8   : > { %v5744_v31 = vpop.permute.xlu0 %1321 }
 0x3c9   : > { %8213 = vst [vmem:[#allocation79_spill] sm:$0xff] %v5744_v31  ;;  %v4575_v31 = vld [vmem:[%s8083_s1 + $0x51] ss:$0 sm:$0xff] }
 0x3ce   : > { %1596 = vrot.lane.b32.xlu0 %v4573_v48, %s8087_s9 }
 0x3d0   : > { %v5752_v45 = vpop.permute.xlu0 %1339 }
 0x3d1   : > { %8215 = vst [vmem:[#allocation81_spill] sm:$0xff] %v5752_v45  ;;  %v5771_v45 = vpop.permute.xlu1 %1179 }
 0x3d2   : > { %8219 = vst [vmem:[#allocation85_spill] sm:$0xff] %v5771_v45 }
 0x3d6   : > { %1614 = vrot.lane.b32.xlu0 %v4574_v5, %s8088_s26 }
 0x3d8   : > { %v5758_v29 = vpop.permute.xlu0 %1357 }
 0x3d9   : > { %8216 = vst [vmem:[#allocation82_spill] sm:$0xff] %v5758_v29  ;;  %v5779_v29 = vpop.permute.xlu1 %1197 }
 0x3da   : > { %8221 = vst [vmem:[#allocation87_spill] sm:$0xff] %v5779_v29 }
 0x3de   : > { %1632 = vrot.lane.b32.xlu0 %v4575_v31, %s8089_s27 }
 0x3e0   : > { %v5766_v48 = vpop.permute.xlu0 %1375 }
 0x3e1   : > { %8218 = vst [vmem:[#allocation84_spill] sm:$0xff] %v5766_v48  ;;  %v4578_v48 = vld [vmem:[%s8083_s1 + $0x54] ss:$0 sm:$0xff]  ;;  %v5788_v45 = vpop.permute.xlu1 %1215 }
 0x3e2   : > { %8223 = vst [vmem:[#allocation89_spill] sm:$0xff] %v5788_v45 }
 0x3e6   : > { %1650 = vrot.lane.b32.xlu0 %v4576_v19, %s8158_s13  ;;  %v5790_v19 = vld [vmem:[#allocation2 + $0x3] sm:$0xff] }
 0x3e7   : > { %8224 = vst [vmem:[#allocation90_spill] sm:$0xff] %v5790_v19 }
 0x3e8   : > { %v5774_v5 = vpop.permute.xlu0 %1393 }
 0x3e9   : > { %8220 = vst [vmem:[#allocation86_spill] sm:$0xff] %v5774_v5  ;;  %v5792_v5 = vld [vmem:[#allocation2 + $0xb] sm:$0xff]  ;;  %v5802_v45 = vpop.permute.xlu1 %1233 }
 0x3ea   : > { %8225 = vst [vmem:[#allocation91_spill] sm:$0xff] %v5802_v45  ;;  %v4581_v45 = vld [vmem:[%s8083_s1 + $0x57] ss:$0 sm:$0xff] }
 0x3ee   : > { %1668 = vrot.lane.b32.xlu0 %v4577_v27, %s8090_s6  ;;  %v4579_v27 = vld [vmem:[%s8083_s1 + $0x55] ss:$0 sm:$0xff] }
 0x3f0   : > { %v5782_v31 = vpop.permute.xlu0 %1411 }
 0x3f1   : > { %8222 = vst [vmem:[#allocation88_spill] sm:$0xff] %v5782_v31 }
 0x3f6   : > { %1686 = vrot.lane.b32.xlu0 %v4578_v48, %s8091_s19 }
 0x3f8   : > { %v1435_v46 = vpop.permute.xlu0 %1434 }
 0x3f9   : > { %v1437_v61 = vmul.f32 %v1435_v46, %v5790_v19  ;;  %v1438_v29 = vmul.f32 %v1435_v46, %v5792_v5  ;;  %v4580_v46 = vld [vmem:[%s8083_s1 + $0x56] ss:$0 sm:$0xff] }
 0x3fb   : > { %1443 = vrot.lane.b32.xlu2 %v1438_v29, %s8092_s17  ;;  %1441 = vrot.lane.b32.xlu1 %v1437_v61, %s8092_s17 }
 0x3fe   : > { %1704 = vrot.lane.b32.xlu0 %v4579_v27, %s8093_s30 }
 0x400   : > { %v1453_v48 = vpop.permute.xlu0 %1452 }
 0x401   : > { %v1455_v31 = vmul.f32 %v1453_v48, %v5790_v19  ;;  %v1456_v28 = vmul.f32 %v1453_v48, %v5792_v5  ;;  %v5817_v48 = vpop.permute.xlu1 %1251 }
 0x402   : > { %8226 = vst [vmem:[#allocation92_spill] sm:$0xff] %v5817_v48 }
 0x403   : > { %1461 = vrot.lane.b32.xlu2 %v1456_v28, %s8094_s20  ;;  %1459 = vrot.lane.b32.xlu1 %v1455_v31, %s8094_s20 }
 0x406   : > { %1722 = vrot.lane.b32.xlu0 %v4580_v46, %s8095_s24 }
 0x408   : > { %v1471_v61 = vpop.permute.xlu0 %1470 }
 0x409   : > { %v1473_v29 = vmul.f32 %v1471_v61, %v5790_v19  ;;  %v1474_v27 = vmul.f32 %v1471_v61, %v5792_v5  ;;  %v4582_v61 = vld [vmem:[%s8083_s1 + $0x58] ss:$0 sm:$0xff]  ;;  %v5829_v48 = vpop.permute.xlu1 %1269 }
 0x40a   : > { %8227 = vst [vmem:[#allocation93_spill] sm:$0xff] %v5829_v48 }
 0x40b   : > { %1479 = vrot.lane.b32.xlu2 %v1474_v27, %s8096_s5  ;;  %1477 = vrot.lane.b32.xlu1 %v1473_v29, %s8096_s5 }
 0x40e   : > { %1740 = vrot.lane.b32.xlu0 %v4581_v45, %s8097_s25 }
 0x410   : > { %v1489_v28 = vpop.permute.xlu0 %1488 }
 0x411   : > { %v1491_v31 = vmul.f32 %v1489_v28, %v5790_v19  ;;  %v1492_v46 = vmul.f32 %v1489_v28, %v5792_v5  ;;  %v4583_v28 = vld [vmem:[%s8083_s1 + $0x59] ss:$0 sm:$0xff] }
 0x413   : > { %1497 = vrot.lane.b32.xlu2 %v1492_v46, %s8098_s7  ;;  %1495 = vrot.lane.b32.xlu1 %v1491_v31, %s8098_s7  ;;  %v5840_v31 = vpop.permute.xlu1 %1287 }
 0x414   : > { %8228 = vst [vmem:[#allocation94_spill] sm:$0xff] %v5840_v31 }
 0x416   : > { %1758 = vrot.lane.b32.xlu0 %v4582_v61, %s8099_s11 }
 0x418   : > { %v1507_v29 = vpop.permute.xlu0 %1506 }
 0x419   : > { %v1509_v45 = vmul.f32 %v1507_v29, %v5790_v19  ;;  %v1510_v27 = vmul.f32 %v1507_v29, %v5792_v5  ;;  %v4584_v29 = vld [vmem:[%s8083_s1 + $0x5a] ss:$0 sm:$0xff] }
 0x41b   : > { %1515 = vrot.lane.b32.xlu2 %v1510_v27, %s8100_s21  ;;  %1513 = vrot.lane.b32.xlu1 %v1509_v45, %s8100_s21  ;;  %v5850_v27 = vpop.permute.xlu1 %1305 }
 0x41c   : > { %8229 = vst [vmem:[#allocation95_spill] sm:$0xff] %v5850_v27  ;;  %v4586_v27 = vld [vmem:[%s8083_s1 + $0x5c] ss:$0 sm:$0xff] }
 0x41e   : > { %1776 = vrot.lane.b32.xlu0 %v4583_v28, %s8101_s10 }
 0x420   : > { %v1525_v46 = vpop.permute.xlu0 %1524 }
 0x421   : > { %v1527_v61 = vmul.f32 %v1525_v46, %v5790_v19  ;;  %v1528_v48 = vmul.f32 %v1525_v46, %v5792_v5  ;;  %v4585_v46 = vld [vmem:[%s8083_s1 + $0x5b] ss:$0 sm:$0xff] }
 0x423   : > { %1533 = vrot.lane.b32.xlu2 %v1528_v48, %s8102_s18  ;;  %1531 = vrot.lane.b32.xlu1 %v1527_v61, %s8102_s18 }
 0x426   : > { %1794 = vrot.lane.b32.xlu0 %v4584_v29, %s8103_s0 }
 0x428   : > { %v1543_v45 = vpop.permute.xlu0 %1542 }
 0x429   : > { %v1545_v28 = vmul.f32 %v1543_v45, %v5790_v19  ;;  %v1546_v31 = vmul.f32 %v1543_v45, %v5792_v5  ;;  %v5865_v45 = vpop.permute.xlu1 %1323 }
 0x42a   : > { %8231 = vst [vmem:[#allocation96_spill] sm:$0xff] %v5865_v45 }
 0x42b   : > { %1551 = vrot.lane.b32.xlu2 %v1546_v31, %s8104_s12  ;;  %1549 = vrot.lane.b32.xlu1 %v1545_v28, %s8104_s12  ;;  %s8274_s12 = smov 6  }
 0x42e   : > { %1812 = vrot.lane.b32.xlu0 %v4585_v46, %s8230_s29  ;;  %s8271_s29 = smov 5  }
 0x430   : > { %v1561_v48 = vpop.permute.xlu0 %1560 }
 0x431   : > { %v1563_v61 = vmul.f32 %v1561_v48, %v5790_v19  ;;  %v1564_v29 = vmul.f32 %v1561_v48, %v5792_v5  ;;  %v5874_v48 = vpop.permute.xlu1 %1341 }
 0x432   : > { %8235 = vst [vmem:[#allocation97_spill] sm:$0xff] %v5874_v48 }
 0x433   : > { %1569 = vrot.lane.b32.xlu2 %v1564_v29, %s8232_s4  ;;  %1567 = vrot.lane.b32.xlu1 %v1563_v61, %s8232_s4  ;;  %s8297_s4 = smov 23  }
 0x436   : > { %1832 = vrot.lane.b32.xlu0 %v4586_v27, %s8233_s22  ;;  %s8240_s22 = smov 116  }
 0x438   : > { %v1579_v31 = vpop.permute.xlu0 %1578 }
 0x439   : > { %v1581_v28 = vmul.f32 %v1579_v31, %v5790_v19  ;;  %v1582_v46 = vmul.f32 %v1579_v31, %v5792_v5  ;;  %v5880_v27 = vpop.permute.xlu1 %1359 }
 0x43a   : > { %8237 = vst [vmem:[#allocation98_spill] sm:$0xff] %v5880_v27 }
 0x43b   : > { %1587 = vrot.lane.b32.xlu2 %v1582_v46, %s8234_s23  ;;  %1585 = vrot.lane.b32.xlu1 %v1581_v28, %s8234_s23  ;;  %s8301_s23 = smov 117  }
 0x440   : > { %v1597_v33 = vpop.permute.xlu0 %1596 }
 0x441   : > { %v1599_v45 = vmul.f32 %v1597_v33, %v5790_v19  ;;  %v1600_v29 = vmul.f32 %v1597_v33, %v5792_v5  ;;  %v5886_v48 = vpop.permute.xlu1 %1377 }
 0x442   : > { %8239 = vst [vmem:[#allocation99_spill] sm:$0xff] %v5886_v48 }
 0x443   : > { %1605 = vrot.lane.b32.xlu2 %v1600_v29, %s8236_s14  ;;  %1603 = vrot.lane.b32.xlu1 %v1599_v45, %s8236_s14  ;;  %s8242_s14 = smov 115  }
 0x448   : > { %v1615_v61 = vpop.permute.xlu0 %1614 }
 0x449   : > { %v1617_v31 = vmul.f32 %v1615_v61, %v5790_v19  ;;  %v1618_v46 = vmul.f32 %v1615_v61, %v5792_v5  ;;  %v5894_v11 = vpop.permute.xlu1 %1395 }
 0x44a   : > { %8241 = vst [vmem:[#allocation100_spill] sm:$0xff] %v5894_v11 }
 0x44b   : > { %1623 = vrot.lane.b32.xlu2 %v1618_v46, %s8238_s28  ;;  %1621 = vrot.lane.b32.xlu1 %v1617_v31, %s8238_s28  ;;  %s8243_s28 = smov 114  }
 0x450   : > { %v1633_v28 = vpop.permute.xlu0 %1632 }
 0x451   : > { %v1635_v33 = vmul.f32 %v1633_v28, %v5790_v19  ;;  %v1636_v29 = vmul.f32 %v1633_v28, %v5792_v5 }
 0x453   : > { %1641 = vrot.lane.b32.xlu2 %v1636_v29, %s8240_s22  ;;  %1639 = vrot.lane.b32.xlu1 %v1635_v33, %s8240_s22  ;;  %v5902_v33 = vpop.permute.xlu1 %1413  ;;  %s8245_s22 = smov 113  }
 0x454   : > { %8244 = vst [vmem:[#allocation101_spill] sm:$0xff] %v5902_v33 }
 0x458   : > { %v1651_v45 = vpop.permute.xlu0 %1650 }
 0x459   : > { %v1653_v27 = vmul.f32 %v1651_v45, %v5790_v19  ;;  %v1654_v61 = vmul.f32 %v1651_v45, %v5792_v5 }
 0x45b   : > { %1659 = vrot.lane.b32.xlu2 %v1654_v61, %s8242_s14  ;;  %1657 = vrot.lane.b32.xlu1 %v1653_v27, %s8242_s14  ;;  %s8247_s14 = smov 112  }
 0x460   : > { %v1669_v31 = vpop.permute.xlu0 %1668 }
 0x461   : > { %v1671_v46 = vmul.f32 %v1669_v31, %v5790_v19  ;;  %v1672_v28 = vmul.f32 %v1669_v31, %v5792_v5 }
 0x463   : > { %1677 = vrot.lane.b32.xlu2 %v1672_v28, %s8243_s28  ;;  %1675 = vrot.lane.b32.xlu1 %v1671_v46, %s8243_s28  ;;  %s8249_s28 = smov 111  }
 0x468   : > { %v1687_v29 = vpop.permute.xlu0 %1686 }
 0x469   : > { %v1689_v45 = vmul.f32 %v1687_v29, %v5790_v19  ;;  %v1690_v11 = vmul.f32 %v1687_v29, %v5792_v5 }
 0x46b   : > { %1695 = vrot.lane.b32.xlu2 %v1690_v11, %s8245_s22  ;;  %1693 = vrot.lane.b32.xlu1 %v1689_v45, %s8245_s22  ;;  %s8251_s22 = smov 110  }
 0x46d   : > { %v5908_v27 = vpop.permute.xlu1 %1441 }
 0x46e   : > { %8246 = vst [vmem:[#allocation102_spill] sm:$0xff] %v5908_v27 }
 0x470   : > { %v1705_v61 = vpop.permute.xlu0 %1704 }
 0x471   : > { %v1707_v31 = vmul.f32 %v1705_v61, %v5790_v19  ;;  %v1708_v28 = vmul.f32 %v1705_v61, %v5792_v5 }
 0x473   : > { %1713 = vrot.lane.b32.xlu2 %v1708_v28, %s8247_s14  ;;  %1711 = vrot.lane.b32.xlu1 %v1707_v31, %s8247_s14  ;;  %s8253_s14 = smov 109  }
 0x475   : > { %v5914_v46 = vpop.permute.xlu1 %1459 }
 0x476   : > { %8248 = vst [vmem:[#allocation103_spill] sm:$0xff] %v5914_v46 }
 0x478   : > { %v1723_v33 = vpop.permute.xlu0 %1722 }
 0x479   : > { %v1725_v29 = vmul.f32 %v1723_v33, %v5790_v19  ;;  %v1726_v11 = vmul.f32 %v1723_v33, %v5792_v5 }
 0x47b   : > { %1731 = vrot.lane.b32.xlu2 %v1726_v11, %s8249_s28  ;;  %1729 = vrot.lane.b32.xlu1 %v1725_v29, %s8249_s28  ;;  %s8255_s28 = smov 108  }
 0x47d   : > { %v5920_v45 = vpop.permute.xlu1 %1477 }
 0x47e   : > { %8250 = vst [vmem:[#allocation104_spill] sm:$0xff] %v5920_v45 }
 0x480   : > { %v1741_v48 = vpop.permute.xlu0 %1740 }
 0x481   : > { %v1743_v61 = vmul.f32 %v1741_v48, %v5790_v19  ;;  %v1744_v28 = vmul.f32 %v1741_v48, %v5792_v5 }
 0x483   : > { %1749 = vrot.lane.b32.xlu2 %v1744_v28, %s8251_s22  ;;  %1747 = vrot.lane.b32.xlu1 %v1743_v61, %s8251_s22  ;;  %s8268_s22 = smov 4  }
 0x485   : > { %v5926_v31 = vpop.permute.xlu1 %1495 }
 0x486   : > { %8252 = vst [vmem:[#allocation105_spill] sm:$0xff] %v5926_v31  ;;  %v5940_v31 = vpop.permute.xlu2 %1424 }
 0x487   : > { %8257 = vst [vmem:[#allocation108_spill] sm:$0xff] %v5940_v31  ;;  %v4724_v31 = vld [vmem:[#allocation2] sm:$0xff] }
 0x488   : > { %v1759_v46 = vpop.permute.xlu0 %1758 }
 0x489   : > { %v1761_v33 = vmul.f32 %v1759_v46, %v5790_v19  ;;  %v1762_v11 = vmul.f32 %v1759_v46, %v5792_v5 }
 0x48b   : > { %1767 = vrot.lane.b32.xlu2 %v1762_v11, %s8253_s14  ;;  %1765 = vrot.lane.b32.xlu1 %v1761_v33, %s8253_s14  ;;  %s8258_s14 = smov 107  }
 0x48d   : > { %v5932_v29 = vpop.permute.xlu1 %1513 }
 0x48e   : > { %8254 = vst [vmem:[#allocation106_spill] sm:$0xff] %v5932_v29 }
 0x490   : > { %v1777_v45 = vpop.permute.xlu0 %1776 }
 0x491   : > { %v1779_v48 = vmul.f32 %v1777_v45, %v5790_v19  ;;  %v1780_v28 = vmul.f32 %v1777_v45, %v5792_v5  ;;  %v5948_v45 = vpop.permute.xlu2 %1443 }
 0x492   : > { %8260 = vst [vmem:[#allocation110_spill] sm:$0xff] %v5948_v45  ;;  %v4590_v45 = vld [vmem:[%s8083_s1 + $0x60] ss:$0 sm:$0xff] }
 0x493   : > { %1785 = vrot.lane.b32.xlu2 %v1780_v28, %s8255_s28  ;;  %1783 = vrot.lane.b32.xlu1 %v1779_v48, %s8255_s28  ;;  %s8261_s28 = smov 106  }
 0x495   : > { %v5938_v61 = vpop.permute.xlu1 %1531 }
 0x496   : > { %8256 = vst [vmem:[#allocation107_spill] sm:$0xff] %v5938_v61 }
 0x498   : > { %v1795_v46 = vpop.permute.xlu0 %1794 }
 0x499   : > { %v1797_v11 = vmul.f32 %v1795_v46, %v5790_v19  ;;  %v1798_v33 = vmul.f32 %v1795_v46, %v5792_v5  ;;  %v4587_v46 = vld [vmem:[%s8083_s1 + $0x5d] ss:$0 sm:$0xff] }
 0x49b   : > { %1803 = vrot.lane.b32.xlu2 %v1798_v33, %s8258_s14  ;;  %1801 = vrot.lane.b32.xlu1 %v1797_v11, %s8258_s14  ;;  %v5959_v11 = vpop.permute.xlu2 %1461  ;;  %s8264_s14 = smov 2  }
 0x49c   : > { %8263 = vst [vmem:[#allocation112_spill] sm:$0xff] %v5959_v11 }
 0x49d   : > { %v5946_v29 = vpop.permute.xlu1 %1549 }
 0x49e   : > { %8259 = vst [vmem:[#allocation109_spill] sm:$0xff] %v5946_v29 }
 0x4a0   : > { %v1813_v28 = vpop.permute.xlu0 %1812 }
 0x4a1   : > { %v1815_v48 = vmul.f32 %v1813_v28, %v5790_v19  ;;  %v1816_v61 = vmul.f32 %v1813_v28, %v5792_v5  ;;  %v4588_v5 = vld [vmem:[%s8083_s1 + $0x5e] ss:$0 sm:$0xff]  ;;  %v4605_v19 = vld [vmem:[%s8083_s1 + $0x6f] ss:$0 sm:$0xff] }
 0x4a3   : > { %1821 = vrot.lane.b32.xlu2 %v1816_v61, %s8261_s28  ;;  %1819 = vrot.lane.b32.xlu1 %v1815_v48, %s8261_s28  ;;  %v5968_v61 = vpop.permute.xlu2 %1479  ;;  %v4589_v48 = vld [vmem:[%s8083_s1 + $0x5f] ss:$0 sm:$0xff]  ;;  %s8299_s28 = smov 119  }
 0x4a4   : > { %8266 = vst [vmem:[#allocation114_spill] sm:$0xff] %v5968_v61  ;;  %v4591_v61 = vld [vmem:[%s8083_s1 + $0x61] ss:$0 sm:$0xff] }
 0x4a5   : > { %v5954_v27 = vpop.permute.xlu1 %1567 }
 0x4a6   : > { %8262 = vst [vmem:[#allocation111_spill] sm:$0xff] %v5954_v27 }
 0x4ab   : > { %1842 = vrot.lane.b32.xlu1 %v4587_v46, %s8264_s14  ;;  %v5978_v46 = vpop.permute.xlu2 %1497  ;;  %s8300_s14 = smov 118  }
 0x4ac   : > { %8270 = vst [vmem:[#allocation117_spill] sm:$0xff] %v5978_v46  ;;  %v4592_v46 = vld [vmem:[%s8083_s1 + $0x62] ss:$0 sm:$0xff] }
 0x4ad   : > { %v5962_v33 = vpop.permute.xlu1 %1585 }
 0x4ae   : > { %8265 = vst [vmem:[#allocation113_spill] sm:$0xff] %v5962_v33 }
 0x4b3   : > { %1860 = vrot.lane.b32.xlu1 %v4588_v5, %s8195_s3  ;;  %s8296_s3 = smov 121  }
 0x4b5   : > { %v5970_v28 = vpop.permute.xlu1 %1603 }
 0x4b6   : > { %8267 = vst [vmem:[#allocation115_spill] sm:$0xff] %v5970_v28  ;;  %v5989_v28 = vpop.permute.xlu2 %1515 }
 0x4b7   : > { %8273 = vst [vmem:[#allocation119_spill] sm:$0xff] %v5989_v28 }
 0x4bb   : > { %1878 = vrot.lane.b32.xlu1 %v4589_v48, %s8268_s22  ;;  %s8298_s22 = smov 120  }
 0x4bd   : > { %v5976_v11 = vpop.permute.xlu1 %1621 }
 0x4be   : > { %8269 = vst [vmem:[#allocation116_spill] sm:$0xff] %v5976_v11  ;;  %v5997_v11 = vpop.permute.xlu2 %1533 }
 0x4bf   : > { %8276 = vst [vmem:[#allocation121_spill] sm:$0xff] %v5997_v11 }
 0x4c3   : > { %1896 = vrot.lane.b32.xlu1 %v4590_v45, %s8271_s29 }
 0x4c5   : > { %v5984_v5 = vpop.permute.xlu1 %1639 }
 0x4c6   : > { %8272 = vst [vmem:[#allocation118_spill] sm:$0xff] %v5984_v5  ;;  %v4593_v5 = vld [vmem:[%s8083_s1 + $0x63] ss:$0 sm:$0xff]  ;;  %v6006_v28 = vpop.permute.xlu2 %1551 }
 0x4c7   : > { %8278 = vst [vmem:[#allocation123_spill] sm:$0xff] %v6006_v28  ;;  %v4596_v28 = vld [vmem:[%s8083_s1 + $0x66] ss:$0 sm:$0xff] }
 0x4cb   : > { %1914 = vrot.lane.b32.xlu1 %v4591_v61, %s8274_s12 }
 0x4cd   : > { %v5992_v48 = vpop.permute.xlu1 %1657 }
 0x4ce   : > { %8275 = vst [vmem:[#allocation120_spill] sm:$0xff] %v5992_v48  ;;  %v4594_v48 = vld [vmem:[%s8083_s1 + $0x64] ss:$0 sm:$0xff] }
 0x4d3   : > { %1932 = vrot.lane.b32.xlu1 %v4592_v46, %s8205_s15  ;;  %v6016_v46 = vpop.permute.xlu2 %1569 }
 0x4d4   : > { %8281 = vst [vmem:[#allocation126_spill] sm:$0xff] %v6016_v46  ;;  %v4597_v46 = vld [vmem:[%s8083_s1 + $0x67] ss:$0 sm:$0xff] }
 0x4d5   : > { %v6000_v45 = vpop.permute.xlu1 %1675 }
 0x4d6   : > { %8277 = vst [vmem:[#allocation122_spill] sm:$0xff] %v6000_v45  ;;  %v4595_v45 = vld [vmem:[%s8083_s1 + $0x65] ss:$0 sm:$0xff] }
 0x4db   : > { %1950 = vrot.lane.b32.xlu1 %v4593_v5, %s8208_s8 }
 0x4dd   : > { %v6008_v61 = vpop.permute.xlu1 %1693 }
 0x4de   : > { %8279 = vst [vmem:[#allocation124_spill] sm:$0xff] %v6008_v61  ;;  %v6027_v61 = vpop.permute.xlu2 %1587 }
 0x4df   : > { %8283 = vst [vmem:[#allocation128_spill] sm:$0xff] %v6027_v61 }
 0x4e3   : > { %1968 = vrot.lane.b32.xlu1 %v4594_v48, %s8148_s16 }
 0x4e5   : > { %v6014_v11 = vpop.permute.xlu1 %1711 }
 0x4e6   : > { %8280 = vst [vmem:[#allocation125_spill] sm:$0xff] %v6014_v11  ;;  %v6035_v11 = vpop.permute.xlu2 %1605 }
 0x4e7   : > { %8285 = vst [vmem:[#allocation130_spill] sm:$0xff] %v6035_v11 }
 0x4eb   : > { %1986 = vrot.lane.b32.xlu1 %v4595_v45, %s8151_s2 }
 0x4ed   : > { %v6022_v5 = vpop.permute.xlu1 %1729 }
 0x4ee   : > { %8282 = vst [vmem:[#allocation127_spill] sm:$0xff] %v6022_v5  ;;  %v4598_v5 = vld [vmem:[%s8083_s1 + $0x68] ss:$0 sm:$0xff]  ;;  %v6044_v61 = vpop.permute.xlu2 %1623 }
 0x4ef   : > { %8287 = vst [vmem:[#allocation132_spill] sm:$0xff] %v6044_v61  ;;  %v4601_v61 = vld [vmem:[%s8083_s1 + $0x6b] ss:$0 sm:$0xff] }
 0x4f3   : > { %2004 = vrot.lane.b32.xlu1 %v4596_v28, %s8087_s9 }
 0x4f5   : > { %v6030_v48 = vpop.permute.xlu1 %1747 }
 0x4f6   : > { %8284 = vst [vmem:[#allocation129_spill] sm:$0xff] %v6030_v48  ;;  %v4599_v48 = vld [vmem:[%s8083_s1 + $0x69] ss:$0 sm:$0xff] }
 0x4fb   : > { %2022 = vrot.lane.b32.xlu1 %v4597_v46, %s8088_s26  ;;  %v6054_v46 = vpop.permute.xlu2 %1641 }
 0x4fc   : > { %8290 = vst [vmem:[#allocation135_spill] sm:$0xff] %v6054_v46 }
 0x4fd   : > { %v6038_v45 = vpop.permute.xlu1 %1765 }
 0x4fe   : > { %8286 = vst [vmem:[#allocation131_spill] sm:$0xff] %v6038_v45  ;;  %v4600_v45 = vld [vmem:[%s8083_s1 + $0x6a] ss:$0 sm:$0xff] }
 0x503   : > { %2040 = vrot.lane.b32.xlu1 %v4598_v5, %s8089_s27 }
 0x505   : > { %v6046_v28 = vpop.permute.xlu1 %1783 }
 0x506   : > { %8288 = vst [vmem:[#allocation133_spill] sm:$0xff] %v6046_v28  ;;  %v6065_v28 = vpop.permute.xlu2 %1659 }
 0x507   : > { %8292 = vst [vmem:[#allocation137_spill] sm:$0xff] %v6065_v28 }
 0x50b   : > { %2058 = vrot.lane.b32.xlu1 %v4599_v48, %s8158_s13  ;;  %v6068_v48 = vld [vmem:[#allocation2 + $0x4] sm:$0xff] }
 0x50d   : > { %v6052_v11 = vpop.permute.xlu1 %1801 }
 0x50e   : > { %8289 = vst [vmem:[#allocation134_spill] sm:$0xff] %v6052_v11  ;;  %v6070_v11 = vld [vmem:[#allocation2 + $0xc] sm:$0xff]  ;;  %v6079_v28 = vpop.permute.xlu2 %1677 }
 0x50f   : > { %8293 = vst [vmem:[#allocation138_spill] sm:$0xff] %v6079_v28 }
 0x513   : > { %2076 = vrot.lane.b32.xlu1 %v4600_v45, %s8090_s6  ;;  %v4602_v45 = vld [vmem:[%s8083_s1 + $0x6c] ss:$0 sm:$0xff] }
 0x515   : > { %v6060_v5 = vpop.permute.xlu1 %1819 }
 0x516   : > { %8291 = vst [vmem:[#allocation136_spill] sm:$0xff] %v6060_v5 }
 0x51b   : > { %2094 = vrot.lane.b32.xlu1 %v4601_v61, %s8091_s19 }
 0x51d   : > { %v1843_v46 = vpop.permute.xlu1 %1842 }
 0x51e   : > { %v1845_v33 = vmul.f32 %v1843_v46, %v6068_v48  ;;  %v1846_v27 = vmul.f32 %v1843_v46, %v6070_v11  ;;  %v4603_v46 = vld [vmem:[%s8083_s1 + $0x6d] ss:$0 sm:$0xff] }
 0x520   : > { %1851 = vrot.lane.b32.xlu0 %v1846_v27, %s8092_s17  ;;  %1849 = vrot.lane.b32.xlu2 %v1845_v33, %s8092_s17  ;;  %v6090_v27 = vpop.permute.xlu2 %1695 }
 0x521   : > { %8294 = vst [vmem:[#allocation139_spill] sm:$0xff] %v6090_v27 }
 0x523   : > { %2112 = vrot.lane.b32.xlu1 %v4602_v45, %s8093_s30 }
 0x525   : > { %v1861_v61 = vpop.permute.xlu1 %1860 }
 0x526   : > { %v1863_v5 = vmul.f32 %v1861_v61, %v6068_v48  ;;  %v1864_v29 = vmul.f32 %v1861_v61, %v6070_v11  ;;  %v4604_v61 = vld [vmem:[%s8083_s1 + $0x6e] ss:$0 sm:$0xff] }
 0x528   : > { %1869 = vrot.lane.b32.xlu0 %v1864_v29, %s8094_s20  ;;  %1867 = vrot.lane.b32.xlu2 %v1863_v5, %s8094_s20  ;;  %v6100_v5 = vpop.permute.xlu2 %1713 }
 0x529   : > { %8295 = vst [vmem:[#allocation140_spill] sm:$0xff] %v6100_v5 }
 0x52b   : > { %2130 = vrot.lane.b32.xlu1 %v4603_v46, %s8095_s24 }
 0x52d   : > { %v1879_v33 = vpop.permute.xlu1 %1878 }
 0x52e   : > { %v1881_v45 = vmul.f32 %v1879_v33, %v6068_v48  ;;  %v1882_v28 = vmul.f32 %v1879_v33, %v6070_v11  ;;  %v203_v33 = vmul.f32 %v4724_v31, %v4983_v18 }
 0x530   : > { %1887 = vrot.lane.b32.xlu0 %v1882_v28, %s8096_s5  ;;  %1885 = vrot.lane.b32.xlu2 %v1881_v45, %s8096_s5  ;;  %v223_v28 = vadd.f32 %v5116_v35, %v203_v33 }
 0x532   : > { %v241_v45 = vadd.f32 %v5090_v15, %v223_v28 }
 0x533   : > { %2148 = vrot.lane.b32.xlu1 %v4604_v61, %s8097_s25 }
 0x534   : > { %v259_v61 = vadd.f32 %v5096_v20, %v241_v45  ;;  %v4607_v45 = vld [vmem:[%s8083_s1 + $0x71] ss:$0 sm:$0xff] }
 0x535   : > { %v1897_v29 = vpop.permute.xlu1 %1896 }
 0x536   : > { %v1899_v46 = vmul.f32 %v1897_v29, %v6068_v48  ;;  %v1900_v27 = vmul.f32 %v1897_v29, %v6070_v11  ;;  %v277_v37 = vadd.f32 %v5102_v25, %v259_v61 }
 0x538   : > { %1905 = vrot.lane.b32.xlu0 %v1900_v27, %s8098_s7  ;;  %1903 = vrot.lane.b32.xlu2 %v1899_v46, %s8098_s7  ;;  %v4606_v27 = vld [vmem:[%s8083_s1 + $0x70] ss:$0 sm:$0xff]  ;;  %v6120_v46 = vpop.permute.xlu2 %1731  ;;  %v295_v15 = vadd.f32 %v5108_v30, %v277_v37 }
 0x53a   : > { %v313_v20 = vadd.f32 %v5114_v34, %v295_v15 }
 0x53b   : > { %2166 = vrot.lane.b32.xlu1 %v4605_v19, %s8099_s11 }
 0x53c   : > { %v331_v35 = vadd.f32 %v5122_v39, %v313_v20 }
 0x53d   : > { %v1915_v29 = vpop.permute.xlu1 %1914 }
 0x53e   : > { %v1917_v5 = vmul.f32 %v1915_v29, %v6068_v48  ;;  %v1918_v31 = vmul.f32 %v1915_v29, %v6070_v11  ;;  %v349_v28 = vadd.f32 %v5130_v44, %v331_v35  ;;  %v4725_v29 = vld [vmem:[#allocation2 + $0x8] sm:$0xff] }
 0x540   : > { %1923 = vrot.lane.b32.xlu0 %v1918_v31, %s8100_s21  ;;  %1921 = vrot.lane.b32.xlu2 %v1917_v5, %s8100_s21  ;;  %v367_v30 = vadd.f32 %v5140_v22, %v349_v28  ;;  %v6137_v34 = vpop.permute.xlu2 %1749  ;;  %v204_v31 = vmul.f32 %v4725_v29, %v4983_v18  ;;  %v4608_v22 = vld [vmem:[%s8083_s1 + $0x72] ss:$0 sm:$0xff]  ;;  %s8303_s1 = smov 116  }
 0x542   : > { %v385_v39 = vadd.f32 %v5148_v50, %v367_v30  ;;  %v224_v50 = vadd.f32 %v5124_v40, %v204_v31 }
 0x543   : > { %2184 = vrot.lane.b32.xlu1 %v4606_v27, %s8101_s10 }
 0x544   : > { %v403_v37 = vadd.f32 %v5154_v51, %v385_v39  ;;  %v242_v15 = vadd.f32 %v5136_v47, %v224_v50 }
 0x545   : > { %v1933_v19 = vpop.permute.xlu1 %1932 }
 0x546   : > { %v1935_v25 = vmul.f32 %v1933_v19, %v6068_v48  ;;  %v1936_v33 = vmul.f32 %v1933_v19, %v6070_v11  ;;  %v421_v27 = vadd.f32 %v5162_v54, %v403_v37  ;;  %v260_v54 = vadd.f32 %v5146_v49, %v242_v15 }
 0x548   : > { %1941 = vrot.lane.b32.xlu0 %v1936_v33, %s8102_s18  ;;  %1939 = vrot.lane.b32.xlu2 %v1935_v25, %s8102_s18  ;;  %v439_v51 = vadd.f32 %v5170_v57, %v421_v27  ;;  %v6156_v18 = vpop.permute.xlu2 %1767  ;;  %v278_v40 = vadd.f32 %v5156_v52, %v260_v54  ;;  %s8445_s18 = smov 121  }
 0x54a   : > { %v457_v20 = vadd.f32 %v5178_v60, %v439_v51  ;;  %v296_v47 = vadd.f32 %v5167_v56, %v278_v40 }
 0x54b   : > { %2202 = vrot.lane.b32.xlu1 %v4607_v45, %s8103_s0  ;;  %s8446_s0 = smov 23  }
 0x54c   : > { %v475_v35 = vadd.f32 %v5186_v63, %v457_v20  ;;  %v314_v49 = vadd.f32 %v5175_v59, %v296_v47 }
 0x54d   : > { %v1951_v5 = vpop.permute.xlu1 %1950 }
 0x54e   : > { %v1953_v44 = vmul.f32 %v1951_v5, %v6068_v48  ;;  %v1954_v61 = vmul.f32 %v1951_v5, %v6070_v11  ;;  %v493_v57 = vadd.f32 %v5192_v1, %v475_v35  ;;  %v332_v28 = vadd.f32 %v5184_v62, %v314_v49 }
 0x550   : > { %1959 = vrot.lane.b32.xlu0 %v1954_v61, %s8296_s3  ;;  %1957 = vrot.lane.b32.xlu2 %v1953_v44, %s8296_s3  ;;  %v511_v60 = vadd.f32 %v5200_v4, %v493_v57  ;;  %v6172_v52 = vpop.permute.xlu2 %1785  ;;  %v350_v37 = vadd.f32 %v5194_v2, %v332_v28  ;;  %v8307_v57 = vld [vmem:[#allocation21_spill] sm:$0xff]  ;;  %s8441_s3 = smov 3  }
 0x552   : > { %v529_v63 = vadd.f32 %v5208_v7, %v511_v60  ;;  %v368_v59 = vadd.f32 %v5205_v6, %v350_v37  ;;  %v4727_v60 = vld [vmem:[#allocation2 + $0x9] sm:$0xff] }
 0x553   : > { %2220 = vrot.lane.b32.xlu1 %v4608_v22, %s8297_s4  ;;  %v612_v49 = vmul.f32 %v4727_v60, %v5398_v0  ;;  %s8450_s4 = smov 118  }
 0x554   : > { %v547_v45 = vadd.f32 %v5216_v10, %v529_v63  ;;  %v386_v4 = vadd.f32 %v5213_v9, %v368_v59  ;;  %v4726_v10 = vld [vmem:[#allocation2 + $0x1] sm:$0xff] }
 0x555   : > { %v1969_v19 = vpop.permute.xlu1 %1968  ;;  %v611_v5 = vmul.f32 %v4726_v10, %v5398_v0  ;;  %v8313_v0 = vld [vmem:[#allocation24_spill] sm:$0xff] }
 0x556   : > { %v1971_v25 = vmul.f32 %v1969_v19, %v6068_v48  ;;  %v1972_v33 = vmul.f32 %v1969_v19, %v6070_v11  ;;  %v565_v56 = vadd.f32 %v5224_v13, %v547_v45  ;;  %v404_v44 = vadd.f32 %v5222_v12, %v386_v4 }
 0x558   : > { %1977 = vrot.lane.b32.xlu0 %v1972_v33, %s8298_s22  ;;  %1975 = vrot.lane.b32.xlu2 %v1971_v25, %s8298_s22  ;;  %v583_v62 = vadd.f32 %v5230_v16, %v565_v56  ;;  %v422_v29 = vadd.f32 %v5232_v17, %v404_v44  ;;  %v6189_v6 = vpop.permute.xlu2 %1803  ;;  %v8311_v56 = vld [vmem:[#allocation22_spill] sm:$0xff]  ;;  %s8439_s22 = smov 1  }
 0x55a   : > { %v601_v7 = vadd.f32 %v5238_v21, %v583_v62  ;;  %v440_v9 = vadd.f32 %v5243_v24, %v422_v29  ;;  %v8312_v62 = vld [vmem:[#allocation27_spill] sm:$0xff] }
 0x55c   : > { %v613_v31 = vadd.f32 %v611_v5, %v601_v7  ;;  %v458_v12 = vadd.f32 %v5257_v36, %v440_v9  ;;  %v8314_v5 = vld [vmem:[#allocation28_spill] sm:$0xff] }
 0x55d   : > { %v1987_v30 = vpop.permute.xlu1 %1986 }
 0x55e   : > { %v1989_v1 = vmul.f32 %v1987_v30, %v6068_v48  ;;  %v1990_v39 = vmul.f32 %v1987_v30, %v6070_v11  ;;  %v631_v16 = vadd.f32 %v5348_v41, %v613_v31  ;;  %v476_v27 = vadd.f32 %v5268_v43, %v458_v12  ;;  %v8317_v12 = vld [vmem:[#allocation29_spill] sm:$0xff] }
 0x560   : > { %1995 = vrot.lane.b32.xlu0 %v1990_v39, %s8299_s28  ;;  %1993 = vrot.lane.b32.xlu2 %v1989_v1, %s8299_s28  ;;  %v649_v21 = vadd.f32 %v5354_v26, %v631_v16  ;;  %v494_v15 = vadd.f32 %v5278_v55, %v476_v27  ;;  %v6207_v43 = vpop.permute.xlu2 %1821  ;;  %v8309_v39 = vld [vmem:[#allocation25_spill] sm:$0xff]  ;;  %v8318_v27 = vld [vmem:[#allocation32_spill] sm:$0xff] }
 0x562   : > { %v667_v22 = vadd.f32 %v5360_v3, %v649_v21  ;;  %v512_v24 = vadd.f32 %v5293_v14, %v494_v15  ;;  %v8302_v14 = vld [vmem:[#allocation19_spill] sm:$0xff] }
 0x564   : > { %v685_v20 = vadd.f32 %v5366_v23, %v667_v22  ;;  %v530_v41 = vadd.f32 %v5305_v32, %v512_v24  ;;  %v8304_v32 = vld [vmem:[#allocation17_spill] sm:$0xff] }
 0x565   : > { %v2005_v2 = vpop.permute.xlu1 %2004 }
 0x566   : > { %v2007_v13 = vmul.f32 %v2005_v2, %v6068_v48  ;;  %v2008_v61 = vmul.f32 %v2005_v2, %v6070_v11  ;;  %v703_v36 = vadd.f32 %v5372_v38, %v685_v20  ;;  %v548_v3 = vadd.f32 %v5316_v42, %v530_v41  ;;  %v8315_v2 = vld [vmem:[#allocation26_spill] sm:$0xff]  ;;  %v6248_v20 = vpop.permute.xlu0 %1832 }
 0x568   : > { %2013 = vrot.lane.b32.xlu0 %v2008_v61, %s8300_s14  ;;  %2011 = vrot.lane.b32.xlu2 %v2007_v13, %s8300_s14  ;;  %v721_v26 = vadd.f32 %v5378_v53, %v703_v36  ;;  %v566_v19 = vadd.f32 %v5326_v58, %v548_v3  ;;  %v8305_v53 = vld [vmem:[#allocation20_spill] sm:$0xff]  ;;  %v8308_v58 = vld [vmem:[#allocation23_spill] sm:$0xff]  ;;  %v8316_v61 = vld [vmem:[#allocation30_spill] sm:$0xff]  ;;  %s8437_s14 = sld [smem:[#allocation143_spill]] }
 0x569   : > { %v8322_v36 = vld [vmem:[#allocation33_spill] sm:$0xff] }
 0x56a   : > { %v739_v55 = vadd.f32 %v5384_v8, %v721_v26  ;;  %v584_v38 = vadd.f32 %v8304_v32, %v566_v19  ;;  %v8306_v8 = vld [vmem:[#allocation18_spill] sm:$0xff]  ;;  %v8323_v26 = vld [vmem:[#allocation36_spill] sm:$0xff] }
 0x56b   : > { %v8326_v32 = vld [vmem:[#allocation38_spill] sm:$0xff] }
 0x56c   : > { %v757_v25 = vadd.f32 %v8302_v14, %v739_v55  ;;  %v602_v40 = vadd.f32 %v8306_v8, %v584_v38  ;;  %v8324_v55 = vld [vmem:[#allocation35_spill] sm:$0xff]  ;;  %v8329_v8 = vld [vmem:[#allocation40_spill] sm:$0xff] }
 0x56d   : > { %v2023_v17 = vpop.permute.xlu1 %2022 }
 0x56e   : > { %v2025_v50 = vmul.f32 %v2023_v17, %v6068_v48  ;;  %v2026_v51 = vmul.f32 %v2023_v17, %v6070_v11  ;;  %v775_v33 = vadd.f32 %v8305_v53, %v757_v25  ;;  %v614_v1 = vadd.f32 %v612_v49, %v602_v40  ;;  %v8320_v17 = vld [vmem:[#allocation31_spill] sm:$0xff]  ;;  %s8438_s28 = smov %s8437_s14 }
 0x56f   : > { %v8327_v53 = vld [vmem:[#allocation39_spill] sm:$0xff] }
 0x570   : > { %2031 = vrot.lane.b32.xlu0 %v2026_v51, %s8301_s23  ;;  %2029 = vrot.lane.b32.xlu2 %v2025_v50, %s8301_s23  ;;  %v793_v47 = vadd.f32 %v8307_v57, %v775_v33  ;;  %v632_v59 = vadd.f32 %v8311_v56, %v614_v1  ;;  %v8321_v51 = vld [vmem:[#allocation34_spill] sm:$0xff]  ;;  %v8330_v57 = vld [vmem:[#allocation41_spill] sm:$0xff]  ;;  %s8440_s23 = smov 2  }
 0x571   : > { %v8333_v1 = vld [vmem:[#allocation65_spill] sm:$0xff] }
 0x572   : > { %v811_v63 = vadd.f32 %v8308_v58, %v793_v47  ;;  %v650_v10 = vadd.f32 %v8313_v0, %v632_v59  ;;  %v8331_v58 = vld [vmem:[#allocation42_spill] sm:$0xff]  ;;  %v8335_v0 = vld [vmem:[#allocation45_spill] sm:$0xff] }
 0x574   : > { %v829_v37 = vadd.f32 %v8309_v39, %v811_v63  ;;  %v668_v13 = vadd.f32 %v8315_v2, %v650_v10 }
 0x575   : > { %v2041_v54 = vpop.permute.xlu1 %2040 }
 0x576   : > { %v2043_v23 = vmul.f32 %v2041_v54, %v6068_v48  ;;  %v2044_v35 = vmul.f32 %v2041_v54, %v6070_v11  ;;  %v847_v4 = vadd.f32 %v8312_v62, %v829_v37  ;;  %v686_v21 = vadd.f32 %v8317_v12, %v668_v13  ;;  %v8334_v37 = vld [vmem:[#allocation44_spill] sm:$0xff]  ;;  %v8340_v12 = vld [vmem:[#allocation57_spill] sm:$0xff] }
 0x577   : > { %v8338_v13 = vld [vmem:[#allocation56_spill] sm:$0xff] }
 0x578   : > { %2049 = vrot.lane.b32.xlu0 %v2044_v35, %s8303_s1  ;;  %2047 = vrot.lane.b32.xlu2 %v2043_v23, %s8303_s1  ;;  %s8310_s1 = smov 115   ;;  %v865_v44 = vadd.f32 %v8314_v5, %v847_v4  ;;  %v704_v50 = vadd.f32 %v8320_v17, %v686_v21  ;;  %v8325_v23 = vld [vmem:[#allocation37_spill] sm:$0xff]  ;;  %v8342_v17 = vld [vmem:[#allocation58_spill] sm:$0xff] }
 0x57a   : > { %v6221_v42 = vpop.permute.xlu2 %1849  ;;  %v883_v29 = vadd.f32 %v8316_v61, %v865_v44  ;;  %v722_v41 = vadd.f32 %v8322_v36, %v704_v50  ;;  %v8337_v44 = vld [vmem:[#allocation46_spill] sm:$0xff] }
 0x57c   : > { %v901_v22 = vadd.f32 %v8318_v27, %v883_v29  ;;  %v740_v54 = vadd.f32 %v8324_v55, %v722_v41  ;;  %v8341_v27 = vld [vmem:[#allocation48_spill] sm:$0xff]  ;;  %v8343_v41 = vld [vmem:[#allocation49_spill] sm:$0xff] }
 0x57d   : > { %v2059_v28 = vpop.permute.xlu1 %2058 }
 0x57e   : > { %v2061_v45 = vmul.f32 %v2059_v28, %v6068_v48  ;;  %v2062_v30 = vmul.f32 %v2059_v28, %v6070_v11  ;;  %v919_v15 = vadd.f32 %v8321_v51, %v901_v22  ;;  %v758_v38 = vadd.f32 %v8326_v32, %v740_v54  ;;  %v8332_v28 = vld [vmem:[#allocation43_spill] sm:$0xff]  ;;  %v8346_v54 = vld [vmem:[#allocation50_spill] sm:$0xff] }
 0x57f   : > { %v8348_v32 = vld [vmem:[#allocation51_spill] sm:$0xff] }
 0x580   : > { %2067 = vrot.lane.b32.xlu0 %v2062_v30, %s8310_s1  ;;  %2065 = vrot.lane.b32.xlu2 %v2061_v45, %s8310_s1  ;;  %s8319_s1 = smov 114   ;;  %v937_v3 = vadd.f32 %v8323_v26, %v919_v15  ;;  %v776_v40 = vadd.f32 %v8329_v8, %v758_v38  ;;  %v4728_v30 = vld [vmem:[#allocation2 + $0x2] sm:$0xff] }
 0x581   : > { %v1019_v39 = vmul.f32 %v4728_v30, %v8333_v1  ;;  %v8350_v8 = vld [vmem:[#allocation52_spill] sm:$0xff] }
 0x582   : > { %v6234_v7 = vpop.permute.xlu2 %1867  ;;  %v955_v35 = vadd.f32 %v8325_v23, %v937_v3  ;;  %v794_v63 = vadd.f32 %v8331_v58, %v776_v40  ;;  %v8344_v3 = vld [vmem:[#allocation59_spill] sm:$0xff] }
 0x584   : > { %v973_v33 = vadd.f32 %v8327_v53, %v955_v35  ;;  %v812_v56 = vadd.f32 %v8334_v37, %v794_v63  ;;  %v8347_v35 = vld [vmem:[#allocation60_spill] sm:$0xff]  ;;  %v8349_v53 = vld [vmem:[#allocation61_spill] sm:$0xff] }
 0x585   : > { %v2077_v31 = vpop.permute.xlu1 %2076 }
 0x586   : > { %v2079_v9 = vmul.f32 %v2077_v31, %v6068_v48  ;;  %v2080_v16 = vmul.f32 %v2077_v31, %v6070_v11  ;;  %v991_v47 = vadd.f32 %v8330_v57, %v973_v33  ;;  %v830_v10 = vadd.f32 %v8335_v0, %v812_v56  ;;  %v8351_v57 = vld [vmem:[#allocation62_spill] sm:$0xff] }
 0x587   : > { %v8355_v56 = vld [vmem:[#allocation54_spill] sm:$0xff] }
 0x588   : > { %2085 = vrot.lane.b32.xlu0 %v2080_v16, %s8319_s1  ;;  %2083 = vrot.lane.b32.xlu2 %v2079_v9, %s8319_s1  ;;  %s8328_s1 = smov 113   ;;  %v1009_v45 = vadd.f32 %v8332_v28, %v991_v47  ;;  %v848_v2 = vadd.f32 %v8337_v44, %v830_v10  ;;  %v8339_v9 = vld [vmem:[#allocation47_spill] sm:$0xff] }
 0x58a   : > { %v6250_v24 = vpop.permute.xlu2 %1885  ;;  %v1021_v5 = vadd.f32 %v1019_v39, %v1009_v45  ;;  %v866_v16 = vadd.f32 %v8339_v9, %v848_v2  ;;  %v8352_v45 = vld [vmem:[#allocation53_spill] sm:$0xff]  ;;  %v8353_v39 = vld [vmem:[#allocation63_spill] sm:$0xff]  ;;  %v8358_v2 = vld [vmem:[#allocation66_spill] sm:$0xff] }
 0x58c   : > { %v1039_v61 = vadd.f32 %v8338_v13, %v1021_v5  ;;  %v884_v22 = vadd.f32 %v8341_v27, %v866_v16  ;;  %v8357_v5 = vld [vmem:[#allocation55_spill] sm:$0xff]  ;;  %v8359_v16 = vld [vmem:[#allocation68_spill] sm:$0xff] }
 0x58d   : > { %v2095_v19 = vpop.permute.xlu1 %2094 }
 0x58e   : > { %v2097_v14 = vmul.f32 %v2095_v19, %v6068_v48  ;;  %v2098_v25 = vmul.f32 %v2095_v19, %v6070_v11  ;;  %v1057_v21 = vadd.f32 %v8340_v12, %v1039_v61  ;;  %v902_v26 = vadd.f32 %v8343_v41, %v884_v22  ;;  %v4729_v61 = vld [vmem:[#allocation2 + $0xa] sm:$0xff] }
 0x58f   : > { %v1020_v9 = vmul.f32 %v4729_v61, %v8333_v1  ;;  %v8363_v41 = vld [vmem:[#allocation72_spill] sm:$0xff] }
 0x590   : > { %2103 = vrot.lane.b32.xlu0 %v2098_v25, %s8328_s1  ;;  %2101 = vrot.lane.b32.xlu2 %v2097_v14, %s8328_s1  ;;  %s8336_s1 = smov 112   ;;  %v1075_v50 = vadd.f32 %v8342_v17, %v1057_v21  ;;  %v920_v23 = vadd.f32 %v8346_v54, %v902_v26 }
 0x592   : > { %v6264_v60 = vpop.permute.xlu2 %1903  ;;  %v6266_v49 = vpop.permute.xlu0 %1851  ;;  %v1093_v55 = vadd.f32 %v8344_v3, %v1075_v50  ;;  %v938_v38 = vadd.f32 %v8348_v32, %v920_v23  ;;  %v8360_v50 = vld [vmem:[#allocation70_spill] sm:$0xff]  ;;  %v8365_v23 = vld [vmem:[#allocation73_spill] sm:$0xff] }
 0x594   : > { %v1111_v19 = vadd.f32 %v8347_v35, %v1093_v55  ;;  %v956_v40 = vadd.f32 %v8350_v8, %v938_v38  ;;  %v8364_v55 = vld [vmem:[#allocation69_spill] sm:$0xff]  ;;  %v8367_v38 = vld [vmem:[#allocation75_spill] sm:$0xff] }
 0x595   : > { %v2113_v59 = vpop.permute.xlu1 %2112 }
 0x596   : > { %v2115_v62 = vmul.f32 %v2113_v59, %v6068_v48  ;;  %v2116_v4 = vmul.f32 %v2113_v59, %v6070_v11  ;;  %v1129_v33 = vadd.f32 %v8349_v53, %v1111_v19  ;;  %v974_v30 = vadd.f32 %v8352_v45, %v956_v40  ;;  %v8366_v19 = vld [vmem:[#allocation71_spill] sm:$0xff] }
 0x598   : > { %2121 = vrot.lane.b32.xlu0 %v2116_v4, %s8336_s1  ;;  %2119 = vrot.lane.b32.xlu2 %v2115_v62, %s8336_s1  ;;  %s8345_s1 = smov 111   ;;  %v1147_v47 = vadd.f32 %v8351_v57, %v1129_v33  ;;  %v992_v59 = vadd.f32 %v8355_v56, %v974_v30  ;;  %v8356_v62 = vld [vmem:[#allocation64_spill] sm:$0xff]  ;;  %v8368_v57 = vld [vmem:[#allocation74_spill] sm:$0xff]  ;;  %v8372_v30 = vld [vmem:[#allocation79_spill] sm:$0xff] }
 0x59a   : > { %v6279_v29 = vpop.permute.xlu2 %1921  ;;  %v6281_v31 = vpop.permute.xlu0 %1869  ;;  %v1165_v37 = vadd.f32 %v8353_v39, %v1147_v47  ;;  %v1010_v44 = vadd.f32 %v8357_v5, %v992_v59  ;;  %v8373_v59 = vld [vmem:[#allocation78_spill] sm:$0xff] }
 0x59c   : > { %v1183_v4 = vadd.f32 %v8356_v62, %v1165_v37  ;;  %v1022_v17 = vadd.f32 %v1020_v9, %v1010_v44  ;;  %v8375_v44 = vld [vmem:[#allocation80_spill] sm:$0xff] }
 0x59d   : > { %v2131_v51 = vpop.permute.xlu1 %2130 }
 0x59e   : > { %v2133_v15 = vmul.f32 %v2131_v51, %v6068_v48  ;;  %v2134_v36 = vmul.f32 %v2131_v51, %v6070_v11  ;;  %v1201_v13 = vadd.f32 %v8358_v2, %v1183_v4  ;;  %v8374_v4 = vld [vmem:[#allocation81_spill] sm:$0xff] }
 0x5a0   : > { %2139 = vrot.lane.b32.xlu0 %v2134_v36, %s8345_s1  ;;  %2137 = vrot.lane.b32.xlu2 %v2133_v15, %s8345_s1  ;;  %s8354_s1 = smov 110   ;;  %v1219_v12 = vadd.f32 %v8359_v16, %v1201_v13  ;;  %v8362_v15 = vld [vmem:[#allocation67_spill] sm:$0xff]  ;;  %v8376_v13 = vld [vmem:[#allocation82_spill] sm:$0xff] }
 0x5a1   : > { %v1040_v36 = vadd.f32 %v8362_v15, %v1022_v17  ;;  %v8381_v15 = vld [vmem:[#allocation86_spill] sm:$0xff] }
 0x5a2   : > { %v6295_v14 = vpop.permute.xlu2 %1939  ;;  %v6297_v25 = vpop.permute.xlu0 %1887  ;;  %v1237_v51 = vadd.f32 %v8360_v50, %v1219_v12  ;;  %v8380_v50 = vld [vmem:[#allocation85_spill] sm:$0xff] }
 0x5a3   : > { %v1058_v54 = vadd.f32 %v8364_v55, %v1040_v36  ;;  %v8382_v55 = vld [vmem:[#allocation87_spill] sm:$0xff] }
 0x5a4   : > { %v1255_v26 = vadd.f32 %v8363_v41, %v1237_v51 }
 0x5a5   : > { %v2149_v58 = vpop.permute.xlu1 %2148  ;;  %v1076_v32 = vadd.f32 %v8366_v19, %v1058_v54  ;;  %v8384_v19 = vld [vmem:[#allocation90_spill] sm:$0xff] }
 0x5a6   : > { %v2151_v63 = vmul.f32 %v2149_v58, %v6068_v48  ;;  %v2152_v28 = vmul.f32 %v2149_v58, %v6070_v11  ;;  %v1273_v35 = vadd.f32 %v8365_v23, %v1255_v26  ;;  %v8369_v58 = vld [vmem:[#allocation77_spill] sm:$0xff]  ;;  %v8383_v23 = vld [vmem:[#allocation88_spill] sm:$0xff] }
 0x5a7   : > { %v1094_v47 = vadd.f32 %v8368_v57, %v1076_v32  ;;  %v8385_v32 = vld [vmem:[#allocation108_spill] sm:$0xff] }
 0x5a8   : > { %2157 = vrot.lane.b32.xlu0 %v2152_v28, %s8354_s1  ;;  %2155 = vrot.lane.b32.xlu2 %v2151_v63, %s8354_s1  ;;  %s8361_s1 = smov 109   ;;  %v1291_v53 = vadd.f32 %v8367_v38, %v1273_v35  ;;  %v8371_v28 = vld [vmem:[#allocation76_spill] sm:$0xff]  ;;  %v1427_v38 = vmul.f32 %v8385_v32, %v8384_v19 }
 0x5a9   : > { %v1112_v45 = vadd.f32 %v8371_v28, %v1094_v47  ;;  %v8387_v47 = vld [vmem:[#allocation91_spill] sm:$0xff]  ;;  %v8389_v28 = vld [vmem:[#allocation92_spill] sm:$0xff] }
 0x5aa   : > { %v6311_v0 = vpop.permute.xlu2 %1957  ;;  %v6313_v10 = vpop.permute.xlu0 %1905  ;;  %v1309_v63 = vadd.f32 %v8369_v58, %v1291_v53  ;;  %v8386_v53 = vld [vmem:[#allocation89_spill] sm:$0xff] }
 0x5ab   : > { %v1130_v62 = vadd.f32 %v8373_v59, %v1112_v45 }
 0x5ac   : > { %v1327_v39 = vadd.f32 %v8372_v30, %v1309_v63  ;;  %v8390_v30 = vld [vmem:[#allocation102_spill] sm:$0xff] }
 0x5ad   : > { %v2167_v21 = vpop.permute.xlu1 %2166  ;;  %v1148_v2 = vadd.f32 %v8375_v44, %v1130_v62  ;;  %v8392_v44 = vld [vmem:[#allocation103_spill] sm:$0xff] }
 0x5ae   : > { %v2169_v27 = vmul.f32 %v2167_v21, %v6068_v48  ;;  %v2170_v22 = vmul.f32 %v2167_v21, %v6070_v11  ;;  %v1345_v5 = vadd.f32 %v8374_v4, %v1327_v39  ;;  %v8377_v21 = vld [vmem:[#allocation83_spill] sm:$0xff]  ;;  %v8391_v4 = vld [vmem:[#allocation93_spill] sm:$0xff] }
 0x5b0   : > { %2175 = vrot.lane.b32.xlu0 %v2170_v22, %s8361_s1  ;;  %2173 = vrot.lane.b32.xlu2 %v2169_v27, %s8361_s1  ;;  %s8370_s1 = smov 108   ;;  %v1363_v61 = vadd.f32 %v8376_v13, %v1345_v5  ;;  %v1166_v27 = vadd.f32 %v8377_v21, %v1148_v2  ;;  %v8378_v22 = vld [vmem:[#allocation84_spill] sm:$0xff]  ;;  %v8393_v13 = vld [vmem:[#allocation94_spill] sm:$0xff] }
 0x5b2   : > { %v6326_v3 = vpop.permute.xlu2 %1975  ;;  %v6328_v1 = vpop.permute.xlu0 %1923  ;;  %v1381_v17 = vadd.f32 %v8378_v22, %v1363_v61  ;;  %v1184_v51 = vadd.f32 %v8380_v50, %v1166_v27  ;;  %v8396_v27 = vld [vmem:[#allocation105_spill] sm:$0xff] }
 0x5b4   : > { %v1399_v36 = vadd.f32 %v8381_v15, %v1381_v17  ;;  %v1202_v54 = vadd.f32 %v8382_v55, %v1184_v51  ;;  %v8397_v17 = vld [vmem:[#allocation96_spill] sm:$0xff]  ;;  %v8398_v51 = vld [vmem:[#allocation106_spill] sm:$0xff] }
 0x5b5   : > { %v2185_v33 = vpop.permute.xlu1 %2184 }
 0x5b6   : > { %v2187_v8 = vmul.f32 %v2185_v33, %v6068_v48  ;;  %v2188_v40 = vmul.f32 %v2185_v33, %v6070_v11  ;;  %v1417_v35 = vadd.f32 %v8383_v23, %v1399_v36  ;;  %v1220_v33 = vadd.f32 %v8386_v53, %v1202_v54  ;;  %v8399_v54 = vld [vmem:[#allocation97_spill] sm:$0xff] }
 0x5b8   : > { %2193 = vrot.lane.b32.xlu0 %v2188_v40, %s8370_s1  ;;  %2191 = vrot.lane.b32.xlu2 %v2187_v8, %s8370_s1  ;;  %s8379_s1 = smov 107   ;;  %v1238_v58 = vadd.f32 %v8387_v47, %v1220_v33  ;;  %v1429_v63 = vadd.f32 %v1427_v38, %v1417_v35  ;;  %v8400_v35 = vld [vmem:[#allocation107_spill] sm:$0xff]  ;;  %v8401_v38 = vld [vmem:[#allocation98_spill] sm:$0xff]  ;;  %v8402_v33 = vld [vmem:[#allocation109_spill] sm:$0xff] }
 0x5b9   : > { %v8404_v47 = vld [vmem:[#allocation111_spill] sm:$0xff] }
 0x5ba   : > { %v6342_v37 = vpop.permute.xlu2 %1993  ;;  %v6344_v56 = vpop.permute.xlu0 %1941  ;;  %v1256_v45 = vadd.f32 %v8389_v28, %v1238_v58  ;;  %v1447_v39 = vadd.f32 %v8390_v30, %v1429_v63  ;;  %v8405_v63 = vld [vmem:[#allocation100_spill] sm:$0xff] }
 0x5bc   : > { %v1274_v5 = vadd.f32 %v8391_v4, %v1256_v45  ;;  %v1465_v2 = vadd.f32 %v8392_v44, %v1447_v39  ;;  %v8406_v45 = vld [vmem:[#allocation113_spill] sm:$0xff] }
 0x5bd   : > { %v2203_v9 = vpop.permute.xlu1 %2202 }
 0x5be   : > { %v2205_v16 = vmul.f32 %v2203_v9, %v6068_v48  ;;  %v2206_v12 = vmul.f32 %v2203_v9, %v6070_v11  ;;  %v1292_v61 = vadd.f32 %v8393_v13, %v1274_v5  ;;  %v8394_v9 = vld [vmem:[#allocation104_spill] sm:$0xff]  ;;  %v8407_v5 = vld [vmem:[#allocation101_spill] sm:$0xff] }
 0x5c0   : > { %2211 = vrot.lane.b32.xlu0 %v2206_v12, %s8379_s1  ;;  %2209 = vrot.lane.b32.xlu2 %v2205_v16, %s8379_s1  ;;  %s8388_s1 = smov 106   ;;  %v1483_v16 = vadd.f32 %v8394_v9, %v1465_v2  ;;  %v8395_v12 = vld [vmem:[#allocation95_spill] sm:$0xff] }
 0x5c1   : > { %v1310_v21 = vadd.f32 %v8395_v12, %v1292_v61  ;;  %v8408_v2 = vld [vmem:[#allocation115_spill] sm:$0xff]  ;;  %v4730_v61 = vld [vmem:[#allocation2 + $0xb] sm:$0xff] }
 0x5c2   : > { %v6358_v41 = vpop.permute.xlu2 %2011  ;;  %v6360_v26 = vpop.permute.xlu0 %1959  ;;  %v1501_v22 = vadd.f32 %v8396_v27, %v1483_v16  ;;  %v1428_v9 = vmul.f32 %v4730_v61, %v8385_v32  ;;  %v8409_v16 = vld [vmem:[#allocation116_spill] sm:$0xff]  ;;  %v8410_v27 = vld [vmem:[#allocation118_spill] sm:$0xff] }
 0x5c3   : > { %v1328_v50 = vadd.f32 %v8397_v17, %v1310_v21  ;;  %v8411_v17 = vld [vmem:[#allocation110_spill] sm:$0xff]  ;;  %v8416_v32 = vld [vmem:[#allocation124_spill] sm:$0xff] }
 0x5c4   : > { %v1519_v15 = vadd.f32 %v8398_v51, %v1501_v22  ;;  %v8412_v51 = vld [vmem:[#allocation120_spill] sm:$0xff] }
 0x5c5   : > { %v2221_v8 = vpop.permute.xlu1 %2220  ;;  %v1346_v23 = vadd.f32 %v8399_v54, %v1328_v50 }
 0x5c6   : > { %v2223_v40 = vmul.f32 %v2221_v8, %v6068_v48  ;;  %v2224_v57 = vmul.f32 %v2221_v8, %v6070_v11  ;;  %v1537_v19 = vadd.f32 %v8400_v35, %v1519_v15  ;;  %v8413_v35 = vld [vmem:[#allocation112_spill] sm:$0xff] }
 0x5c7   : > { %v1364_v53 = vadd.f32 %v8401_v38, %v1346_v23  ;;  %v8414_v38 = vld [vmem:[#allocation122_spill] sm:$0xff] }
 0x5c8   : > { %2229 = vrot.lane.b32.xlu0 %v2224_v57, %s8388_s1  ;;  %2227 = vrot.lane.b32.xlu2 %v2223_v40, %s8388_s1  ;;  %v1555_v8 = vadd.f32 %v8402_v33, %v1537_v19  ;;  %v8403_v40 = vld [vmem:[#allocation99_spill] sm:$0xff]  ;;  %v8415_v33 = vld [vmem:[#allocation114_spill] sm:$0xff]  ;;  %s8444_s1 = smov 22  }
 0x5c9   : > { %v1382_v57 = vadd.f32 %v8403_v40, %v1364_v53 }
 0x5ca   : > { %v6374_v59 = vpop.permute.xlu2 %2029  ;;  %v6376_v62 = vpop.permute.xlu0 %1977  ;;  %v1573_v58 = vadd.f32 %v8404_v47, %v1555_v8 }
 0x5cb   : > { %v1400_v28 = vadd.f32 %v8405_v63, %v1382_v57  ;;  %v8417_v57 = vld [vmem:[#allocation117_spill] sm:$0xff] }
 0x5cc   : > { %v1591_v30 = vadd.f32 %v8406_v45, %v1573_v58  ;;  %v8418_v58 = vld [vmem:[#allocation125_spill] sm:$0xff] }
 0x5cd   : > { %v1418_v44 = vadd.f32 %v8407_v5, %v1400_v28  ;;  %v8419_v28 = vld [vmem:[#allocation119_spill] sm:$0xff] }
 0x5ce   : > { %v1609_v13 = vadd.f32 %v8408_v2, %v1591_v30  ;;  %v8420_v30 = vld [vmem:[#allocation127_spill] sm:$0xff] }
 0x5cf   : > { %v1430_v21 = vadd.f32 %v1428_v9, %v1418_v44  ;;  %v8422_v9 = vld [vmem:[#allocation129_spill] sm:$0xff] }
 0x5d0   : > { %v1627_v12 = vadd.f32 %v8409_v16, %v1609_v13  ;;  %v8421_v13 = vld [vmem:[#allocation121_spill] sm:$0xff] }
 0x5d1   : > { %v1448_v50 = vadd.f32 %v8411_v17, %v1430_v21  ;;  %v8425_v17 = vld [vmem:[#allocation126_spill] sm:$0xff] }
 0x5d2   : > { %v6386_v36 = vpop.permute.xlu2 %2047  ;;  %v6388_v55 = vpop.permute.xlu0 %1995  ;;  %v1645_v22 = vadd.f32 %v8410_v27, %v1627_v12  ;;  %v8423_v12 = vld [vmem:[#allocation123_spill] sm:$0xff] }
 0x5d3   : > { %v1466_v19 = vadd.f32 %v8413_v35, %v1448_v50  ;;  %v8424_v27 = vld [vmem:[#allocation131_spill] sm:$0xff]  ;;  %v8427_v35 = vld [vmem:[#allocation128_spill] sm:$0xff] }
 0x5d4   : > { %v1663_v15 = vadd.f32 %v8412_v51, %v1645_v22  ;;  %v8426_v51 = vld [vmem:[#allocation133_spill] sm:$0xff] }
 0x5d5   : > { %v1484_v8 = vadd.f32 %v8415_v33, %v1466_v19 }
 0x5d6   : > { %v1681_v53 = vadd.f32 %v8414_v38, %v1663_v15  ;;  %v8428_v38 = vld [vmem:[#allocation134_spill] sm:$0xff] }
 0x5d7   : > { %v1502_v47 = vadd.f32 %v8417_v57, %v1484_v8  ;;  %v8430_v57 = vld [vmem:[#allocation136_spill] sm:$0xff] }
 0x5d8   : > { %v1699_v40 = vadd.f32 %v8416_v32, %v1681_v53  ;;  %v8429_v32 = vld [vmem:[#allocation130_spill] sm:$0xff] }
 0x5d9   : > { %v1520_v45 = vadd.f32 %v8419_v28, %v1502_v47  ;;  %v1835_v28 = vmul.f32 %v6248_v20, %v6068_v48 }
 0x5da   : > { %v6398_v39 = vpop.permute.xlu2 %2065  ;;  %v6400_v4 = vpop.permute.xlu0 %2013  ;;  %v1717_v63 = vadd.f32 %v8418_v58, %v1699_v40  ;;  %v8431_v58 = vld [vmem:[#allocation132_spill] sm:$0xff] }
 0x5db   : > { %v1538_v61 = vadd.f32 %v8421_v13, %v1520_v45  ;;  %v8432_v45 = vld [vmem:[#allocation135_spill] sm:$0xff]  ;;  %v8433_v13 = vld [vmem:[#allocation137_spill] sm:$0xff] }
 0x5dc   : > { %v1735_v5 = vadd.f32 %v8420_v30, %v1717_v63 }
 0x5dd   : > { %v1556_v21 = vadd.f32 %v8423_v12, %v1538_v61 }
 0x5de   : > { %v1753_v16 = vadd.f32 %v8422_v9, %v1735_v5 }
 0x5df   : > { %v1574_v50 = vadd.f32 %v8425_v17, %v1556_v21  ;;  %v8434_v21 = vld [vmem:[#allocation138_spill] sm:$0xff]  ;;  %v8435_v17 = vld [vmem:[#allocation139_spill] sm:$0xff] }
 0x5e0   : > { %v1771_v22 = vadd.f32 %v8424_v27, %v1753_v16 }
 0x5e1   : > { %v1592_v19 = vadd.f32 %v8427_v35, %v1574_v50 }
 0x5e2   : > { %v6409_v54 = vpop.permute.xlu2 %2083  ;;  %v6411_v23 = vpop.permute.xlu0 %2031  ;;  %v1789_v15 = vadd.f32 %v8426_v51, %v1771_v22 }
 0x5e3   : > { %v1610_v40 = vadd.f32 %v8429_v32, %v1592_v19 }
 0x5e4   : > { %v1807_v53 = vadd.f32 %v8428_v38, %v1789_v15  ;;  %v8436_v15 = vld [vmem:[#allocation140_spill] sm:$0xff] }
 0x5e5   : > { %v1628_v63 = vadd.f32 %v8431_v58, %v1610_v40 }
 0x5e6   : > { %v1825_v47 = vadd.f32 %v8430_v57, %v1807_v53 }
 0x5e7   : > { %v1646_v30 = vadd.f32 %v8432_v45, %v1628_v63 }
 0x5e8   : > { %v1837_v5 = vadd.f32 %v1835_v28, %v1825_v47 }
 0x5e9   : > { %v1664_v61 = vadd.f32 %v8433_v13, %v1646_v30 }
 0x5ea   : > { %v2102_v44 = vpop.permute.xlu2 %2101  ;;  %v6421_v2 = vpop.permute.xlu0 %2049  ;;  %v1855_v9 = vadd.f32 %v6221_v42, %v1837_v5 }
 0x5eb   : > { %v1682_v27 = vadd.f32 %v8434_v21, %v1664_v61 }
 0x5ec   : > { %v1873_v22 = vadd.f32 %v6234_v7, %v1855_v9 }
 0x5ed   : > { %v1700_v50 = vadd.f32 %v8435_v17, %v1682_v27 }
 0x5ee   : > { %v1891_v51 = vadd.f32 %v6250_v24, %v1873_v22 }
 0x5ef   : > { %v1718_v35 = vadd.f32 %v8436_v15, %v1700_v50 }
 0x5f0   : > { %v1909_v48 = vadd.f32 %v6264_v60, %v1891_v51 }
 0x5f1   : > { %v1736_v19 = vadd.f32 %v6120_v46, %v1718_v35 }
 0x5f2   : > { %v2120_v33 = vpop.permute.xlu2 %2119  ;;  %v6431_v8 = vpop.permute.xlu0 %2067  ;;  %v1927_v38 = vadd.f32 %v6279_v29, %v1909_v48 }
 0x5f3   : > { %v1754_v32 = vadd.f32 %v6137_v34, %v1736_v19 }
 0x5f4   : > { %v1945_v40 = vadd.f32 %v6295_v14, %v1927_v38  ;;  %v1836_v14 = vmul.f32 %v6248_v20, %v6070_v11  ;;  %v4612_v38 = vld [vmem:[%s8438_s28 + $0x3] ss:$0 sm:$0xff] }
 0x5f5   : > { %v1772_v7 = vadd.f32 %v6156_v18, %v1754_v32  ;;  %v4609_v18 = vld [vmem:[%s8437_s14] ss:$0 sm:$0xff]  ;;  %v4614_v32 = vld [vmem:[%s8438_s28 + $0x5] ss:$0 sm:$0xff]  ;;  %s8449_s14 = smov 119  }
 0x5f6   : > { %v1963_v57 = vadd.f32 %v6311_v0, %v1945_v40  ;;  %2260 = vrot.lane.b32.xlu0 %v4609_v18, %s8439_s22  ;;  %v4615_v40 = vld [vmem:[%s8438_s28 + $0x6] ss:$0 sm:$0xff]  ;;  %v4624_v18 = vld [vmem:[%s8438_s28 + $0xf] ss:$0 sm:$0xff]  ;;  %s8451_s22 = smov 117  }
 0x5f7   : > { %v1790_v24 = vadd.f32 %v6172_v52, %v1772_v7  ;;  %v4616_v7 = vld [vmem:[%s8438_s28 + $0x7] ss:$0 sm:$0xff] }
 0x5f8   : > { %v1981_v47 = vadd.f32 %v6326_v3, %v1963_v57  ;;  %v4617_v57 = vld [vmem:[%s8438_s28 + $0x8] ss:$0 sm:$0xff] }
 0x5f9   : > { %v1808_v60 = vadd.f32 %v6189_v6, %v1790_v24  ;;  %v4618_v24 = vld [vmem:[%s8438_s28 + $0x9] ss:$0 sm:$0xff] }
 0x5fa   : > { %v2138_v16 = vpop.permute.xlu2 %2137  ;;  %v2086_v12 = vpop.permute.xlu0 %2085  ;;  %v1999_v46 = vadd.f32 %v6342_v37, %v1981_v47  ;;  %v4619_v47 = vld [vmem:[%s8438_s28 + $0xa] ss:$0 sm:$0xff] }
 0x5fb   : > { %v1826_v63 = vadd.f32 %v6207_v43, %v1808_v60  ;;  %v4620_v60 = vld [vmem:[%s8438_s28 + $0xb] ss:$0 sm:$0xff] }
 0x5fc   : > { %v2017_v34 = vadd.f32 %v6358_v41, %v1999_v46  ;;  %v4621_v46 = vld [vmem:[%s8438_s28 + $0xc] ss:$0 sm:$0xff] }
 0x5fd   : > { %v1838_v6 = vadd.f32 %v1836_v14, %v1826_v63 }
 0x5fe   : > { %v2035_v52 = vadd.f32 %v6374_v59, %v2017_v34 }
 0x5ff   : > { %v1856_v3 = vadd.f32 %v6266_v49, %v1838_v6 }
 0x600   : > { %v2053_v0 = vadd.f32 %v6386_v36, %v2035_v52 }
 0x601   : > { %v1874_v28 = vadd.f32 %v6281_v31, %v1856_v3 }
 0x602   : > { %v2156_v53 = vpop.permute.xlu2 %2155  ;;  %v2104_v42 = vpop.permute.xlu0 %2103  ;;  %v2071_v43 = vadd.f32 %v6398_v39, %v2053_v0 }
 0x603   : > { %v1892_v30 = vadd.f32 %v6297_v25, %v1874_v28 }
 0x604   : > { %v2089_v45 = vadd.f32 %v6409_v54, %v2071_v43  ;;  %v4625_v43 = vld [vmem:[%s8438_s28 + $0x10] ss:$0 sm:$0xff] }
 0x605   : > { %v1910_v20 = vadd.f32 %v6313_v10, %v1892_v30 }
 0x606   : > { %v2107_v11 = vadd.f32 %v2102_v44, %v2089_v45  ;;  %v4626_v45 = vld [vmem:[%s8438_s28 + $0x11] ss:$0 sm:$0xff] }
 0x607   : > { %v1928_v5 = vadd.f32 %v6328_v1, %v1910_v20 }
 0x608   : > { %v2125_v59 = vadd.f32 %v2120_v33, %v2107_v11 }
 0x609   : > { %v1946_v49 = vadd.f32 %v6344_v56, %v1928_v5 }
 0x60a   : > { %v2174_v58 = vpop.permute.xlu2 %2173  ;;  %v2122_v29 = vpop.permute.xlu0 %2121  ;;  %v2143_v13 = vadd.f32 %v2138_v16, %v2125_v59  ;;  %v4627_v59 = vld [vmem:[%s8438_s28 + $0x12] ss:$0 sm:$0xff] }
 0x60b   : > { %v1964_v9 = vadd.f32 %v6360_v26, %v1946_v49 }
 0x60c   : > { %v2161_v39 = vadd.f32 %v2156_v53, %v2143_v13 }
 0x60d   : > { %v1982_v31 = vadd.f32 %v6376_v62, %v1964_v9 }
 0x60e   : > { %v2179_v21 = vadd.f32 %v2174_v58, %v2161_v39  ;;  %v4622_v58 = vld [vmem:[%s8438_s28 + $0xd] ss:$0 sm:$0xff] }
 0x60f   : > { %v2000_v25 = vadd.f32 %v6388_v55, %v1982_v31  ;;  %v4610_v55 = vld [vmem:[%s8438_s28 + $0x1] ss:$0 sm:$0xff] }
 0x611   : > { %v2018_v33 = vadd.f32 %v6400_v4, %v2000_v25 }
 0x612   : > { %v2192_v37 = vpop.permute.xlu2 %2191  ;;  %v2140_v41 = vpop.permute.xlu0 %2139 }
 0x613   : > { %v2197_v54 = vadd.f32 %v2192_v37, %v2179_v21  ;;  %v2036_v16 = vadd.f32 %v6411_v23, %v2018_v33  ;;  %v4629_v21 = vld [vmem:[%s8438_s28 + $0x14] ss:$0 sm:$0xff] }
 0x615   : > { %v2054_v56 = vadd.f32 %v6421_v2, %v2036_v16  ;;  %v4611_v2 = vld [vmem:[%s8438_s28 + $0x2] ss:$0 sm:$0xff] }
 0x617   : > { %v2072_v26 = vadd.f32 %v6431_v8, %v2054_v56 }
 0x619   : > { %v2090_v62 = vadd.f32 %v2086_v12, %v2072_v26  ;;  %v4632_v26 = vld [vmem:[%s8438_s28 + $0x17] ss:$0 sm:$0xff] }
 0x61a   : > { %v2210_v36 = vpop.permute.xlu2 %2209  ;;  %v2158_v61 = vpop.permute.xlu0 %2157 }
 0x61b   : > { %v2215_v44 = vadd.f32 %v2210_v36, %v2197_v54  ;;  %v2108_v50 = vadd.f32 %v2104_v42, %v2090_v62  ;;  %v4613_v42 = vld [vmem:[%s8438_s28 + $0x4] ss:$0 sm:$0xff] }
 0x61d   : > { %v2126_v51 = vadd.f32 %v2122_v29, %v2108_v50  ;;  %v4623_v29 = vld [vmem:[%s8438_s28 + $0xe] ss:$0 sm:$0xff] }
 0x61f   : > { %v2144_v4 = vadd.f32 %v2140_v41, %v2126_v51 }
 0x621   : > { %v2162_v23 = vadd.f32 %v2158_v61, %v2144_v4  ;;  %v4628_v61 = vld [vmem:[%s8438_s28 + $0x13] ss:$0 sm:$0xff] }
 0x622   : > { %v2228_v27 = vpop.permute.xlu2 %2227  ;;  %v2176_v10 = vpop.permute.xlu0 %2175 }
 0x623   : > { %v2233_v1 = vadd.f32 %v2228_v27, %v2215_v44  ;;  %v2180_v35 = vadd.f32 %v2176_v10, %v2162_v23  ;;  %v4630_v44 = vld [vmem:[%s8438_s28 + $0x15] ss:$0 sm:$0xff] }
 0x625   : > { %v2235_v22 = vmax.f32 %v2233_v1, 0.0  ;;  %v4631_v1 = vld [vmem:[%s8438_s28 + $0x16] ss:$0 sm:$0xff] }
 0x627   : > { %2247 = vrot.lane.b32.xlu1 %v2235_v22, %s8087_s9 }
 0x62a   : > { %v2194_v17 = vpop.permute.xlu0 %2193 }
 0x62b   : > { %v2198_v48 = vadd.f32 %v2194_v17, %v2180_v35 }
 0x62f   : > { %2270 = vrot.lane.b32.xlu1 %v4610_v55, %s8440_s23  ;;  %s8442_s23 = smov 4  }
 0x632   : > { %v2212_v15 = vpop.permute.xlu0 %2211 }
 0x633   : > { %v2216_v8 = vadd.f32 %v2212_v15, %v2198_v48 }
 0x637   : > { %2288 = vrot.lane.b32.xlu1 %v4611_v2, %s8441_s3  ;;  %s8443_s3 = smov 122  }
 0x63a   : > { %v2230_v12 = vpop.permute.xlu0 %2229 }
 0x63b   : > { %v2234_v19 = vadd.f32 %v2230_v12, %v2216_v8 }
 0x63d   : > { %v2236_v53 = vmax.f32 %v2234_v19, 0.0 }
 0x63f   : > { %2306 = vrot.lane.b32.xlu1 %v4612_v38, %s8442_s23  ;;  %2249 = vrot.lane.b32.xlu2 %v2236_v53, %s8087_s9  ;;  %s8448_s23 = smov 1  }
 0x647   : > { %2324 = vrot.lane.b32.xlu1 %v4613_v42, %s8271_s29 }
 0x64f   : > { %2342 = vrot.lane.b32.xlu1 %v4614_v32, %s8274_s12 }
 0x657   : > { %2360 = vrot.lane.b32.xlu1 %v4615_v40, %s8205_s15 }
 0x65f   : > { %2378 = vrot.lane.b32.xlu1 %v4616_v7, %s8208_s8 }
 0x667   : > { %2396 = vrot.lane.b32.xlu1 %v4617_v57, %s8148_s16 }
 0x66f   : > { %2414 = vrot.lane.b32.xlu1 %v4618_v24, %s8151_s2 }
 0x677   : > { %2432 = vrot.lane.b32.xlu1 %v4619_v47, %s8087_s9 }
 0x67f   : > { %2450 = vrot.lane.b32.xlu1 %v4620_v60, %s8088_s26 }
 0x687   : > { %2468 = vrot.lane.b32.xlu1 %v4621_v46, %s8089_s27 }
 0x68f   : > { %2486 = vrot.lane.b32.xlu1 %v4622_v58, %s8158_s13 }
 0x697   : > { %2504 = vrot.lane.b32.xlu1 %v4623_v29, %s8090_s6 }
 0x699   : > { %v2248_v63 = vpop.permute.xlu1 %2247  ;;  %v2250_v34 = vpop.permute.xlu2 %2249 }
 0x69a   : > { %2253 = vst.msk [vmem:[#allocation3 + $0x2] sm:$0xff] %vm192_vm5, %v2248_v63 }
 0x69b   : > { %2254 = vst.msk [vmem:[#allocation3 + $0xa] sm:$0xff] %vm192_vm5, %v2250_v34 }
 0x69f   : > { %2522 = vrot.lane.b32.xlu1 %v4624_v18, %s8091_s19 }
 0x6a1   : > { %v6546_v14 = vld [vmem:[#allocation3] sm:$0xff]  ;;  %v2271_v52 = vpop.permute.xlu1 %2270 }
 0x6a2   : > { %v6548_v6 = vld [vmem:[#allocation3 + $0x8] sm:$0xff]  ;;  %v2273_v0 = vmul.f32 %v2271_v52, %v6546_v14 }
 0x6a3   : > { %v2274_v3 = vmul.f32 %v2271_v52, %v6548_v6 }
 0x6a4   : > { %2277 = vrot.lane.b32.xlu2 %v2273_v0, %s8092_s17 }
 0x6a5   : > { %2279 = vrot.lane.b32.xlu0 %v2274_v3, %s8092_s17 }
 0x6a7   : > { %2540 = vrot.lane.b32.xlu1 %v4625_v43, %s8093_s30 }
 0x6a9   : > { %v2289_v37 = vpop.permute.xlu1 %2288 }
 0x6aa   : > { %v2291_v41 = vmul.f32 %v2289_v37, %v6546_v14  ;;  %v2292_v28 = vmul.f32 %v2289_v37, %v6548_v6 }
 0x6ac   : > { %2295 = vrot.lane.b32.xlu2 %v2291_v41, %s8094_s20 }
 0x6ad   : > { %2297 = vrot.lane.b32.xlu0 %v2292_v28, %s8094_s20 }
 0x6af   : > { %2558 = vrot.lane.b32.xlu1 %v4626_v45, %s8095_s24 }
 0x6b1   : > { %v2307_v30 = vpop.permute.xlu1 %2306 }
 0x6b2   : > { %v2309_v11 = vmul.f32 %v2307_v30, %v6546_v14  ;;  %v2310_v20 = vmul.f32 %v2307_v30, %v6548_v6 }
 0x6b4   : > { %2313 = vrot.lane.b32.xlu2 %v2309_v11, %s8096_s5 }
 0x6b5   : > { %2315 = vrot.lane.b32.xlu0 %v2310_v20, %s8096_s5 }
 0x6b7   : > { %2576 = vrot.lane.b32.xlu1 %v4627_v59, %s8097_s25 }
 0x6b9   : > { %v2325_v5 = vpop.permute.xlu1 %2324 }
 0x6ba   : > { %v2327_v13 = vmul.f32 %v2325_v5, %v6546_v14  ;;  %v2328_v36 = vmul.f32 %v2325_v5, %v6548_v6 }
 0x6bc   : > { %2331 = vrot.lane.b32.xlu2 %v2327_v13, %s8098_s7 }
 0x6bd   : > { %2333 = vrot.lane.b32.xlu0 %v2328_v36, %s8098_s7 }
 0x6bf   : > { %2594 = vrot.lane.b32.xlu1 %v4628_v61, %s8099_s11  ;;  %v6680_v61 = vpop.permute.xlu0 %2260  ;;  %s8479_s11 = smov 116  }
 0x6c1   : > { %v2343_v49 = vpop.permute.xlu1 %2342 }
 0x6c2   : > { %v2345_v39 = vmul.f32 %v2343_v49, %v6546_v14  ;;  %v2346_v9 = vmul.f32 %v2343_v49, %v6548_v6 }
 0x6c4   : > { %2349 = vrot.lane.b32.xlu2 %v2345_v39, %s8100_s21 }
 0x6c5   : > { %2351 = vrot.lane.b32.xlu0 %v2346_v9, %s8100_s21 }
 0x6c7   : > { %2612 = vrot.lane.b32.xlu1 %v4629_v21, %s8101_s10  ;;  %s8470_s10 = smov 20  }
 0x6c9   : > { %v2361_v31 = vpop.permute.xlu1 %2360 }
 0x6ca   : > { %v2363_v54 = vmul.f32 %v2361_v31, %v6546_v14  ;;  %v2364_v25 = vmul.f32 %v2361_v31, %v6548_v6 }
 0x6cc   : > { %2367 = vrot.lane.b32.xlu2 %v2363_v54, %s8443_s3 }
 0x6cd   : > { %2369 = vrot.lane.b32.xlu0 %v2364_v25, %s8443_s3 }
 0x6cf   : > { %2630 = vrot.lane.b32.xlu1 %v4630_v44, %s8444_s1  ;;  %s8447_s1 = smov 120  }
 0x6d1   : > { %v2379_v27 = vpop.permute.xlu1 %2378 }
 0x6d2   : > { %v2381_v10 = vmul.f32 %v2379_v27, %v6546_v14  ;;  %v2382_v33 = vmul.f32 %v2379_v27, %v6548_v6 }
 0x6d4   : > { %2385 = vrot.lane.b32.xlu2 %v2381_v10, %s8445_s18  ;;  %v4633_v10 = vld [vmem:[%s8438_s28 + $0x18] ss:$0 sm:$0xff] }
 0x6d5   : > { %2387 = vrot.lane.b32.xlu0 %v2382_v33, %s8445_s18 }
 0x6d7   : > { %2648 = vrot.lane.b32.xlu1 %v4631_v1, %s8446_s0  ;;  %s8453_s0 = smov 115  }
 0x6d9   : > { %v2397_v16 = vpop.permute.xlu1 %2396 }
 0x6da   : > { %v2399_v22 = vmul.f32 %v2397_v16, %v6546_v14  ;;  %v2400_v56 = vmul.f32 %v2397_v16, %v6548_v6 }
 0x6dc   : > { %2403 = vrot.lane.b32.xlu2 %v2399_v22, %s8447_s1 }
 0x6dd   : > { %2405 = vrot.lane.b32.xlu0 %v2400_v56, %s8447_s1  ;;  %s8464_s1 = smov 3   ;;  %v4635_v56 = vld [vmem:[%s8438_s28 + $0x1a] ss:$0 sm:$0xff] }
 0x6df   : > { %2668 = vrot.lane.b32.xlu1 %v4632_v26, %s8448_s23  ;;  %s8452_s23 = smov 116  }
 0x6e1   : > { %v2415_v17 = vpop.permute.xlu1 %2414 }
 0x6e2   : > { %v2417_v62 = vmul.f32 %v2415_v17, %v6546_v14  ;;  %v2418_v55 = vmul.f32 %v2415_v17, %v6548_v6 }
 0x6e4   : > { %2421 = vrot.lane.b32.xlu2 %v2417_v62, %s8449_s14  ;;  %v4636_v62 = vld [vmem:[%s8438_s28 + $0x1b] ss:$0 sm:$0xff] }
 0x6e5   : > { %2423 = vrot.lane.b32.xlu0 %v2418_v55, %s8449_s14  ;;  %s8474_s14 = smov 22  }
 0x6e9   : > { %v2433_v50 = vpop.permute.xlu1 %2432 }
 0x6ea   : > { %v2435_v51 = vmul.f32 %v2433_v50, %v6546_v14  ;;  %v2436_v4 = vmul.f32 %v2433_v50, %v6548_v6  ;;  %v4637_v50 = vld [vmem:[%s8438_s28 + $0x1c] ss:$0 sm:$0xff] }
 0x6ec   : > { %2439 = vrot.lane.b32.xlu2 %v2435_v51, %s8450_s4 }
 0x6ed   : > { %2441 = vrot.lane.b32.xlu0 %v2436_v4, %s8450_s4  ;;  %s8481_s4 = smov 114  }
 0x6f1   : > { %v2451_v15 = vpop.permute.xlu1 %2450 }
 0x6f2   : > { %v2453_v23 = vmul.f32 %v2451_v15, %v6546_v14  ;;  %v2454_v2 = vmul.f32 %v2451_v15, %v6548_v6  ;;  %v4638_v15 = vld [vmem:[%s8438_s28 + $0x1d] ss:$0 sm:$0xff] }
 0x6f4   : > { %2457 = vrot.lane.b32.xlu2 %v2453_v23, %s8451_s22 }
 0x6f5   : > { %2459 = vrot.lane.b32.xlu0 %v2454_v2, %s8451_s22  ;;  %s8454_s22 = smov 114  }
 0x6f9   : > { %v2469_v35 = vpop.permute.xlu1 %2468 }
 0x6fa   : > { %v2471_v48 = vmul.f32 %v2469_v35, %v6546_v14  ;;  %v2472_v8 = vmul.f32 %v2469_v35, %v6548_v6  ;;  %v4639_v35 = vld [vmem:[%s8438_s28 + $0x1e] ss:$0 sm:$0xff] }
 0x6fc   : > { %2475 = vrot.lane.b32.xlu2 %v2471_v48, %s8452_s23 }
 0x6fd   : > { %2477 = vrot.lane.b32.xlu0 %v2472_v8, %s8452_s23  ;;  %s8455_s23 = smov 113  }
 0x6fe   : > { %v6630_v12 = vpop.permute.xlu2 %2277 }
 0x701   : > { %v2487_v19 = vpop.permute.xlu1 %2486 }
 0x702   : > { %v2489_v38 = vmul.f32 %v2487_v19, %v6546_v14  ;;  %v2490_v53 = vmul.f32 %v2487_v19, %v6548_v6  ;;  %v4640_v19 = vld [vmem:[%s8438_s28 + $0x1f] ss:$0 sm:$0xff] }
 0x704   : > { %2493 = vrot.lane.b32.xlu2 %v2489_v38, %s8453_s0 }
 0x705   : > { %2495 = vrot.lane.b32.xlu0 %v2490_v53, %s8453_s0  ;;  %s8456_s0 = smov 112  }
 0x706   : > { %v6636_v42 = vpop.permute.xlu2 %2295 }
 0x709   : > { %v2505_v32 = vpop.permute.xlu1 %2504 }
 0x70a   : > { %v2507_v40 = vmul.f32 %v2505_v32, %v6546_v14  ;;  %v2508_v7 = vmul.f32 %v2505_v32, %v6548_v6  ;;  %v4641_v32 = vld [vmem:[%s8438_s28 + $0x20] ss:$0 sm:$0xff] }
 0x70c   : > { %2511 = vrot.lane.b32.xlu2 %v2507_v40, %s8454_s22 }
 0x70d   : > { %2513 = vrot.lane.b32.xlu0 %v2508_v7, %s8454_s22  ;;  %s8457_s22 = smov 111   ;;  %v4642_v7 = vld [vmem:[%s8438_s28 + $0x21] ss:$0 sm:$0xff] }
 0x70e   : > { %v6642_v57 = vpop.permute.xlu2 %2313 }
 0x711   : > { %v2523_v24 = vpop.permute.xlu1 %2522 }
 0x712   : > { %v2525_v47 = vmul.f32 %v2523_v24, %v6546_v14  ;;  %v2526_v60 = vmul.f32 %v2523_v24, %v6548_v6 }
 0x714   : > { %2529 = vrot.lane.b32.xlu2 %v2525_v47, %s8455_s23 }
 0x715   : > { %2531 = vrot.lane.b32.xlu0 %v2526_v60, %s8455_s23  ;;  %s8458_s23 = smov 110   ;;  %v4643_v60 = vld [vmem:[%s8438_s28 + $0x22] ss:$0 sm:$0xff] }
 0x716   : > { %v6648_v46 = vpop.permute.xlu2 %2331 }
 0x717   : > { %v6688_v31 = vpop.permute.xlu0 %2279 }
 0x719   : > { %v2541_v58 = vpop.permute.xlu1 %2540 }
 0x71a   : > { %v2543_v29 = vmul.f32 %v2541_v58, %v6546_v14  ;;  %v2544_v63 = vmul.f32 %v2541_v58, %v6548_v6 }
 0x71c   : > { %2547 = vrot.lane.b32.xlu2 %v2543_v29, %s8456_s0 }
 0x71d   : > { %2549 = vrot.lane.b32.xlu0 %v2544_v63, %s8456_s0  ;;  %s8459_s0 = smov 109   ;;  %v4644_v63 = vld [vmem:[%s8438_s28 + $0x23] ss:$0 sm:$0xff] }
 0x71e   : > { %v6654_v34 = vpop.permute.xlu2 %2349 }
 0x71f   : > { %v6699_v33 = vpop.permute.xlu0 %2297 }
 0x721   : > { %v2559_v18 = vpop.permute.xlu1 %2558 }
 0x722   : > { %v2561_v52 = vmul.f32 %v2559_v18, %v6546_v14  ;;  %v2562_v0 = vmul.f32 %v2559_v18, %v6548_v6 }
 0x724   : > { %2565 = vrot.lane.b32.xlu2 %v2561_v52, %s8457_s22  ;;  %v6786_v52 = vld [vmem:[#allocation3 + $0x1] sm:$0xff] }
 0x725   : > { %2567 = vrot.lane.b32.xlu0 %v2562_v0, %s8457_s22  ;;  %s8460_s22 = smov 108   ;;  %8469 = vst [vmem:[#allocation18_spill] sm:$0xff] %v6786_v52  ;;  %v6788_v0 = vld [vmem:[#allocation3 + $0x9] sm:$0xff] }
 0x726   : > { %v6660_v3 = vpop.permute.xlu2 %2367 }
 0x727   : > { %v6708_v16 = vpop.permute.xlu0 %2315 }
 0x729   : > { %v2577_v43 = vpop.permute.xlu1 %2576 }
 0x72a   : > { %v2579_v37 = vmul.f32 %v2577_v43, %v6546_v14  ;;  %v2580_v41 = vmul.f32 %v2577_v43, %v6548_v6 }
 0x72c   : > { %2583 = vrot.lane.b32.xlu2 %v2579_v37, %s8458_s23 }
 0x72d   : > { %2585 = vrot.lane.b32.xlu0 %v2580_v41, %s8458_s23  ;;  %s8465_s23 = smov 4  }
 0x72e   : > { %v6666_v28 = vpop.permute.xlu2 %2385 }
 0x72f   : > { %v6718_v17 = vpop.permute.xlu0 %2333 }
 0x731   : > { %v2595_v45 = vpop.permute.xlu1 %2594 }
 0x732   : > { %v2597_v30 = vmul.f32 %v2595_v45, %v6546_v14  ;;  %v2598_v11 = vmul.f32 %v2595_v45, %v6548_v6  ;;  %v4645_v45 = vld [vmem:[%s8438_s28 + $0x24] ss:$0 sm:$0xff] }
 0x734   : > { %2601 = vrot.lane.b32.xlu2 %v2597_v30, %s8459_s0 }
 0x735   : > { %2603 = vrot.lane.b32.xlu0 %v2598_v11, %s8459_s0  ;;  %s8461_s0 = smov 107  }
 0x736   : > { %v6672_v20 = vpop.permute.xlu2 %2403 }
 0x737   : > { %v6729_v51 = vpop.permute.xlu0 %2351 }
 0x739   : > { %v2613_v59 = vpop.permute.xlu1 %2612 }
 0x73a   : > { %v2615_v5 = vmul.f32 %v2613_v59, %v6546_v14  ;;  %v2616_v13 = vmul.f32 %v2613_v59, %v6548_v6 }
 0x73c   : > { %2619 = vrot.lane.b32.xlu2 %v2615_v5, %s8460_s22 }
 0x73d   : > { %2621 = vrot.lane.b32.xlu0 %v2616_v13, %s8460_s22  ;;  %s8462_s22 = smov 106   ;;  %v4646_v13 = vld [vmem:[%s8438_s28 + $0x25] ss:$0 sm:$0xff] }
 0x73e   : > { %v6678_v36 = vpop.permute.xlu2 %2421 }
 0x73f   : > { %v6737_v23 = vpop.permute.xlu0 %2369 }
 0x741   : > { %v2631_v49 = vpop.permute.xlu1 %2630 }
 0x742   : > { %v2633_v39 = vmul.f32 %v2631_v49, %v6546_v14  ;;  %v2634_v9 = vmul.f32 %v2631_v49, %v6548_v6 }
 0x744   : > { %2637 = vrot.lane.b32.xlu2 %v2633_v39, %s8461_s0 }
 0x745   : > { %2639 = vrot.lane.b32.xlu0 %v2634_v9, %s8461_s0  ;;  %s8463_s0 = smov 2  }
 0x746   : > { %v6686_v21 = vpop.permute.xlu2 %2439 }
 0x747   : > { %v6746_v48 = vpop.permute.xlu0 %2387 }
 0x749   : > { %v2649_v54 = vpop.permute.xlu1 %2648 }
 0x74a   : > { %v2651_v25 = vmul.f32 %v2649_v54, %v6546_v14  ;;  %v2652_v44 = vmul.f32 %v2649_v54, %v6548_v6  ;;  %v4634_v14 = vld [vmem:[%s8438_s28 + $0x19] ss:$0 sm:$0xff]  ;;  %v4647_v54 = vld [vmem:[%s8438_s28 + $0x26] ss:$0 sm:$0xff] }
 0x74c   : > { %2655 = vrot.lane.b32.xlu2 %v2651_v25, %s8462_s22 }
 0x74d   : > { %2657 = vrot.lane.b32.xlu0 %v2652_v44, %s8462_s22  ;;  %s8471_s22 = smov 120  }
 0x74e   : > { %v6694_v27 = vpop.permute.xlu2 %2457 }
 0x74f   : > { %v6756_v53 = vpop.permute.xlu0 %2405 }
 0x754   : > { %2678 = vrot.lane.b32.xlu2 %v4633_v10, %s8463_s0  ;;  %s8472_s0 = smov 21  }
 0x756   : > { %v6702_v1 = vpop.permute.xlu2 %2475 }
 0x757   : > { %v6767_v24 = vpop.permute.xlu0 %2423 }
 0x75c   : > { %2696 = vrot.lane.b32.xlu2 %v4634_v14, %s8464_s1 }
 0x75e   : > { %v6710_v22 = vpop.permute.xlu2 %2493 }
 0x75f   : > { %v6775_v58 = vpop.permute.xlu0 %2441 }
 0x764   : > { %2714 = vrot.lane.b32.xlu2 %v4635_v56, %s8465_s23  ;;  %v4648_v56 = vld [vmem:[%s8438_s28 + $0x27] ss:$0 sm:$0xff] }
 0x766   : > { %v6716_v26 = vpop.permute.xlu2 %2511 }
 0x767   : > { %v6784_v18 = vpop.permute.xlu0 %2459 }
 0x76c   : > { %2732 = vrot.lane.b32.xlu2 %v4636_v62, %s8271_s29 }
 0x76e   : > { %v6724_v55 = vpop.permute.xlu2 %2529 }
 0x76f   : > { %v6798_v11 = vpop.permute.xlu0 %2477 }
 0x774   : > { %2750 = vrot.lane.b32.xlu2 %v4637_v50, %s8274_s12 }
 0x776   : > { %v6732_v4 = vpop.permute.xlu2 %2547 }
 0x777   : > { %v6813_v25 = vpop.permute.xlu0 %2495 }
 0x77c   : > { %2768 = vrot.lane.b32.xlu2 %v4638_v15, %s8205_s15 }
 0x77e   : > { %v6740_v2 = vpop.permute.xlu2 %2565 }
 0x77f   : > { %v6825_v62 = vpop.permute.xlu0 %2513 }
 0x784   : > { %2786 = vrot.lane.b32.xlu2 %v4639_v35, %s8208_s8 }
 0x786   : > { %v6748_v8 = vpop.permute.xlu2 %2583 }
 0x78c   : > { %2804 = vrot.lane.b32.xlu2 %v4640_v19, %s8148_s16  ;;  %v4649_v19 = vld [vmem:[%s8438_s28 + $0x28] ss:$0 sm:$0xff] }
 0x78e   : > { %v6754_v38 = vpop.permute.xlu2 %2601 }
 0x794   : > { %2822 = vrot.lane.b32.xlu2 %v4641_v32, %s8151_s2  ;;  %v6836_v32 = vpop.permute.xlu0 %2531 }
 0x796   : > { %v6762_v40 = vpop.permute.xlu2 %2619 }
 0x797   : > { %8466 = vst [vmem:[#allocation19_spill] sm:$0xff] %v6762_v40 }
 0x79c   : > { %2840 = vrot.lane.b32.xlu2 %v4642_v7, %s8087_s9 }
 0x79e   : > { %v6770_v47 = vpop.permute.xlu2 %2637 }
 0x79f   : > { %8467 = vst [vmem:[#allocation17_spill] sm:$0xff] %v6770_v47 }
 0x7a4   : > { %2858 = vrot.lane.b32.xlu2 %v4643_v60, %s8088_s26 }
 0x7a6   : > { %v6778_v29 = vpop.permute.xlu2 %2655 }
 0x7a7   : > { %8468 = vst [vmem:[#allocation20_spill] sm:$0xff] %v6778_v29 }
 0x7ac   : > { %2876 = vrot.lane.b32.xlu2 %v4644_v63, %s8089_s27 }
 0x7ae   : > { %v2679_v43 = vpop.permute.xlu2 %2678 }
 0x7af   : > { %v2681_v37 = vmul.f32 %v2679_v43, %v6786_v52  ;;  %v2682_v41 = vmul.f32 %v2679_v43, %v6788_v0  ;;  %v4650_v43 = vld [vmem:[%s8438_s28 + $0x29] ss:$0 sm:$0xff] }
 0x7b1   : > { %2687 = vrot.lane.b32.xlu1 %v2682_v41, %s8092_s17  ;;  %2685 = vrot.lane.b32.xlu0 %v2681_v37, %s8092_s17  ;;  %v6846_v41 = vpop.permute.xlu0 %2549 }
 0x7b4   : > { %2894 = vrot.lane.b32.xlu2 %v4645_v45, %s8158_s13 }
 0x7b6   : > { %v2697_v30 = vpop.permute.xlu2 %2696 }
 0x7b7   : > { %v2699_v59 = vmul.f32 %v2697_v30, %v6786_v52  ;;  %v2700_v5 = vmul.f32 %v2697_v30, %v6788_v0 }
 0x7b9   : > { %2705 = vrot.lane.b32.xlu1 %v2700_v5, %s8094_s20  ;;  %2703 = vrot.lane.b32.xlu0 %v2699_v59, %s8094_s20  ;;  %v4651_v59 = vld [vmem:[%s8438_s28 + $0x2a] ss:$0 sm:$0xff] }
 0x7bc   : > { %2912 = vrot.lane.b32.xlu2 %v4646_v13, %s8090_s6 }
 0x7be   : > { %v2715_v49 = vpop.permute.xlu2 %2714 }
 0x7bf   : > { %v2717_v39 = vmul.f32 %v2715_v49, %v6786_v52  ;;  %v2718_v9 = vmul.f32 %v2715_v49, %v6788_v0 }
 0x7c1   : > { %2723 = vrot.lane.b32.xlu1 %v2718_v9, %s8096_s5  ;;  %2721 = vrot.lane.b32.xlu0 %v2717_v39, %s8096_s5  ;;  %v4652_v39 = vld [vmem:[%s8438_s28 + $0x2b] ss:$0 sm:$0xff]  ;;  %v6861_v9 = vpop.permute.xlu0 %2567 }
 0x7c4   : > { %2930 = vrot.lane.b32.xlu2 %v4647_v54, %s8091_s19 }
 0x7c6   : > { %v2733_v44 = vpop.permute.xlu2 %2732 }
 0x7c7   : > { %v2735_v10 = vmul.f32 %v2733_v44, %v6786_v52  ;;  %v2736_v14 = vmul.f32 %v2733_v44, %v6788_v0 }
 0x7c9   : > { %2741 = vrot.lane.b32.xlu1 %v2736_v14, %s8098_s7  ;;  %2739 = vrot.lane.b32.xlu0 %v2735_v10, %s8098_s7  ;;  %v4653_v14 = vld [vmem:[%s8438_s28 + $0x2c] ss:$0 sm:$0xff] }
 0x7cc   : > { %2948 = vrot.lane.b32.xlu2 %v4648_v56, %s8093_s30  ;;  %v6873_v56 = vpop.permute.xlu0 %2585 }
 0x7ce   : > { %v2751_v50 = vpop.permute.xlu2 %2750 }
 0x7cf   : > { %v2753_v15 = vmul.f32 %v2751_v50, %v6786_v52  ;;  %v2754_v35 = vmul.f32 %v2751_v50, %v6788_v0 }
 0x7d1   : > { %2759 = vrot.lane.b32.xlu1 %v2754_v35, %s8100_s21  ;;  %2757 = vrot.lane.b32.xlu0 %v2753_v15, %s8100_s21 }
 0x7d4   : > { %2966 = vrot.lane.b32.xlu2 %v4649_v19, %s8095_s24  ;;  %v4654_v19 = vld [vmem:[%s8438_s28 + $0x2d] ss:$0 sm:$0xff] }
 0x7d6   : > { %v2769_v7 = vpop.permute.xlu2 %2768 }
 0x7d7   : > { %v2771_v60 = vmul.f32 %v2769_v7, %v6786_v52  ;;  %v2772_v63 = vmul.f32 %v2769_v7, %v6788_v0  ;;  %v6884_v7 = vpop.permute.xlu0 %2603 }
 0x7d9   : > { %2777 = vrot.lane.b32.xlu1 %v2772_v63, %s8443_s3  ;;  %2775 = vrot.lane.b32.xlu0 %v2771_v60, %s8443_s3  ;;  %s8473_s3 = smov 119  }
 0x7dc   : > { %2984 = vrot.lane.b32.xlu2 %v4650_v43, %s8097_s25 }
 0x7de   : > { %v2787_v37 = vpop.permute.xlu2 %2786 }
 0x7df   : > { %v2789_v45 = vmul.f32 %v2787_v37, %v6786_v52  ;;  %v2790_v30 = vmul.f32 %v2787_v37, %v6788_v0  ;;  %v4655_v37 = vld [vmem:[%s8438_s28 + $0x2e] ss:$0 sm:$0xff] }
 0x7e1   : > { %2795 = vrot.lane.b32.xlu1 %v2790_v30, %s8445_s18  ;;  %2793 = vrot.lane.b32.xlu0 %v2789_v45, %s8445_s18  ;;  %s8476_s18 = smov 23   ;;  %v6894_v30 = vpop.permute.xlu0 %2621 }
 0x7e4   : > { %3002 = vrot.lane.b32.xlu2 %v4651_v59, %s8470_s10 }
 0x7e6   : > { %v2805_v5 = vpop.permute.xlu2 %2804 }
 0x7e7   : > { %v2807_v13 = vmul.f32 %v2805_v5, %v6786_v52  ;;  %v2808_v49 = vmul.f32 %v2805_v5, %v6788_v0 }
 0x7e9   : > { %2813 = vrot.lane.b32.xlu1 %v2808_v49, %s8471_s22  ;;  %2811 = vrot.lane.b32.xlu0 %v2807_v13, %s8471_s22  ;;  %s8478_s22 = smov 1  }
 0x7ec   : > { %3020 = vrot.lane.b32.xlu2 %v4652_v39, %s8472_s0  ;;  %s8475_s0 = smov 118  }
 0x7ee   : > { %v2823_v54 = vpop.permute.xlu2 %2822 }
 0x7ef   : > { %v2825_v44 = vmul.f32 %v2823_v54, %v6786_v52  ;;  %v2826_v10 = vmul.f32 %v2823_v54, %v6788_v0  ;;  %v6902_v54 = vpop.permute.xlu0 %2639 }
 0x7f1   : > { %2831 = vrot.lane.b32.xlu1 %v2826_v10, %s8473_s3  ;;  %2829 = vrot.lane.b32.xlu0 %v2825_v44, %s8473_s3  ;;  %s8480_s3 = smov 115  }
 0x7f4   : > { %3038 = vrot.lane.b32.xlu2 %v4653_v14, %s8474_s14  ;;  %s8477_s14 = smov 117  }
 0x7f6   : > { %v2841_v50 = vpop.permute.xlu2 %2840 }
 0x7f7   : > { %v2843_v15 = vmul.f32 %v2841_v50, %v6786_v52  ;;  %v2844_v35 = vmul.f32 %v2841_v50, %v6788_v0  ;;  %v6910_v50 = vpop.permute.xlu0 %2657 }
 0x7f9   : > { %2849 = vrot.lane.b32.xlu1 %v2844_v35, %s8475_s0  ;;  %2847 = vrot.lane.b32.xlu0 %v2843_v15, %s8475_s0  ;;  %s8498_s0 = smov 2  }
 0x7fc   : > { %3056 = vrot.lane.b32.xlu2 %v4654_v19, %s8476_s18  ;;  %s8520_s18 = smov 21  }
 0x7fe   : > { %v2859_v60 = vpop.permute.xlu2 %2858 }
 0x7ff   : > { %v2861_v63 = vmul.f32 %v2859_v60, %v6786_v52  ;;  %v2862_v43 = vmul.f32 %v2859_v60, %v6788_v0 }
 0x801   : > { %2867 = vrot.lane.b32.xlu1 %v2862_v43, %s8477_s14  ;;  %2865 = vrot.lane.b32.xlu0 %v2861_v63, %s8477_s14  ;;  %s8534_s14 = smov 117  }
 0x804   : > { %3076 = vrot.lane.b32.xlu2 %v4655_v37, %s8478_s22  ;;  %s8523_s22 = smov 22  }
 0x806   : > { %v2877_v45 = vpop.permute.xlu2 %2876 }
 0x807   : > { %v2879_v59 = vmul.f32 %v2877_v45, %v6786_v52  ;;  %v2880_v5 = vmul.f32 %v2877_v45, %v6788_v0 }
 0x809   : > { %2885 = vrot.lane.b32.xlu1 %v2880_v5, %s8479_s11  ;;  %2883 = vrot.lane.b32.xlu0 %v2879_v59, %s8479_s11  ;;  %s8482_s11 = smov 113  }
 0x80e   : > { %v2895_v13 = vpop.permute.xlu2 %2894 }
 0x80f   : > { %v2897_v49 = vmul.f32 %v2895_v13, %v6786_v52  ;;  %v2898_v39 = vmul.f32 %v2895_v13, %v6788_v0 }
 0x811   : > { %2903 = vrot.lane.b32.xlu1 %v2898_v39, %s8480_s3  ;;  %2901 = vrot.lane.b32.xlu0 %v2897_v49, %s8480_s3  ;;  %s8484_s3 = smov 112  }
 0x816   : > { %v2913_v44 = vpop.permute.xlu2 %2912 }
 0x817   : > { %v2915_v10 = vmul.f32 %v2913_v44, %v6786_v52  ;;  %v2916_v14 = vmul.f32 %v2913_v44, %v6788_v0 }
 0x819   : > { %2921 = vrot.lane.b32.xlu1 %v2916_v14, %s8481_s4  ;;  %2919 = vrot.lane.b32.xlu0 %v2915_v10, %s8481_s4  ;;  %s8486_s4 = smov 111  }
 0x81e   : > { %v2931_v15 = vpop.permute.xlu2 %2930 }
 0x81f   : > { %v2933_v35 = vmul.f32 %v2931_v15, %v6786_v52  ;;  %v2934_v19 = vmul.f32 %v2931_v15, %v6788_v0 }
 0x821   : > { %2939 = vrot.lane.b32.xlu1 %v2934_v19, %s8482_s11  ;;  %2937 = vrot.lane.b32.xlu0 %v2933_v35, %s8482_s11  ;;  %s8488_s11 = smov 110  }
 0x823   : > { %v6916_v60 = vpop.permute.xlu0 %2685 }
 0x824   : > { %8483 = vst [vmem:[#allocation21_spill] sm:$0xff] %v6916_v60 }
 0x826   : > { %v2949_v63 = vpop.permute.xlu2 %2948 }
 0x827   : > { %v2951_v43 = vmul.f32 %v2949_v63, %v6786_v52  ;;  %v2952_v37 = vmul.f32 %v2949_v63, %v6788_v0 }
 0x829   : > { %2957 = vrot.lane.b32.xlu1 %v2952_v37, %s8484_s3  ;;  %2955 = vrot.lane.b32.xlu0 %v2951_v43, %s8484_s3  ;;  %s8490_s3 = smov 109  }
 0x82b   : > { %v6922_v45 = vpop.permute.xlu0 %2703 }
 0x82c   : > { %8485 = vst [vmem:[#allocation23_spill] sm:$0xff] %v6922_v45 }
 0x82e   : > { %v2967_v59 = vpop.permute.xlu2 %2966 }
 0x82f   : > { %v2969_v5 = vmul.f32 %v2967_v59, %v6786_v52  ;;  %v2970_v13 = vmul.f32 %v2967_v59, %v6788_v0 }
 0x831   : > { %2975 = vrot.lane.b32.xlu1 %v2970_v13, %s8486_s4  ;;  %2973 = vrot.lane.b32.xlu0 %v2969_v5, %s8486_s4  ;;  %s8492_s4 = smov 108  }
 0x833   : > { %v6928_v49 = vpop.permute.xlu0 %2721 }
 0x834   : > { %8487 = vst [vmem:[#allocation25_spill] sm:$0xff] %v6928_v49 }
 0x836   : > { %v2985_v39 = vpop.permute.xlu2 %2984 }
 0x837   : > { %v2987_v44 = vmul.f32 %v2985_v39, %v6786_v52  ;;  %v2988_v10 = vmul.f32 %v2985_v39, %v6788_v0 }
 0x839   : > { %2993 = vrot.lane.b32.xlu1 %v2988_v10, %s8488_s11  ;;  %2991 = vrot.lane.b32.xlu0 %v2987_v44, %s8488_s11  ;;  %s8494_s11 = smov 107  }
 0x83b   : > { %v6934_v14 = vpop.permute.xlu0 %2739 }
 0x83c   : > { %8489 = vst [vmem:[#allocation22_spill] sm:$0xff] %v6934_v14 }
 0x83e   : > { %v3003_v15 = vpop.permute.xlu2 %3002 }
 0x83f   : > { %v3005_v35 = vmul.f32 %v3003_v15, %v6786_v52  ;;  %v3006_v19 = vmul.f32 %v3003_v15, %v6788_v0 }
 0x841   : > { %3011 = vrot.lane.b32.xlu1 %v3006_v19, %s8490_s3  ;;  %3009 = vrot.lane.b32.xlu0 %v3005_v35, %s8490_s3  ;;  %s8496_s3 = smov 106  }
 0x843   : > { %v6940_v63 = vpop.permute.xlu0 %2757 }
 0x844   : > { %8491 = vst [vmem:[#allocation27_spill] sm:$0xff] %v6940_v63 }
 0x846   : > { %v3021_v43 = vpop.permute.xlu2 %3020 }
 0x847   : > { %v3023_v37 = vmul.f32 %v3021_v43, %v6786_v52  ;;  %v3024_v59 = vmul.f32 %v3021_v43, %v6788_v0 }
 0x849   : > { %3029 = vrot.lane.b32.xlu1 %v3024_v59, %s8492_s4  ;;  %3027 = vrot.lane.b32.xlu0 %v3023_v37, %s8492_s4  ;;  %v4656_v37 = vld [vmem:[%s8438_s28 + $0x2f] ss:$0 sm:$0xff]  ;;  %s8522_s4 = smov 122  }
 0x84b   : > { %v6946_v5 = vpop.permute.xlu0 %2775 }
 0x84c   : > { %8493 = vst [vmem:[#allocation24_spill] sm:$0xff] %v6946_v5 }
 0x84e   : > { %v3039_v13 = vpop.permute.xlu2 %3038 }
 0x84f   : > { %v3041_v39 = vmul.f32 %v3039_v13, %v6786_v52  ;;  %v3042_v44 = vmul.f32 %v3039_v13, %v6788_v0  ;;  %v4657_v13 = vld [vmem:[%s8438_s28 + $0x30] ss:$0 sm:$0xff] }
 0x851   : > { %3047 = vrot.lane.b32.xlu1 %v3042_v44, %s8494_s11  ;;  %3045 = vrot.lane.b32.xlu0 %v3041_v39, %s8494_s11  ;;  %v6969_v39 = vpop.permute.xlu1 %2668  ;;  %s8530_s11 = smov 119  }
 0x853   : > { %v6952_v10 = vpop.permute.xlu0 %2793 }
 0x854   : > { %8495 = vst [vmem:[#allocation28_spill] sm:$0xff] %v6952_v10 }
 0x856   : > { %v3057_v15 = vpop.permute.xlu2 %3056 }
 0x857   : > { %v3059_v35 = vmul.f32 %v3057_v15, %v6786_v52  ;;  %v3060_v19 = vmul.f32 %v3057_v15, %v6788_v0  ;;  %v4658_v15 = vld [vmem:[%s8438_s28 + $0x31] ss:$0 sm:$0xff] }
 0x859   : > { %3065 = vrot.lane.b32.xlu1 %v3060_v19, %s8496_s3  ;;  %3063 = vrot.lane.b32.xlu0 %v3059_v35, %s8496_s3  ;;  %v6977_v35 = vpop.permute.xlu1 %2687  ;;  %s8526_s3 = smov 23  }
 0x85b   : > { %v6958_v43 = vpop.permute.xlu0 %2811 }
 0x85c   : > { %8497 = vst [vmem:[#allocation26_spill] sm:$0xff] %v6958_v43 }
 0x861   : > { %3086 = vrot.lane.b32.xlu0 %v4656_v37, %s8498_s0  ;;  %v4659_v37 = vld [vmem:[%s8438_s28 + $0x32] ss:$0 sm:$0xff] }
 0x863   : > { %v6964_v59 = vpop.permute.xlu0 %2829 }
 0x864   : > { %8499 = vst [vmem:[#allocation30_spill] sm:$0xff] %v6964_v59  ;;  %v6985_v59 = vpop.permute.xlu1 %2705 }
 0x869   : > { %3104 = vrot.lane.b32.xlu0 %v4657_v13, %s8464_s1 }
 0x86b   : > { %v6972_v44 = vpop.permute.xlu0 %2847 }
 0x86c   : > { %8500 = vst [vmem:[#allocation29_spill] sm:$0xff] %v6972_v44  ;;  %v4660_v44 = vld [vmem:[%s8438_s28 + $0x33] ss:$0 sm:$0xff]  ;;  %v6994_v43 = vpop.permute.xlu1 %2723 }
 0x871   : > { %3122 = vrot.lane.b32.xlu0 %v4658_v15, %s8465_s23 }
 0x873   : > { %v6980_v19 = vpop.permute.xlu0 %2865 }
 0x874   : > { %8501 = vst [vmem:[#allocation32_spill] sm:$0xff] %v6980_v19  ;;  %v4661_v19 = vld [vmem:[%s8438_s28 + $0x34] ss:$0 sm:$0xff] }
 0x879   : > { %3140 = vrot.lane.b32.xlu0 %v4659_v37, %s8271_s29  ;;  %v7004_v37 = vpop.permute.xlu1 %2741 }
 0x87b   : > { %v6988_v13 = vpop.permute.xlu0 %2883 }
 0x87c   : > { %8502 = vst [vmem:[#allocation31_spill] sm:$0xff] %v6988_v13  ;;  %v4662_v13 = vld [vmem:[%s8438_s28 + $0x35] ss:$0 sm:$0xff] }
 0x881   : > { %3158 = vrot.lane.b32.xlu0 %v4660_v44, %s8274_s12  ;;  %v7015_v5 = vpop.permute.xlu1 %2759 }
 0x883   : > { %v6996_v15 = vpop.permute.xlu0 %2901 }
 0x884   : > { %8503 = vst [vmem:[#allocation34_spill] sm:$0xff] %v6996_v15  ;;  %v4663_v15 = vld [vmem:[%s8438_s28 + $0x36] ss:$0 sm:$0xff] }
 0x889   : > { %3176 = vrot.lane.b32.xlu0 %v4661_v19, %s8205_s15  ;;  %v7023_v63 = vpop.permute.xlu1 %2777 }
 0x88b   : > { %v7002_v10 = vpop.permute.xlu0 %2919 }
 0x88c   : > { %8504 = vst [vmem:[#allocation33_spill] sm:$0xff] %v7002_v10  ;;  %v4664_v10 = vld [vmem:[%s8438_s28 + $0x37] ss:$0 sm:$0xff] }
 0x891   : > { %3194 = vrot.lane.b32.xlu0 %v4662_v13, %s8208_s8  ;;  %v7032_v14 = vpop.permute.xlu1 %2795 }
 0x893   : > { %v7010_v44 = vpop.permute.xlu0 %2937 }
 0x894   : > { %8505 = vst [vmem:[#allocation36_spill] sm:$0xff] %v7010_v44  ;;  %v4665_v44 = vld [vmem:[%s8438_s28 + $0x38] ss:$0 sm:$0xff] }
 0x899   : > { %3212 = vrot.lane.b32.xlu0 %v4663_v15, %s8148_s16 }
 0x89b   : > { %v7018_v19 = vpop.permute.xlu0 %2955 }
 0x89c   : > { %8506 = vst [vmem:[#allocation35_spill] sm:$0xff] %v7018_v19  ;;  %v4666_v19 = vld [vmem:[%s8438_s28 + $0x39] ss:$0 sm:$0xff] }
 0x8a1   : > { %3230 = vrot.lane.b32.xlu0 %v4664_v10, %s8151_s2  ;;  %v7042_v10 = vpop.permute.xlu1 %2813 }
 0x8a2   : > { %8510 = vst [vmem:[#allocation40_spill] sm:$0xff] %v7042_v10 }
 0x8a3   : > { %v7026_v13 = vpop.permute.xlu0 %2973 }
 0x8a4   : > { %8507 = vst [vmem:[#allocation37_spill] sm:$0xff] %v7026_v13  ;;  %v4667_v13 = vld [vmem:[%s8438_s28 + $0x3a] ss:$0 sm:$0xff] }
 0x8a9   : > { %3248 = vrot.lane.b32.xlu0 %v4665_v44, %s8087_s9  ;;  %v7053_v45 = vpop.permute.xlu1 %2831 }
 0x8aa   : > { %8512 = vst [vmem:[#allocation42_spill] sm:$0xff] %v7053_v45 }
 0x8ab   : > { %v7034_v15 = vpop.permute.xlu0 %2991 }
 0x8ac   : > { %8508 = vst [vmem:[#allocation38_spill] sm:$0xff] %v7034_v15  ;;  %v4668_v15 = vld [vmem:[%s8438_s28 + $0x3b] ss:$0 sm:$0xff] }
 0x8b1   : > { %3266 = vrot.lane.b32.xlu0 %v4666_v19, %s8088_s26  ;;  %v7061_v60 = vpop.permute.xlu1 %2849 }
 0x8b2   : > { %8514 = vst [vmem:[#allocation65_spill] sm:$0xff] %v7061_v60 }
 0x8b3   : > { %v7040_v49 = vpop.permute.xlu0 %3009 }
 0x8b4   : > { %8509 = vst [vmem:[#allocation39_spill] sm:$0xff] %v7040_v49  ;;  %v4669_v49 = vld [vmem:[%s8438_s28 + $0x3c] ss:$0 sm:$0xff] }
 0x8b9   : > { %3284 = vrot.lane.b32.xlu0 %v4667_v13, %s8089_s27  ;;  %v7070_v52 = vpop.permute.xlu1 %2867 }
 0x8ba   : > { %8516 = vst [vmem:[#allocation45_spill] sm:$0xff] %v7070_v52 }
 0x8bb   : > { %v7048_v44 = vpop.permute.xlu0 %3027 }
 0x8bc   : > { %8511 = vst [vmem:[#allocation41_spill] sm:$0xff] %v7048_v44  ;;  %v4670_v44 = vld [vmem:[%s8438_s28 + $0x3d] ss:$0 sm:$0xff] }
 0x8c1   : > { %3302 = vrot.lane.b32.xlu0 %v4668_v15, %s8158_s13  ;;  %v7072_v15 = vld [vmem:[#allocation3 + $0x2] sm:$0xff] }
 0x8c3   : > { %v7056_v19 = vpop.permute.xlu0 %3045 }
 0x8c4   : > { %8513 = vst [vmem:[#allocation43_spill] sm:$0xff] %v7056_v19  ;;  %v7074_v19 = vld [vmem:[#allocation3 + $0xa] sm:$0xff] }
 0x8c9   : > { %3320 = vrot.lane.b32.xlu0 %v4669_v49, %s8090_s6  ;;  %v4671_v49 = vld [vmem:[%s8438_s28 + $0x3e] ss:$0 sm:$0xff] }
 0x8cb   : > { %v7064_v13 = vpop.permute.xlu0 %3063 }
 0x8cc   : > { %8515 = vst [vmem:[#allocation44_spill] sm:$0xff] %v7064_v13  ;;  %v7084_v13 = vpop.permute.xlu1 %2885 }
 0x8cd   : > { %8517 = vst [vmem:[#allocation46_spill] sm:$0xff] %v7084_v13  ;;  %v4673_v13 = vld [vmem:[%s8438_s28 + $0x40] ss:$0 sm:$0xff] }
 0x8d1   : > { %3338 = vrot.lane.b32.xlu0 %v4670_v44, %s8091_s19 }
 0x8d3   : > { %v3087_v29 = vpop.permute.xlu0 %3086 }
 0x8d4   : > { %v3089_v45 = vmul.f32 %v3087_v29, %v7072_v15  ;;  %v3090_v60 = vmul.f32 %v3087_v29, %v7074_v19  ;;  %v4672_v29 = vld [vmem:[%s8438_s28 + $0x3f] ss:$0 sm:$0xff] }
 0x8d6   : > { %3095 = vrot.lane.b32.xlu2 %v3090_v60, %s8092_s17  ;;  %3093 = vrot.lane.b32.xlu1 %v3089_v45, %s8092_s17 }
 0x8d9   : > { %3356 = vrot.lane.b32.xlu0 %v4671_v49, %s8093_s30 }
 0x8db   : > { %v3105_v44 = vpop.permute.xlu0 %3104 }
 0x8dc   : > { %v3107_v52 = vmul.f32 %v3105_v44, %v7072_v15  ;;  %v3108_v47 = vmul.f32 %v3105_v44, %v7074_v19  ;;  %v7099_v44 = vpop.permute.xlu1 %2903 }
 0x8dd   : > { %8518 = vst [vmem:[#allocation56_spill] sm:$0xff] %v7099_v44 }
 0x8de   : > { %3113 = vrot.lane.b32.xlu2 %v3108_v47, %s8094_s20  ;;  %3111 = vrot.lane.b32.xlu1 %v3107_v52, %s8094_s20 }
 0x8e1   : > { %3374 = vrot.lane.b32.xlu0 %v4672_v29, %s8095_s24 }
 0x8e3   : > { %v3123_v60 = vpop.permute.xlu0 %3122 }
 0x8e4   : > { %v3125_v45 = vmul.f32 %v3123_v60, %v7072_v15  ;;  %v3126_v49 = vmul.f32 %v3123_v60, %v7074_v19  ;;  %v4674_v60 = vld [vmem:[%s8438_s28 + $0x41] ss:$0 sm:$0xff]  ;;  %v7111_v44 = vpop.permute.xlu1 %2921 }
 0x8e5   : > { %8519 = vst [vmem:[#allocation47_spill] sm:$0xff] %v7111_v44 }
 0x8e6   : > { %3131 = vrot.lane.b32.xlu2 %v3126_v49, %s8096_s5  ;;  %3129 = vrot.lane.b32.xlu1 %v3125_v45, %s8096_s5 }
 0x8e9   : > { %3392 = vrot.lane.b32.xlu0 %v4673_v13, %s8097_s25 }
 0x8eb   : > { %v3141_v47 = vpop.permute.xlu0 %3140 }
 0x8ec   : > { %v3143_v52 = vmul.f32 %v3141_v47, %v7072_v15  ;;  %v3144_v29 = vmul.f32 %v3141_v47, %v7074_v19  ;;  %v4675_v47 = vld [vmem:[%s8438_s28 + $0x42] ss:$0 sm:$0xff] }
 0x8ee   : > { %3149 = vrot.lane.b32.xlu2 %v3144_v29, %s8098_s7  ;;  %3147 = vrot.lane.b32.xlu1 %v3143_v52, %s8098_s7  ;;  %v7122_v52 = vpop.permute.xlu1 %2939 }
 0x8ef   : > { %8521 = vst [vmem:[#allocation57_spill] sm:$0xff] %v7122_v52 }
 0x8f1   : > { %3410 = vrot.lane.b32.xlu0 %v4674_v60, %s8470_s10 }
 0x8f3   : > { %v3159_v45 = vpop.permute.xlu0 %3158 }
 0x8f4   : > { %v3161_v13 = vmul.f32 %v3159_v45, %v7072_v15  ;;  %v3162_v49 = vmul.f32 %v3159_v45, %v7074_v19  ;;  %v4676_v45 = vld [vmem:[%s8438_s28 + $0x43] ss:$0 sm:$0xff] }
 0x8f6   : > { %3167 = vrot.lane.b32.xlu2 %v3162_v49, %s8100_s21  ;;  %3165 = vrot.lane.b32.xlu1 %v3161_v13, %s8100_s21  ;;  %v7132_v49 = vpop.permute.xlu1 %2957  ;;  %s8525_s21 = smov 121  }
 0x8f7   : > { %8524 = vst [vmem:[#allocation48_spill] sm:$0xff] %v7132_v49  ;;  %v4678_v49 = vld [vmem:[%s8438_s28 + $0x45] ss:$0 sm:$0xff] }
 0x8f9   : > { %3428 = vrot.lane.b32.xlu0 %v4675_v47, %s8520_s18  ;;  %s8529_s18 = smov 1  }
 0x8fb   : > { %v3177_v29 = vpop.permute.xlu0 %3176 }
 0x8fc   : > { %v3179_v60 = vmul.f32 %v3177_v29, %v7072_v15  ;;  %v3180_v44 = vmul.f32 %v3177_v29, %v7074_v19  ;;  %v4677_v29 = vld [vmem:[%s8438_s28 + $0x44] ss:$0 sm:$0xff] }
 0x8fe   : > { %3185 = vrot.lane.b32.xlu2 %v3180_v44, %s8522_s4  ;;  %3183 = vrot.lane.b32.xlu1 %v3179_v60, %s8522_s4  ;;  %s8528_s4 = smov 120  }
 0x901   : > { %3446 = vrot.lane.b32.xlu0 %v4676_v45, %s8523_s22  ;;  %s8532_s22 = smov 118  }
 0x903   : > { %v3195_v13 = vpop.permute.xlu0 %3194 }
 0x904   : > { %v3197_v47 = vmul.f32 %v3195_v13, %v7072_v15  ;;  %v3198_v52 = vmul.f32 %v3195_v13, %v7074_v19  ;;  %v7147_v13 = vpop.permute.xlu1 %2975 }
 0x905   : > { %8527 = vst [vmem:[#allocation58_spill] sm:$0xff] %v7147_v13 }
 0x906   : > { %3203 = vrot.lane.b32.xlu2 %v3198_v52, %s8525_s21  ;;  %3201 = vrot.lane.b32.xlu1 %v3197_v47, %s8525_s21 }
 0x909   : > { %3464 = vrot.lane.b32.xlu0 %v4677_v29, %s8526_s3 }
 0x90b   : > { %v3213_v44 = vpop.permute.xlu0 %3212 }
 0x90c   : > { %v3215_v60 = vmul.f32 %v3213_v44, %v7072_v15  ;;  %v3216_v45 = vmul.f32 %v3213_v44, %v7074_v19  ;;  %v7156_v44 = vpop.permute.xlu1 %2993 }
 0x90d   : > { %8531 = vst [vmem:[#allocation49_spill] sm:$0xff] %v7156_v44 }
 0x90e   : > { %3221 = vrot.lane.b32.xlu2 %v3216_v45, %s8528_s4  ;;  %3219 = vrot.lane.b32.xlu1 %v3215_v60, %s8528_s4 }
 0x911   : > { %3484 = vrot.lane.b32.xlu0 %v4678_v49, %s8529_s18 }
 0x913   : > { %v3231_v52 = vpop.permute.xlu0 %3230 }
 0x914   : > { %v3233_v47 = vmul.f32 %v3231_v52, %v7072_v15  ;;  %v3234_v29 = vmul.f32 %v3231_v52, %v7074_v19  ;;  %v7162_v49 = vpop.permute.xlu1 %3011 }
 0x915   : > { %8533 = vst [vmem:[#allocation59_spill] sm:$0xff] %v7162_v49 }
 0x916   : > { %3239 = vrot.lane.b32.xlu2 %v3234_v29, %s8530_s11  ;;  %3237 = vrot.lane.b32.xlu1 %v3233_v47, %s8530_s11  ;;  %v7168_v47 = vpop.permute.xlu2 %3076  ;;  %s8601_s11 = smov 21  }
 0x917   : > { %8535 = vst [vmem:[#allocation50_spill] sm:$0xff] %v7168_v47 }
 0x91b   : > { %v3249_v10 = vpop.permute.xlu0 %3248 }
 0x91c   : > { %v3251_v13 = vmul.f32 %v3249_v10, %v7072_v15  ;;  %v3252_v45 = vmul.f32 %v3249_v10, %v7074_v19  ;;  %v7170_v40 = vpop.permute.xlu1 %3029 }
 0x91d   : > { %8536 = vst [vmem:[#allocation60_spill] sm:$0xff] %v7170_v40 }
 0x91e   : > { %3257 = vrot.lane.b32.xlu2 %v3252_v45, %s8532_s22  ;;  %3255 = vrot.lane.b32.xlu1 %v3251_v13, %s8532_s22  ;;  %s8537_s22 = smov 116  }
 0x923   : > { %v3267_v60 = vpop.permute.xlu0 %3266 }
 0x924   : > { %v3269_v52 = vmul.f32 %v3267_v60, %v7072_v15  ;;  %v3270_v29 = vmul.f32 %v3267_v60, %v7074_v19  ;;  %v7180_v49 = vpop.permute.xlu1 %3047 }
 0x925   : > { %8539 = vst [vmem:[#allocation61_spill] sm:$0xff] %v7180_v49 }
 0x926   : > { %3275 = vrot.lane.b32.xlu2 %v3270_v29, %s8534_s14  ;;  %3273 = vrot.lane.b32.xlu1 %v3269_v52, %s8534_s14  ;;  %s8540_s14 = smov 115  }
 0x92b   : > { %v3285_v44 = vpop.permute.xlu0 %3284 }
 0x92c   : > { %v3287_v10 = vmul.f32 %v3285_v44, %v7072_v15  ;;  %v3288_v13 = vmul.f32 %v3285_v44, %v7074_v19 }
 0x92e   : > { %3293 = vrot.lane.b32.xlu2 %v3288_v13, %s8537_s22  ;;  %3291 = vrot.lane.b32.xlu1 %v3287_v10, %s8537_s22  ;;  %s8542_s22 = smov 114  }
 0x930   : > { %v7176_v45 = vpop.permute.xlu2 %3095 }
 0x931   : > { %8538 = vst [vmem:[#allocation51_spill] sm:$0xff] %v7176_v45  ;;  %v7190_v45 = vpop.permute.xlu1 %3065 }
 0x932   : > { %8543 = vst [vmem:[#allocation62_spill] sm:$0xff] %v7190_v45 }
 0x933   : > { %v3303_v60 = vpop.permute.xlu0 %3302 }
 0x934   : > { %v3305_v29 = vmul.f32 %v3303_v60, %v7072_v15  ;;  %v3306_v52 = vmul.f32 %v3303_v60, %v7074_v19 }
 0x936   : > { %3311 = vrot.lane.b32.xlu2 %v3306_v52, %s8540_s14  ;;  %3309 = vrot.lane.b32.xlu1 %v3305_v29, %s8540_s14  ;;  %s8545_s14 = smov 113  }
 0x938   : > { %v7184_v47 = vpop.permute.xlu2 %3113 }
 0x939   : > { %8541 = vst [vmem:[#allocation52_spill] sm:$0xff] %v7184_v47 }
 0x93b   : > { %v3321_v44 = vpop.permute.xlu0 %3320 }
 0x93c   : > { %v3323_v13 = vmul.f32 %v3321_v44, %v7072_v15  ;;  %v3324_v10 = vmul.f32 %v3321_v44, %v7074_v19  ;;  %v2264_v44 = vmul.f32 %v6680_v61, %v6548_v6 }
 0x93e   : > { %3329 = vrot.lane.b32.xlu2 %v3324_v10, %s8542_s22  ;;  %3327 = vrot.lane.b32.xlu1 %v3323_v13, %s8542_s22  ;;  %v2284_v13 = vadd.f32 %v6688_v31, %v2264_v44  ;;  %s8547_s22 = smov 112  }
 0x940   : > { %v7192_v60 = vpop.permute.xlu2 %3131 }
 0x941   : > { %8544 = vst [vmem:[#allocation53_spill] sm:$0xff] %v7192_v60  ;;  %v2302_v60 = vadd.f32 %v6699_v33, %v2284_v13 }
 0x943   : > { %v3339_v49 = vpop.permute.xlu0 %3338 }
 0x944   : > { %v3341_v52 = vmul.f32 %v3339_v49, %v7072_v15  ;;  %v3342_v29 = vmul.f32 %v3339_v49, %v7074_v19 }
 0x946   : > { %3347 = vrot.lane.b32.xlu2 %v3342_v29, %s8545_s14  ;;  %3345 = vrot.lane.b32.xlu1 %v3341_v52, %s8545_s14  ;;  %v2320_v29 = vadd.f32 %v6708_v16, %v2302_v60  ;;  %s8548_s14 = smov 111  }
 0x948   : > { %v7200_v47 = vpop.permute.xlu1 %3093  ;;  %v7202_v10 = vpop.permute.xlu2 %3149  ;;  %v2338_v6 = vadd.f32 %v6718_v17, %v2320_v29 }
 0x949   : > { %8546 = vst [vmem:[#allocation63_spill] sm:$0xff] %v7200_v47 }
 0x94a   : > { %v2356_v31 = vadd.f32 %v6729_v51, %v2338_v6 }
 0x94b   : > { %v3357_v45 = vpop.permute.xlu0 %3356 }
 0x94c   : > { %v3359_v40 = vmul.f32 %v3357_v45, %v7072_v15  ;;  %v3360_v49 = vmul.f32 %v3357_v45, %v7074_v19  ;;  %v2374_v33 = vadd.f32 %v6737_v23, %v2356_v31 }
 0x94e   : > { %3365 = vrot.lane.b32.xlu2 %v3360_v49, %s8547_s22  ;;  %3363 = vrot.lane.b32.xlu1 %v3359_v40, %s8547_s22  ;;  %v2392_v16 = vadd.f32 %v6746_v48, %v2374_v33  ;;  %s8549_s22 = smov 110  }
 0x950   : > { %v7212_v52 = vpop.permute.xlu1 %3111  ;;  %v7214_v47 = vpop.permute.xlu2 %3167  ;;  %v2410_v17 = vadd.f32 %v6756_v53, %v2392_v16  ;;  %v4731_v53 = vld [vmem:[#allocation3] sm:$0xff] }
 0x951   : > { %v2263_v31 = vmul.f32 %v4731_v53, %v6680_v61 }
 0x952   : > { %v2428_v51 = vadd.f32 %v6767_v24, %v2410_v17 }
 0x953   : > { %v3375_v44 = vpop.permute.xlu0 %3374 }
 0x954   : > { %v3377_v13 = vmul.f32 %v3375_v44, %v7072_v15  ;;  %v3378_v45 = vmul.f32 %v3375_v44, %v7074_v19  ;;  %v2446_v23 = vadd.f32 %v6775_v58, %v2428_v51  ;;  %v2283_v58 = vadd.f32 %v6630_v12, %v2263_v31 }
 0x956   : > { %3383 = vrot.lane.b32.xlu2 %v3378_v45, %s8548_s14  ;;  %3381 = vrot.lane.b32.xlu1 %v3377_v13, %s8548_s14  ;;  %v2464_v48 = vadd.f32 %v6784_v18, %v2446_v23  ;;  %v2301_v45 = vadd.f32 %v6636_v42, %v2283_v58  ;;  %s8606_s14 = smov 117  }
 0x958   : > { %v7224_v40 = vpop.permute.xlu1 %3129  ;;  %v7226_v60 = vpop.permute.xlu2 %3185  ;;  %v2482_v33 = vadd.f32 %v6798_v11, %v2464_v48  ;;  %v2319_v61 = vadd.f32 %v6642_v57, %v2301_v45 }
 0x95a   : > { %v2500_v13 = vadd.f32 %v6813_v25, %v2482_v33  ;;  %v2337_v12 = vadd.f32 %v6648_v46, %v2319_v61 }
 0x95b   : > { %v3393_v49 = vpop.permute.xlu0 %3392 }
 0x95c   : > { %v3395_v29 = vmul.f32 %v3393_v49, %v7072_v15  ;;  %v3396_v6 = vmul.f32 %v3393_v49, %v7074_v19  ;;  %v2518_v18 = vadd.f32 %v6825_v62, %v2500_v13  ;;  %v2355_v23 = vadd.f32 %v6654_v34, %v2337_v12 }
 0x95e   : > { %3401 = vrot.lane.b32.xlu2 %v3396_v6, %s8549_s22  ;;  %3399 = vrot.lane.b32.xlu1 %v3395_v29, %s8549_s22  ;;  %v2536_v11 = vadd.f32 %v6836_v32, %v2518_v18  ;;  %s8550_s22 = smov 109   ;;  %v2373_v57 = vadd.f32 %v6660_v3, %v2355_v23  ;;  %v8554_v23 = vld [vmem:[#allocation19_spill] sm:$0xff] }
 0x960   : > { %v7237_v44 = vpop.permute.xlu1 %3147  ;;  %v7239_v24 = vpop.permute.xlu2 %3203  ;;  %v2554_v25 = vadd.f32 %v6846_v41, %v2536_v11  ;;  %v2391_v46 = vadd.f32 %v6666_v28, %v2373_v57  ;;  %v8555_v57 = vld [vmem:[#allocation40_spill] sm:$0xff] }
 0x962   : > { %v2572_v49 = vadd.f32 %v6861_v9, %v2554_v25  ;;  %v2409_v34 = vadd.f32 %v6672_v20, %v2391_v46  ;;  %v8559_v46 = vld [vmem:[#allocation65_spill] sm:$0xff] }
 0x963   : > { %v3411_v16 = vpop.permute.xlu0 %3410 }
 0x964   : > { %v3413_v17 = vmul.f32 %v3411_v16, %v7072_v15  ;;  %v3414_v51 = vmul.f32 %v3411_v16, %v7074_v19  ;;  %v2590_v32 = vadd.f32 %v6873_v56, %v2572_v49  ;;  %v2427_v53 = vadd.f32 %v6678_v36, %v2409_v34  ;;  %v8560_v34 = vld [vmem:[#allocation18_spill] sm:$0xff] }
 0x966   : > { %3419 = vrot.lane.b32.xlu2 %v3414_v51, %s8550_s22  ;;  %3417 = vrot.lane.b32.xlu1 %v3413_v17, %s8550_s22  ;;  %v2608_v41 = vadd.f32 %v6884_v7, %v2590_v32  ;;  %s8551_s22 = smov 108   ;;  %v2445_v28 = vadd.f32 %v6686_v21, %v2427_v53  ;;  %v8561_v53 = vld [vmem:[#allocation45_spill] sm:$0xff] }
 0x968   : > { %v7253_v42 = vpop.permute.xlu1 %3165  ;;  %v7255_v62 = vpop.permute.xlu2 %3221  ;;  %v2626_v9 = vadd.f32 %v6894_v30, %v2608_v41  ;;  %v2463_v20 = vadd.f32 %v6694_v27, %v2445_v28  ;;  %v2672_v30 = vmul.f32 %v6969_v39, %v6788_v0 }
 0x96a   : > { %v2644_v31 = vadd.f32 %v6902_v54, %v2626_v9  ;;  %v2481_v36 = vadd.f32 %v6702_v1, %v2463_v20  ;;  %v2671_v9 = vmul.f32 %v6969_v39, %v8560_v34  ;;  %v8563_v20 = vld [vmem:[#allocation21_spill] sm:$0xff]  ;;  %v8565_v39 = vld [vmem:[#allocation23_spill] sm:$0xff] }
 0x96b   : > { %v3429_v29 = vpop.permute.xlu0 %3428 }
 0x96c   : > { %v3431_v6 = vmul.f32 %v3429_v29, %v7072_v15  ;;  %v3432_v48 = vmul.f32 %v3429_v29, %v7074_v19  ;;  %v2662_v7 = vadd.f32 %v6910_v50, %v2644_v31  ;;  %v2499_v45 = vadd.f32 %v6710_v22, %v2481_v36  ;;  %v8556_v29 = vld [vmem:[#allocation17_spill] sm:$0xff]  ;;  %v8564_v36 = vld [vmem:[#allocation56_spill] sm:$0xff] }
 0x96e   : > { %3437 = vrot.lane.b32.xlu2 %v3432_v48, %s8551_s22  ;;  %3435 = vrot.lane.b32.xlu1 %v3431_v6, %s8551_s22  ;;  %s8552_s22 = smov 107   ;;  %v2674_v54 = vadd.f32 %v2672_v30, %v2662_v7  ;;  %v2517_v27 = vadd.f32 %v6716_v26, %v2499_v45  ;;  %v8557_v48 = vld [vmem:[#allocation42_spill] sm:$0xff]  ;;  %v4681_v45 = vld [vmem:[%s8438_s28 + $0x48] ss:$0 sm:$0xff] }
 0x96f   : > { %v8562_v7 = vld [vmem:[#allocation46_spill] sm:$0xff] }
 0x970   : > { %v7269_v3 = vpop.permute.xlu1 %3183  ;;  %v7271_v56 = vpop.permute.xlu2 %3239  ;;  %v2692_v18 = vadd.f32 %v6977_v35, %v2674_v54  ;;  %v2535_v1 = vadd.f32 %v6724_v55, %v2517_v27  ;;  %v4679_v55 = vld [vmem:[%s8438_s28 + $0x46] ss:$0 sm:$0xff] }
 0x971   : > { %v8566_v27 = vld [vmem:[#allocation47_spill] sm:$0xff] }
 0x972   : > { %v2710_v16 = vadd.f32 %v6985_v59, %v2692_v18  ;;  %v2553_v22 = vadd.f32 %v6732_v4, %v2535_v1 }
 0x973   : > { %v3447_v33 = vpop.permute.xlu0 %3446 }
 0x974   : > { %v3449_v58 = vmul.f32 %v3447_v33, %v7072_v15  ;;  %v3450_v13 = vmul.f32 %v3447_v33, %v7074_v19  ;;  %v2728_v61 = vadd.f32 %v6994_v43, %v2710_v16  ;;  %v2571_v11 = vadd.f32 %v6740_v2, %v2553_v22 }
 0x976   : > { %3455 = vrot.lane.b32.xlu2 %v3450_v13, %s8552_s22  ;;  %3453 = vrot.lane.b32.xlu1 %v3449_v58, %s8552_s22  ;;  %s8553_s22 = smov 106   ;;  %v2746_v35 = vadd.f32 %v7004_v37, %v2728_v61  ;;  %v2589_v43 = vadd.f32 %v6748_v8, %v2571_v11  ;;  %v8569_v61 = vld [vmem:[#allocation22_spill] sm:$0xff] }
 0x978   : > { %v7285_v21 = vpop.permute.xlu1 %3201  ;;  %v7287_v50 = vpop.permute.xlu2 %3257  ;;  %v2764_v12 = vadd.f32 %v7015_v5, %v2746_v35  ;;  %v2607_v4 = vadd.f32 %v6754_v38, %v2589_v43  ;;  %v4680_v38 = vld [vmem:[%s8438_s28 + $0x47] ss:$0 sm:$0xff]  ;;  %v8570_v35 = vld [vmem:[#allocation48_spill] sm:$0xff] }
 0x979   : > { %v8571_v43 = vld [vmem:[#allocation27_spill] sm:$0xff] }
 0x97a   : > { %v2782_v25 = vadd.f32 %v7023_v63, %v2764_v12  ;;  %v2625_v49 = vadd.f32 %v8554_v23, %v2607_v4  ;;  %v8558_v63 = vld [vmem:[#allocation20_spill] sm:$0xff]  ;;  %v8572_v4 = vld [vmem:[#allocation58_spill] sm:$0xff] }
 0x97b   : > { %v3465_v0 = vpop.permute.xlu0 %3464  ;;  %v4682_v23 = vld [vmem:[%s8438_s28 + $0x49] ss:$0 sm:$0xff] }
 0x97c   : > { %v3467_v17 = vmul.f32 %v3465_v0, %v7072_v15  ;;  %v3468_v51 = vmul.f32 %v3465_v0, %v7074_v19  ;;  %v2800_v37 = vadd.f32 %v7032_v14, %v2782_v25  ;;  %v2643_v6 = vadd.f32 %v8556_v29, %v2625_v49  ;;  %v8567_v0 = vld [vmem:[#allocation25_spill] sm:$0xff]  ;;  %v8573_v49 = vld [vmem:[#allocation24_spill] sm:$0xff] }
 0x97e   : > { %3473 = vrot.lane.b32.xlu2 %v3468_v51, %s8553_s22  ;;  %3471 = vrot.lane.b32.xlu1 %v3467_v17, %s8553_s22  ;;  %v2818_v2 = vadd.f32 %v8555_v57, %v2800_v37  ;;  %v2661_v14 = vadd.f32 %v8558_v63, %v2643_v6  ;;  %v8568_v51 = vld [vmem:[#allocation57_spill] sm:$0xff]  ;;  %v8575_v6 = vld [vmem:[#allocation28_spill] sm:$0xff]  ;;  %v8577_v63 = vld [vmem:[#allocation26_spill] sm:$0xff] }
 0x980   : > { %v7301_v26 = vpop.permute.xlu1 %3219  ;;  %v7303_v59 = vpop.permute.xlu2 %3275  ;;  %v2836_v8 = vadd.f32 %v8557_v48, %v2818_v2  ;;  %v2673_v28 = vadd.f32 %v2671_v9, %v2661_v14  ;;  %v8574_v2 = vld [vmem:[#allocation49_spill] sm:$0xff] }
 0x982   : > { %v2854_v41 = vadd.f32 %v8559_v46, %v2836_v8  ;;  %v2691_v30 = vadd.f32 %v8563_v20, %v2673_v28  ;;  %v8576_v8 = vld [vmem:[#allocation59_spill] sm:$0xff]  ;;  %v8578_v46 = vld [vmem:[#allocation60_spill] sm:$0xff]  ;;  %v8580_v28 = vld [vmem:[#allocation61_spill] sm:$0xff] }
 0x983   : > { %v8581_v20 = vld [vmem:[#allocation29_spill] sm:$0xff] }
 0x984   : > { %v2872_v31 = vadd.f32 %v8561_v53, %v2854_v41  ;;  %v2709_v18 = vadd.f32 %v8565_v39, %v2691_v30  ;;  %v8579_v53 = vld [vmem:[#allocation30_spill] sm:$0xff] }
 0x986   : > { %3494 = vrot.lane.b32.xlu1 %v4679_v55, %s8498_s0  ;;  %v2890_v33 = vadd.f32 %v8562_v7, %v2872_v31  ;;  %v2727_v17 = vadd.f32 %v8567_v0, %v2709_v18  ;;  %v8584_v18 = vld [vmem:[#allocation32_spill] sm:$0xff] }
 0x988   : > { %v7317_v32 = vpop.permute.xlu1 %3237  ;;  %v7319_v5 = vpop.permute.xlu2 %3293  ;;  %v2908_v54 = vadd.f32 %v8564_v36, %v2890_v33  ;;  %v2745_v22 = vadd.f32 %v8569_v61, %v2727_v17  ;;  %v4683_v33 = vld [vmem:[%s8438_s28 + $0x4a] ss:$0 sm:$0xff]  ;;  %v8582_v36 = vld [vmem:[#allocation62_spill] sm:$0xff] }
 0x989   : > { %v8586_v61 = vld [vmem:[#allocation34_spill] sm:$0xff] }
 0x98a   : > { %v2926_v16 = vadd.f32 %v8566_v27, %v2908_v54  ;;  %v2763_v25 = vadd.f32 %v8571_v43, %v2745_v22  ;;  %v4684_v43 = vld [vmem:[%s8438_s28 + $0x4b] ss:$0 sm:$0xff] }
 0x98c   : > { %v2944_v1 = vadd.f32 %v8568_v51, %v2926_v16  ;;  %v2781_v57 = vadd.f32 %v8573_v49, %v2763_v25  ;;  %v8585_v16 = vld [vmem:[#allocation31_spill] sm:$0xff]  ;;  %v8588_v25 = vld [vmem:[#allocation33_spill] sm:$0xff] }
 0x98e   : > { %3512 = vrot.lane.b32.xlu1 %v4680_v38, %s8464_s1  ;;  %v2962_v11 = vadd.f32 %v8570_v35, %v2944_v1  ;;  %v2799_v48 = vadd.f32 %v8575_v6, %v2781_v57  ;;  %v8587_v35 = vld [vmem:[#allocation51_spill] sm:$0xff]  ;;  %v8591_v57 = vld [vmem:[#allocation53_spill] sm:$0xff] }
 0x990   : > { %v7333_v58 = vpop.permute.xlu1 %3255  ;;  %v7335_v13 = vpop.permute.xlu2 %3311  ;;  %v2980_v37 = vadd.f32 %v8572_v4, %v2962_v11  ;;  %v2817_v14 = vadd.f32 %v8577_v63, %v2799_v48  ;;  %v8589_v4 = vld [vmem:[#allocation52_spill] sm:$0xff]  ;;  %v8593_v63 = vld [vmem:[#allocation37_spill] sm:$0xff] }
 0x992   : > { %v2998_v29 = vadd.f32 %v8574_v2, %v2980_v37  ;;  %v2835_v31 = vadd.f32 %v8579_v53, %v2817_v14  ;;  %v8594_v53 = vld [vmem:[#allocation38_spill] sm:$0xff] }
 0x994   : > { %v3016_v38 = vadd.f32 %v8576_v8, %v2998_v29  ;;  %v2853_v30 = vadd.f32 %v8581_v20, %v2835_v31  ;;  %v8592_v29 = vld [vmem:[#allocation35_spill] sm:$0xff] }
 0x996   : > { %3530 = vrot.lane.b32.xlu1 %v4681_v45, %s8465_s23  ;;  %v3034_v41 = vadd.f32 %v8578_v46, %v3016_v38  ;;  %v8583_v45 = vld [vmem:[#allocation50_spill] sm:$0xff]  ;;  %v2871_v27 = vadd.f32 %v8584_v18, %v2853_v30 }
 0x997   : > { %v3080_v39 = vmul.f32 %v8583_v45, %v7074_v19 }
 0x998   : > { %v7349_v12 = vpop.permute.xlu1 %3273  ;;  %v7351_v55 = vpop.permute.xlu2 %3329  ;;  %v3052_v7 = vadd.f32 %v8580_v28, %v3034_v41  ;;  %v2889_v0 = vadd.f32 %v8585_v16, %v2871_v27  ;;  %v4685_v41 = vld [vmem:[%s8438_s28 + $0x4c] ss:$0 sm:$0xff] }
 0x999   : > { %v8598_v16 = vld [vmem:[#allocation44_spill] sm:$0xff] }
 0x99a   : > { %v3070_v54 = vadd.f32 %v8582_v36, %v3052_v7  ;;  %v2907_v22 = vadd.f32 %v8586_v61, %v2889_v0  ;;  %v8595_v7 = vld [vmem:[#allocation39_spill] sm:$0xff] }
 0x99c   : > { %v3082_v17 = vadd.f32 %v3080_v39, %v3070_v54  ;;  %v2925_v19 = vadd.f32 %v8588_v25, %v2907_v22  ;;  %v8597_v39 = vld [vmem:[#allocation43_spill] sm:$0xff] }
 0x99e   : > { %3548 = vrot.lane.b32.xlu1 %v4682_v23, %s8271_s29  ;;  %v3100_v11 = vadd.f32 %v8587_v35, %v3082_v17  ;;  %v8590_v23 = vld [vmem:[#allocation36_spill] sm:$0xff]  ;;  %v3079_v17 = vmul.f32 %v8583_v45, %v7072_v15 }
 0x99f   : > { %v2943_v49 = vadd.f32 %v8590_v23, %v2925_v19 }
 0x9a0   : > { %v7365_v34 = vpop.permute.xlu1 %3291  ;;  %v3348_v9 = vpop.permute.xlu2 %3347  ;;  %v3118_v37 = vadd.f32 %v8589_v4, %v3100_v11  ;;  %v8599_v11 = vld [vmem:[#allocation63_spill] sm:$0xff] }
 0x9a1   : > { %v2961_v6 = vadd.f32 %v8592_v29, %v2943_v49 }
 0x9a2   : > { %v3136_v2 = vadd.f32 %v8591_v57, %v3118_v37  ;;  %v4688_v57 = vld [vmem:[%s8438_s28 + $0x4f] ss:$0 sm:$0xff] }
 0x9a3   : > { %v2979_v14 = vadd.f32 %v8593_v63, %v2961_v6 }
 0x9a4   : > { %v3154_v48 = vadd.f32 %v7202_v10, %v3136_v2  ;;  %v8596_v10 = vld [vmem:[#allocation41_spill] sm:$0xff] }
 0x9a5   : > { %v2997_v31 = vadd.f32 %v8594_v53, %v2979_v14 }
 0x9a6   : > { %3566 = vrot.lane.b32.xlu1 %v4683_v33, %s8274_s12  ;;  %v3172_v46 = vadd.f32 %v7214_v47, %v3154_v48  ;;  %v4689_v48 = vld [vmem:[%s8438_s28 + $0x50] ss:$0 sm:$0xff] }
 0x9a7   : > { %v3015_v33 = vadd.f32 %v8595_v7, %v2997_v31 }
 0x9a8   : > { %v7379_v51 = vpop.permute.xlu1 %3309  ;;  %v3366_v1 = vpop.permute.xlu2 %3365  ;;  %v3190_v28 = vadd.f32 %v7226_v60, %v3172_v46  ;;  %v4686_v60 = vld [vmem:[%s8438_s28 + $0x4d] ss:$0 sm:$0xff] }
 0x9a9   : > { %v3033_v30 = vadd.f32 %v8596_v10, %v3015_v33  ;;  %v4693_v10 = vld [vmem:[%s8438_s28 + $0x54] ss:$0 sm:$0xff] }
 0x9aa   : > { %v3208_v20 = vadd.f32 %v7239_v24, %v3190_v28 }
 0x9ab   : > { %v3051_v18 = vadd.f32 %v8597_v39, %v3033_v30  ;;  %v7464_v30 = vld [vmem:[#allocation3 + $0x3] sm:$0xff] }
 0x9ac   : > { %v3226_v36 = vadd.f32 %v7255_v62, %v3208_v20 }
 0x9ad   : > { %v3069_v0 = vadd.f32 %v8598_v16, %v3051_v18  ;;  %v4694_v18 = vld [vmem:[%s8438_s28 + $0x55] ss:$0 sm:$0xff] }
 0x9ae   : > { %3584 = vrot.lane.b32.xlu1 %v4684_v43, %s8205_s15  ;;  %v3244_v27 = vadd.f32 %v7271_v56, %v3226_v36  ;;  %v7466_v36 = vld [vmem:[#allocation3 + $0xb] sm:$0xff] }
 0x9af   : > { %v3081_v62 = vadd.f32 %v3079_v17, %v3069_v0  ;;  %v4695_v0 = vld [vmem:[%s8438_s28 + $0x56] ss:$0 sm:$0xff] }
 0x9b0   : > { %v3328_v8 = vpop.permute.xlu1 %3327  ;;  %v3384_v38 = vpop.permute.xlu2 %3383  ;;  %v3262_v24 = vadd.f32 %v7287_v50, %v3244_v27  ;;  %v4687_v50 = vld [vmem:[%s8438_s28 + $0x4e] ss:$0 sm:$0xff] }
 0x9b1   : > { %v3099_v43 = vadd.f32 %v8599_v11, %v3081_v62  ;;  %v4696_v62 = vld [vmem:[%s8438_s28 + $0x57] ss:$0 sm:$0xff]  ;;  %v4697_v11 = vld [vmem:[%s8438_s28 + $0x58] ss:$0 sm:$0xff] }
 0x9b2   : > { %v3280_v61 = vadd.f32 %v7303_v59, %v3262_v24 }
 0x9b3   : > { %v3117_v19 = vadd.f32 %v7212_v52, %v3099_v43 }
 0x9b4   : > { %v3298_v22 = vadd.f32 %v7319_v5, %v3280_v61 }
 0x9b5   : > { %v3135_v59 = vadd.f32 %v7224_v40, %v3117_v19  ;;  %v4698_v19 = vld [vmem:[%s8438_s28 + $0x59] ss:$0 sm:$0xff] }
 0x9b6   : > { %3602 = vrot.lane.b32.xlu1 %v4685_v41, %s8208_s8  ;;  %v3316_v25 = vadd.f32 %v7335_v13, %v3298_v22 }
 0x9b7   : > { %v3153_v5 = vadd.f32 %v7237_v44, %v3135_v59 }
 0x9b8   : > { %v3346_v54 = vpop.permute.xlu1 %3345  ;;  %v3402_v47 = vpop.permute.xlu2 %3401  ;;  %v3334_v15 = vadd.f32 %v7351_v55, %v3316_v25 }
 0x9b9   : > { %v3171_v13 = vadd.f32 %v7253_v42, %v3153_v5  ;;  %v4699_v5 = vld [vmem:[%s8438_s28 + $0x5a] ss:$0 sm:$0xff] }
 0x9ba   : > { %v3352_v45 = vadd.f32 %v3348_v9, %v3334_v15 }
 0x9bb   : > { %v3189_v52 = vadd.f32 %v7269_v3, %v3171_v13  ;;  %v4700_v13 = vld [vmem:[%s8438_s28 + $0x5b] ss:$0 sm:$0xff] }
 0x9bc   : > { %v3370_v4 = vadd.f32 %v3366_v1, %v3352_v45 }
 0x9bd   : > { %v3207_v40 = vadd.f32 %v7285_v21, %v3189_v52 }
 0x9be   : > { %3620 = vrot.lane.b32.xlu1 %v4686_v60, %s8148_s16  ;;  %v3388_v49 = vadd.f32 %v3384_v38, %v3370_v4  ;;  %s8607_s16 = smov 116  }
 0x9bf   : > { %v3225_v44 = vadd.f32 %v7301_v26, %v3207_v40 }
 0x9c0   : > { %v3364_v35 = vpop.permute.xlu1 %3363  ;;  %v3420_v56 = vpop.permute.xlu2 %3419  ;;  %v3406_v55 = vadd.f32 %v3402_v47, %v3388_v49 }
 0x9c1   : > { %v3243_v42 = vadd.f32 %v7317_v32, %v3225_v44  ;;  %v4690_v32 = vld [vmem:[%s8438_s28 + $0x51] ss:$0 sm:$0xff] }
 0x9c2   : > { %v3424_v9 = vadd.f32 %v3420_v56, %v3406_v55  ;;  %v4701_v55 = vld [vmem:[%s8438_s28 + $0x5c] ss:$0 sm:$0xff] }
 0x9c3   : > { %v3261_v3 = vadd.f32 %v7333_v58, %v3243_v42 }
 0x9c5   : > { %v3279_v21 = vadd.f32 %v7349_v12, %v3261_v3  ;;  %v4691_v12 = vld [vmem:[%s8438_s28 + $0x52] ss:$0 sm:$0xff] }
 0x9c6   : > { %3638 = vrot.lane.b32.xlu1 %v4687_v50, %s8151_s2  ;;  %s8600_s2 = smov 123  }
 0x9c7   : > { %v3297_v38 = vadd.f32 %v7365_v34, %v3279_v21 }
 0x9c8   : > { %v3382_v37 = vpop.permute.xlu1 %3381  ;;  %v3438_v23 = vpop.permute.xlu2 %3437 }
 0x9c9   : > { %v3442_v1 = vadd.f32 %v3438_v23, %v3424_v9  ;;  %v3315_v63 = vadd.f32 %v7379_v51, %v3297_v38  ;;  %v3485_v38 = vpop.permute.xlu0 %3484 }
 0x9cb   : > { %v3333_v14 = vadd.f32 %v3328_v8, %v3315_v63  ;;  %v4692_v8 = vld [vmem:[%s8438_s28 + $0x53] ss:$0 sm:$0xff] }
 0x9cd   : > { %v3351_v46 = vadd.f32 %v3346_v54, %v3333_v14  ;;  %v3487_v14 = vmul.f32 %v3485_v38, %v7464_v30 }
 0x9ce   : > { %3656 = vrot.lane.b32.xlu1 %v4688_v57, %s8087_s9 }
 0x9cf   : > { %v3369_v41 = vadd.f32 %v3364_v35, %v3351_v46 }
 0x9d0   : > { %v3400_v2 = vpop.permute.xlu1 %3399  ;;  %v3456_v29 = vpop.permute.xlu2 %3455 }
 0x9d1   : > { %v7436_v6 = vadd.f32 %v3456_v29, %v3442_v1  ;;  %v3387_v58 = vadd.f32 %v3382_v37, %v3369_v41 }
 0x9d3   : > { %v3405_v31 = vadd.f32 %v3400_v2, %v3387_v58 }
 0x9d6   : > { %3674 = vrot.lane.b32.xlu1 %v4689_v48, %s8088_s26  ;;  %s8603_s26 = smov 22  }
 0x9d8   : > { %v3418_v26 = vpop.permute.xlu1 %3417  ;;  %v3474_v21 = vpop.permute.xlu2 %3473 }
 0x9d9   : > { %v3423_v34 = vadd.f32 %v3418_v26, %v3405_v31 }
 0x9de   : > { %3692 = vrot.lane.b32.xlu1 %v4690_v32, %s8089_s27  ;;  %s8605_s27 = smov 118  }
 0x9e0   : > { %v3436_v53 = vpop.permute.xlu1 %3435 }
 0x9e1   : > { %v3441_v51 = vadd.f32 %v3436_v53, %v3423_v34 }
 0x9e6   : > { %3710 = vrot.lane.b32.xlu1 %v4691_v12, %s8158_s13 }
 0x9e8   : > { %v3454_v28 = vpop.permute.xlu1 %3453 }
 0x9e9   : > { %v3459_v7 = vadd.f32 %v3454_v28, %v3441_v51 }
 0x9ee   : > { %3728 = vrot.lane.b32.xlu1 %v4692_v8, %s8090_s6 }
 0x9f0   : > { %v3472_v33 = vpop.permute.xlu1 %3471 }
 0x9f1   : > { %v7458_v20 = vadd.f32 %v3472_v33, %v3459_v7 }
 0x9f3   : > { %v3489_v46 = vadd.f32 %v3487_v14, %v7458_v20 }
 0x9f6   : > { %3746 = vrot.lane.b32.xlu1 %v4693_v10, %s8091_s19  ;;  %v3478_v10 = vadd.f32 %v3474_v21, %v7436_v6 }
 0x9f8   : > { %v3495_v54 = vpop.permute.xlu1 %3494 }
 0x9f9   : > { %v3497_v47 = vmul.f32 %v3495_v54, %v7464_v30  ;;  %v3498_v39 = vmul.f32 %v3495_v54, %v7466_v36 }
 0x9fb   : > { %3503 = vrot.lane.b32.xlu0 %v3498_v39, %s8092_s17  ;;  %3501 = vrot.lane.b32.xlu2 %v3497_v47, %s8092_s17 }
 0x9fe   : > { %3764 = vrot.lane.b32.xlu1 %v4694_v18, %s8093_s30  ;;  %v3488_v18 = vmul.f32 %v3485_v38, %v7466_v36 }
 0xa00   : > { %v3513_v27 = vpop.permute.xlu1 %3512 }
 0xa01   : > { %v3515_v60 = vmul.f32 %v3513_v27, %v7464_v30  ;;  %v3516_v16 = vmul.f32 %v3513_v27, %v7466_v36  ;;  %v3490_v27 = vadd.f32 %v3488_v18, %v3478_v10 }
 0xa03   : > { %3521 = vrot.lane.b32.xlu0 %v3516_v16, %s8094_s20  ;;  %3519 = vrot.lane.b32.xlu2 %v3515_v60, %s8094_s20 }
 0xa06   : > { %3782 = vrot.lane.b32.xlu1 %v4695_v0, %s8095_s24  ;;  %s8602_s24 = smov 122  }
 0xa08   : > { %v3531_v24 = vpop.permute.xlu1 %3530 }
 0xa09   : > { %v3533_v17 = vmul.f32 %v3531_v24, %v7464_v30  ;;  %v3534_v61 = vmul.f32 %v3531_v24, %v7466_v36 }
 0xa0b   : > { %3539 = vrot.lane.b32.xlu0 %v3534_v61, %s8096_s5  ;;  %3537 = vrot.lane.b32.xlu2 %v3533_v17, %s8096_s5 }
 0xa0e   : > { %3800 = vrot.lane.b32.xlu1 %v4696_v62, %s8097_s25 }
 0xa10   : > { %v3549_v22 = vpop.permute.xlu1 %3548 }
 0xa11   : > { %v3551_v35 = vmul.f32 %v3549_v22, %v7464_v30  ;;  %v3552_v56 = vmul.f32 %v3549_v22, %v7466_v36 }
 0xa13   : > { %3557 = vrot.lane.b32.xlu0 %v3552_v56, %s8098_s7  ;;  %3555 = vrot.lane.b32.xlu2 %v3551_v35, %s8098_s7 }
 0xa16   : > { %3818 = vrot.lane.b32.xlu1 %v4697_v11, %s8470_s10 }
 0xa18   : > { %v3567_v43 = vpop.permute.xlu1 %3566 }
 0xa19   : > { %v3569_v25 = vmul.f32 %v3567_v43, %v7464_v30  ;;  %v3570_v50 = vmul.f32 %v3567_v43, %v7466_v36 }
 0xa1b   : > { %3575 = vrot.lane.b32.xlu0 %v3570_v50, %s8600_s2  ;;  %3573 = vrot.lane.b32.xlu2 %v3569_v25, %s8600_s2 }
 0xa1e   : > { %3836 = vrot.lane.b32.xlu1 %v4698_v19, %s8601_s11  ;;  %s8604_s11 = smov 119  }
 0xa20   : > { %v3585_v15 = vpop.permute.xlu1 %3584 }
 0xa21   : > { %v3587_v59 = vmul.f32 %v3585_v15, %v7464_v30  ;;  %v3588_v45 = vmul.f32 %v3585_v15, %v7466_v36 }
 0xa23   : > { %3593 = vrot.lane.b32.xlu0 %v3588_v45, %s8602_s24  ;;  %3591 = vrot.lane.b32.xlu2 %v3587_v59, %s8602_s24 }
 0xa26   : > { %3854 = vrot.lane.b32.xlu1 %v4699_v5, %s8603_s26 }
 0xa28   : > { %v3603_v4 = vpop.permute.xlu1 %3602 }
 0xa29   : > { %v3605_v37 = vmul.f32 %v3603_v4, %v7464_v30  ;;  %v3606_v23 = vmul.f32 %v3603_v4, %v7466_v36 }
 0xa2b   : > { %3611 = vrot.lane.b32.xlu0 %v3606_v23, %s8525_s21  ;;  %3609 = vrot.lane.b32.xlu2 %v3605_v37, %s8525_s21 }
 0xa2e   : > { %3872 = vrot.lane.b32.xlu1 %v4700_v13, %s8526_s3 }
 0xa30   : > { %v3621_v49 = vpop.permute.xlu1 %3620 }
 0xa31   : > { %v3623_v57 = vmul.f32 %v3621_v49, %v7464_v30  ;;  %v3624_v52 = vmul.f32 %v3621_v49, %v7466_v36 }
 0xa33   : > { %3629 = vrot.lane.b32.xlu0 %v3624_v52, %s8528_s4  ;;  %3627 = vrot.lane.b32.xlu2 %v3623_v57, %s8528_s4  ;;  %s8633_s4 = smov 109  }
 0xa36   : > { %3892 = vrot.lane.b32.xlu1 %v4701_v55, %s8529_s18  ;;  %s8608_s18 = smov 115  }
 0xa38   : > { %v3639_v40 = vpop.permute.xlu1 %3638 }
 0xa39   : > { %v3641_v9 = vmul.f32 %v3639_v40, %v7464_v30  ;;  %v3642_v44 = vmul.f32 %v3639_v40, %v7466_v36 }
 0xa3b   : > { %3647 = vrot.lane.b32.xlu0 %v3642_v44, %s8604_s11  ;;  %3645 = vrot.lane.b32.xlu2 %v3641_v9, %s8604_s11 }
 0xa40   : > { %v3657_v1 = vpop.permute.xlu1 %3656 }
 0xa41   : > { %v3659_v2 = vmul.f32 %v3657_v1, %v7464_v30  ;;  %v3660_v29 = vmul.f32 %v3657_v1, %v7466_v36 }
 0xa43   : > { %3665 = vrot.lane.b32.xlu0 %v3660_v29, %s8605_s27  ;;  %3663 = vrot.lane.b32.xlu2 %v3659_v2, %s8605_s27  ;;  %s8638_s27 = smov 1  }
 0xa48   : > { %v3675_v42 = vpop.permute.xlu1 %3674 }
 0xa49   : > { %v3677_v48 = vmul.f32 %v3675_v42, %v7464_v30  ;;  %v3678_v3 = vmul.f32 %v3675_v42, %v7466_v36 }
 0xa4b   : > { %3683 = vrot.lane.b32.xlu0 %v3678_v3, %s8606_s14  ;;  %3681 = vrot.lane.b32.xlu2 %v3677_v48, %s8606_s14  ;;  %s8609_s14 = smov 114  }
 0xa50   : > { %v3693_v26 = vpop.permute.xlu1 %3692 }
 0xa51   : > { %v3695_v63 = vmul.f32 %v3693_v26, %v7464_v30  ;;  %v3696_v32 = vmul.f32 %v3693_v26, %v7466_v36 }
 0xa53   : > { %3701 = vrot.lane.b32.xlu0 %v3696_v32, %s8607_s16  ;;  %3699 = vrot.lane.b32.xlu2 %v3695_v63, %s8607_s16  ;;  %s8640_s16 = sld [smem:[#allocation11_spill]] }
 0xa55   : > { %v3502_v41 = vpop.permute.xlu2 %3501 }
 0xa56   : > { %v3507_v53 = vadd.f32 %v3502_v41, %v3489_v46 }
 0xa58   : > { %v3711_v58 = vpop.permute.xlu1 %3710 }
 0xa59   : > { %v3713_v12 = vmul.f32 %v3711_v58, %v7464_v30  ;;  %v3714_v31 = vmul.f32 %v3711_v58, %v7466_v36 }
 0xa5b   : > { %3719 = vrot.lane.b32.xlu0 %v3714_v31, %s8608_s18  ;;  %3717 = vrot.lane.b32.xlu2 %v3713_v12, %s8608_s18  ;;  %s8610_s18 = smov 113  }
 0xa5d   : > { %v3520_v34 = vpop.permute.xlu2 %3519 }
 0xa5e   : > { %v3525_v51 = vadd.f32 %v3520_v34, %v3507_v53 }
 0xa60   : > { %v3729_v28 = vpop.permute.xlu1 %3728 }
 0xa61   : > { %v3731_v7 = vmul.f32 %v3729_v28, %v7464_v30  ;;  %v3732_v8 = vmul.f32 %v3729_v28, %v7466_v36 }
 0xa63   : > { %3737 = vrot.lane.b32.xlu0 %v3732_v8, %s8609_s14  ;;  %3735 = vrot.lane.b32.xlu2 %v3731_v7, %s8609_s14  ;;  %s8611_s14 = smov 112   ;;  %v4702_v8 = vld [vmem:[%s8438_s28 + $0x5d] ss:$0 sm:$0xff] }
 0xa65   : > { %v3538_v33 = vpop.permute.xlu2 %3537 }
 0xa66   : > { %v3543_v20 = vadd.f32 %v3538_v33, %v3525_v51 }
 0xa68   : > { %v3747_v54 = vpop.permute.xlu1 %3746 }
 0xa69   : > { %v3749_v47 = vmul.f32 %v3747_v54, %v7464_v30  ;;  %v3750_v39 = vmul.f32 %v3747_v54, %v7466_v36 }
 0xa6b   : > { %3755 = vrot.lane.b32.xlu0 %v3750_v39, %s8610_s18  ;;  %3753 = vrot.lane.b32.xlu2 %v3749_v47, %s8610_s18  ;;  %s8612_s18 = smov 111  }
 0xa6d   : > { %v3556_v60 = vpop.permute.xlu2 %3555  ;;  %v3504_v16 = vpop.permute.xlu0 %3503 }
 0xa6e   : > { %v3561_v0 = vadd.f32 %v3556_v60, %v3543_v20  ;;  %v3508_v24 = vadd.f32 %v3504_v16, %v3490_v27  ;;  %v4704_v27 = vld [vmem:[%s8438_s28 + $0x5f] ss:$0 sm:$0xff] }
 0xa70   : > { %v3765_v17 = vpop.permute.xlu1 %3764 }
 0xa71   : > { %v3767_v61 = vmul.f32 %v3765_v17, %v7464_v30  ;;  %v3768_v6 = vmul.f32 %v3765_v17, %v7466_v36  ;;  %v4705_v17 = vld [vmem:[%s8438_s28 + $0x60] ss:$0 sm:$0xff] }
 0xa73   : > { %3773 = vrot.lane.b32.xlu0 %v3768_v6, %s8611_s14  ;;  %3771 = vrot.lane.b32.xlu2 %v3767_v61, %s8611_s14  ;;  %s8613_s14 = smov 110  }
 0xa75   : > { %v3574_v62 = vpop.permute.xlu2 %3573  ;;  %v3522_v22 = vpop.permute.xlu0 %3521 }
 0xa76   : > { %v3579_v35 = vadd.f32 %v3574_v62, %v3561_v0  ;;  %v3526_v56 = vadd.f32 %v3522_v22, %v3508_v24 }
 0xa78   : > { %v3783_v11 = vpop.permute.xlu1 %3782 }
 0xa79   : > { %v3785_v43 = vmul.f32 %v3783_v11, %v7464_v30  ;;  %v3786_v25 = vmul.f32 %v3783_v11, %v7466_v36 }
 0xa7b   : > { %3791 = vrot.lane.b32.xlu0 %v3786_v25, %s8612_s18  ;;  %3789 = vrot.lane.b32.xlu2 %v3785_v43, %s8612_s18  ;;  %s8614_s18 = smov 109  }
 0xa7d   : > { %v3592_v50 = vpop.permute.xlu2 %3591  ;;  %v3540_v19 = vpop.permute.xlu0 %3539 }
 0xa7e   : > { %v3597_v15 = vadd.f32 %v3592_v50, %v3579_v35  ;;  %v3544_v59 = vadd.f32 %v3540_v19, %v3526_v56  ;;  %v4706_v35 = vld [vmem:[%s8438_s28 + $0x61] ss:$0 sm:$0xff]  ;;  %v4707_v50 = vld [vmem:[%s8438_s28 + $0x62] ss:$0 sm:$0xff] }
 0xa80   : > { %v3801_v45 = vpop.permute.xlu1 %3800 }
 0xa81   : > { %v3803_v5 = vmul.f32 %v3801_v45, %v7464_v30  ;;  %v3804_v4 = vmul.f32 %v3801_v45, %v7466_v36 }
 0xa83   : > { %3809 = vrot.lane.b32.xlu0 %v3804_v4, %s8613_s14  ;;  %3807 = vrot.lane.b32.xlu2 %v3803_v5, %s8613_s14  ;;  %s8615_s14 = smov 108   ;;  %v4708_v5 = vld [vmem:[%s8438_s28 + $0x63] ss:$0 sm:$0xff] }
 0xa85   : > { %v3610_v37 = vpop.permute.xlu2 %3609  ;;  %v3558_v23 = vpop.permute.xlu0 %3557 }
 0xa86   : > { %v3615_v13 = vadd.f32 %v3610_v37, %v3597_v15  ;;  %v3562_v49 = vadd.f32 %v3558_v23, %v3544_v59 }
 0xa88   : > { %v3819_v57 = vpop.permute.xlu1 %3818 }
 0xa89   : > { %v3821_v52 = vmul.f32 %v3819_v57, %v7464_v30  ;;  %v3822_v55 = vmul.f32 %v3819_v57, %v7466_v36 }
 0xa8b   : > { %3827 = vrot.lane.b32.xlu0 %v3822_v55, %s8614_s18  ;;  %3825 = vrot.lane.b32.xlu2 %v3821_v52, %s8614_s18  ;;  %s8616_s18 = smov 107  }
 0xa8d   : > { %v3628_v40 = vpop.permute.xlu2 %3627  ;;  %v3576_v9 = vpop.permute.xlu0 %3575 }
 0xa8e   : > { %v3633_v44 = vadd.f32 %v3628_v40, %v3615_v13  ;;  %v3580_v1 = vadd.f32 %v3576_v9, %v3562_v49  ;;  %v4709_v49 = vld [vmem:[%s8438_s28 + $0x66] ss:$0 sm:$0xff]  ;;  %v4710_v9 = vld [vmem:[%s8438_s28 + $0x69] ss:$0 sm:$0xff] }
 0xa90   : > { %v3837_v2 = vpop.permute.xlu1 %3836 }
 0xa91   : > { %v3839_v29 = vmul.f32 %v3837_v2, %v7464_v30  ;;  %v3840_v42 = vmul.f32 %v3837_v2, %v7466_v36 }
 0xa93   : > { %3845 = vrot.lane.b32.xlu0 %v3840_v42, %s8615_s14  ;;  %3843 = vrot.lane.b32.xlu2 %v3839_v29, %s8615_s14  ;;  %v4711_v42 = vld [vmem:[%s8438_s28 + $0x6c] ss:$0 sm:$0xff] }
 0xa95   : > { %v3646_v48 = vpop.permute.xlu2 %3645  ;;  %v3594_v3 = vpop.permute.xlu0 %3593 }
 0xa96   : > { %v3651_v21 = vadd.f32 %v3646_v48, %v3633_v44  ;;  %v3598_v38 = vadd.f32 %v3594_v3, %v3580_v1 }
 0xa98   : > { %v3855_v26 = vpop.permute.xlu1 %3854 }
 0xa99   : > { %v3857_v63 = vmul.f32 %v3855_v26, %v7464_v30  ;;  %v3858_v32 = vmul.f32 %v3855_v26, %v7466_v36  ;;  %v4712_v26 = vld [vmem:[%s8438_s28 + $0x6f] ss:$0 sm:$0xff] }
 0xa9b   : > { %3863 = vrot.lane.b32.xlu0 %v3858_v32, %s8616_s18  ;;  %3861 = vrot.lane.b32.xlu2 %v3857_v63, %s8616_s18 }
 0xa9d   : > { %v3664_v14 = vpop.permute.xlu2 %3663  ;;  %v3612_v46 = vpop.permute.xlu0 %3611 }
 0xa9e   : > { %v3669_v41 = vadd.f32 %v3664_v14, %v3651_v21  ;;  %v3616_v53 = vadd.f32 %v3612_v46, %v3598_v38 }
 0xaa0   : > { %v3873_v58 = vpop.permute.xlu1 %3872 }
 0xaa1   : > { %v3875_v12 = vmul.f32 %v3873_v58, %v7464_v30  ;;  %v3876_v31 = vmul.f32 %v3873_v58, %v7466_v36  ;;  %v4703_v36 = vld [vmem:[%s8438_s28 + $0x5e] ss:$0 sm:$0xff]  ;;  %v7644_v58 = vld [vmem:[#allocation3 + $0xc] sm:$0xff] }
 0xaa3   : > { %3881 = vrot.lane.b32.xlu0 %v3876_v31, %s8553_s22  ;;  %3879 = vrot.lane.b32.xlu2 %v3875_v12, %s8553_s22  ;;  %s8620_s22 = smov 12  }
 0xaa5   : > { %v3682_v34 = vpop.permute.xlu2 %3681  ;;  %v3630_v51 = vpop.permute.xlu0 %3629 }
 0xaa6   : > { %v3687_v28 = vadd.f32 %v3682_v34, %v3669_v41  ;;  %v3634_v7 = vadd.f32 %v3630_v51, %v3616_v53  ;;  %v4713_v41 = vld [vmem:[%s8438_s28 + $0x72] ss:$0 sm:$0xff]  ;;  %v7642_v53 = vld [vmem:[#allocation3 + $0x4] sm:$0xff] }
 0xaab   : > { %3902 = vrot.lane.b32.xlu2 %v4702_v8, %s8498_s0 }
 0xaad   : > { %v3700_v33 = vpop.permute.xlu2 %3699  ;;  %v3648_v20 = vpop.permute.xlu0 %3647 }
 0xaae   : > { %v3705_v10 = vadd.f32 %v3700_v33, %v3687_v28  ;;  %v3652_v30 = vadd.f32 %v3648_v20, %v3634_v7 }
 0xab3   : > { %3920 = vrot.lane.b32.xlu2 %v4703_v36, %s8464_s1 }
 0xab5   : > { %v3718_v54 = vpop.permute.xlu2 %3717  ;;  %v3666_v47 = vpop.permute.xlu0 %3665 }
 0xab6   : > { %v3723_v39 = vadd.f32 %v3718_v54, %v3705_v10  ;;  %v3670_v18 = vadd.f32 %v3666_v47, %v3652_v30 }
 0xabb   : > { %3938 = vrot.lane.b32.xlu2 %v4704_v27, %s8465_s23  ;;  %s8632_s23 = smov 111  }
 0xabd   : > { %v3736_v60 = vpop.permute.xlu2 %3735  ;;  %v3684_v16 = vpop.permute.xlu0 %3683 }
 0xabe   : > { %v3741_v0 = vadd.f32 %v3736_v60, %v3723_v39  ;;  %v3688_v24 = vadd.f32 %v3684_v16, %v3670_v18 }
 0xac3   : > { %3956 = vrot.lane.b32.xlu2 %v4705_v17, %s8271_s29  ;;  %s8634_s29 = sld [smem:[#allocation16_spill]] }
 0xac5   : > { %v3754_v61 = vpop.permute.xlu2 %3753  ;;  %v3702_v6 = vpop.permute.xlu0 %3701 }
 0xac6   : > { %v3759_v62 = vadd.f32 %v3754_v61, %v3741_v0  ;;  %v3706_v22 = vadd.f32 %v3702_v6, %v3688_v24  ;;  %v4714_v61 = vld [vmem:[%s8438_s28 + $0x65] ss:$0 sm:$0xff]  ;;  %v4715_v6 = vld [vmem:[%s8438_s28 + $0x64] ss:$0 sm:$0xff] }
 0xacb   : > { %3974 = vrot.lane.b32.xlu2 %v4706_v35, %s8274_s12  ;;  %v4718_v35 = vld [vmem:[%s8438_s28 + $0x6b] ss:$0 sm:$0xff]  ;;  %s8637_s12 = smov 106  }
 0xacd   : > { %v3772_v56 = vpop.permute.xlu2 %3771  ;;  %v3720_v11 = vpop.permute.xlu0 %3719 }
 0xace   : > { %v3777_v43 = vadd.f32 %v3772_v56, %v3759_v62  ;;  %v3724_v25 = vadd.f32 %v3720_v11, %v3706_v22  ;;  %v4716_v62 = vld [vmem:[%s8438_s28 + $0x68] ss:$0 sm:$0xff]  ;;  %v4717_v22 = vld [vmem:[%s8438_s28 + $0x67] ss:$0 sm:$0xff]  ;;  %v4719_v56 = vld [vmem:[%s8438_s28 + $0x6a] ss:$0 sm:$0xff] }
 0xacf   : > { %v4720_v11 = vld [vmem:[%s8438_s28 + $0x6e] ss:$0 sm:$0xff] }
 0xad3   : > { %3992 = vrot.lane.b32.xlu2 %v4707_v50, %s8205_s15  ;;  %v4723_v50 = vld [vmem:[%s8438_s28 + $0x70] ss:$0 sm:$0xff]  ;;  %s8639_s15 = sld [smem:[#allocation8_spill]] }
 0xad5   : > { %v3790_v19 = vpop.permute.xlu2 %3789  ;;  %v3738_v15 = vpop.permute.xlu0 %3737 }
 0xad6   : > { %v3795_v59 = vadd.f32 %v3790_v19, %v3777_v43  ;;  %v3742_v45 = vadd.f32 %v3738_v15, %v3724_v25  ;;  %v4721_v43 = vld [vmem:[%s8438_s28 + $0x6d] ss:$0 sm:$0xff]  ;;  %v4722_v25 = vld [vmem:[%s8438_s28 + $0x71] ss:$0 sm:$0xff] }
 0xad9   : > { %s161_s0 = sand.u32 1, %s8639_s15  }
 0xada   : > { %s4398_s14 = sshll.u32 %s161_s0, 4 }
 0xadb   : > { %4010 = vrot.lane.b32.xlu2 %v4708_v5, %s8208_s8  ;;  %s163_s1 = scalar_lea.vmem [#allocation4], %s4398_s14 }
 0xadd   : > { %v3808_v4 = vpop.permute.xlu2 %3807  ;;  %v3756_v37 = vpop.permute.xlu0 %3755 }
 0xade   : > { %v3813_v23 = vadd.f32 %v3808_v4, %v3795_v59  ;;  %v3760_v13 = vadd.f32 %v3756_v37, %v3742_v45  ;;  %v3893_v45 = vpop.permute.xlu1 %3892 }
 0xadf   : > { %v3895_v37 = vmul.f32 %v3893_v45, %v7642_v53 }
 0xae3   : > { %4064 = vrot.lane.b32.xlu2 %v4709_v49, %s8087_s9 }
 0xae5   : > { %v3826_v57 = vpop.permute.xlu2 %3825  ;;  %v3774_v52 = vpop.permute.xlu0 %3773 }
 0xae6   : > { %v3831_v55 = vadd.f32 %v3826_v57, %v3813_v23  ;;  %v3778_v40 = vadd.f32 %v3774_v52, %v3760_v13  ;;  %v3896_v23 = vmul.f32 %v3893_v45, %v7644_v58 }
 0xaeb   : > { %4118 = vrot.lane.b32.xlu2 %v4710_v9, %s8158_s13  ;;  %s8621_s13 = smov 18  }
 0xaed   : > { %v3844_v44 = vpop.permute.xlu2 %3843  ;;  %v3792_v1 = vpop.permute.xlu0 %3791 }
 0xaee   : > { %v3849_v2 = vadd.f32 %v3844_v44, %v3831_v55  ;;  %v3796_v29 = vadd.f32 %v3792_v1, %v3778_v40 }
 0xaf3   : > { %4172 = vrot.lane.b32.xlu2 %v4711_v42, %s8093_s30  ;;  %s8628_s30 = smov 113  }
 0xaf5   : > { %v3862_v48 = vpop.permute.xlu2 %3861  ;;  %v3810_v3 = vpop.permute.xlu0 %3809 }
 0xaf6   : > { %v3867_v21 = vadd.f32 %v3862_v48, %v3849_v2  ;;  %v3814_v38 = vadd.f32 %v3810_v3, %v3796_v29 }
 0xafb   : > { %4226 = vrot.lane.b32.xlu2 %v4712_v26, %s8470_s10  ;;  %s8617_s10 = smov 10  }
 0xafd   : > { %v3880_v63 = vpop.permute.xlu2 %3879  ;;  %v3828_v32 = vpop.permute.xlu0 %3827 }
 0xafe   : > { %v7636_v14 = vadd.f32 %v3880_v63, %v3867_v21  ;;  %v3832_v46 = vadd.f32 %v3828_v32, %v3814_v38 }
 0xb00   : > { %v3897_v49 = vadd.f32 %v3895_v37, %v7636_v14 }
 0xb03   : > { %4280 = vrot.lane.b32.xlu2 %v4713_v41, %s8526_s3  ;;  %s8618_s3 = smov 9  }
 0xb05   : > { %v3903_v12 = vpop.permute.xlu2 %3902  ;;  %v3846_v31 = vpop.permute.xlu0 %3845 }
 0xb06   : > { %v3905_v34 = vmul.f32 %v3903_v12, %v7642_v53  ;;  %v3906_v51 = vmul.f32 %v3903_v12, %v7644_v58  ;;  %v3850_v28 = vadd.f32 %v3846_v31, %v3832_v46 }
 0xb08   : > { %3911 = vrot.lane.b32.xlu1 %v3906_v51, %s8092_s17  ;;  %3909 = vrot.lane.b32.xlu0 %v3905_v34, %s8092_s17 }
 0xb0d   : > { %v3921_v7 = vpop.permute.xlu2 %3920  ;;  %v3864_v8 = vpop.permute.xlu0 %3863 }
 0xb0e   : > { %v3923_v33 = vmul.f32 %v3921_v7, %v7642_v53  ;;  %v3924_v20 = vmul.f32 %v3921_v7, %v7644_v58  ;;  %v3868_v10 = vadd.f32 %v3864_v8, %v3850_v28 }
 0xb10   : > { %3929 = vrot.lane.b32.xlu1 %v3924_v20, %s8094_s20  ;;  %3927 = vrot.lane.b32.xlu0 %v3923_v33, %s8094_s20 }
 0xb15   : > { %v3939_v30 = vpop.permute.xlu2 %3938  ;;  %v3882_v5 = vpop.permute.xlu0 %3881 }
 0xb16   : > { %v3941_v36 = vmul.f32 %v3939_v30, %v7642_v53  ;;  %v3942_v54 = vmul.f32 %v3939_v30, %v7644_v58  ;;  %v3886_v4 = vadd.f32 %v3882_v5, %v3868_v10 }
 0xb18   : > { %3947 = vrot.lane.b32.xlu1 %v3942_v54, %s8096_s5  ;;  %3945 = vrot.lane.b32.xlu0 %v3941_v36, %s8096_s5  ;;  %v3898_v13 = vadd.f32 %v3896_v23, %v3886_v4  ;;  %s8626_s5 = smov 117  }
 0xb1d   : > { %v3957_v47 = vpop.permute.xlu2 %3956 }
 0xb1e   : > { %v3959_v39 = vmul.f32 %v3957_v47, %v7642_v53  ;;  %v3960_v18 = vmul.f32 %v3957_v47, %v7644_v58 }
 0xb20   : > { %3965 = vrot.lane.b32.xlu1 %v3960_v18, %s8098_s7  ;;  %3963 = vrot.lane.b32.xlu0 %v3959_v39, %s8098_s7  ;;  %s8642_s7 = sld [smem:[#allocation144_spill]] }
 0xb25   : > { %v3975_v27 = vpop.permute.xlu2 %3974 }
 0xb26   : > { %v3977_v60 = vmul.f32 %v3975_v27, %v7642_v53  ;;  %v3978_v16 = vmul.f32 %v3975_v27, %v7644_v58 }
 0xb28   : > { %3983 = vrot.lane.b32.xlu1 %v3978_v16, %s8600_s2  ;;  %3981 = vrot.lane.b32.xlu0 %v3977_v60, %s8600_s2  ;;  %s8631_s2 = smov 110  }
 0xb2d   : > { %v3993_v0 = vpop.permute.xlu2 %3992 }
 0xb2e   : > { %v3995_v24 = vmul.f32 %v3993_v0, %v7642_v53  ;;  %v3996_v17 = vmul.f32 %v3993_v0, %v7644_v58 }
 0xb30   : > { %4001 = vrot.lane.b32.xlu1 %v3996_v17, %s8602_s24  ;;  %3999 = vrot.lane.b32.xlu0 %v3995_v24, %s8602_s24  ;;  %s8619_s24 = smov 13  }
 0xb35   : > { %v4011_v19 = vpop.permute.xlu2 %4010 }
 0xb36   : > { %v4013_v15 = vmul.f32 %v4011_v19, %v7642_v53  ;;  %v4014_v59 = vmul.f32 %v4011_v19, %v7644_v58 }
 0xb38   : > { %4046 = vrot.lane.b32.xlu1 %v4714_v61, %s8617_s10  ;;  %4028 = vrot.lane.b32.xlu0 %v4715_v6, %s8618_s3  ;;  %s8629_s10 = smov 114   ;;  %s8630_s3 = smov 112  }
 0xb3d   : > { %v4065_v10 = vpop.permute.xlu2 %4064 }
 0xb3e   : > { %v4067_v30 = vmul.f32 %v4065_v10, %v7642_v53  ;;  %v4068_v36 = vmul.f32 %v4065_v10, %v7644_v58 }
 0xb40   : > { %4100 = vrot.lane.b32.xlu1 %v4716_v62, %s8619_s24  ;;  %4082 = vrot.lane.b32.xlu0 %v4717_v22, %s8620_s22  ;;  %s8635_s24 = smov 107   ;;  %s8636_s22 = smov 108  }
 0xb45   : > { %v4119_v16 = vpop.permute.xlu2 %4118 }
 0xb46   : > { %v4121_v0 = vmul.f32 %v4119_v16, %v7642_v53  ;;  %v4122_v24 = vmul.f32 %v4119_v16, %v7644_v58 }
 0xb48   : > { %4154 = vrot.lane.b32.xlu1 %v4718_v35, %s8091_s19  ;;  %4136 = vrot.lane.b32.xlu0 %v4719_v56, %s8090_s6  ;;  %s8622_s6 = smov 21  }
 0xb4d   : > { %v4173_v56 = vpop.permute.xlu2 %4172 }
 0xb50   : > { %4208 = vrot.lane.b32.xlu1 %v4720_v11, %s8097_s25  ;;  %4190 = vrot.lane.b32.xlu0 %v4721_v43, %s8621_s13  ;;  %s8624_s25 = smov 118   ;;  %v4175_v11 = vmul.f32 %v4173_v56, %v7642_v53  ;;  %v4176_v43 = vmul.f32 %v4173_v56, %v7644_v58  ;;  %s4407_s13 = sshll.u32 %s8640_s16, 4 }
 0xb51   : > { %s4328_s19 = scalar_lea.hbm %s8642_s7, %s4407_s13 }
 0xb55   : > { %v4227_v5 = vpop.permute.xlu2 %4226 }
 0xb56   : > { %v4229_v4 = vmul.f32 %v4227_v5, %v7642_v53  ;;  %v4230_v37 = vmul.f32 %v4227_v5, %v7644_v58 }
 0xb58   : > { %4262 = vrot.lane.b32.xlu1 %v4722_v25, %s8603_s26  ;;  %4244 = vrot.lane.b32.xlu0 %v4723_v50, %s8622_s6  ;;  %s8625_s26 = smov 116   ;;  %s4329_s6 = sshll.u32 %s163_s1, 4  ;;  %s4330_s6 = int_to_ptr.vmem [resolvable:$true] %s4329_s6 }
 0xb60   : > { %4019 = vrot.lane.b32.xlu1 %v4014_v59, %s8525_s21  ;;  %4017 = vrot.lane.b32.xlu0 %v4013_v15, %s8525_s21  ;;  %s8623_s21 = smov 120  }
 0xb7a   : > { %v3912_v57 = vpop.permute.xlu1 %3911  ;;  %v3910_v52 = vpop.permute.xlu0 %3909 }
 0xb7b   : > { %v3916_v55 = vadd.f32 %v3912_v57, %v3898_v13  ;;  %v3915_v40 = vadd.f32 %v3910_v52, %v3897_v49 }
 0xb82   : > { %v3930_v9 = vpop.permute.xlu1 %3929  ;;  %v3928_v44 = vpop.permute.xlu0 %3927 }
 0xb83   : > { %v3934_v1 = vadd.f32 %v3930_v9, %v3916_v55  ;;  %v3933_v2 = vadd.f32 %v3928_v44, %v3915_v40  ;;  %v4281_v40 = vpop.permute.xlu2 %4280 }
 0xb84   : > { %v4283_v9 = vmul.f32 %v4281_v40, %v7642_v53  ;;  %v4284_v44 = vmul.f32 %v4281_v40, %v7644_v58 }
 0xb8a   : > { %v3948_v29 = vpop.permute.xlu1 %3947  ;;  %v3946_v42 = vpop.permute.xlu0 %3945 }
 0xb8b   : > { %v3952_v48 = vadd.f32 %v3948_v29, %v3934_v1  ;;  %v3951_v3 = vadd.f32 %v3946_v42, %v3933_v2  ;;  %v4732_v2 = vld [vmem:[%s8634_s29 + $0x8] sm:$0xff]  ;;  %v4733_v29 = vld [vmem:[%s8634_s29] sm:$0xff] }
 0xb92   : > { %v3966_v21 = vpop.permute.xlu1 %3965  ;;  %v3964_v38 = vpop.permute.xlu0 %3963 }
 0xb93   : > { %v3970_v26 = vadd.f32 %v3966_v21, %v3952_v48  ;;  %v3969_v63 = vadd.f32 %v3964_v38, %v3951_v3 }
 0xb9a   : > { %v3984_v32 = vpop.permute.xlu1 %3983  ;;  %v3982_v46 = vpop.permute.xlu0 %3981 }
 0xb9b   : > { %v3988_v41 = vadd.f32 %v3984_v32, %v3970_v26  ;;  %v3987_v14 = vadd.f32 %v3982_v46, %v3969_v63 }
 0xba2   : > { %v4002_v12 = vpop.permute.xlu1 %4001  ;;  %v4000_v31 = vpop.permute.xlu0 %3999 }
 0xba3   : > { %v7717_v34 = vadd.f32 %v4002_v12, %v3988_v41  ;;  %v7719_v51 = vadd.f32 %v4000_v31, %v3987_v14 }
 0xbaa   : > { %v4047_v28 = vpop.permute.xlu1 %4046  ;;  %v4029_v7 = vpop.permute.xlu0 %4028 }
 0xbab   : > { %v4049_v8 = vmul.f32 %v4047_v28, %v7642_v53  ;;  %v4031_v33 = vmul.f32 %v4029_v7, %v7642_v53  ;;  %v4032_v20 = vmul.f32 %v4029_v7, %v7644_v58  ;;  %v4050_v54 = vmul.f32 %v4047_v28, %v7644_v58 }
 0xbad   : > { %4053 = vrot.lane.b32.xlu1 %v4049_v8, %s8604_s11  ;;  %4037 = vrot.lane.b32.xlu0 %v4032_v20, %s8623_s21 }
 0xbae   : > { %4035 = vrot.lane.b32.xlu2 %v4031_v33, %s8623_s21  ;;  %s4331_s21 = sshll.u32 %s4328_s19, 4  ;;  %s4332_s21 = int_to_ptr.hbm [resolvable:$true] %s4331_s21 }
 0xbb2   : > { %v4101_v47 = vpop.permute.xlu1 %4100  ;;  %v4083_v39 = vpop.permute.xlu0 %4082 }
 0xbb3   : > { %v4103_v18 = vmul.f32 %v4101_v47, %v7642_v53  ;;  %v4086_v27 = vmul.f32 %v4083_v39, %v7644_v58  ;;  %v4085_v60 = vmul.f32 %v4083_v39, %v7642_v53  ;;  %v4104_v17 = vmul.f32 %v4101_v47, %v7644_v58 }
 0xbb5   : > { %4073 = vrot.lane.b32.xlu1 %v4068_v36, %s8624_s25  ;;  %4071 = vrot.lane.b32.xlu0 %v4067_v30, %s8624_s25  ;;  %s4317_s25 = scalar_lea.sflag [#allocation5], %s161_s0 }
 0xbb6   : > { %4055 = vrot.lane.b32.xlu2 %v4050_v54, %s8604_s11  ;;  %s8627_s11 = smov 115  }
 0xbba   : > { %v4155_v61 = vpop.permute.xlu1 %4154  ;;  %v4137_v6 = vpop.permute.xlu0 %4136 }
 0xbbb   : > { %v4157_v62 = vmul.f32 %v4155_v61, %v7642_v53  ;;  %v4140_v22 = vmul.f32 %v4137_v6, %v7644_v58  ;;  %v4139_v35 = vmul.f32 %v4137_v6, %v7642_v53  ;;  %v4158_v25 = vmul.f32 %v4155_v61, %v7644_v58 }
 0xbbd   : > { %4107 = vrot.lane.b32.xlu1 %v4103_v18, %s8625_s26  ;;  %4091 = vrot.lane.b32.xlu0 %v4086_v27, %s8626_s5 }
 0xbbe   : > { %4089 = vrot.lane.b32.xlu2 %v4085_v60, %s8626_s5 }
 0xbc2   : > { %v4209_v50 = vpop.permute.xlu1 %4208  ;;  %v4191_v19 = vpop.permute.xlu0 %4190 }
 0xbc3   : > { %v4211_v15 = vmul.f32 %v4209_v50, %v7642_v53  ;;  %v4194_v59 = vmul.f32 %v4191_v19, %v7644_v58  ;;  %v4193_v45 = vmul.f32 %v4191_v19, %v7642_v53  ;;  %v4212_v23 = vmul.f32 %v4209_v50, %v7644_v58 }
 0xbc5   : > { %4127 = vrot.lane.b32.xlu1 %v4122_v24, %s8627_s11  ;;  %4125 = vrot.lane.b32.xlu0 %v4121_v0, %s8627_s11 }
 0xbc6   : > { %4109 = vrot.lane.b32.xlu2 %v4104_v17, %s8625_s26 }
 0xbca   : > { %v4263_v13 = vpop.permute.xlu1 %4262  ;;  %v4245_v49 = vpop.permute.xlu0 %4244 }
 0xbcb   : > { %v4265_v57 = vmul.f32 %v4263_v13, %v7642_v53  ;;  %v4248_v52 = vmul.f32 %v4245_v49, %v7644_v58  ;;  %v4247_v55 = vmul.f32 %v4245_v49, %v7642_v53  ;;  %v4266_v1 = vmul.f32 %v4263_v13, %v7644_v58 }
 0xbcd   : > { %4161 = vrot.lane.b32.xlu1 %v4157_v62, %s8628_s30  ;;  %4145 = vrot.lane.b32.xlu0 %v4140_v22, %s8629_s10 }
 0xbce   : > { %4143 = vrot.lane.b32.xlu2 %v4139_v35, %s8629_s10 }
 0xbd2   : > { %v4020_v3 = vpop.permute.xlu1 %4019  ;;  %v4018_v53 = vpop.permute.xlu0 %4017 }
 0xbd3   : > { %v4023_v20 = vadd.f32 %v4018_v53, %v7719_v51  ;;  %v4024_v30 = vadd.f32 %v4020_v3, %v7717_v34 }
 0xbd5   : > { %4181 = vrot.lane.b32.xlu1 %v4176_v43, %s8630_s3  ;;  %4179 = vrot.lane.b32.xlu0 %v4175_v11, %s8630_s3 }
 0xbd6   : > { %4163 = vrot.lane.b32.xlu2 %v4158_v25, %s8628_s30  ;;  %s4754_s30 = scalar_lea.hbm %s8642_s7, 32 }
 0xbdd   : > { %4215 = vrot.lane.b32.xlu1 %v4211_v15, %s8631_s2  ;;  %4199 = vrot.lane.b32.xlu0 %v4194_v59, %s8632_s23 }
 0xbde   : > { %4197 = vrot.lane.b32.xlu2 %v4193_v45, %s8632_s23 }
 0xbe5   : > { %4235 = vrot.lane.b32.xlu1 %v4230_v37, %s8633_s4  ;;  %4233 = vrot.lane.b32.xlu0 %v4229_v4, %s8633_s4 }
 0xbe6   : > { %4217 = vrot.lane.b32.xlu2 %v4212_v23, %s8631_s2 }
 0xbed   : > { %4269 = vrot.lane.b32.xlu1 %v4265_v57, %s8635_s24  ;;  %4253 = vrot.lane.b32.xlu0 %v4248_v52, %s8636_s22 }
 0xbee   : > { %4251 = vrot.lane.b32.xlu2 %v4247_v55, %s8636_s22 }
 0xbf5   : > { %4289 = vrot.lane.b32.xlu1 %v4284_v44, %s8637_s12  ;;  %4287 = vrot.lane.b32.xlu0 %v4283_v9, %s8637_s12 }
 0xbf6   : > { %4271 = vrot.lane.b32.xlu2 %v4266_v1, %s8635_s24 }
 0xbfd   : > { %4297 = vrot.lane.b32.xlu0 %v4732_v2, %s8638_s27 }
 0xbfe   : > { %4295 = vrot.lane.b32.xlu2 %v4733_v29, %s8638_s27 }
 0xc08   : > { %v4036_v42 = vpop.permute.xlu2 %4035 }
 0xc09   : > { %v4041_v10 = vadd.f32 %v4036_v42, %v4023_v20 }
 0xc10   : > { %v4056_v48 = vpop.permute.xlu2 %4055 }
 0xc18   : > { %v4090_v21 = vpop.permute.xlu2 %4089 }
 0xc1f   : > { %v4054_v38 = vpop.permute.xlu1 %4053  ;;  %v4038_v26 = vpop.permute.xlu0 %4037 }
 0xc20   : > { %v4110_v58 = vpop.permute.xlu2 %4109  ;;  %v4059_v36 = vadd.f32 %v4054_v38, %v4041_v10  ;;  %v4042_v39 = vadd.f32 %v4038_v26, %v4024_v30 }
 0xc22   : > { %v4060_v60 = vadd.f32 %v4056_v48, %v4042_v39 }
 0xc27   : > { %v4074_v63 = vpop.permute.xlu1 %4073  ;;  %v4072_v32 = vpop.permute.xlu0 %4071 }
 0xc28   : > { %v4144_v46 = vpop.permute.xlu2 %4143  ;;  %v4077_v18 = vadd.f32 %v4072_v32, %v4059_v36  ;;  %v4078_v0 = vadd.f32 %v4074_v63, %v4060_v60 }
 0xc2a   : > { %v4095_v16 = vadd.f32 %v4090_v21, %v4077_v18 }
 0xc2f   : > { %v4108_v41 = vpop.permute.xlu1 %4107  ;;  %v4092_v14 = vpop.permute.xlu0 %4091 }
 0xc30   : > { %v4164_v12 = vpop.permute.xlu2 %4163  ;;  %v4113_v24 = vadd.f32 %v4108_v41, %v4095_v16  ;;  %v4096_v6 = vadd.f32 %v4092_v14, %v4078_v0 }
 0xc32   : > { %v4114_v22 = vadd.f32 %v4110_v58, %v4096_v6 }
 0xc37   : > { %v4128_v31 = vpop.permute.xlu1 %4127  ;;  %v4126_v28 = vpop.permute.xlu0 %4125 }
 0xc38   : > { %v4198_v33 = vpop.permute.xlu2 %4197  ;;  %v4131_v62 = vadd.f32 %v4126_v28, %v4113_v24  ;;  %v4132_v56 = vadd.f32 %v4128_v31, %v4114_v22 }
 0xc3a   : > { %v4149_v35 = vadd.f32 %v4144_v46, %v4131_v62 }
 0xc3f   : > { %v4162_v7 = vpop.permute.xlu1 %4161  ;;  %v4146_v8 = vpop.permute.xlu0 %4145 }
 0xc40   : > { %v4218_v27 = vpop.permute.xlu2 %4217  ;;  %v4167_v11 = vadd.f32 %v4162_v7, %v4149_v35  ;;  %v4150_v25 = vadd.f32 %v4146_v8, %v4132_v56 }
 0xc42   : > { %v4168_v19 = vadd.f32 %v4164_v12, %v4150_v25 }
 0xc47   : > { %v4182_v54 = vpop.permute.xlu1 %4181  ;;  %v4180_v47 = vpop.permute.xlu0 %4179 }
 0xc48   : > { %v4252_v51 = vpop.permute.xlu2 %4251  ;;  %v4185_v50 = vadd.f32 %v4180_v47, %v4167_v11  ;;  %v4186_v59 = vadd.f32 %v4182_v54, %v4168_v19 }
 0xc4a   : > { %v4203_v15 = vadd.f32 %v4198_v33, %v4185_v50 }
 0xc4f   : > { %v4216_v17 = vpop.permute.xlu1 %4215  ;;  %v4200_v61 = vpop.permute.xlu0 %4199 }
 0xc50   : > { %v4221_v45 = vadd.f32 %v4216_v17, %v4203_v15  ;;  %v4272_v5 = vpop.permute.xlu2 %4271  ;;  %v4204_v37 = vadd.f32 %v4200_v61, %v4186_v59 }
 0xc52   : > { %v4222_v49 = vadd.f32 %v4218_v27, %v4204_v37 }
 0xc57   : > { %v4236_v34 = vpop.permute.xlu1 %4235  ;;  %v4234_v43 = vpop.permute.xlu0 %4233 }
 0xc58   : > { %v4239_v23 = vadd.f32 %v4234_v43, %v4221_v45  ;;  %v4240_v52 = vadd.f32 %v4236_v34, %v4222_v49  ;;  %v4296_v9 = vpop.permute.xlu2 %4295 }
 0xc5a   : > { %v4257_v57 = vadd.f32 %v4252_v51, %v4239_v23 }
 0xc5f   : > { %v4254_v4 = vpop.permute.xlu0 %4253  ;;  %v4270_v13 = vpop.permute.xlu1 %4269 }
 0xc60   : > { %v4275_v55 = vadd.f32 %v4270_v13, %v4257_v57  ;;  %v4258_v44 = vadd.f32 %v4254_v4, %v4240_v52 }
 0xc62   : > { %v4276_v42 = vadd.f32 %v4272_v5, %v4258_v44 }
 0xc67   : > { %v4288_v40 = vpop.permute.xlu0 %4287  ;;  %v4290_v29 = vpop.permute.xlu1 %4289 }
 0xc68   : > { %v4293_v1 = vadd.f32 %v4288_v40, %v4275_v55  ;;  %v4294_v3 = vadd.f32 %v4290_v29, %v4276_v42 }
 0xc6a   : > { %v4301_v2 = vadd.f32 %v4296_v9, %v4293_v1 }
 0xc6c   : > { %v4303_v48 = vmax.f32 %v4301_v2, 0.0 }
 0xc6e   : > { %4307 = vrot.lane.b32.xlu1 %v4303_v48, %s8092_s17 }
 0xc6f   : > { %v4298_v53 = vpop.permute.xlu0 %4297 }
 0xc70   : > { %v4302_v21 = vadd.f32 %v4298_v53, %v4294_v3 }
 0xc72   : > { %v4304_v38 = vmax.f32 %v4302_v21, 0.0 }
 0xc74   : > { %4309 = vrot.lane.b32.xlu2 %v4304_v38, %s8092_s17  ;;  %s4748_s17 = sshra.s32 %s4332_s21, 4  ;;  %s4749_s17 = int_to_ptr.hbm [resolvable:$true] %s4748_s17 }
 0xc75   : > { %s4750_s26 = scalar_lea.hbm %s4749_s17, 16  ;;  %p4755_p0 = scmp.lt.s32.totalorder %s4749_s17, %s8642_s7 }
 0xc76   : > { %p4751_p11 = scmp.ne.s32.totalorder %s4749_s17, %s4750_s26  ;;  %p4756_p1 = scmp.lt.s32.totalorder %s4754_s30, %s4750_s26 }
 0xc78   : > { %p4752_p12 = pnand %p4751_p11, %p4903_p5  ;;  %p4757_p2 = por %p4756_p1, %p4755_p0 }
 0xc7a   : > { %p4753_p13 = pneg %p4752_p12 }
 0xc7c   : > { %p4758_p3 = pnand %p4757_p2, %p4753_p13 }
 0xcce   : > { %v4310_v26 = vpop.permute.xlu2 %4309 }
 0xccf   : > { %4315 = vst.msk [vmem:[%s163_s1 + $0x8] sm:$0xff] %vm4313_vm6, %v4310_v26 }
 0xce0   : > { %v4308_v58 = vpop.permute.xlu1 %4307 }
 0xce1   : > { %4314 = vst.msk [vmem:[%s163_s1] sm:$0xff] %vm4313_vm6, %v4308_v58 }
 0xce2   : > { %4761 = shalt.err (!%p4758_p3)
}
 0xce3   : > { %s4844_s2 = smov 128  }
 0xce4   : > { %4408 = dma.vmem_to_hbm [thread:$0]  (%p4903_p5), %s4330_s6, 256, %s4332_s21, %s4317_s25, %s4844_s2, %s4844_s2, %s8208_s8  }
 0xce5 PF: > { %s8643_s23 = sld [smem:[#allocation10_spill]] }
 0xce6   : > { %s8644_s4 = sld [smem:[#allocation7_spill]] }
 0xceb   : > { %p4414_p4 = scmp.ge.s32.totalorder %s8643_s23, 2 }
 0xcec   : > { %s4346_s24 = sand.u32 1, %s8644_s4  }
 0xced   : > { %p4411_p7 = pnand %p4414_p4, %p4907_p6  ;;  %s4347_s22 = scalar_lea.sflag [#allocation5], %s4346_s24 }
 0xcef   : > { %p4412_p8 = pneg %p4411_p7 }
 0xcf1   : > { %4779 = dma.done.wait (%p4412_p8), %s4347_s22, 256  }
 0xcf2   : > { %4781 = vsyncadd (%p4412_p8), %s4347_s22, 4294967040  ;;  %s8646_s15 = sld [smem:[#allocation12_spill]] }
 0xcf3   : > { %s8647_s12 = sld [smem:[#allocation8_spill]] }
 0xcf4   : > { %s8648_s13 = sld [smem:[#allocation9_spill]] }
 0xcf5   : > { %s8649_s14 = sld [smem:[#allocation13_spill]] }
 0xcf8   : > { %p13_p9 = scmp.ge.s32.totalorder %s8646_s15, 4  }
 0xcfa   :  { %15 = sbr.rel (!%p13_p9) target bundleno = 8 (0x8), region = 67 }
 0xcff   :  { %4353 = vsyncpa [#allocation5], 1 }
 0xd00   :  { %4355 = vsyncpa [#allocation5 + $0x1], 1 }

</bundles_post_ra>
